<compile_context>
chip_gen: v7x
topology: tpu7x:2x2x1
jax: 0.10.0
libtpu: 0.0.40
codegen_flags: <defaults>
</compile_context>

<pallas_src>
import math
import functools

import jax
import jax.numpy as jnp
from jax.experimental import pallas as pl
from jax.experimental.pallas import tpu as pltpu

F32 = jnp.float32
BF16 = jnp.bfloat16
_LN_EPS = 1e-5
_INV_SQRT2 = 1.0 / math.sqrt(2.0)


# ----------------------------------------------------------------------------
# Small helpers
# ----------------------------------------------------------------------------

def _parallel():
    return pltpu.CompilerParams(dimension_semantics=("parallel",))


def _row_tile(m, cap=2048, min_steps=2):
    """Largest multiple-of-8 divisor of m that is <= cap and (when possible)
    leaves >= min_steps grid steps so both v7x TensorCores get work."""
    best = None
    for t in range(8, min(cap, m) + 1, 8):
        if m % t == 0 and m // t >= min_steps:
            best = t
    return best if best is not None else m


def _batch_tile(n, cap=8, min_steps=2):
    """Largest divisor of n <= cap leaving >= min_steps grid steps (if possible)."""
    best = None
    for t in range(1, min(cap, n) + 1):
        if n % t == 0 and n // t >= min_steps:
            best = t
    return best if best is not None else n


def _gelu(x):
    # TODO(synk): tanh-approx GELU (torch default is exact-erf GELU); ~1e-3
    # deviation, moves the work from VALU polynomials to the (idle) EUP slot.
    c = 0.7978845608028654  # sqrt(2/pi)
    return 0.5 * x * (1.0 + jnp.tanh(c * (x + 0.044715 * x * x * x)))


def _layernorm(h, g, b):
    mu = jnp.mean(h, axis=-1, keepdims=True)
    var = jnp.mean((h - mu) ** 2, axis=-1, keepdims=True)
    return (h - mu) * jax.lax.rsqrt(var + _LN_EPS) * g + b


# ----------------------------------------------------------------------------
# Kernel 1: input projection (conv1x1 + ReLU), row-gridded over tokens
# ----------------------------------------------------------------------------

def _inproj_kernel(a_ref, w_ref, b_ref, o_ref):
    acc = jnp.dot(a_ref[...].astype(BF16), w_ref[...],
                  preferred_element_type=F32) + b_ref[...]
    o_ref[...] = jnp.maximum(acc, 0.0)


def pallas_input_projection(a, w, b, row_cap=2048):
    M, Kin = a.shape
    N = w.shape[1]
    TM = _row_tile(M, row_cap)
    return pl.pallas_call(
        _inproj_kernel,
        out_shape=jax.ShapeDtypeStruct((M, N), F32),
        grid=(M // TM,),
        in_specs=[pl.BlockSpec((TM, Kin), lambda i: (i, 0)),
                  pl.BlockSpec((Kin, N), lambda i: (0, 0)),
                  pl.BlockSpec((1, N), lambda i: (0, 0))],
        out_specs=pl.BlockSpec((TM, N), lambda i: (i, 0)),
        compiler_params=_parallel(),
    )(a, w, b)


# ----------------------------------------------------------------------------
# Kernel 2: fully-fused post-norm nn.TransformerEncoderLayer
#   grid over batch; per-grid-step static loop over BT batch elements so every
#   tensor op in the kernel is a plain 2-D op (no unaligned reshapes).
# ----------------------------------------------------------------------------

def _encoder_layer_kernel(nheads):
    def kernel(x_ref, inw_ref, inb_ref, outw_ref, outb_ref,
               g1_ref, bb1_ref, f1w_ref, f1b_ref, f2w_ref, f2b_ref,
               g2_ref, bb2_ref, o_ref):
        BT, _, E = x_ref.shape
        Dh = E // nheads
        scale = 1.0 / math.sqrt(Dh)

        # Hoist weight/bias loads out of the batch loop (stay VMEM/vreg resident).
        inw, inb = inw_ref[...], inb_ref[...]
        outw, outb = outw_ref[...], outb_ref[...]
        g1, bb1 = g1_ref[...], bb1_ref[...]
        f1w, f1b = f1w_ref[...], f1b_ref[...]
        f2w, f2b = f2w_ref[...], f2b_ref[...]
        g2, bb2 = g2_ref[...], bb2_ref[...]

        for bi in range(BT):
            x = x_ref[bi]                                              # [S, E] f32
            qkv = jnp.dot(x.astype(BF16), inw,
                          preferred_element_type=F32) + inb            # [S, 3E]
            heads = []
            for h in range(nheads):
                q = (qkv[:, h * Dh:(h + 1) * Dh] * scale).astype(BF16)
                k = qkv[:, E + h * Dh:E + (h + 1) * Dh].astype(BF16)
                v = qkv[:, 2 * E + h * Dh:2 * E + (h + 1) * Dh].astype(BF16)
                s = jnp.einsum("qd,kd->qk", q, k,
                               preferred_element_type=F32)             # [S, S]
                s = s - jnp.max(s, axis=-1, keepdims=True)
                p = jnp.exp(s)
                p = p * pl.reciprocal(jnp.sum(p, axis=-1, keepdims=True),
                                      approx=True)
                heads.append(jnp.dot(p.astype(BF16), v,
                                     preferred_element_type=F32))      # [S, Dh]
            attn = jnp.concatenate(heads, axis=-1)                     # [S, E]

            h1 = x + jnp.dot(attn.astype(BF16), outw,
                             preferred_element_type=F32) + outb
            h1 = _layernorm(h1, g1, bb1)

            ff = jnp.dot(h1.astype(BF16), f1w,
                         preferred_element_type=F32) + f1b
            ff = _gelu(ff)
            ff = jnp.dot(ff.astype(BF16), f2w,
                         preferred_element_type=F32) + f2b
            o_ref[bi] = _layernorm(h1 + ff, g2, bb2)
    return kernel


def pallas_transformer_layer(y3, p, nheads, bt_cap=8):
    """Post-norm TransformerEncoderLayer on [Bt, S, E] (dropout = no-op)."""
    Bt, S, E = y3.shape
    FF = p["ff1_w"].shape[1]
    BT = _batch_tile(Bt, bt_cap)
    blk = pl.BlockSpec((BT, S, E), lambda i: (i, 0, 0))
    full = lambda shape: pl.BlockSpec(shape, lambda i: (0,) * len(shape))
    return pl.pallas_call(
        _encoder_layer_kernel(nheads),
        out_shape=jax.ShapeDtypeStruct((Bt, S, E), F32),
        grid=(Bt // BT,),
        in_specs=[blk,
                  full((E, 3 * E)), full((1, 3 * E)),
                  full((E, E)), full((1, E)),
                  full((1, E)), full((1, E)),
                  full((E, FF)), full((1, FF)),
                  full((FF, E)), full((1, E)),
                  full((1, E)), full((1, E))],
        out_specs=blk,
        compiler_params=_parallel(),
    )(y3, p["in_w"], p["in_b"], p["out_w"], p["out_b"],
      p["ln1_g"], p["ln1_b"], p["ff1_w"], p["ff1_b"],
      p["ff2_w"], p["ff2_b"], p["ln2_g"], p["ln2_b"])


# ----------------------------------------------------------------------------
# Kernel 3: residual-block tail
#   [mid|side] merged conv1x1 (K=C+Sd) + sigmoid*tanh gate + output conv1x1
#   + residual/sqrt(2) + in-kernel skip accumulation; single lane-dense [TM,2C]
#   store (new x | new skip_sum).
# ----------------------------------------------------------------------------

def _tail_kernel(y_ref, s_ref, x_ref, sk_ref, wms_ref, bms_ref,
                 wo_ref, bo_ref, o_ref):
    ys = jnp.concatenate([y_ref[...], s_ref[...]], axis=-1)            # [TM, C+Sd]
    z = jnp.dot(ys.astype(BF16), wms_ref[...],
                preferred_element_type=F32) + bms_ref[...]             # [TM, 2C]
    C = z.shape[-1] // 2
    gated = jax.nn.sigmoid(z[:, :C]) * jnp.tanh(z[:, C:])
    o = jnp.dot(gated.astype(BF16), wo_ref[...],
                preferred_element_type=F32) + bo_ref[...]              # [TM, 2C]
    x_new = (x_ref[...] + o[:, :C]) * _INV_SQRT2
    sk_new = sk_ref[...] + o[:, C:]
    o_ref[...] = jnp.concatenate([x_new, sk_new], axis=-1)             # one 128-lane store


def pallas_residual_tail(y2, s2, x2, skip_prev, p, row_cap=2048):
    M, C = y2.shape
    Sd = s2.shape[1]
    TM = _row_tile(M, row_cap)
    row = lambda n: pl.BlockSpec((TM, n), lambda i: (i, 0))
    full = lambda shape: pl.BlockSpec(shape, lambda i: (0, 0))
    return pl.pallas_call(
        _tail_kernel,
        out_shape=jax.ShapeDtypeStruct((M, 2 * C), F32),
        grid=(M // TM,),
        in_specs=[row(C), row(Sd), row(C), row(C),
                  full((C + Sd, 2 * C)), full((1, 2 * C)),
                  full((C, 2 * C)), full((1, 2 * C))],
        out_specs=row(2 * C),
        compiler_params=_parallel(),
    )(y2, s2, x2, skip_prev, p["ms_w"], p["ms_b"], p["out_w"], p["out_b"])


# ----------------------------------------------------------------------------
# Kernel 4: output head (skip scale + proj1 + ReLU + proj2-as-VPU-reduction)
# ----------------------------------------------------------------------------

def _head_kernel(scale):
    def kernel(x_ref, w1_ref, b1_ref, w2_ref, b2_ref, o_ref):
        x = x_ref[...] * scale
        h = jnp.dot(x.astype(BF16), w1_ref[...],
                    preferred_element_type=F32) + b1_ref[...]
        h = jnp.maximum(h, 0.0)
        # C -> 1 projection as multiply + lane reduction (avoid N=1 MXU matmul).
        o_ref[...] = jnp.sum(h * w2_ref[...], axis=-1, keepdims=True) + b2_ref[...]
    return kernel


def pallas_output_head(x2, params, scale, row_cap=2048):
    M, C = x2.shape
    TM = _row_tile(M, row_cap)
    row = lambda n: pl.BlockSpec((TM, n), lambda i: (i, 0))
    full = lambda shape: pl.BlockSpec(shape, lambda i: (0, 0))
    return pl.pallas_call(
        _head_kernel(scale),
        out_shape=jax.ShapeDtypeStruct((M, 1), F32),
        grid=(M // TM,),
        in_specs=[row(C), full((C, C)), full((1, C)), full((1, C)), full((1, 1))],
        out_specs=row(1),
        compiler_params=_parallel(),
    )(x2, params["op1_w"], params["op1_b"], params["op2_w"], params["op2_b"])


# ----------------------------------------------------------------------------
# Model (channels-last everywhere; single NCHW -> channels-last at the boundary)
# ----------------------------------------------------------------------------

def residual_block(x_blkc, side_tok, attr_emb, demb, skip_sum, p, nheads):
    """x_blkc: [B, K, L, C] channels-last; side_tok/skip_sum: [B*K*L, *]."""
    B, K, L, C = x_blkc.shape
    N = attr_emb.shape[1]
    Lt = N + L

    # Tiny projections (<100 rows) are left to XLA: pallas_call overhead dominates.
    a = jnp.dot(attr_emb, p["attr_w"]) + p["attr_b"]                    # [B, N, C]
    a = jnp.broadcast_to(a[:, None, :, :], (B, K, N, C))
    d = jnp.dot(demb, p["diff_w"]) + p["diff_b"]                        # [B, C]

    y = jnp.concatenate([a, x_blkc], axis=2) + d[:, None, None, :]      # [B,K,Lt,C]

    if Lt > 1:   # temporal transformer: seq=Lt, batch=B*K (no transpose needed)
        y = pallas_transformer_layer(y.reshape(B * K, Lt, C), p["time"], nheads)
        y = y.reshape(B, K, Lt, C)
    if K > 1:    # feature transformer: seq=K, batch=B*Lt (one transpose each way)
        yf = y.transpose(0, 2, 1, 3).reshape(B * Lt, K, C)
        yf = pallas_transformer_layer(yf, p["feat"], nheads)
        y = yf.reshape(B, Lt, K, C).transpose(0, 2, 1, 3)

    y2 = y[:, :, N:, :].reshape(B * K * L, C)                           # drop attr tokens
    x2 = x_blkc.reshape(B * K * L, C)
    comb = pallas_residual_tail(y2, side_tok, x2, skip_sum, p)          # [M, 2C]
    return comb[:, :C].reshape(B, K, L, C), comb[:, C:]


def diff_csdi_forward(params, x, side_emb, attr_emb, diffusion_step, *, nheads):
    B, inputdim, K, L = x.shape
    C = params["in_w"].shape[1]
    M = B * K * L

    # Single NCHW -> channels-last conversion at the boundary.
    x_tok = x.transpose(0, 2, 3, 1).reshape(M, inputdim)
    side_tok = side_emb.transpose(0, 2, 3, 1).reshape(M, side_emb.shape[1])

    h = pallas_input_projection(x_tok, params["in_w"], params["in_b"])  # [M, C]

    # Diffusion-embedding MLP: [B, D] rows — plain jnp (XLA fuses the whole thing).
    e = params["emb_table"][diffusion_step]
    e = jax.nn.silu(jnp.dot(e, params["de1_w"]) + params["de1_b"])
    demb = jax.nn.silu(jnp.dot(e, params["de2_w"]) + params["de2_b"])   # [B, D]

    x_blkc = h.reshape(B, K, L, C)
    skip_sum = jnp.zeros((M, C), F32)
    for lp in params["layers"]:
        x_blkc, skip_sum = residual_block(x_blkc, side_tok, attr_emb, demb,
                                          skip_sum, lp, nheads)

    out = pallas_output_head(skip_sum, params,
                             1.0 / math.sqrt(len(params["layers"])))    # [M, 1]
    return out.reshape(B, K, L)


# ----------------------------------------------------------------------------
# Deterministic parameter construction (weights pre-transposed [In,Out],
# MXU-path weights pre-cast bf16, mid/side weights pre-concatenated)
# ----------------------------------------------------------------------------

def build_embedding(num_steps, dim):
    steps = jnp.arange(num_steps, dtype=F32)[:, None]
    freqs = (10.0 ** (jnp.arange(dim, dtype=F32) / (dim - 1) * 4.0))[None, :]
    table = steps * freqs
    return jnp.concatenate([jnp.sin(table), jnp.cos(table)], axis=1)


def init_params(key, config, inputdim=2):
    C = config["channels"]
    D = config["diffusion_embedding_dim"]
    attr_dim = config["attr_dim"]
    side_dim = config["side_dim"]
    keys = iter(jax.random.split(key, 512))

    def wbf(ind, outd, scale=0.08):   # MXU-path weight: [In, Out], bf16
        return (jax.random.normal(next(keys), (ind, outd)) * scale).astype(BF16)

    def wf32(ind, outd, scale=0.08):  # XLA-path weight: [In, Out], f32
        return (jax.random.normal(next(keys), (ind, outd)) * scale).astype(F32)

    def b(outd, scale=0.02):
        return (jax.random.normal(next(keys), (1, outd)) * scale).astype(F32)

    def trans(E, FF):
        return dict(
            in_w=wbf(E, 3 * E), in_b=b(3 * E),
            out_w=wbf(E, E), out_b=b(E),
            ff1_w=wbf(E, FF), ff1_b=b(FF),
            ff2_w=wbf(FF, E), ff2_b=b(E),
            ln1_g=jnp.ones((1, E), F32), ln1_b=jnp.zeros((1, E), F32),
            ln2_g=jnp.ones((1, E), F32), ln2_b=jnp.zeros((1, E), F32),
        )

    def res_block():
        mid_w, mid_b = wbf(C, 2 * C), b(2 * C)
        side_w, side_b = wbf(side_dim, 2 * C), b(2 * C)
        return dict(
            diff_w=wf32(D, C), diff_b=b(C),
            attr_w=wf32(attr_dim, C), attr_b=b(C),
            ms_w=jnp.concatenate([mid_w, side_w], axis=0),   # [(C+Sd), 2C] bf16
            ms_b=mid_b + side_b,                              # biases add
            out_w=wbf(C, 2 * C), out_b=b(2 * C),
            time=trans(C, 64), feat=trans(C, 64),             # dim_feedforward=64
        )

    return dict(
        in_w=wbf(inputdim, C), in_b=b(C),
        op1_w=wbf(C, C), op1_b=b(C),
        op2_w=jnp.zeros((1, C), F32), op2_b=b(1),   # nn.init.zeros_ on op2 weight
        de1_w=wf32(D, D), de1_b=b(D),
        de2_w=wf32(D, D), de2_b=b(D),
        emb_table=build_embedding(config["num_steps"], D // 2),
        layers=[res_block() for _ in range(config["layers"])],
    )


# ----------------------------------------------------------------------------
# Main
# ----------------------------------------------------------------------------

if __name__ == "__main__":
    config = dict(
        channels=64,
        num_steps=50,
        diffusion_embedding_dim=128,
        side_dim=16,
        attr_dim=8,
        nheads=8,
        is_linear=False,     # TODO(synk): is_linear=True (LinearAttentionTransformer) not implemented
        is_attr_proj=True,
        layers=2,
    )
    INPUTDIM = 2
    B, K, L, N = 2, 4, 8, 3

    key = jax.random.PRNGKey(0)
    kp, kx, ks, ka = jax.random.split(key, 4)

    params = init_params(kp, config, inputdim=INPUTDIM)

    x = jax.random.normal(kx, (B, INPUTDIM, K, L), dtype=F32)
    side_emb = jax.random.normal(ks, (B, config["side_dim"], K, L), dtype=F32)
    attr_emb = jax.random.normal(ka, (B, N, config["attr_dim"]), dtype=F32)
    diffusion_step = jnp.array([3, 17], dtype=jnp.int32)

    fwd = jax.jit(functools.partial(diff_csdi_forward, nheads=config["nheads"]))
    out = jax.block_until_ready(fwd(params, x, side_emb, attr_emb, diffusion_step))

    assert out.shape == (B, K, L), out.shape
    print("KERNEL_OK")
</pallas_src>

<mosaic_0001>
module attributes {stable_mosaic.version = 11 : i64} {
  func.func @_inproj_kernel(%arg0: i32, %arg1: memref<32x2xf32, #tpu.memory_space<vmem>>, %arg2: memref<2x64xbf16, #tpu.memory_space<vmem>>, %arg3: memref<1x64xf32, #tpu.memory_space<vmem>>, %arg4: memref<32x64xf32, #tpu.memory_space<vmem>>) attributes {dimension_semantics = [#tpu.dimension_semantics<parallel>], iteration_bounds = array<i64: 2>, scalar_prefetch = 0 : i64, scratch_operands = 0 : i64, tpu.core_type = #tpu.core_type<tc>, window_params = [{transform_indices = @transform_0, window_bounds = array<i64: 32, 2>}, {pipeline_mode = #tpu.pipeline_mode<synchronous>, transform_indices = @transform_1, window_bounds = array<i64: 2, 64>}, {pipeline_mode = #tpu.pipeline_mode<synchronous>, transform_indices = @transform_2, window_bounds = array<i64: 1, 64>}, {transform_indices = @transform_3, window_bounds = array<i64: 32, 64>}]} {
    %c0 = arith.constant 0 : index
    %c0_0 = arith.constant 0 : index
    %0 = vector.load %arg1[%c0, %c0_0] : memref<32x2xf32, #tpu.memory_space<vmem>>, vector<32x2xf32>
    %1 = arith.truncf %0 : vector<32x2xf32> to vector<32x2xbf16>
    %c0_1 = arith.constant 0 : index
    %c0_2 = arith.constant 0 : index
    %2 = vector.load %arg2[%c0_1, %c0_2] : memref<2x64xbf16, #tpu.memory_space<vmem>>, vector<2x64xbf16>
    %cst = arith.constant dense<0.000000e+00> : vector<32x64xf32>
    %3 = tpu.matmul %1, %2, %cst {dimension_numbers = #tpu.dot_dimension_numbers<[1], [0], [0], [1], [0, 0, 1, 1], [], []>} : vector<32x2xbf16>, vector<2x64xbf16>, vector<32x64xf32> -> vector<32x64xf32>
    %c0_3 = arith.constant 0 : index
    %c0_4 = arith.constant 0 : index
    %4 = vector.load %arg3[%c0_3, %c0_4] : memref<1x64xf32, #tpu.memory_space<vmem>>, vector<1x64xf32>
    %5 = vector.broadcast %4 : vector<1x64xf32> to vector<32x64xf32>
    %6 = arith.addf %3, %5 : vector<32x64xf32>
    %cst_5 = arith.constant 0.000000e+00 : f32
    %7 = vector.broadcast %cst_5 : f32 to vector<32x64xf32>
    %8 = arith.maximumf %6, %7 : vector<32x64xf32>
    %c0_6 = arith.constant 0 : index
    %c0_7 = arith.constant 0 : index
    %9 = vector.load %arg4[%c0_6, %c0_7] : memref<32x64xf32, #tpu.memory_space<vmem>>, vector<32x64xf32>
    tpu.vector_store %arg4[%c0_6, %c0_7], %8 {strides = array<i32>} : memref<32x64xf32, #tpu.memory_space<vmem>>, vector<32x64xf32>,
    return
  }
  func.func @transform_0(%arg0: i32) -> (i32, i32) {
    %c0_i32 = arith.constant 0 : i32
    %c0_i32_0 = arith.constant 0 : i32
    return %arg0, %c0_i32 : i32, i32
  }
  func.func @transform_1(%arg0: i32) -> (i32, i32) {
    %c0_i32 = arith.constant 0 : i32
    %c0_i32_0 = arith.constant 0 : i32
    %c0_i32_1 = arith.constant 0 : i32
    return %c0_i32, %c0_i32_0 : i32, i32
  }
  func.func @transform_2(%arg0: i32) -> (i32, i32) {
    %c0_i32 = arith.constant 0 : i32
    %c0_i32_0 = arith.constant 0 : i32
    %c0_i32_1 = arith.constant 0 : i32
    return %c0_i32, %c0_i32_0 : i32, i32
  }
  func.func @transform_3(%arg0: i32) -> (i32, i32) {
    %c0_i32 = arith.constant 0 : i32
    %c0_i32_0 = arith.constant 0 : i32
    return %arg0, %c0_i32 : i32, i32
  }
}

module attributes {stable_mosaic.version = 11 : i64} {
  func.func @kernel(%arg0: i32, %arg1: memref<2x4x64xf32, #tpu.memory_space<vmem>>, %arg2: memref<64x192xbf16, #tpu.memory_space<vmem>>, %arg3: memref<1x192xf32, #tpu.memory_space<vmem>>, %arg4: memref<64x64xbf16, #tpu.memory_space<vmem>>, %arg5: memref<1x64xf32, #tpu.memory_space<vmem>>, %arg6: memref<1x64xf32, #tpu.memory_space<vmem>>, %arg7: memref<1x64xf32, #tpu.memory_space<vmem>>, %arg8: memref<64x64xbf16, #tpu.memory_space<vmem>>, %arg9: memref<1x64xf32, #tpu.memory_space<vmem>>, %arg10: memref<64x64xbf16, #tpu.memory_space<vmem>>, %arg11: memref<1x64xf32, #tpu.memory_space<vmem>>, %arg12: memref<1x64xf32, #tpu.memory_space<vmem>>, %arg13: memref<1x64xf32, #tpu.memory_space<vmem>>, %arg14: memref<2x4x64xf32, #tpu.memory_space<vmem>>) attributes {dimension_semantics = [#tpu.dimension_semantics<parallel>], iteration_bounds = array<i64: 11>, scalar_prefetch = 0 : i64, scratch_operands = 0 : i64, tpu.core_type = #tpu.core_type<tc>, window_params = [{transform_indices = @transform_0, window_bounds = array<i64: 2, 4, 64>}, {pipeline_mode = #tpu.pipeline_mode<synchronous>, transform_indices = @transform_1, window_bounds = array<i64: 64, 192>}, {pipeline_mode = #tpu.pipeline_mode<synchronous>, transform_indices = @transform_2, window_bounds = array<i64: 1, 192>}, {pipeline_mode = #tpu.pipeline_mode<synchronous>, transform_indices = @transform_3, window_bounds = array<i64: 64, 64>}, {pipeline_mode = #tpu.pipeline_mode<synchronous>, transform_indices = @transform_4, window_bounds = array<i64: 1, 64>}, {pipeline_mode = #tpu.pipeline_mode<synchronous>, transform_indices = @transform_5, window_bounds = array<i64: 1, 64>}, {pipeline_mode = #tpu.pipeline_mode<synchronous>, transform_indices = @transform_6, window_bounds = array<i64: 1, 64>}, {pipeline_mode = #tpu.pipeline_mode<synchronous>, transform_indices = @transform_7, window_bounds = array<i64: 64, 64>}, {pipeline_mode = #tpu.pipeline_mode<synchronous>, transform_indices = @transform_8, window_bounds = array<i64: 1, 64>}, {pipeline_mode = #tpu.pipeline_mode<synchronous>, transform_indices = @transform_9, window_bounds = array<i64: 64, 64>}, {pipeline_mode = #tpu.pipeline_mode<synchronous>, transform_indices = @transform_10, window_bounds = array<i64: 1, 64>}, {pipeline_mode = #tpu.pipeline_mode<synchronous>, transform_indices = @transform_11, window_bounds = array<i64: 1, 64>}, {pipeline_mode = #tpu.pipeline_mode<synchronous>, transform_indices = @transform_12, window_bounds = array<i64: 1, 64>}, {transform_indices = @transform_13, window_bounds = array<i64: 2, 4, 64>}]} {
    %c0 = arith.constant 0 : index
    %c0_0 = arith.constant 0 : index
    %0 = vector.load %arg2[%c0, %c0_0] : memref<64x192xbf16, #tpu.memory_space<vmem>>, vector<64x192xbf16>
    %c0_1 = arith.constant 0 : index
    %c0_2 = arith.constant 0 : index
    %1 = vector.load %arg3[%c0_1, %c0_2] : memref<1x192xf32, #tpu.memory_space<vmem>>, vector<1x192xf32>
    %c0_3 = arith.constant 0 : index
    %c0_4 = arith.constant 0 : index
    %2 = vector.load %arg4[%c0_3, %c0_4] : memref<64x64xbf16, #tpu.memory_space<vmem>>, vector<64x64xbf16>
    %c0_5 = arith.constant 0 : index
    %c0_6 = arith.constant 0 : index
    %3 = vector.load %arg5[%c0_5, %c0_6] : memref<1x64xf32, #tpu.memory_space<vmem>>, vector<1x64xf32>
    %c0_7 = arith.constant 0 : index
    %c0_8 = arith.constant 0 : index
    %4 = vector.load %arg6[%c0_7, %c0_8] : memref<1x64xf32, #tpu.memory_space<vmem>>, vector<1x64xf32>
    %c0_9 = arith.constant 0 : index
    %c0_10 = arith.constant 0 : index
    %5 = vector.load %arg7[%c0_9, %c0_10] : memref<1x64xf32, #tpu.memory_space<vmem>>, vector<1x64xf32>
    %c0_11 = arith.constant 0 : index
    %c0_12 = arith.constant 0 : index
    %6 = vector.load %arg8[%c0_11, %c0_12] : memref<64x64xbf16, #tpu.memory_space<vmem>>, vector<64x64xbf16>
    %c0_13 = arith.constant 0 : index
    %c0_14 = arith.constant 0 : index
    %7 = vector.load %arg9[%c0_13, %c0_14] : memref<1x64xf32, #tpu.memory_space<vmem>>, vector<1x64xf32>
    %c0_15 = arith.constant 0 : index
    %c0_16 = arith.constant 0 : index
    %8 = vector.load %arg10[%c0_15, %c0_16] : memref<64x64xbf16, #tpu.memory_space<vmem>>, vector<64x64xbf16>
    %c0_17 = arith.constant 0 : index
    %c0_18 = arith.constant 0 : index
    %9 = vector.load %arg11[%c0_17, %c0_18] : memref<1x64xf32, #tpu.memory_space<vmem>>, vector<1x64xf32>
    %c0_19 = arith.constant 0 : index
    %c0_20 = arith.constant 0 : index
    %10 = vector.load %arg12[%c0_19, %c0_20] : memref<1x64xf32, #tpu.memory_space<vmem>>, vector<1x64xf32>
    %c0_21 = arith.constant 0 : index
    %c0_22 = arith.constant 0 : index
    %11 = vector.load %arg13[%c0_21, %c0_22] : memref<1x64xf32, #tpu.memory_space<vmem>>, vector<1x64xf32>
    %c0_23 = arith.constant 0 : index
    %c0_24 = arith.constant 0 : index
    %c0_25 = arith.constant 0 : index
    %12 = vector.load %arg1[%c0_23, %c0_24, %c0_25] : memref<2x4x64xf32, #tpu.memory_space<vmem>>, vector<1x4x64xf32>
    %13 = vector.shape_cast %12 : vector<1x4x64xf32> to vector<4x64xf32>
    %14 = arith.truncf %13 : vector<4x64xf32> to vector<4x64xbf16>
    %cst = arith.constant dense<0.000000e+00> : vector<4x192xf32>
    %15 = tpu.matmul %14, %0, %cst {dimension_numbers = #tpu.dot_dimension_numbers<[1], [0], [0], [1], [0, 0, 1, 1], [], []>} : vector<4x64xbf16>, vector<64x192xbf16>, vector<4x192xf32> -> vector<4x192xf32>
    %16 = vector.broadcast %1 : vector<1x192xf32> to vector<4x192xf32>
    %17 = arith.addf %15, %16 : vector<4x192xf32>
    %18 = vector.extract_strided_slice %17 {offsets = [0, 0], sizes = [4, 8], strides = [1, 1]} : vector<4x192xf32> to vector<4x8xf32>
    %cst_26 = arith.constant 0.353553385 : f32
    %19 = vector.broadcast %cst_26 : f32 to vector<4x8xf32>
    %20 = arith.mulf %18, %19 : vector<4x8xf32>
    %21 = arith.truncf %20 : vector<4x8xf32> to vector<4x8xbf16>
    %22 = vector.extract_strided_slice %17 {offsets = [0, 64], sizes = [4, 8], strides = [1, 1]} : vector<4x192xf32> to vector<4x8xf32>
    %23 = arith.truncf %22 : vector<4x8xf32> to vector<4x8xbf16>
    %24 = vector.extract_strided_slice %17 {offsets = [0, 128], sizes = [4, 8], strides = [1, 1]} : vector<4x192xf32> to vector<4x8xf32>
    %25 = arith.truncf %24 : vector<4x8xf32> to vector<4x8xbf16>
    "tpu.trace_start"() <{level = 10 : i32, message = "qd,kd->qk"}> : () -> ()
    %cst_27 = arith.constant dense<0.000000e+00> : vector<4x4xf32>
    %26 = tpu.matmul %21, %23, %cst_27 {dimension_numbers = #tpu.dot_dimension_numbers<[1], [1], [0], [0], [0, 0, 1, 0], [], []>} : vector<4x8xbf16>, vector<4x8xbf16>, vector<4x4xf32> -> vector<4x4xf32>
    "tpu.trace_stop"() : () -> ()
    %cst_28 = arith.constant dense<0xFF800000> : vector<4xf32>
    %27 = vector.multi_reduction <maximumf>, %26, %cst_28 [1] : vector<4x4xf32> to vector<4xf32>
    %28 = vector.shape_cast %27 : vector<4xf32> to vector<4x1xf32>
    %29 = vector.broadcast %28 : vector<4x1xf32> to vector<4x4xf32>
    %30 = arith.subf %26, %29 : vector<4x4xf32>
    %31 = math.exp %30 : vector<4x4xf32>
    %cst_29 = arith.constant dense<0.000000e+00> : vector<4xf32>
    %32 = vector.multi_reduction <add>, %31, %cst_29 [1] : vector<4x4xf32> to vector<4xf32>
    %33 = vector.shape_cast %32 : vector<4xf32> to vector<4x1xf32>
    %34 = tpu.reciprocal %33 {approx = true} : vector<4x1xf32> -> vector<4x1xf32>
    %35 = vector.broadcast %34 : vector<4x1xf32> to vector<4x4xf32>
    %36 = arith.mulf %31, %35 : vector<4x4xf32>
    %37 = arith.truncf %36 : vector<4x4xf32> to vector<4x4xbf16>
    %cst_30 = arith.constant dense<0.000000e+00> : vector<4x8xf32>
    %38 = tpu.matmul %37, %25, %cst_30 {dimension_numbers = #tpu.dot_dimension_numbers<[1], [0], [0], [1], [0, 0, 1, 1], [], []>} : vector<4x4xbf16>, vector<4x8xbf16>, vector<4x8xf32> -> vector<4x8xf32>
    %39 = vector.extract_strided_slice %17 {offsets = [0, 8], sizes = [4, 8], strides = [1, 1]} : vector<4x192xf32> to vector<4x8xf32>
    %cst_31 = arith.constant 0.353553385 : f32
    %40 = vector.broadcast %cst_31 : f32 to vector<4x8xf32>
    %41 = arith.mulf %39, %40 : vector<4x8xf32>
    %42 = arith.truncf %41 : vector<4x8xf32> to vector<4x8xbf16>
    %43 = vector.extract_strided_slice %17 {offsets = [0, 72], sizes = [4, 8], strides = [1, 1]} : vector<4x192xf32> to vector<4x8xf32>
    %44 = arith.truncf %43 : vector<4x8xf32> to vector<4x8xbf16>
    %45 = vector.extract_strided_slice %17 {offsets = [0, 136], sizes = [4, 8], strides = [1, 1]} : vector<4x192xf32> to vector<4x8xf32>
    %46 = arith.truncf %45 : vector<4x8xf32> to vector<4x8xbf16>
    "tpu.trace_start"() <{level = 10 : i32, message = "qd,kd->qk"}> : () -> ()
    %cst_32 = arith.constant dense<0.000000e+00> : vector<4x4xf32>
    %47 = tpu.matmul %42, %44, %cst_32 {dimension_numbers = #tpu.dot_dimension_numbers<[1], [1], [0], [0], [0, 0, 1, 0], [], []>} : vector<4x8xbf16>, vector<4x8xbf16>, vector<4x4xf32> -> vector<4x4xf32>
    "tpu.trace_stop"() : () -> ()
    %cst_33 = arith.constant dense<0xFF800000> : vector<4xf32>
    %48 = vector.multi_reduction <maximumf>, %47, %cst_33 [1] : vector<4x4xf32> to vector<4xf32>
    %49 = vector.shape_cast %48 : vector<4xf32> to vector<4x1xf32>
    %50 = vector.broadcast %49 : vector<4x1xf32> to vector<4x4xf32>
    %51 = arith.subf %47, %50 : vector<4x4xf32>
    %52 = math.exp %51 : vector<4x4xf32>
    %cst_34 = arith.constant dense<0.000000e+00> : vector<4xf32>
    %53 = vector.multi_reduction <add>, %52, %cst_34 [1] : vector<4x4xf32> to vector<4xf32>
    %54 = vector.shape_cast %53 : vector<4xf32> to vector<4x1xf32>
    %55 = tpu.reciprocal %54 {approx = true} : vector<4x1xf32> -> vector<4x1xf32>
    %56 = vector.broadcast %55 : vector<4x1xf32> to vector<4x4xf32>
    %57 = arith.mulf %52, %56 : vector<4x4xf32>
    %58 = arith.truncf %57 : vector<4x4xf32> to vector<4x4xbf16>
    %cst_35 = arith.constant dense<0.000000e+00> : vector<4x8xf32>
    %59 = tpu.matmul %58, %46, %cst_35 {dimension_numbers = #tpu.dot_dimension_numbers<[1], [0], [0], [1], [0, 0, 1, 1], [], []>} : vector<4x4xbf16>, vector<4x8xbf16>, vector<4x8xf32> -> vector<4x8xf32>
    %60 = vector.extract_strided_slice %17 {offsets = [0, 16], sizes = [4, 8], strides = [1, 1]} : vector<4x192xf32> to vector<4x8xf32>
    %cst_36 = arith.constant 0.353553385 : f32
    %61 = vector.broadcast %cst_36 : f32 to vector<4x8xf32>
    %62 = arith.mulf %60, %61 : vector<4x8xf32>
    %63 = arith.truncf %62 : vector<4x8xf32> to vector<4x8xbf16>
    %64 = vector.extract_strided_slice %17 {offsets = [0, 80], sizes = [4, 8], strides = [1, 1]} : vector<4x192xf32> to vector<4x8xf32>
    %65 = arith.truncf %64 : vector<4x8xf32> to vector<4x8xbf16>
    %66 = vector.extract_strided_slice %17 {offsets = [0, 144], sizes = [4, 8], strides = [1, 1]} : vector<4x192xf32> to vector<4x8xf32>
    %67 = arith.truncf %66 : vector<4x8xf32> to vector<4x8xbf16>
    "tpu.trace_start"() <{level = 10 : i32, message = "qd,kd->qk"}> : () -> ()
    %cst_37 = arith.constant dense<0.000000e+00> : vector<4x4xf32>
    %68 = tpu.matmul %63, %65, %cst_37 {dimension_numbers = #tpu.dot_dimension_numbers<[1], [1], [0], [0], [0, 0, 1, 0], [], []>} : vector<4x8xbf16>, vector<4x8xbf16>, vector<4x4xf32> -> vector<4x4xf32>
    "tpu.trace_stop"() : () -> ()
    %cst_38 = arith.constant dense<0xFF800000> : vector<4xf32>
    %69 = vector.multi_reduction <maximumf>, %68, %cst_38 [1] : vector<4x4xf32> to vector<4xf32>
    %70 = vector.shape_cast %69 : vector<4xf32> to vector<4x1xf32>
    %71 = vector.broadcast %70 : vector<4x1xf32> to vector<4x4xf32>
    %72 = arith.subf %68, %71 : vector<4x4xf32>
    %73 = math.exp %72 : vector<4x4xf32>
    %cst_39 = arith.constant dense<0.000000e+00> : vector<4xf32>
    %74 = vector.multi_reduction <add>, %73, %cst_39 [1] : vector<4x4xf32> to vector<4xf32>
    %75 = vector.shape_cast %74 : vector<4xf32> to vector<4x1xf32>
    %76 = tpu.reciprocal %75 {approx = true} : vector<4x1xf32> -> vector<4x1xf32>
    %77 = vector.broadcast %76 : vector<4x1xf32> to vector<4x4xf32>
    %78 = arith.mulf %73, %77 : vector<4x4xf32>
    %79 = arith.truncf %78 : vector<4x4xf32> to vector<4x4xbf16>
    %cst_40 = arith.constant dense<0.000000e+00> : vector<4x8xf32>
    %80 = tpu.matmul %79, %67, %cst_40 {dimension_numbers = #tpu.dot_dimension_numbers<[1], [0], [0], [1], [0, 0, 1, 1], [], []>} : vector<4x4xbf16>, vector<4x8xbf16>, vector<4x8xf32> -> vector<4x8xf32>
    %81 = vector.extract_strided_slice %17 {offsets = [0, 24], sizes = [4, 8], strides = [1, 1]} : vector<4x192xf32> to vector<4x8xf32>
    %cst_41 = arith.constant 0.353553385 : f32
    %82 = vector.broadcast %cst_41 : f32 to vector<4x8xf32>
    %83 = arith.mulf %81, %82 : vector<4x8xf32>
    %84 = arith.truncf %83 : vector<4x8xf32> to vector<4x8xbf16>
    %85 = vector.extract_strided_slice %17 {offsets = [0, 88], sizes = [4, 8], strides = [1, 1]} : vector<4x192xf32> to vector<4x8xf32>
    %86 = arith.truncf %85 : vector<4x8xf32> to vector<4x8xbf16>
    %87 = vector.extract_strided_slice %17 {offsets = [0, 152], sizes = [4, 8], strides = [1, 1]} : vector<4x192xf32> to vector<4x8xf32>
    %88 = arith.truncf %87 : vector<4x8xf32> to vector<4x8xbf16>
    "tpu.trace_start"() <{level = 10 : i32, message = "qd,kd->qk"}> : () -> ()
    %cst_42 = arith.constant dense<0.000000e+00> : vector<4x4xf32>
    %89 = tpu.matmul %84, %86, %cst_42 {dimension_numbers = #tpu.dot_dimension_numbers<[1], [1], [0], [0], [0, 0, 1, 0], [], []>} : vector<4x8xbf16>, vector<4x8xbf16>, vector<4x4xf32> -> vector<4x4xf32>
    "tpu.trace_stop"() : () -> ()
    %cst_43 = arith.constant dense<0xFF800000> : vector<4xf32>
    %90 = vector.multi_reduction <maximumf>, %89, %cst_43 [1] : vector<4x4xf32> to vector<4xf32>
    %91 = vector.shape_cast %90 : vector<4xf32> to vector<4x1xf32>
    %92 = vector.broadcast %91 : vector<4x1xf32> to vector<4x4xf32>
    %93 = arith.subf %89, %92 : vector<4x4xf32>
    %94 = math.exp %93 : vector<4x4xf32>
    %cst_44 = arith.constant dense<0.000000e+00> : vector<4xf32>
    %95 = vector.multi_reduction <add>, %94, %cst_44 [1] : vector<4x4xf32> to vector<4xf32>
    %96 = vector.shape_cast %95 : vector<4xf32> to vector<4x1xf32>
    %97 = tpu.reciprocal %96 {approx = true} : vector<4x1xf32> -> vector<4x1xf32>
    %98 = vector.broadcast %97 : vector<4x1xf32> to vector<4x4xf32>
    %99 = arith.mulf %94, %98 : vector<4x4xf32>
    %100 = arith.truncf %99 : vector<4x4xf32> to vector<4x4xbf16>
    %cst_45 = arith.constant dense<0.000000e+00> : vector<4x8xf32>
    %101 = tpu.matmul %100, %88, %cst_45 {dimension_numbers = #tpu.dot_dimension_numbers<[1], [0], [0], [1], [0, 0, 1, 1], [], []>} : vector<4x4xbf16>, vector<4x8xbf16>, vector<4x8xf32> -> vector<4x8xf32>
    %102 = vector.extract_strided_slice %17 {offsets = [0, 32], sizes = [4, 8], strides = [1, 1]} : vector<4x192xf32> to vector<4x8xf32>
    %cst_46 = arith.constant 0.353553385 : f32
    %103 = vector.broadcast %cst_46 : f32 to vector<4x8xf32>
    %104 = arith.mulf %102, %103 : vector<4x8xf32>
    %105 = arith.truncf %104 : vector<4x8xf32> to vector<4x8xbf16>
    %106 = vector.extract_strided_slice %17 {offsets = [0, 96], sizes = [4, 8], strides = [1, 1]} : vector<4x192xf32> to vector<4x8xf32>
    %107 = arith.truncf %106 : vector<4x8xf32> to vector<4x8xbf16>
    %108 = vector.extract_strided_slice %17 {offsets = [0, 160], sizes = [4, 8], strides = [1, 1]} : vector<4x192xf32> to vector<4x8xf32>
    %109 = arith.truncf %108 : vector<4x8xf32> to vector<4x8xbf16>
    "tpu.trace_start"() <{level = 10 : i32, message = "qd,kd->qk"}> : () -> ()
    %cst_47 = arith.constant dense<0.000000e+00> : vector<4x4xf32>
    %110 = tpu.matmul %105, %107, %cst_47 {dimension_numbers = #tpu.dot_dimension_numbers<[1], [1], [0], [0], [0, 0, 1, 0], [], []>} : vector<4x8xbf16>, vector<4x8xbf16>, vector<4x4xf32> -> vector<4x4xf32>
    "tpu.trace_stop"() : () -> ()
    %cst_48 = arith.constant dense<0xFF800000> : vector<4xf32>
    %111 = vector.multi_reduction <maximumf>, %110, %cst_48 [1] : vector<4x4xf32> to vector<4xf32>
    %112 = vector.shape_cast %111 : vector<4xf32> to vector<4x1xf32>
    %113 = vector.broadcast %112 : vector<4x1xf32> to vector<4x4xf32>
    %114 = arith.subf %110, %113 : vector<4x4xf32>
    %115 = math.exp %114 : vector<4x4xf32>
    %cst_49 = arith.constant dense<0.000000e+00> : vector<4xf32>
    %116 = vector.multi_reduction <add>, %115, %cst_49 [1] : vector<4x4xf32> to vector<4xf32>
    %117 = vector.shape_cast %116 : vector<4xf32> to vector<4x1xf32>
    %118 = tpu.reciprocal %117 {approx = true} : vector<4x1xf32> -> vector<4x1xf32>
    %119 = vector.broadcast %118 : vector<4x1xf32> to vector<4x4xf32>
    %120 = arith.mulf %115, %119 : vector<4x4xf32>
    %121 = arith.truncf %120 : vector<4x4xf32> to vector<4x4xbf16>
    %cst_50 = arith.constant dense<0.000000e+00> : vector<4x8xf32>
    %122 = tpu.matmul %121, %109, %cst_50 {dimension_numbers = #tpu.dot_dimension_numbers<[1], [0], [0], [1], [0, 0, 1, 1], [], []>} : vector<4x4xbf16>, vector<4x8xbf16>, vector<4x8xf32> -> vector<4x8xf32>
    %123 = vector.extract_strided_slice %17 {offsets = [0, 40], sizes = [4, 8], strides = [1, 1]} : vector<4x192xf32> to vector<4x8xf32>
    %cst_51 = arith.constant 0.353553385 : f32
    %124 = vector.broadcast %cst_51 : f32 to vector<4x8xf32>
    %125 = arith.mulf %123, %124 : vector<4x8xf32>
    %126 = arith.truncf %125 : vector<4x8xf32> to vector<4x8xbf16>
    %127 = vector.extract_strided_slice %17 {offsets = [0, 104], sizes = [4, 8], strides = [1, 1]} : vector<4x192xf32> to vector<4x8xf32>
    %128 = arith.truncf %127 : vector<4x8xf32> to vector<4x8xbf16>
    %129 = vector.extract_strided_slice %17 {offsets = [0, 168], sizes = [4, 8], strides = [1, 1]} : vector<4x192xf32> to vector<4x8xf32>
    %130 = arith.truncf %129 : vector<4x8xf32> to vector<4x8xbf16>
    "tpu.trace_start"() <{level = 10 : i32, message = "qd,kd->qk"}> : () -> ()
    %cst_52 = arith.constant dense<0.000000e+00> : vector<4x4xf32>
    %131 = tpu.matmul %126, %128, %cst_52 {dimension_numbers = #tpu.dot_dimension_numbers<[1], [1], [0], [0], [0, 0, 1, 0], [], []>} : vector<4x8xbf16>, vector<4x8xbf16>, vector<4x4xf32> -> vector<4x4xf32>
    "tpu.trace_stop"() : () -> ()
    %cst_53 = arith.constant dense<0xFF800000> : vector<4xf32>
    %132 = vector.multi_reduction <maximumf>, %131, %cst_53 [1] : vector<4x4xf32> to vector<4xf32>
    %133 = vector.shape_cast %132 : vector<4xf32> to vector<4x1xf32>
    %134 = vector.broadcast %133 : vector<4x1xf32> to vector<4x4xf32>
    %135 = arith.subf %131, %134 : vector<4x4xf32>
    %136 = math.exp %135 : vector<4x4xf32>
    %cst_54 = arith.constant dense<0.000000e+00> : vector<4xf32>
    %137 = vector.multi_reduction <add>, %136, %cst_54 [1] : vector<4x4xf32> to vector<4xf32>
    %138 = vector.shape_cast %137 : vector<4xf32> to vector<4x1xf32>
    %139 = tpu.reciprocal %138 {approx = true} : vector<4x1xf32> -> vector<4x1xf32>
    %140 = vector.broadcast %139 : vector<4x1xf32> to vector<4x4xf32>
    %141 = arith.mulf %136, %140 : vector<4x4xf32>
    %142 = arith.truncf %141 : vector<4x4xf32> to vector<4x4xbf16>
    %cst_55 = arith.constant dense<0.000000e+00> : vector<4x8xf32>
    %143 = tpu.matmul %142, %130, %cst_55 {dimension_numbers = #tpu.dot_dimension_numbers<[1], [0], [0], [1], [0, 0, 1, 1], [], []>} : vector<4x4xbf16>, vector<4x8xbf16>, vector<4x8xf32> -> vector<4x8xf32>
    %144 = vector.extract_strided_slice %17 {offsets = [0, 48], sizes = [4, 8], strides = [1, 1]} : vector<4x192xf32> to vector<4x8xf32>
    %cst_56 = arith.constant 0.353553385 : f32
    %145 = vector.broadcast %cst_56 : f32 to vector<4x8xf32>
    %146 = arith.mulf %144, %145 : vector<4x8xf32>
    %147 = arith.truncf %146 : vector<4x8xf32> to vector<4x8xbf16>
    %148 = vector.extract_strided_slice %17 {offsets = [0, 112], sizes = [4, 8], strides = [1, 1]} : vector<4x192xf32> to vector<4x8xf32>
    %149 = arith.truncf %148 : vector<4x8xf32> to vector<4x8xbf16>
    %150 = vector.extract_strided_slice %17 {offsets = [0, 176], sizes = [4, 8], strides = [1, 1]} : vector<4x192xf32> to vector<4x8xf32>
    %151 = arith.truncf %150 : vector<4x8xf32> to vector<4x8xbf16>
    "tpu.trace_start"() <{level = 10 : i32, message = "qd,kd->qk"}> : () -> ()
    %cst_57 = arith.constant dense<0.000000e+00> : vector<4x4xf32>
    %152 = tpu.matmul %147, %149, %cst_57 {dimension_numbers = #tpu.dot_dimension_numbers<[1], [1], [0], [0], [0, 0, 1, 0], [], []>} : vector<4x8xbf16>, vector<4x8xbf16>, vector<4x4xf32> -> vector<4x4xf32>
    "tpu.trace_stop"() : () -> ()
    %cst_58 = arith.constant dense<0xFF800000> : vector<4xf32>
    %153 = vector.multi_reduction <maximumf>, %152, %cst_58 [1] : vector<4x4xf32> to vector<4xf32>
    %154 = vector.shape_cast %153 : vector<4xf32> to vector<4x1xf32>
    %155 = vector.broadcast %154 : vector<4x1xf32> to vector<4x4xf32>
    %156 = arith.subf %152, %155 : vector<4x4xf32>
    %157 = math.exp %156 : vector<4x4xf32>
    %cst_59 = arith.constant dense<0.000000e+00> : vector<4xf32>
    %158 = vector.multi_reduction <add>, %157, %cst_59 [1] : vector<4x4xf32> to vector<4xf32>
    %159 = vector.shape_cast %158 : vector<4xf32> to vector<4x1xf32>
    %160 = tpu.reciprocal %159 {approx = true} : vector<4x1xf32> -> vector<4x1xf32>
    %161 = vector.broadcast %160 : vector<4x1xf32> to vector<4x4xf32>
    %162 = arith.mulf %157, %161 : vector<4x4xf32>
    %163 = arith.truncf %162 : vector<4x4xf32> to vector<4x4xbf16>
    %cst_60 = arith.constant dense<0.000000e+00> : vector<4x8xf32>
    %164 = tpu.matmul %163, %151, %cst_60 {dimension_numbers = #tpu.dot_dimension_numbers<[1], [0], [0], [1], [0, 0, 1, 1], [], []>} : vector<4x4xbf16>, vector<4x8xbf16>, vector<4x8xf32> -> vector<4x8xf32>
    %165 = vector.extract_strided_slice %17 {offsets = [0, 56], sizes = [4, 8], strides = [1, 1]} : vector<4x192xf32> to vector<4x8xf32>
    %cst_61 = arith.constant 0.353553385 : f32
    %166 = vector.broadcast %cst_61 : f32 to vector<4x8xf32>
    %167 = arith.mulf %165, %166 : vector<4x8xf32>
    %168 = arith.truncf %167 : vector<4x8xf32> to vector<4x8xbf16>
    %169 = vector.extract_strided_slice %17 {offsets = [0, 120], sizes = [4, 8], strides = [1, 1]} : vector<4x192xf32> to vector<4x8xf32>
    %170 = arith.truncf %169 : vector<4x8xf32> to vector<4x8xbf16>
    %171 = vector.extract_strided_slice %17 {offsets = [0, 184], sizes = [4, 8], strides = [1, 1]} : vector<4x192xf32> to vector<4x8xf32>
    %172 = arith.truncf %171 : vector<4x8xf32> to vector<4x8xbf16>
    "tpu.trace_start"() <{level = 10 : i32, message = "qd,kd->qk"}> : () -> ()
    %cst_62 = arith.constant dense<0.000000e+00> : vector<4x4xf32>
    %173 = tpu.matmul %168, %170, %cst_62 {dimension_numbers = #tpu.dot_dimension_numbers<[1], [1], [0], [0], [0, 0, 1, 0], [], []>} : vector<4x8xbf16>, vector<4x8xbf16>, vector<4x4xf32> -> vector<4x4xf32>
    "tpu.trace_stop"() : () -> ()
    %cst_63 = arith.constant dense<0xFF800000> : vector<4xf32>
    %174 = vector.multi_reduction <maximumf>, %173, %cst_63 [1] : vector<4x4xf32> to vector<4xf32>
    %175 = vector.shape_cast %174 : vector<4xf32> to vector<4x1xf32>
    %176 = vector.broadcast %175 : vector<4x1xf32> to vector<4x4xf32>
    %177 = arith.subf %173, %176 : vector<4x4xf32>
    %178 = math.exp %177 : vector<4x4xf32>
    %cst_64 = arith.constant dense<0.000000e+00> : vector<4xf32>
    %179 = vector.multi_reduction <add>, %178, %cst_64 [1] : vector<4x4xf32> to vector<4xf32>
    %180 = vector.shape_cast %179 : vector<4xf32> to vector<4x1xf32>
    %181 = tpu.reciprocal %180 {approx = true} : vector<4x1xf32> -> vector<4x1xf32>
    %182 = vector.broadcast %181 : vector<4x1xf32> to vector<4x4xf32>
    %183 = arith.mulf %178, %182 : vector<4x4xf32>
    %184 = arith.truncf %183 : vector<4x4xf32> to vector<4x4xbf16>
    %cst_65 = arith.constant dense<0.000000e+00> : vector<4x8xf32>
    %185 = tpu.matmul %184, %172, %cst_65 {dimension_numbers = #tpu.dot_dimension_numbers<[1], [0], [0], [1], [0, 0, 1, 1], [], []>} : vector<4x4xbf16>, vector<4x8xbf16>, vector<4x8xf32> -> vector<4x8xf32>
    %186 = tpu.concatenate %38, %59, %80, %101, %122, %143, %164, %185 in 1 : vector<4x8xf32>, vector<4x8xf32>, vector<4x8xf32>, vector<4x8xf32>, vector<4x8xf32>, vector<4x8xf32>, vector<4x8xf32>, vector<4x8xf32> -> vector<4x64xf32>
    %187 = arith.truncf %186 : vector<4x64xf32> to vector<4x64xbf16>
    %cst_66 = arith.constant dense<0.000000e+00> : vector<4x64xf32>
    %188 = tpu.matmul %187, %2, %cst_66 {dimension_numbers = #tpu.dot_dimension_numbers<[1], [0], [0], [1], [0, 0, 1, 1], [], []>} : vector<4x64xbf16>, vector<64x64xbf16>, vector<4x64xf32> -> vector<4x64xf32>
    %189 = arith.addf %13, %188 : vector<4x64xf32>
    %190 = vector.broadcast %3 : vector<1x64xf32> to vector<4x64xf32>
    %191 = arith.addf %189, %190 : vector<4x64xf32>
    %cst_67 = arith.constant dense<0.000000e+00> : vector<4xf32>
    %192 = vector.multi_reduction <add>, %191, %cst_67 [1] : vector<4x64xf32> to vector<4xf32>
    %193 = vector.shape_cast %192 : vector<4xf32> to vector<4x1xf32>
    %cst_68 = arith.constant 6.400000e+01 : f32
    %194 = vector.broadcast %cst_68 : f32 to vector<4x1xf32>
    %195 = arith.divf %193, %194 : vector<4x1xf32>
    %196 = vector.broadcast %195 : vector<4x1xf32> to vector<4x64xf32>
    %197 = arith.subf %191, %196 : vector<4x64xf32>
    %198 = arith.mulf %197, %197 : vector<4x64xf32>
    %cst_69 = arith.constant dense<0.000000e+00> : vector<4xf32>
    %199 = vector.multi_reduction <add>, %198, %cst_69 [1] : vector<4x64xf32> to vector<4xf32>
    %200 = vector.shape_cast %199 : vector<4xf32> to vector<4x1xf32>
    %cst_70 = arith.constant 6.400000e+01 : f32
    %201 = vector.broadcast %cst_70 : f32 to vector<4x1xf32>
    %202 = arith.divf %200, %201 : vector<4x1xf32>
    %203 = vector.broadcast %195 : vector<4x1xf32> to vector<4x64xf32>
    %204 = arith.subf %191, %203 : vector<4x64xf32>
    %cst_71 = arith.constant 9.99999974E-6 : f32
    %205 = vector.broadcast %cst_71 : f32 to vector<4x1xf32>
    %206 = arith.addf %202, %205 : vector<4x1xf32>
    %207 = math.rsqrt %206 : vector<4x1xf32>
    %208 = vector.broadcast %207 : vector<4x1xf32> to vector<4x64xf32>
    %209 = arith.mulf %204, %208 : vector<4x64xf32>
    %210 = vector.broadcast %4 : vector<1x64xf32> to vector<4x64xf32>
    %211 = arith.mulf %209, %210 : vector<4x64xf32>
    %212 = vector.broadcast %5 : vector<1x64xf32> to vector<4x64xf32>
    %213 = arith.addf %211, %212 : vector<4x64xf32>
    %214 = arith.truncf %213 : vector<4x64xf32> to vector<4x64xbf16>
    %cst_72 = arith.constant dense<0.000000e+00> : vector<4x64xf32>
    %215 = tpu.matmul %214, %6, %cst_72 {dimension_numbers = #tpu.dot_dimension_numbers<[1], [0], [0], [1], [0, 0, 1, 1], [], []>} : vector<4x64xbf16>, vector<64x64xbf16>, vector<4x64xf32> -> vector<4x64xf32>
    %216 = vector.broadcast %7 : vector<1x64xf32> to vector<4x64xf32>
    %217 = arith.addf %215, %216 : vector<4x64xf32>
    %cst_73 = arith.constant 5.000000e-01 : f32
    %218 = vector.broadcast %cst_73 : f32 to vector<4x64xf32>
    %219 = arith.mulf %218, %217 : vector<4x64xf32>
    %cst_74 = arith.constant 4.471500e-02 : f32
    %220 = vector.broadcast %cst_74 : f32 to vector<4x64xf32>
    %221 = arith.mulf %220, %217 : vector<4x64xf32>
    %222 = arith.mulf %221, %217 : vector<4x64xf32>
    %223 = arith.mulf %222, %217 : vector<4x64xf32>
    %224 = arith.addf %217, %223 : vector<4x64xf32>
    %cst_75 = arith.constant 0.797884583 : f32
    %225 = vector.broadcast %cst_75 : f32 to vector<4x64xf32>
    %226 = arith.mulf %225, %224 : vector<4x64xf32>
    %227 = math.tanh %226 : vector<4x64xf32>
    %cst_76 = arith.constant 1.000000e+00 : f32
    %228 = vector.broadcast %cst_76 : f32 to vector<4x64xf32>
    %229 = arith.addf %228, %227 : vector<4x64xf32>
    %230 = arith.mulf %219, %229 : vector<4x64xf32>
    %231 = arith.truncf %230 : vector<4x64xf32> to vector<4x64xbf16>
    %cst_77 = arith.constant dense<0.000000e+00> : vector<4x64xf32>
    %232 = tpu.matmul %231, %8, %cst_77 {dimension_numbers = #tpu.dot_dimension_numbers<[1], [0], [0], [1], [0, 0, 1, 1], [], []>} : vector<4x64xbf16>, vector<64x64xbf16>, vector<4x64xf32> -> vector<4x64xf32>
    %233 = vector.broadcast %9 : vector<1x64xf32> to vector<4x64xf32>
    %234 = arith.addf %232, %233 : vector<4x64xf32>
    %235 = arith.addf %213, %234 : vector<4x64xf32>
    %cst_78 = arith.constant dense<0.000000e+00> : vector<4xf32>
    %236 = vector.multi_reduction <add>, %235, %cst_78 [1] : vector<4x64xf32> to vector<4xf32>
    %237 = vector.shape_cast %236 : vector<4xf32> to vector<4x1xf32>
    %cst_79 = arith.constant 6.400000e+01 : f32
    %238 = vector.broadcast %cst_79 : f32 to vector<4x1xf32>
    %239 = arith.divf %237, %238 : vector<4x1xf32>
    %240 = vector.broadcast %239 : vector<4x1xf32> to vector<4x64xf32>
    %241 = arith.subf %235, %240 : vector<4x64xf32>
    %242 = arith.mulf %241, %241 : vector<4x64xf32>
    %cst_80 = arith.constant dense<0.000000e+00> : vector<4xf32>
    %243 = vector.multi_reduction <add>, %242, %cst_80 [1] : vector<4x64xf32> to vector<4xf32>
    %244 = vector.shape_cast %243 : vector<4xf32> to vector<4x1xf32>
    %cst_81 = arith.constant 6.400000e+01 : f32
    %245 = vector.broadcast %cst_81 : f32 to vector<4x1xf32>
    %246 = arith.divf %244, %245 : vector<4x1xf32>
    %247 = vector.broadcast %239 : vector<4x1xf32> to vector<4x64xf32>
    %248 = arith.subf %235, %247 : vector<4x64xf32>
    %cst_82 = arith.constant 9.99999974E-6 : f32
    %249 = vector.broadcast %cst_82 : f32 to vector<4x1xf32>
    %250 = arith.addf %246, %249 : vector<4x1xf32>
    %251 = math.rsqrt %250 : vector<4x1xf32>
    %252 = vector.broadcast %251 : vector<4x1xf32> to vector<4x64xf32>
    %253 = arith.mulf %248, %252 : vector<4x64xf32>
    %254 = vector.broadcast %10 : vector<1x64xf32> to vector<4x64xf32>
    %255 = arith.mulf %253, %254 : vector<4x64xf32>
    %256 = vector.broadcast %11 : vector<1x64xf32> to vector<4x64xf32>
    %257 = arith.addf %255, %256 : vector<4x64xf32>
    %c0_83 = arith.constant 0 : index
    %c0_84 = arith.constant 0 : index
    %c0_85 = arith.constant 0 : index
    %258 = vector.load %arg14[%c0_83, %c0_84, %c0_85] : memref<2x4x64xf32, #tpu.memory_space<vmem>>, vector<1x4x64xf32>
    %259 = vector.shape_cast %258 : vector<1x4x64xf32> to vector<4x64xf32>
    %260 = vector.shape_cast %257 : vector<4x64xf32> to vector<1x4x64xf32>
    tpu.vector_store %arg14[%c0_83, %c0_84, %c0_85], %260 {strides = array<i32>} : memref<2x4x64xf32, #tpu.memory_space<vmem>>, vector<1x4x64xf32>,
    %c1 = arith.constant 1 : index
    %c0_86 = arith.constant 0 : index
    %c0_87 = arith.constant 0 : index
    %261 = vector.load %arg1[%c1, %c0_86, %c0_87] : memref<2x4x64xf32, #tpu.memory_space<vmem>>, vector<1x4x64xf32>
    %262 = vector.shape_cast %261 : vector<1x4x64xf32> to vector<4x64xf32>
    %263 = arith.truncf %262 : vector<4x64xf32> to vector<4x64xbf16>
    %cst_88 = arith.constant dense<0.000000e+00> : vector<4x192xf32>
    %264 = tpu.matmul %263, %0, %cst_88 {dimension_numbers = #tpu.dot_dimension_numbers<[1], [0], [0], [1], [0, 0, 1, 1], [], []>} : vector<4x64xbf16>, vector<64x192xbf16>, vector<4x192xf32> -> vector<4x192xf32>
    %265 = vector.broadcast %1 : vector<1x192xf32> to vector<4x192xf32>
    %266 = arith.addf %264, %265 : vector<4x192xf32>
    %267 = vector.extract_strided_slice %266 {offsets = [0, 0], sizes = [4, 8], strides = [1, 1]} : vector<4x192xf32> to vector<4x8xf32>
    %cst_89 = arith.constant 0.353553385 : f32
    %268 = vector.broadcast %cst_89 : f32 to vector<4x8xf32>
    %269 = arith.mulf %267, %268 : vector<4x8xf32>
    %270 = arith.truncf %269 : vector<4x8xf32> to vector<4x8xbf16>
    %271 = vector.extract_strided_slice %266 {offsets = [0, 64], sizes = [4, 8], strides = [1, 1]} : vector<4x192xf32> to vector<4x8xf32>
    %272 = arith.truncf %271 : vector<4x8xf32> to vector<4x8xbf16>
    %273 = vector.extract_strided_slice %266 {offsets = [0, 128], sizes = [4, 8], strides = [1, 1]} : vector<4x192xf32> to vector<4x8xf32>
    %274 = arith.truncf %273 : vector<4x8xf32> to vector<4x8xbf16>
    "tpu.trace_start"() <{level = 10 : i32, message = "qd,kd->qk"}> : () -> ()
    %cst_90 = arith.constant dense<0.000000e+00> : vector<4x4xf32>
    %275 = tpu.matmul %270, %272, %cst_90 {dimension_numbers = #tpu.dot_dimension_numbers<[1], [1], [0], [0], [0, 0, 1, 0], [], []>} : vector<4x8xbf16>, vector<4x8xbf16>, vector<4x4xf32> -> vector<4x4xf32>
    "tpu.trace_stop"() : () -> ()
    %cst_91 = arith.constant dense<0xFF800000> : vector<4xf32>
    %276 = vector.multi_reduction <maximumf>, %275, %cst_91 [1] : vector<4x4xf32> to vector<4xf32>
    %277 = vector.shape_cast %276 : vector<4xf32> to vector<4x1xf32>
    %278 = vector.broadcast %277 : vector<4x1xf32> to vector<4x4xf32>
    %279 = arith.subf %275, %278 : vector<4x4xf32>
    %280 = math.exp %279 : vector<4x4xf32>
    %cst_92 = arith.constant dense<0.000000e+00> : vector<4xf32>
    %281 = vector.multi_reduction <add>, %280, %cst_92 [1] : vector<4x4xf32> to vector<4xf32>
    %282 = vector.shape_cast %281 : vector<4xf32> to vector<4x1xf32>
    %283 = tpu.reciprocal %282 {approx = true} : vector<4x1xf32> -> vector<4x1xf32>
    %284 = vector.broadcast %283 : vector<4x1xf32> to vector<4x4xf32>
    %285 = arith.mulf %280, %284 : vector<4x4xf32>
    %286 = arith.truncf %285 : vector<4x4xf32> to vector<4x4xbf16>
    %cst_93 = arith.constant dense<0.000000e+00> : vector<4x8xf32>
    %287 = tpu.matmul %286, %274, %cst_93 {dimension_numbers = #tpu.dot_dimension_numbers<[1], [0], [0], [1], [0, 0, 1, 1], [], []>} : vector<4x4xbf16>, vector<4x8xbf16>, vector<4x8xf32> -> vector<4x8xf32>
    %288 = vector.extract_strided_slice %266 {offsets = [0, 8], sizes = [4, 8], strides = [1, 1]} : vector<4x192xf32> to vector<4x8xf32>
    %cst_94 = arith.constant 0.353553385 : f32
    %289 = vector.broadcast %cst_94 : f32 to vector<4x8xf32>
    %290 = arith.mulf %288, %289 : vector<4x8xf32>
    %291 = arith.truncf %290 : vector<4x8xf32> to vector<4x8xbf16>
    %292 = vector.extract_strided_slice %266 {offsets = [0, 72], sizes = [4, 8], strides = [1, 1]} : vector<4x192xf32> to vector<4x8xf32>
    %293 = arith.truncf %292 : vector<4x8xf32> to vector<4x8xbf16>
    %294 = vector.extract_strided_slice %266 {offsets = [0, 136], sizes = [4, 8], strides = [1, 1]} : vector<4x192xf32> to vector<4x8xf32>
    %295 = arith.truncf %294 : vector<4x8xf32> to vector<4x8xbf16>
    "tpu.trace_start"() <{level = 10 : i32, message = "qd,kd->qk"}> : () -> ()
    %cst_95 = arith.constant dense<0.000000e+00> : vector<4x4xf32>
    %296 = tpu.matmul %291, %293, %cst_95 {dimension_numbers = #tpu.dot_dimension_numbers<[1], [1], [0], [0], [0, 0, 1, 0], [], []>} : vector<4x8xbf16>, vector<4x8xbf16>, vector<4x4xf32> -> vector<4x4xf32>
    "tpu.trace_stop"() : () -> ()
    %cst_96 = arith.constant dense<0xFF800000> : vector<4xf32>
    %297 = vector.multi_reduction <maximumf>, %296, %cst_96 [1] : vector<4x4xf32> to vector<4xf32>
    %298 = vector.shape_cast %297 : vector<4xf32> to vector<4x1xf32>
    %299 = vector.broadcast %298 : vector<4x1xf32> to vector<4x4xf32>
    %300 = arith.subf %296, %299 : vector<4x4xf32>
    %301 = math.exp %300 : vector<4x4xf32>
    %cst_97 = arith.constant dense<0.000000e+00> : vector<4xf32>
    %302 = vector.multi_reduction <add>, %301, %cst_97 [1] : vector<4x4xf32> to vector<4xf32>
    %303 = vector.shape_cast %302 : vector<4xf32> to vector<4x1xf32>
    %304 = tpu.reciprocal %303 {approx = true} : vector<4x1xf32> -> vector<4x1xf32>
    %305 = vector.broadcast %304 : vector<4x1xf32> to vector<4x4xf32>
    %306 = arith.mulf %301, %305 : vector<4x4xf32>
    %307 = arith.truncf %306 : vector<4x4xf32> to vector<4x4xbf16>
    %cst_98 = arith.constant dense<0.000000e+00> : vector<4x8xf32>
    %308 = tpu.matmul %307, %295, %cst_98 {dimension_numbers = #tpu.dot_dimension_numbers<[1], [0], [0], [1], [0, 0, 1, 1], [], []>} : vector<4x4xbf16>, vector<4x8xbf16>, vector<4x8xf32> -> vector<4x8xf32>
    %309 = vector.extract_strided_slice %266 {offsets = [0, 16], sizes = [4, 8], strides = [1, 1]} : vector<4x192xf32> to vector<4x8xf32>
    %cst_99 = arith.constant 0.353553385 : f32
    %310 = vector.broadcast %cst_99 : f32 to vector<4x8xf32>
    %311 = arith.mulf %309, %310 : vector<4x8xf32>
    %312 = arith.truncf %311 : vector<4x8xf32> to vector<4x8xbf16>
    %313 = vector.extract_strided_slice %266 {offsets = [0, 80], sizes = [4, 8], strides = [1, 1]} : vector<4x192xf32> to vector<4x8xf32>
    %314 = arith.truncf %313 : vector<4x8xf32> to vector<4x8xbf16>
    %315 = vector.extract_strided_slice %266 {offsets = [0, 144], sizes = [4, 8], strides = [1, 1]} : vector<4x192xf32> to vector<4x8xf32>
    %316 = arith.truncf %315 : vector<4x8xf32> to vector<4x8xbf16>
    "tpu.trace_start"() <{level = 10 : i32, message = "qd,kd->qk"}> : () -> ()
    %cst_100 = arith.constant dense<0.000000e+00> : vector<4x4xf32>
    %317 = tpu.matmul %312, %314, %cst_100 {dimension_numbers = #tpu.dot_dimension_numbers<[1], [1], [0], [0], [0, 0, 1, 0], [], []>} : vector<4x8xbf16>, vector<4x8xbf16>, vector<4x4xf32> -> vector<4x4xf32>
    "tpu.trace_stop"() : () -> ()
    %cst_101 = arith.constant dense<0xFF800000> : vector<4xf32>
    %318 = vector.multi_reduction <maximumf>, %317, %cst_101 [1] : vector<4x4xf32> to vector<4xf32>
    %319 = vector.shape_cast %318 : vector<4xf32> to vector<4x1xf32>
    %320 = vector.broadcast %319 : vector<4x1xf32> to vector<4x4xf32>
    %321 = arith.subf %317, %320 : vector<4x4xf32>
    %322 = math.exp %321 : vector<4x4xf32>
    %cst_102 = arith.constant dense<0.000000e+00> : vector<4xf32>
    %323 = vector.multi_reduction <add>, %322, %cst_102 [1] : vector<4x4xf32> to vector<4xf32>
    %324 = vector.shape_cast %323 : vector<4xf32> to vector<4x1xf32>
    %325 = tpu.reciprocal %324 {approx = true} : vector<4x1xf32> -> vector<4x1xf32>
    %326 = vector.broadcast %325 : vector<4x1xf32> to vector<4x4xf32>
    %327 = arith.mulf %322, %326 : vector<4x4xf32>
    %328 = arith.truncf %327 : vector<4x4xf32> to vector<4x4xbf16>
    %cst_103 = arith.constant dense<0.000000e+00> : vector<4x8xf32>
    %329 = tpu.matmul %328, %316, %cst_103 {dimension_numbers = #tpu.dot_dimension_numbers<[1], [0], [0], [1], [0, 0, 1, 1], [], []>} : vector<4x4xbf16>, vector<4x8xbf16>, vector<4x8xf32> -> vector<4x8xf32>
    %330 = vector.extract_strided_slice %266 {offsets = [0, 24], sizes = [4, 8], strides = [1, 1]} : vector<4x192xf32> to vector<4x8xf32>
    %cst_104 = arith.constant 0.353553385 : f32
    %331 = vector.broadcast %cst_104 : f32 to vector<4x8xf32>
    %332 = arith.mulf %330, %331 : vector<4x8xf32>
    %333 = arith.truncf %332 : vector<4x8xf32> to vector<4x8xbf16>
    %334 = vector.extract_strided_slice %266 {offsets = [0, 88], sizes = [4, 8], strides = [1, 1]} : vector<4x192xf32> to vector<4x8xf32>
    %335 = arith.truncf %334 : vector<4x8xf32> to vector<4x8xbf16>
    %336 = vector.extract_strided_slice %266 {offsets = [0, 152], sizes = [4, 8], strides = [1, 1]} : vector<4x192xf32> to vector<4x8xf32>
    %337 = arith.truncf %336 : vector<4x8xf32> to vector<4x8xbf16>
    "tpu.trace_start"() <{level = 10 : i32, message = "qd,kd->qk"}> : () -> ()
    %cst_105 = arith.constant dense<0.000000e+00> : vector<4x4xf32>
    %338 = tpu.matmul %333, %335, %cst_105 {dimension_numbers = #tpu.dot_dimension_numbers<[1], [1], [0], [0], [0, 0, 1, 0], [], []>} : vector<4x8xbf16>, vector<4x8xbf16>, vector<4x4xf32> -> vector<4x4xf32>
    "tpu.trace_stop"() : () -> ()
    %cst_106 = arith.constant dense<0xFF800000> : vector<4xf32>
    %339 = vector.multi_reduction <maximumf>, %338, %cst_106 [1] : vector<4x4xf32> to vector<4xf32>
    %340 = vector.shape_cast %339 : vector<4xf32> to vector<4x1xf32>
    %341 = vector.broadcast %340 : vector<4x1xf32> to vector<4x4xf32>
    %342 = arith.subf %338, %341 : vector<4x4xf32>
    %343 = math.exp %342 : vector<4x4xf32>
    %cst_107 = arith.constant dense<0.000000e+00> : vector<4xf32>
    %344 = vector.multi_reduction <add>, %343, %cst_107 [1] : vector<4x4xf32> to vector<4xf32>
    %345 = vector.shape_cast %344 : vector<4xf32> to vector<4x1xf32>
    %346 = tpu.reciprocal %345 {approx = true} : vector<4x1xf32> -> vector<4x1xf32>
    %347 = vector.broadcast %346 : vector<4x1xf32> to vector<4x4xf32>
    %348 = arith.mulf %343, %347 : vector<4x4xf32>
    %349 = arith.truncf %348 : vector<4x4xf32> to vector<4x4xbf16>
    %cst_108 = arith.constant dense<0.000000e+00> : vector<4x8xf32>
    %350 = tpu.matmul %349, %337, %cst_108 {dimension_numbers = #tpu.dot_dimension_numbers<[1], [0], [0], [1], [0, 0, 1, 1], [], []>} : vector<4x4xbf16>, vector<4x8xbf16>, vector<4x8xf32> -> vector<4x8xf32>
    %351 = vector.extract_strided_slice %266 {offsets = [0, 32], sizes = [4, 8], strides = [1, 1]} : vector<4x192xf32> to vector<4x8xf32>
    %cst_109 = arith.constant 0.353553385 : f32
    %352 = vector.broadcast %cst_109 : f32 to vector<4x8xf32>
    %353 = arith.mulf %351, %352 : vector<4x8xf32>
    %354 = arith.truncf %353 : vector<4x8xf32> to vector<4x8xbf16>
    %355 = vector.extract_strided_slice %266 {offsets = [0, 96], sizes = [4, 8], strides = [1, 1]} : vector<4x192xf32> to vector<4x8xf32>
    %356 = arith.truncf %355 : vector<4x8xf32> to vector<4x8xbf16>
    %357 = vector.extract_strided_slice %266 {offsets = [0, 160], sizes = [4, 8], strides = [1, 1]} : vector<4x192xf32> to vector<4x8xf32>
    %358 = arith.truncf %357 : vector<4x8xf32> to vector<4x8xbf16>
    "tpu.trace_start"() <{level = 10 : i32, message = "qd,kd->qk"}> : () -> ()
    %cst_110 = arith.constant dense<0.000000e+00> : vector<4x4xf32>
    %359 = tpu.matmul %354, %356, %cst_110 {dimension_numbers = #tpu.dot_dimension_numbers<[1], [1], [0], [0], [0, 0, 1, 0], [], []>} : vector<4x8xbf16>, vector<4x8xbf16>, vector<4x4xf32> -> vector<4x4xf32>
    "tpu.trace_stop"() : () -> ()
    %cst_111 = arith.constant dense<0xFF800000> : vector<4xf32>
    %360 = vector.multi_reduction <maximumf>, %359, %cst_111 [1] : vector<4x4xf32> to vector<4xf32>
    %361 = vector.shape_cast %360 : vector<4xf32> to vector<4x1xf32>
    %362 = vector.broadcast %361 : vector<4x1xf32> to vector<4x4xf32>
    %363 = arith.subf %359, %362 : vector<4x4xf32>
    %364 = math.exp %363 : vector<4x4xf32>
    %cst_112 = arith.constant dense<0.000000e+00> : vector<4xf32>
    %365 = vector.multi_reduction <add>, %364, %cst_112 [1] : vector<4x4xf32> to vector<4xf32>
    %366 = vector.shape_cast %365 : vector<4xf32> to vector<4x1xf32>
    %367 = tpu.reciprocal %366 {approx = true} : vector<4x1xf32> -> vector<4x1xf32>
    %368 = vector.broadcast %367 : vector<4x1xf32> to vector<4x4xf32>
    %369 = arith.mulf %364, %368 : vector<4x4xf32>
    %370 = arith.truncf %369 : vector<4x4xf32> to vector<4x4xbf16>
    %cst_113 = arith.constant dense<0.000000e+00> : vector<4x8xf32>
    %371 = tpu.matmul %370, %358, %cst_113 {dimension_numbers = #tpu.dot_dimension_numbers<[1], [0], [0], [1], [0, 0, 1, 1], [], []>} : vector<4x4xbf16>, vector<4x8xbf16>, vector<4x8xf32> -> vector<4x8xf32>
    %372 = vector.extract_strided_slice %266 {offsets = [0, 40], sizes = [4, 8], strides = [1, 1]} : vector<4x192xf32> to vector<4x8xf32>
    %cst_114 = arith.constant 0.353553385 : f32
    %373 = vector.broadcast %cst_114 : f32 to vector<4x8xf32>
    %374 = arith.mulf %372, %373 : vector<4x8xf32>
    %375 = arith.truncf %374 : vector<4x8xf32> to vector<4x8xbf16>
    %376 = vector.extract_strided_slice %266 {offsets = [0, 104], sizes = [4, 8], strides = [1, 1]} : vector<4x192xf32> to vector<4x8xf32>
    %377 = arith.truncf %376 : vector<4x8xf32> to vector<4x8xbf16>
    %378 = vector.extract_strided_slice %266 {offsets = [0, 168], sizes = [4, 8], strides = [1, 1]} : vector<4x192xf32> to vector<4x8xf32>
    %379 = arith.truncf %378 : vector<4x8xf32> to vector<4x8xbf16>
    "tpu.trace_start"() <{level = 10 : i32, message = "qd,kd->qk"}> : () -> ()
    %cst_115 = arith.constant dense<0.000000e+00> : vector<4x4xf32>
    %380 = tpu.matmul %375, %377, %cst_115 {dimension_numbers = #tpu.dot_dimension_numbers<[1], [1], [0], [0], [0, 0, 1, 0], [], []>} : vector<4x8xbf16>, vector<4x8xbf16>, vector<4x4xf32> -> vector<4x4xf32>
    "tpu.trace_stop"() : () -> ()
    %cst_116 = arith.constant dense<0xFF800000> : vector<4xf32>
    %381 = vector.multi_reduction <maximumf>, %380, %cst_116 [1] : vector<4x4xf32> to vector<4xf32>
    %382 = vector.shape_cast %381 : vector<4xf32> to vector<4x1xf32>
    %383 = vector.broadcast %382 : vector<4x1xf32> to vector<4x4xf32>
    %384 = arith.subf %380, %383 : vector<4x4xf32>
    %385 = math.exp %384 : vector<4x4xf32>
    %cst_117 = arith.constant dense<0.000000e+00> : vector<4xf32>
    %386 = vector.multi_reduction <add>, %385, %cst_117 [1] : vector<4x4xf32> to vector<4xf32>
    %387 = vector.shape_cast %386 : vector<4xf32> to vector<4x1xf32>
    %388 = tpu.reciprocal %387 {approx = true} : vector<4x1xf32> -> vector<4x1xf32>
    %389 = vector.broadcast %388 : vector<4x1xf32> to vector<4x4xf32>
    %390 = arith.mulf %385, %389 : vector<4x4xf32>
    %391 = arith.truncf %390 : vector<4x4xf32> to vector<4x4xbf16>
    %cst_118 = arith.constant dense<0.000000e+00> : vector<4x8xf32>
    %392 = tpu.matmul %391, %379, %cst_118 {dimension_numbers = #tpu.dot_dimension_numbers<[1], [0], [0], [1], [0, 0, 1, 1], [], []>} : vector<4x4xbf16>, vector<4x8xbf16>, vector<4x8xf32> -> vector<4x8xf32>
    %393 = vector.extract_strided_slice %266 {offsets = [0, 48], sizes = [4, 8], strides = [1, 1]} : vector<4x192xf32> to vector<4x8xf32>
    %cst_119 = arith.constant 0.353553385 : f32
    %394 = vector.broadcast %cst_119 : f32 to vector<4x8xf32>
    %395 = arith.mulf %393, %394 : vector<4x8xf32>
    %396 = arith.truncf %395 : vector<4x8xf32> to vector<4x8xbf16>
    %397 = vector.extract_strided_slice %266 {offsets = [0, 112], sizes = [4, 8], strides = [1, 1]} : vector<4x192xf32> to vector<4x8xf32>
    %398 = arith.truncf %397 : vector<4x8xf32> to vector<4x8xbf16>
    %399 = vector.extract_strided_slice %266 {offsets = [0, 176], sizes = [4, 8], strides = [1, 1]} : vector<4x192xf32> to vector<4x8xf32>
    %400 = arith.truncf %399 : vector<4x8xf32> to vector<4x8xbf16>
    "tpu.trace_start"() <{level = 10 : i32, message = "qd,kd->qk"}> : () -> ()
    %cst_120 = arith.constant dense<0.000000e+00> : vector<4x4xf32>
    %401 = tpu.matmul %396, %398, %cst_120 {dimension_numbers = #tpu.dot_dimension_numbers<[1], [1], [0], [0], [0, 0, 1, 0], [], []>} : vector<4x8xbf16>, vector<4x8xbf16>, vector<4x4xf32> -> vector<4x4xf32>
    "tpu.trace_stop"() : () -> ()
    %cst_121 = arith.constant dense<0xFF800000> : vector<4xf32>
    %402 = vector.multi_reduction <maximumf>, %401, %cst_121 [1] : vector<4x4xf32> to vector<4xf32>
    %403 = vector.shape_cast %402 : vector<4xf32> to vector<4x1xf32>
    %404 = vector.broadcast %403 : vector<4x1xf32> to vector<4x4xf32>
    %405 = arith.subf %401, %404 : vector<4x4xf32>
    %406 = math.exp %405 : vector<4x4xf32>
    %cst_122 = arith.constant dense<0.000000e+00> : vector<4xf32>
    %407 = vector.multi_reduction <add>, %406, %cst_122 [1] : vector<4x4xf32> to vector<4xf32>
    %408 = vector.shape_cast %407 : vector<4xf32> to vector<4x1xf32>
    %409 = tpu.reciprocal %408 {approx = true} : vector<4x1xf32> -> vector<4x1xf32>
    %410 = vector.broadcast %409 : vector<4x1xf32> to vector<4x4xf32>
    %411 = arith.mulf %406, %410 : vector<4x4xf32>
    %412 = arith.truncf %411 : vector<4x4xf32> to vector<4x4xbf16>
    %cst_123 = arith.constant dense<0.000000e+00> : vector<4x8xf32>
    %413 = tpu.matmul %412, %400, %cst_123 {dimension_numbers = #tpu.dot_dimension_numbers<[1], [0], [0], [1], [0, 0, 1, 1], [], []>} : vector<4x4xbf16>, vector<4x8xbf16>, vector<4x8xf32> -> vector<4x8xf32>
    %414 = vector.extract_strided_slice %266 {offsets = [0, 56], sizes = [4, 8], strides = [1, 1]} : vector<4x192xf32> to vector<4x8xf32>
    %cst_124 = arith.constant 0.353553385 : f32
    %415 = vector.broadcast %cst_124 : f32 to vector<4x8xf32>
    %416 = arith.mulf %414, %415 : vector<4x8xf32>
    %417 = arith.truncf %416 : vector<4x8xf32> to vector<4x8xbf16>
    %418 = vector.extract_strided_slice %266 {offsets = [0, 120], sizes = [4, 8], strides = [1, 1]} : vector<4x192xf32> to vector<4x8xf32>
    %419 = arith.truncf %418 : vector<4x8xf32> to vector<4x8xbf16>
    %420 = vector.extract_strided_slice %266 {offsets = [0, 184], sizes = [4, 8], strides = [1, 1]} : vector<4x192xf32> to vector<4x8xf32>
    %421 = arith.truncf %420 : vector<4x8xf32> to vector<4x8xbf16>
    "tpu.trace_start"() <{level = 10 : i32, message = "qd,kd->qk"}> : () -> ()
    %cst_125 = arith.constant dense<0.000000e+00> : vector<4x4xf32>
    %422 = tpu.matmul %417, %419, %cst_125 {dimension_numbers = #tpu.dot_dimension_numbers<[1], [1], [0], [0], [0, 0, 1, 0], [], []>} : vector<4x8xbf16>, vector<4x8xbf16>, vector<4x4xf32> -> vector<4x4xf32>
    "tpu.trace_stop"() : () -> ()
    %cst_126 = arith.constant dense<0xFF800000> : vector<4xf32>
    %423 = vector.multi_reduction <maximumf>, %422, %cst_126 [1] : vector<4x4xf32> to vector<4xf32>
    %424 = vector.shape_cast %423 : vector<4xf32> to vector<4x1xf32>
    %425 = vector.broadcast %424 : vector<4x1xf32> to vector<4x4xf32>
    %426 = arith.subf %422, %425 : vector<4x4xf32>
    %427 = math.exp %426 : vector<4x4xf32>
    %cst_127 = arith.constant dense<0.000000e+00> : vector<4xf32>
    %428 = vector.multi_reduction <add>, %427, %cst_127 [1] : vector<4x4xf32> to vector<4xf32>
    %429 = vector.shape_cast %428 : vector<4xf32> to vector<4x1xf32>
    %430 = tpu.reciprocal %429 {approx = true} : vector<4x1xf32> -> vector<4x1xf32>
    %431 = vector.broadcast %430 : vector<4x1xf32> to vector<4x4xf32>
    %432 = arith.mulf %427, %431 : vector<4x4xf32>
    %433 = arith.truncf %432 : vector<4x4xf32> to vector<4x4xbf16>
    %cst_128 = arith.constant dense<0.000000e+00> : vector<4x8xf32>
    %434 = tpu.matmul %433, %421, %cst_128 {dimension_numbers = #tpu.dot_dimension_numbers<[1], [0], [0], [1], [0, 0, 1, 1], [], []>} : vector<4x4xbf16>, vector<4x8xbf16>, vector<4x8xf32> -> vector<4x8xf32>
    %435 = tpu.concatenate %287, %308, %329, %350, %371, %392, %413, %434 in 1 : vector<4x8xf32>, vector<4x8xf32>, vector<4x8xf32>, vector<4x8xf32>, vector<4x8xf32>, vector<4x8xf32>, vector<4x8xf32>, vector<4x8xf32> -> vector<4x64xf32>
    %436 = arith.truncf %435 : vector<4x64xf32> to vector<4x64xbf16>
    %cst_129 = arith.constant dense<0.000000e+00> : vector<4x64xf32>
    %437 = tpu.matmul %436, %2, %cst_129 {dimension_numbers = #tpu.dot_dimension_numbers<[1], [0], [0], [1], [0, 0, 1, 1], [], []>} : vector<4x64xbf16>, vector<64x64xbf16>, vector<4x64xf32> -> vector<4x64xf32>
    %438 = arith.addf %262, %437 : vector<4x64xf32>
    %439 = vector.broadcast %3 : vector<1x64xf32> to vector<4x64xf32>
    %440 = arith.addf %438, %439 : vector<4x64xf32>
    %cst_130 = arith.constant dense<0.000000e+00> : vector<4xf32>
    %441 = vector.multi_reduction <add>, %440, %cst_130 [1] : vector<4x64xf32> to vector<4xf32>
    %442 = vector.shape_cast %441 : vector<4xf32> to vector<4x1xf32>
    %cst_131 = arith.constant 6.400000e+01 : f32
    %443 = vector.broadcast %cst_131 : f32 to vector<4x1xf32>
    %444 = arith.divf %442, %443 : vector<4x1xf32>
    %445 = vector.broadcast %444 : vector<4x1xf32> to vector<4x64xf32>
    %446 = arith.subf %440, %445 : vector<4x64xf32>
    %447 = arith.mulf %446, %446 : vector<4x64xf32>
    %cst_132 = arith.constant dense<0.000000e+00> : vector<4xf32>
    %448 = vector.multi_reduction <add>, %447, %cst_132 [1] : vector<4x64xf32> to vector<4xf32>
    %449 = vector.shape_cast %448 : vector<4xf32> to vector<4x1xf32>
    %cst_133 = arith.constant 6.400000e+01 : f32
    %450 = vector.broadcast %cst_133 : f32 to vector<4x1xf32>
    %451 = arith.divf %449, %450 : vector<4x1xf32>
    %452 = vector.broadcast %444 : vector<4x1xf32> to vector<4x64xf32>
    %453 = arith.subf %440, %452 : vector<4x64xf32>
    %cst_134 = arith.constant 9.99999974E-6 : f32
    %454 = vector.broadcast %cst_134 : f32 to vector<4x1xf32>
    %455 = arith.addf %451, %454 : vector<4x1xf32>
    %456 = math.rsqrt %455 : vector<4x1xf32>
    %457 = vector.broadcast %456 : vector<4x1xf32> to vector<4x64xf32>
    %458 = arith.mulf %453, %457 : vector<4x64xf32>
    %459 = vector.broadcast %4 : vector<1x64xf32> to vector<4x64xf32>
    %460 = arith.mulf %458, %459 : vector<4x64xf32>
    %461 = vector.broadcast %5 : vector<1x64xf32> to vector<4x64xf32>
    %462 = arith.addf %460, %461 : vector<4x64xf32>
    %463 = arith.truncf %462 : vector<4x64xf32> to vector<4x64xbf16>
    %cst_135 = arith.constant dense<0.000000e+00> : vector<4x64xf32>
    %464 = tpu.matmul %463, %6, %cst_135 {dimension_numbers = #tpu.dot_dimension_numbers<[1], [0], [0], [1], [0, 0, 1, 1], [], []>} : vector<4x64xbf16>, vector<64x64xbf16>, vector<4x64xf32> -> vector<4x64xf32>
    %465 = vector.broadcast %7 : vector<1x64xf32> to vector<4x64xf32>
    %466 = arith.addf %464, %465 : vector<4x64xf32>
    %cst_136 = arith.constant 5.000000e-01 : f32
    %467 = vector.broadcast %cst_136 : f32 to vector<4x64xf32>
    %468 = arith.mulf %467, %466 : vector<4x64xf32>
    %cst_137 = arith.constant 4.471500e-02 : f32
    %469 = vector.broadcast %cst_137 : f32 to vector<4x64xf32>
    %470 = arith.mulf %469, %466 : vector<4x64xf32>
    %471 = arith.mulf %470, %466 : vector<4x64xf32>
    %472 = arith.mulf %471, %466 : vector<4x64xf32>
    %473 = arith.addf %466, %472 : vector<4x64xf32>
    %cst_138 = arith.constant 0.797884583 : f32
    %474 = vector.broadcast %cst_138 : f32 to vector<4x64xf32>
    %475 = arith.mulf %474, %473 : vector<4x64xf32>
    %476 = math.tanh %475 : vector<4x64xf32>
    %cst_139 = arith.constant 1.000000e+00 : f32
    %477 = vector.broadcast %cst_139 : f32 to vector<4x64xf32>
    %478 = arith.addf %477, %476 : vector<4x64xf32>
    %479 = arith.mulf %468, %478 : vector<4x64xf32>
    %480 = arith.truncf %479 : vector<4x64xf32> to vector<4x64xbf16>
    %cst_140 = arith.constant dense<0.000000e+00> : vector<4x64xf32>
    %481 = tpu.matmul %480, %8, %cst_140 {dimension_numbers = #tpu.dot_dimension_numbers<[1], [0], [0], [1], [0, 0, 1, 1], [], []>} : vector<4x64xbf16>, vector<64x64xbf16>, vector<4x64xf32> -> vector<4x64xf32>
    %482 = vector.broadcast %9 : vector<1x64xf32> to vector<4x64xf32>
    %483 = arith.addf %481, %482 : vector<4x64xf32>
    %484 = arith.addf %462, %483 : vector<4x64xf32>
    %cst_141 = arith.constant dense<0.000000e+00> : vector<4xf32>
    %485 = vector.multi_reduction <add>, %484, %cst_141 [1] : vector<4x64xf32> to vector<4xf32>
    %486 = vector.shape_cast %485 : vector<4xf32> to vector<4x1xf32>
    %cst_142 = arith.constant 6.400000e+01 : f32
    %487 = vector.broadcast %cst_142 : f32 to vector<4x1xf32>
    %488 = arith.divf %486, %487 : vector<4x1xf32>
    %489 = vector.broadcast %488 : vector<4x1xf32> to vector<4x64xf32>
    %490 = arith.subf %484, %489 : vector<4x64xf32>
    %491 = arith.mulf %490, %490 : vector<4x64xf32>
    %cst_143 = arith.constant dense<0.000000e+00> : vector<4xf32>
    %492 = vector.multi_reduction <add>, %491, %cst_143 [1] : vector<4x64xf32> to vector<4xf32>
    %493 = vector.shape_cast %492 : vector<4xf32> to vector<4x1xf32>
    %cst_144 = arith.constant 6.400000e+01 : f32
    %494 = vector.broadcast %cst_144 : f32 to vector<4x1xf32>
    %495 = arith.divf %493, %494 : vector<4x1xf32>
    %496 = vector.broadcast %488 : vector<4x1xf32> to vector<4x64xf32>
    %497 = arith.subf %484, %496 : vector<4x64xf32>
    %cst_145 = arith.constant 9.99999974E-6 : f32
    %498 = vector.broadcast %cst_145 : f32 to vector<4x1xf32>
    %499 = arith.addf %495, %498 : vector<4x1xf32>
    %500 = math.rsqrt %499 : vector<4x1xf32>
    %501 = vector.broadcast %500 : vector<4x1xf32> to vector<4x64xf32>
    %502 = arith.mulf %497, %501 : vector<4x64xf32>
    %503 = vector.broadcast %10 : vector<1x64xf32> to vector<4x64xf32>
    %504 = arith.mulf %502, %503 : vector<4x64xf32>
    %505 = vector.broadcast %11 : vector<1x64xf32> to vector<4x64xf32>
    %506 = arith.addf %504, %505 : vector<4x64xf32>
    %c1_146 = arith.constant 1 : index
    %c0_147 = arith.constant 0 : index
    %c0_148 = arith.constant 0 : index
    %507 = vector.load %arg14[%c1_146, %c0_147, %c0_148] : memref<2x4x64xf32, #tpu.memory_space<vmem>>, vector<1x4x64xf32>
    %508 = vector.shape_cast %507 : vector<1x4x64xf32> to vector<4x64xf32>
    %509 = vector.shape_cast %506 : vector<4x64xf32> to vector<1x4x64xf32>
    tpu.vector_store %arg14[%c1_146, %c0_147, %c0_148], %509 {strides = array<i32>} : memref<2x4x64xf32, #tpu.memory_space<vmem>>, vector<1x4x64xf32>,
    return
  }
  func.func @transform_0(%arg0: i32) -> (i32, i32, i32) {
    %c0_i32 = arith.constant 0 : i32
    %c0_i32_0 = arith.constant 0 : i32
    %c0_i32_1 = arith.constant 0 : i32
    return %arg0, %c0_i32, %c0_i32_0 : i32, i32, i32
  }
  func.func @transform_1(%arg0: i32) -> (i32, i32) {
    %c0_i32 = arith.constant 0 : i32
    %c0_i32_0 = arith.constant 0 : i32
    %c0_i32_1 = arith.constant 0 : i32
    return %c0_i32, %c0_i32_0 : i32, i32
  }
  func.func @transform_2(%arg0: i32) -> (i32, i32) {
    %c0_i32 = arith.constant 0 : i32
    %c0_i32_0 = arith.constant 0 : i32
    %c0_i32_1 = arith.constant 0 : i32
    return %c0_i32, %c0_i32_0 : i32, i32
  }
  func.func @transform_3(%arg0: i32) -> (i32, i32) {
    %c0_i32 = arith.constant 0 : i32
    %c0_i32_0 = arith.constant 0 : i32
    %c0_i32_1 = arith.constant 0 : i32
    return %c0_i32, %c0_i32_0 : i32, i32
  }
  func.func @transform_4(%arg0: i32) -> (i32, i32) {
    %c0_i32 = arith.constant 0 : i32
    %c0_i32_0 = arith.constant 0 : i32
    %c0_i32_1 = arith.constant 0 : i32
    return %c0_i32, %c0_i32_0 : i32, i32
  }
  func.func @transform_5(%arg0: i32) -> (i32, i32) {
    %c0_i32 = arith.constant 0 : i32
    %c0_i32_0 = arith.constant 0 : i32
    %c0_i32_1 = arith.constant 0 : i32
    return %c0_i32, %c0_i32_0 : i32, i32
  }
  func.func @transform_6(%arg0: i32) -> (i32, i32) {
    %c0_i32 = arith.constant 0 : i32
    %c0_i32_0 = arith.constant 0 : i32
    %c0_i32_1 = arith.constant 0 : i32
    return %c0_i32, %c0_i32_0 : i32, i32
  }
  func.func @transform_7(%arg0: i32) -> (i32, i32) {
    %c0_i32 = arith.constant 0 : i32
    %c0_i32_0 = arith.constant 0 : i32
    %c0_i32_1 = arith.constant 0 : i32
    return %c0_i32, %c0_i32_0 : i32, i32
  }
  func.func @transform_8(%arg0: i32) -> (i32, i32) {
    %c0_i32 = arith.constant 0 : i32
    %c0_i32_0 = arith.constant 0 : i32
    %c0_i32_1 = arith.constant 0 : i32
    return %c0_i32, %c0_i32_0 : i32, i32
  }
  func.func @transform_9(%arg0: i32) -> (i32, i32) {
    %c0_i32 = arith.constant 0 : i32
    %c0_i32_0 = arith.constant 0 : i32
    %c0_i32_1 = arith.constant 0 : i32
    return %c0_i32, %c0_i32_0 : i32, i32
  }
  func.func @transform_10(%arg0: i32) -> (i32, i32) {
    %c0_i32 = arith.constant 0 : i32
    %c0_i32_0 = arith.constant 0 : i32
    %c0_i32_1 = arith.constant 0 : i32
    return %c0_i32, %c0_i32_0 : i32, i32
  }
  func.func @transform_11(%arg0: i32) -> (i32, i32) {
    %c0_i32 = arith.constant 0 : i32
    %c0_i32_0 = arith.constant 0 : i32
    %c0_i32_1 = arith.constant 0 : i32
    return %c0_i32, %c0_i32_0 : i32, i32
  }
  func.func @transform_12(%arg0: i32) -> (i32, i32) {
    %c0_i32 = arith.constant 0 : i32
    %c0_i32_0 = arith.constant 0 : i32
    %c0_i32_1 = arith.constant 0 : i32
    return %c0_i32, %c0_i32_0 : i32, i32
  }
  func.func @transform_13(%arg0: i32) -> (i32, i32, i32) {
    %c0_i32 = arith.constant 0 : i32
    %c0_i32_0 = arith.constant 0 : i32
    %c0_i32_1 = arith.constant 0 : i32
    return %arg0, %c0_i32, %c0_i32_0 : i32, i32, i32
  }
}

module attributes {stable_mosaic.version = 11 : i64} {
  func.func @kernel(%arg0: i32, %arg1: memref<4x11x64xf32, #tpu.memory_space<vmem>>, %arg2: memref<64x192xbf16, #tpu.memory_space<vmem>>, %arg3: memref<1x192xf32, #tpu.memory_space<vmem>>, %arg4: memref<64x64xbf16, #tpu.memory_space<vmem>>, %arg5: memref<1x64xf32, #tpu.memory_space<vmem>>, %arg6: memref<1x64xf32, #tpu.memory_space<vmem>>, %arg7: memref<1x64xf32, #tpu.memory_space<vmem>>, %arg8: memref<64x64xbf16, #tpu.memory_space<vmem>>, %arg9: memref<1x64xf32, #tpu.memory_space<vmem>>, %arg10: memref<64x64xbf16, #tpu.memory_space<vmem>>, %arg11: memref<1x64xf32, #tpu.memory_space<vmem>>, %arg12: memref<1x64xf32, #tpu.memory_space<vmem>>, %arg13: memref<1x64xf32, #tpu.memory_space<vmem>>, %arg14: memref<4x11x64xf32, #tpu.memory_space<vmem>>) attributes {dimension_semantics = [#tpu.dimension_semantics<parallel>], iteration_bounds = array<i64: 2>, scalar_prefetch = 0 : i64, scratch_operands = 0 : i64, tpu.core_type = #tpu.core_type<tc>, window_params = [{transform_indices = @transform_0, window_bounds = array<i64: 4, 11, 64>}, {pipeline_mode = #tpu.pipeline_mode<synchronous>, transform_indices = @transform_1, window_bounds = array<i64: 64, 192>}, {pipeline_mode = #tpu.pipeline_mode<synchronous>, transform_indices = @transform_2, window_bounds = array<i64: 1, 192>}, {pipeline_mode = #tpu.pipeline_mode<synchronous>, transform_indices = @transform_3, window_bounds = array<i64: 64, 64>}, {pipeline_mode = #tpu.pipeline_mode<synchronous>, transform_indices = @transform_4, window_bounds = array<i64: 1, 64>}, {pipeline_mode = #tpu.pipeline_mode<synchronous>, transform_indices = @transform_5, window_bounds = array<i64: 1, 64>}, {pipeline_mode = #tpu.pipeline_mode<synchronous>, transform_indices = @transform_6, window_bounds = array<i64: 1, 64>}, {pipeline_mode = #tpu.pipeline_mode<synchronous>, transform_indices = @transform_7, window_bounds = array<i64: 64, 64>}, {pipeline_mode = #tpu.pipeline_mode<synchronous>, transform_indices = @transform_8, window_bounds = array<i64: 1, 64>}, {pipeline_mode = #tpu.pipeline_mode<synchronous>, transform_indices = @transform_9, window_bounds = array<i64: 64, 64>}, {pipeline_mode = #tpu.pipeline_mode<synchronous>, transform_indices = @transform_10, window_bounds = array<i64: 1, 64>}, {pipeline_mode = #tpu.pipeline_mode<synchronous>, transform_indices = @transform_11, window_bounds = array<i64: 1, 64>}, {pipeline_mode = #tpu.pipeline_mode<synchronous>, transform_indices = @transform_12, window_bounds = array<i64: 1, 64>}, {transform_indices = @transform_13, window_bounds = array<i64: 4, 11, 64>}]} {
    %c0 = arith.constant 0 : index
    %c0_0 = arith.constant 0 : index
    %0 = vector.load %arg2[%c0, %c0_0] : memref<64x192xbf16, #tpu.memory_space<vmem>>, vector<64x192xbf16>
    %c0_1 = arith.constant 0 : index
    %c0_2 = arith.constant 0 : index
    %1 = vector.load %arg3[%c0_1, %c0_2] : memref<1x192xf32, #tpu.memory_space<vmem>>, vector<1x192xf32>
    %c0_3 = arith.constant 0 : index
    %c0_4 = arith.constant 0 : index
    %2 = vector.load %arg4[%c0_3, %c0_4] : memref<64x64xbf16, #tpu.memory_space<vmem>>, vector<64x64xbf16>
    %c0_5 = arith.constant 0 : index
    %c0_6 = arith.constant 0 : index
    %3 = vector.load %arg5[%c0_5, %c0_6] : memref<1x64xf32, #tpu.memory_space<vmem>>, vector<1x64xf32>
    %c0_7 = arith.constant 0 : index
    %c0_8 = arith.constant 0 : index
    %4 = vector.load %arg6[%c0_7, %c0_8] : memref<1x64xf32, #tpu.memory_space<vmem>>, vector<1x64xf32>
    %c0_9 = arith.constant 0 : index
    %c0_10 = arith.constant 0 : index
    %5 = vector.load %arg7[%c0_9, %c0_10] : memref<1x64xf32, #tpu.memory_space<vmem>>, vector<1x64xf32>
    %c0_11 = arith.constant 0 : index
    %c0_12 = arith.constant 0 : index
    %6 = vector.load %arg8[%c0_11, %c0_12] : memref<64x64xbf16, #tpu.memory_space<vmem>>, vector<64x64xbf16>
    %c0_13 = arith.constant 0 : index
    %c0_14 = arith.constant 0 : index
    %7 = vector.load %arg9[%c0_13, %c0_14] : memref<1x64xf32, #tpu.memory_space<vmem>>, vector<1x64xf32>
    %c0_15 = arith.constant 0 : index
    %c0_16 = arith.constant 0 : index
    %8 = vector.load %arg10[%c0_15, %c0_16] : memref<64x64xbf16, #tpu.memory_space<vmem>>, vector<64x64xbf16>
    %c0_17 = arith.constant 0 : index
    %c0_18 = arith.constant 0 : index
    %9 = vector.load %arg11[%c0_17, %c0_18] : memref<1x64xf32, #tpu.memory_space<vmem>>, vector<1x64xf32>
    %c0_19 = arith.constant 0 : index
    %c0_20 = arith.constant 0 : index
    %10 = vector.load %arg12[%c0_19, %c0_20] : memref<1x64xf32, #tpu.memory_space<vmem>>, vector<1x64xf32>
    %c0_21 = arith.constant 0 : index
    %c0_22 = arith.constant 0 : index
    %11 = vector.load %arg13[%c0_21, %c0_22] : memref<1x64xf32, #tpu.memory_space<vmem>>, vector<1x64xf32>
    %c0_23 = arith.constant 0 : index
    %c0_24 = arith.constant 0 : index
    %c0_25 = arith.constant 0 : index
    %12 = vector.load %arg1[%c0_23, %c0_24, %c0_25] : memref<4x11x64xf32, #tpu.memory_space<vmem>>, vector<1x11x64xf32>
    %13 = vector.shape_cast %12 : vector<1x11x64xf32> to vector<11x64xf32>
    %14 = arith.truncf %13 : vector<11x64xf32> to vector<11x64xbf16>
    %cst = arith.constant dense<0.000000e+00> : vector<11x192xf32>
    %15 = tpu.matmul %14, %0, %cst {dimension_numbers = #tpu.dot_dimension_numbers<[1], [0], [0], [1], [0, 0, 1, 1], [], []>} : vector<11x64xbf16>, vector<64x192xbf16>, vector<11x192xf32> -> vector<11x192xf32>
    %16 = vector.broadcast %1 : vector<1x192xf32> to vector<11x192xf32>
    %17 = arith.addf %15, %16 : vector<11x192xf32>
    %18 = vector.extract_strided_slice %17 {offsets = [0, 0], sizes = [11, 8], strides = [1, 1]} : vector<11x192xf32> to vector<11x8xf32>
    %cst_26 = arith.constant 0.353553385 : f32
    %19 = vector.broadcast %cst_26 : f32 to vector<11x8xf32>
    %20 = arith.mulf %18, %19 : vector<11x8xf32>
    %21 = arith.truncf %20 : vector<11x8xf32> to vector<11x8xbf16>
    %22 = vector.extract_strided_slice %17 {offsets = [0, 64], sizes = [11, 8], strides = [1, 1]} : vector<11x192xf32> to vector<11x8xf32>
    %23 = arith.truncf %22 : vector<11x8xf32> to vector<11x8xbf16>
    %24 = vector.extract_strided_slice %17 {offsets = [0, 128], sizes = [11, 8], strides = [1, 1]} : vector<11x192xf32> to vector<11x8xf32>
    %25 = arith.truncf %24 : vector<11x8xf32> to vector<11x8xbf16>
    "tpu.trace_start"() <{level = 10 : i32, message = "qd,kd->qk"}> : () -> ()
    %cst_27 = arith.constant dense<0.000000e+00> : vector<11x11xf32>
    %26 = tpu.matmul %21, %23, %cst_27 {dimension_numbers = #tpu.dot_dimension_numbers<[1], [1], [0], [0], [0, 0, 1, 0], [], []>} : vector<11x8xbf16>, vector<11x8xbf16>, vector<11x11xf32> -> vector<11x11xf32>
    "tpu.trace_stop"() : () -> ()
    %cst_28 = arith.constant dense<0xFF800000> : vector<11xf32>
    %27 = vector.multi_reduction <maximumf>, %26, %cst_28 [1] : vector<11x11xf32> to vector<11xf32>
    %28 = vector.shape_cast %27 : vector<11xf32> to vector<11x1xf32>
    %29 = vector.broadcast %28 : vector<11x1xf32> to vector<11x11xf32>
    %30 = arith.subf %26, %29 : vector<11x11xf32>
    %31 = math.exp %30 : vector<11x11xf32>
    %cst_29 = arith.constant dense<0.000000e+00> : vector<11xf32>
    %32 = vector.multi_reduction <add>, %31, %cst_29 [1] : vector<11x11xf32> to vector<11xf32>
    %33 = vector.shape_cast %32 : vector<11xf32> to vector<11x1xf32>
    %34 = tpu.reciprocal %33 {approx = true} : vector<11x1xf32> -> vector<11x1xf32>
    %35 = vector.broadcast %34 : vector<11x1xf32> to vector<11x11xf32>
    %36 = arith.mulf %31, %35 : vector<11x11xf32>
    %37 = arith.truncf %36 : vector<11x11xf32> to vector<11x11xbf16>
    %cst_30 = arith.constant dense<0.000000e+00> : vector<11x8xf32>
    %38 = tpu.matmul %37, %25, %cst_30 {dimension_numbers = #tpu.dot_dimension_numbers<[1], [0], [0], [1], [0, 0, 1, 1], [], []>} : vector<11x11xbf16>, vector<11x8xbf16>, vector<11x8xf32> -> vector<11x8xf32>
    %39 = vector.extract_strided_slice %17 {offsets = [0, 8], sizes = [11, 8], strides = [1, 1]} : vector<11x192xf32> to vector<11x8xf32>
    %cst_31 = arith.constant 0.353553385 : f32
    %40 = vector.broadcast %cst_31 : f32 to vector<11x8xf32>
    %41 = arith.mulf %39, %40 : vector<11x8xf32>
    %42 = arith.truncf %41 : vector<11x8xf32> to vector<11x8xbf16>
    %43 = vector.extract_strided_slice %17 {offsets = [0, 72], sizes = [11, 8], strides = [1, 1]} : vector<11x192xf32> to vector<11x8xf32>
    %44 = arith.truncf %43 : vector<11x8xf32> to vector<11x8xbf16>
    %45 = vector.extract_strided_slice %17 {offsets = [0, 136], sizes = [11, 8], strides = [1, 1]} : vector<11x192xf32> to vector<11x8xf32>
    %46 = arith.truncf %45 : vector<11x8xf32> to vector<11x8xbf16>
    "tpu.trace_start"() <{level = 10 : i32, message = "qd,kd->qk"}> : () -> ()
    %cst_32 = arith.constant dense<0.000000e+00> : vector<11x11xf32>
    %47 = tpu.matmul %42, %44, %cst_32 {dimension_numbers = #tpu.dot_dimension_numbers<[1], [1], [0], [0], [0, 0, 1, 0], [], []>} : vector<11x8xbf16>, vector<11x8xbf16>, vector<11x11xf32> -> vector<11x11xf32>
    "tpu.trace_stop"() : () -> ()
    %cst_33 = arith.constant dense<0xFF800000> : vector<11xf32>
    %48 = vector.multi_reduction <maximumf>, %47, %cst_33 [1] : vector<11x11xf32> to vector<11xf32>
    %49 = vector.shape_cast %48 : vector<11xf32> to vector<11x1xf32>
    %50 = vector.broadcast %49 : vector<11x1xf32> to vector<11x11xf32>
    %51 = arith.subf %47, %50 : vector<11x11xf32>
    %52 = math.exp %51 : vector<11x11xf32>
    %cst_34 = arith.constant dense<0.000000e+00> : vector<11xf32>
    %53 = vector.multi_reduction <add>, %52, %cst_34 [1] : vector<11x11xf32> to vector<11xf32>
    %54 = vector.shape_cast %53 : vector<11xf32> to vector<11x1xf32>
    %55 = tpu.reciprocal %54 {approx = true} : vector<11x1xf32> -> vector<11x1xf32>
    %56 = vector.broadcast %55 : vector<11x1xf32> to vector<11x11xf32>
    %57 = arith.mulf %52, %56 : vector<11x11xf32>
    %58 = arith.truncf %57 : vector<11x11xf32> to vector<11x11xbf16>
    %cst_35 = arith.constant dense<0.000000e+00> : vector<11x8xf32>
    %59 = tpu.matmul %58, %46, %cst_35 {dimension_numbers = #tpu.dot_dimension_numbers<[1], [0], [0], [1], [0, 0, 1, 1], [], []>} : vector<11x11xbf16>, vector<11x8xbf16>, vector<11x8xf32> -> vector<11x8xf32>
    %60 = vector.extract_strided_slice %17 {offsets = [0, 16], sizes = [11, 8], strides = [1, 1]} : vector<11x192xf32> to vector<11x8xf32>
    %cst_36 = arith.constant 0.353553385 : f32
    %61 = vector.broadcast %cst_36 : f32 to vector<11x8xf32>
    %62 = arith.mulf %60, %61 : vector<11x8xf32>
    %63 = arith.truncf %62 : vector<11x8xf32> to vector<11x8xbf16>
    %64 = vector.extract_strided_slice %17 {offsets = [0, 80], sizes = [11, 8], strides = [1, 1]} : vector<11x192xf32> to vector<11x8xf32>
    %65 = arith.truncf %64 : vector<11x8xf32> to vector<11x8xbf16>
    %66 = vector.extract_strided_slice %17 {offsets = [0, 144], sizes = [11, 8], strides = [1, 1]} : vector<11x192xf32> to vector<11x8xf32>
    %67 = arith.truncf %66 : vector<11x8xf32> to vector<11x8xbf16>
    "tpu.trace_start"() <{level = 10 : i32, message = "qd,kd->qk"}> : () -> ()
    %cst_37 = arith.constant dense<0.000000e+00> : vector<11x11xf32>
    %68 = tpu.matmul %63, %65, %cst_37 {dimension_numbers = #tpu.dot_dimension_numbers<[1], [1], [0], [0], [0, 0, 1, 0], [], []>} : vector<11x8xbf16>, vector<11x8xbf16>, vector<11x11xf32> -> vector<11x11xf32>
    "tpu.trace_stop"() : () -> ()
    %cst_38 = arith.constant dense<0xFF800000> : vector<11xf32>
    %69 = vector.multi_reduction <maximumf>, %68, %cst_38 [1] : vector<11x11xf32> to vector<11xf32>
    %70 = vector.shape_cast %69 : vector<11xf32> to vector<11x1xf32>
    %71 = vector.broadcast %70 : vector<11x1xf32> to vector<11x11xf32>
    %72 = arith.subf %68, %71 : vector<11x11xf32>
    %73 = math.exp %72 : vector<11x11xf32>
    %cst_39 = arith.constant dense<0.000000e+00> : vector<11xf32>
    %74 = vector.multi_reduction <add>, %73, %cst_39 [1] : vector<11x11xf32> to vector<11xf32>
    %75 = vector.shape_cast %74 : vector<11xf32> to vector<11x1xf32>
    %76 = tpu.reciprocal %75 {approx = true} : vector<11x1xf32> -> vector<11x1xf32>
    %77 = vector.broadcast %76 : vector<11x1xf32> to vector<11x11xf32>
    %78 = arith.mulf %73, %77 : vector<11x11xf32>
    %79 = arith.truncf %78 : vector<11x11xf32> to vector<11x11xbf16>
    %cst_40 = arith.constant dense<0.000000e+00> : vector<11x8xf32>
    %80 = tpu.matmul %79, %67, %cst_40 {dimension_numbers = #tpu.dot_dimension_numbers<[1], [0], [0], [1], [0, 0, 1, 1], [], []>} : vector<11x11xbf16>, vector<11x8xbf16>, vector<11x8xf32> -> vector<11x8xf32>
    %81 = vector.extract_strided_slice %17 {offsets = [0, 24], sizes = [11, 8], strides = [1, 1]} : vector<11x192xf32> to vector<11x8xf32>
    %cst_41 = arith.constant 0.353553385 : f32
    %82 = vector.broadcast %cst_41 : f32 to vector<11x8xf32>
    %83 = arith.mulf %81, %82 : vector<11x8xf32>
    %84 = arith.truncf %83 : vector<11x8xf32> to vector<11x8xbf16>
    %85 = vector.extract_strided_slice %17 {offsets = [0, 88], sizes = [11, 8], strides = [1, 1]} : vector<11x192xf32> to vector<11x8xf32>
    %86 = arith.truncf %85 : vector<11x8xf32> to vector<11x8xbf16>
    %87 = vector.extract_strided_slice %17 {offsets = [0, 152], sizes = [11, 8], strides = [1, 1]} : vector<11x192xf32> to vector<11x8xf32>
    %88 = arith.truncf %87 : vector<11x8xf32> to vector<11x8xbf16>
    "tpu.trace_start"() <{level = 10 : i32, message = "qd,kd->qk"}> : () -> ()
    %cst_42 = arith.constant dense<0.000000e+00> : vector<11x11xf32>
    %89 = tpu.matmul %84, %86, %cst_42 {dimension_numbers = #tpu.dot_dimension_numbers<[1], [1], [0], [0], [0, 0, 1, 0], [], []>} : vector<11x8xbf16>, vector<11x8xbf16>, vector<11x11xf32> -> vector<11x11xf32>
    "tpu.trace_stop"() : () -> ()
    %cst_43 = arith.constant dense<0xFF800000> : vector<11xf32>
    %90 = vector.multi_reduction <maximumf>, %89, %cst_43 [1] : vector<11x11xf32> to vector<11xf32>
    %91 = vector.shape_cast %90 : vector<11xf32> to vector<11x1xf32>
    %92 = vector.broadcast %91 : vector<11x1xf32> to vector<11x11xf32>
    %93 = arith.subf %89, %92 : vector<11x11xf32>
    %94 = math.exp %93 : vector<11x11xf32>
    %cst_44 = arith.constant dense<0.000000e+00> : vector<11xf32>
    %95 = vector.multi_reduction <add>, %94, %cst_44 [1] : vector<11x11xf32> to vector<11xf32>
    %96 = vector.shape_cast %95 : vector<11xf32> to vector<11x1xf32>
    %97 = tpu.reciprocal %96 {approx = true} : vector<11x1xf32> -> vector<11x1xf32>
    %98 = vector.broadcast %97 : vector<11x1xf32> to vector<11x11xf32>
    %99 = arith.mulf %94, %98 : vector<11x11xf32>
    %100 = arith.truncf %99 : vector<11x11xf32> to vector<11x11xbf16>
    %cst_45 = arith.constant dense<0.000000e+00> : vector<11x8xf32>
    %101 = tpu.matmul %100, %88, %cst_45 {dimension_numbers = #tpu.dot_dimension_numbers<[1], [0], [0], [1], [0, 0, 1, 1], [], []>} : vector<11x11xbf16>, vector<11x8xbf16>, vector<11x8xf32> -> vector<11x8xf32>
    %102 = vector.extract_strided_slice %17 {offsets = [0, 32], sizes = [11, 8], strides = [1, 1]} : vector<11x192xf32> to vector<11x8xf32>
    %cst_46 = arith.constant 0.353553385 : f32
    %103 = vector.broadcast %cst_46 : f32 to vector<11x8xf32>
    %104 = arith.mulf %102, %103 : vector<11x8xf32>
    %105 = arith.truncf %104 : vector<11x8xf32> to vector<11x8xbf16>
    %106 = vector.extract_strided_slice %17 {offsets = [0, 96], sizes = [11, 8], strides = [1, 1]} : vector<11x192xf32> to vector<11x8xf32>
    %107 = arith.truncf %106 : vector<11x8xf32> to vector<11x8xbf16>
    %108 = vector.extract_strided_slice %17 {offsets = [0, 160], sizes = [11, 8], strides = [1, 1]} : vector<11x192xf32> to vector<11x8xf32>
    %109 = arith.truncf %108 : vector<11x8xf32> to vector<11x8xbf16>
    "tpu.trace_start"() <{level = 10 : i32, message = "qd,kd->qk"}> : () -> ()
    %cst_47 = arith.constant dense<0.000000e+00> : vector<11x11xf32>
    %110 = tpu.matmul %105, %107, %cst_47 {dimension_numbers = #tpu.dot_dimension_numbers<[1], [1], [0], [0], [0, 0, 1, 0], [], []>} : vector<11x8xbf16>, vector<11x8xbf16>, vector<11x11xf32> -> vector<11x11xf32>
    "tpu.trace_stop"() : () -> ()
    %cst_48 = arith.constant dense<0xFF800000> : vector<11xf32>
    %111 = vector.multi_reduction <maximumf>, %110, %cst_48 [1] : vector<11x11xf32> to vector<11xf32>
    %112 = vector.shape_cast %111 : vector<11xf32> to vector<11x1xf32>
    %113 = vector.broadcast %112 : vector<11x1xf32> to vector<11x11xf32>
    %114 = arith.subf %110, %113 : vector<11x11xf32>
    %115 = math.exp %114 : vector<11x11xf32>
    %cst_49 = arith.constant dense<0.000000e+00> : vector<11xf32>
    %116 = vector.multi_reduction <add>, %115, %cst_49 [1] : vector<11x11xf32> to vector<11xf32>
    %117 = vector.shape_cast %116 : vector<11xf32> to vector<11x1xf32>
    %118 = tpu.reciprocal %117 {approx = true} : vector<11x1xf32> -> vector<11x1xf32>
    %119 = vector.broadcast %118 : vector<11x1xf32> to vector<11x11xf32>
    %120 = arith.mulf %115, %119 : vector<11x11xf32>
    %121 = arith.truncf %120 : vector<11x11xf32> to vector<11x11xbf16>
    %cst_50 = arith.constant dense<0.000000e+00> : vector<11x8xf32>
    %122 = tpu.matmul %121, %109, %cst_50 {dimension_numbers = #tpu.dot_dimension_numbers<[1], [0], [0], [1], [0, 0, 1, 1], [], []>} : vector<11x11xbf16>, vector<11x8xbf16>, vector<11x8xf32> -> vector<11x8xf32>
    %123 = vector.extract_strided_slice %17 {offsets = [0, 40], sizes = [11, 8], strides = [1, 1]} : vector<11x192xf32> to vector<11x8xf32>
    %cst_51 = arith.constant 0.353553385 : f32
    %124 = vector.broadcast %cst_51 : f32 to vector<11x8xf32>
    %125 = arith.mulf %123, %124 : vector<11x8xf32>
    %126 = arith.truncf %125 : vector<11x8xf32> to vector<11x8xbf16>
    %127 = vector.extract_strided_slice %17 {offsets = [0, 104], sizes = [11, 8], strides = [1, 1]} : vector<11x192xf32> to vector<11x8xf32>
    %128 = arith.truncf %127 : vector<11x8xf32> to vector<11x8xbf16>
    %129 = vector.extract_strided_slice %17 {offsets = [0, 168], sizes = [11, 8], strides = [1, 1]} : vector<11x192xf32> to vector<11x8xf32>
    %130 = arith.truncf %129 : vector<11x8xf32> to vector<11x8xbf16>
    "tpu.trace_start"() <{level = 10 : i32, message = "qd,kd->qk"}> : () -> ()
    %cst_52 = arith.constant dense<0.000000e+00> : vector<11x11xf32>
    %131 = tpu.matmul %126, %128, %cst_52 {dimension_numbers = #tpu.dot_dimension_numbers<[1], [1], [0], [0], [0, 0, 1, 0], [], []>} : vector<11x8xbf16>, vector<11x8xbf16>, vector<11x11xf32> -> vector<11x11xf32>
    "tpu.trace_stop"() : () -> ()
    %cst_53 = arith.constant dense<0xFF800000> : vector<11xf32>
    %132 = vector.multi_reduction <maximumf>, %131, %cst_53 [1] : vector<11x11xf32> to vector<11xf32>
    %133 = vector.shape_cast %132 : vector<11xf32> to vector<11x1xf32>
    %134 = vector.broadcast %133 : vector<11x1xf32> to vector<11x11xf32>
    %135 = arith.subf %131, %134 : vector<11x11xf32>
    %136 = math.exp %135 : vector<11x11xf32>
    %cst_54 = arith.constant dense<0.000000e+00> : vector<11xf32>
    %137 = vector.multi_reduction <add>, %136, %cst_54 [1] : vector<11x11xf32> to vector<11xf32>
    %138 = vector.shape_cast %137 : vector<11xf32> to vector<11x1xf32>
    %139 = tpu.reciprocal %138 {approx = true} : vector<11x1xf32> -> vector<11x1xf32>
    %140 = vector.broadcast %139 : vector<11x1xf32> to vector<11x11xf32>
    %141 = arith.mulf %136, %140 : vector<11x11xf32>
    %142 = arith.truncf %141 : vector<11x11xf32> to vector<11x11xbf16>
    %cst_55 = arith.constant dense<0.000000e+00> : vector<11x8xf32>
    %143 = tpu.matmul %142, %130, %cst_55 {dimension_numbers = #tpu.dot_dimension_numbers<[1], [0], [0], [1], [0, 0, 1, 1], [], []>} : vector<11x11xbf16>, vector<11x8xbf16>, vector<11x8xf32> -> vector<11x8xf32>
    %144 = vector.extract_strided_slice %17 {offsets = [0, 48], sizes = [11, 8], strides = [1, 1]} : vector<11x192xf32> to vector<11x8xf32>
    %cst_56 = arith.constant 0.353553385 : f32
    %145 = vector.broadcast %cst_56 : f32 to vector<11x8xf32>
    %146 = arith.mulf %144, %145 : vector<11x8xf32>
    %147 = arith.truncf %146 : vector<11x8xf32> to vector<11x8xbf16>
    %148 = vector.extract_strided_slice %17 {offsets = [0, 112], sizes = [11, 8], strides = [1, 1]} : vector<11x192xf32> to vector<11x8xf32>
    %149 = arith.truncf %148 : vector<11x8xf32> to vector<11x8xbf16>
    %150 = vector.extract_strided_slice %17 {offsets = [0, 176], sizes = [11, 8], strides = [1, 1]} : vector<11x192xf32> to vector<11x8xf32>
    %151 = arith.truncf %150 : vector<11x8xf32> to vector<11x8xbf16>
    "tpu.trace_start"() <{level = 10 : i32, message = "qd,kd->qk"}> : () -> ()
    %cst_57 = arith.constant dense<0.000000e+00> : vector<11x11xf32>
    %152 = tpu.matmul %147, %149, %cst_57 {dimension_numbers = #tpu.dot_dimension_numbers<[1], [1], [0], [0], [0, 0, 1, 0], [], []>} : vector<11x8xbf16>, vector<11x8xbf16>, vector<11x11xf32> -> vector<11x11xf32>
    "tpu.trace_stop"() : () -> ()
    %cst_58 = arith.constant dense<0xFF800000> : vector<11xf32>
    %153 = vector.multi_reduction <maximumf>, %152, %cst_58 [1] : vector<11x11xf32> to vector<11xf32>
    %154 = vector.shape_cast %153 : vector<11xf32> to vector<11x1xf32>
    %155 = vector.broadcast %154 : vector<11x1xf32> to vector<11x11xf32>
    %156 = arith.subf %152, %155 : vector<11x11xf32>
    %157 = math.exp %156 : vector<11x11xf32>
    %cst_59 = arith.constant dense<0.000000e+00> : vector<11xf32>
    %158 = vector.multi_reduction <add>, %157, %cst_59 [1] : vector<11x11xf32> to vector<11xf32>
    %159 = vector.shape_cast %158 : vector<11xf32> to vector<11x1xf32>
    %160 = tpu.reciprocal %159 {approx = true} : vector<11x1xf32> -> vector<11x1xf32>
    %161 = vector.broadcast %160 : vector<11x1xf32> to vector<11x11xf32>
    %162 = arith.mulf %157, %161 : vector<11x11xf32>
    %163 = arith.truncf %162 : vector<11x11xf32> to vector<11x11xbf16>
    %cst_60 = arith.constant dense<0.000000e+00> : vector<11x8xf32>
    %164 = tpu.matmul %163, %151, %cst_60 {dimension_numbers = #tpu.dot_dimension_numbers<[1], [0], [0], [1], [0, 0, 1, 1], [], []>} : vector<11x11xbf16>, vector<11x8xbf16>, vector<11x8xf32> -> vector<11x8xf32>
    %165 = vector.extract_strided_slice %17 {offsets = [0, 56], sizes = [11, 8], strides = [1, 1]} : vector<11x192xf32> to vector<11x8xf32>
    %cst_61 = arith.constant 0.353553385 : f32
    %166 = vector.broadcast %cst_61 : f32 to vector<11x8xf32>
    %167 = arith.mulf %165, %166 : vector<11x8xf32>
    %168 = arith.truncf %167 : vector<11x8xf32> to vector<11x8xbf16>
    %169 = vector.extract_strided_slice %17 {offsets = [0, 120], sizes = [11, 8], strides = [1, 1]} : vector<11x192xf32> to vector<11x8xf32>
    %170 = arith.truncf %169 : vector<11x8xf32> to vector<11x8xbf16>
    %171 = vector.extract_strided_slice %17 {offsets = [0, 184], sizes = [11, 8], strides = [1, 1]} : vector<11x192xf32> to vector<11x8xf32>
    %172 = arith.truncf %171 : vector<11x8xf32> to vector<11x8xbf16>
    "tpu.trace_start"() <{level = 10 : i32, message = "qd,kd->qk"}> : () -> ()
    %cst_62 = arith.constant dense<0.000000e+00> : vector<11x11xf32>
    %173 = tpu.matmul %168, %170, %cst_62 {dimension_numbers = #tpu.dot_dimension_numbers<[1], [1], [0], [0], [0, 0, 1, 0], [], []>} : vector<11x8xbf16>, vector<11x8xbf16>, vector<11x11xf32> -> vector<11x11xf32>
    "tpu.trace_stop"() : () -> ()
    %cst_63 = arith.constant dense<0xFF800000> : vector<11xf32>
    %174 = vector.multi_reduction <maximumf>, %173, %cst_63 [1] : vector<11x11xf32> to vector<11xf32>
    %175 = vector.shape_cast %174 : vector<11xf32> to vector<11x1xf32>
    %176 = vector.broadcast %175 : vector<11x1xf32> to vector<11x11xf32>
    %177 = arith.subf %173, %176 : vector<11x11xf32>
    %178 = math.exp %177 : vector<11x11xf32>
    %cst_64 = arith.constant dense<0.000000e+00> : vector<11xf32>
    %179 = vector.multi_reduction <add>, %178, %cst_64 [1] : vector<11x11xf32> to vector<11xf32>
    %180 = vector.shape_cast %179 : vector<11xf32> to vector<11x1xf32>
    %181 = tpu.reciprocal %180 {approx = true} : vector<11x1xf32> -> vector<11x1xf32>
    %182 = vector.broadcast %181 : vector<11x1xf32> to vector<11x11xf32>
    %183 = arith.mulf %178, %182 : vector<11x11xf32>
    %184 = arith.truncf %183 : vector<11x11xf32> to vector<11x11xbf16>
    %cst_65 = arith.constant dense<0.000000e+00> : vector<11x8xf32>
    %185 = tpu.matmul %184, %172, %cst_65 {dimension_numbers = #tpu.dot_dimension_numbers<[1], [0], [0], [1], [0, 0, 1, 1], [], []>} : vector<11x11xbf16>, vector<11x8xbf16>, vector<11x8xf32> -> vector<11x8xf32>
    %186 = tpu.concatenate %38, %59, %80, %101, %122, %143, %164, %185 in 1 : vector<11x8xf32>, vector<11x8xf32>, vector<11x8xf32>, vector<11x8xf32>, vector<11x8xf32>, vector<11x8xf32>, vector<11x8xf32>, vector<11x8xf32> -> vector<11x64xf32>
    %187 = arith.truncf %186 : vector<11x64xf32> to vector<11x64xbf16>
    %cst_66 = arith.constant dense<0.000000e+00> : vector<11x64xf32>
    %188 = tpu.matmul %187, %2, %cst_66 {dimension_numbers = #tpu.dot_dimension_numbers<[1], [0], [0], [1], [0, 0, 1, 1], [], []>} : vector<11x64xbf16>, vector<64x64xbf16>, vector<11x64xf32> -> vector<11x64xf32>
    %189 = arith.addf %13, %188 : vector<11x64xf32>
    %190 = vector.broadcast %3 : vector<1x64xf32> to vector<11x64xf32>
    %191 = arith.addf %189, %190 : vector<11x64xf32>
    %cst_67 = arith.constant dense<0.000000e+00> : vector<11xf32>
    %192 = vector.multi_reduction <add>, %191, %cst_67 [1] : vector<11x64xf32> to vector<11xf32>
    %193 = vector.shape_cast %192 : vector<11xf32> to vector<11x1xf32>
    %cst_68 = arith.constant 6.400000e+01 : f32
    %194 = vector.broadcast %cst_68 : f32 to vector<11x1xf32>
    %195 = arith.divf %193, %194 : vector<11x1xf32>
    %196 = vector.broadcast %195 : vector<11x1xf32> to vector<11x64xf32>
    %197 = arith.subf %191, %196 : vector<11x64xf32>
    %198 = arith.mulf %197, %197 : vector<11x64xf32>
    %cst_69 = arith.constant dense<0.000000e+00> : vector<11xf32>
    %199 = vector.multi_reduction <add>, %198, %cst_69 [1] : vector<11x64xf32> to vector<11xf32>
    %200 = vector.shape_cast %199 : vector<11xf32> to vector<11x1xf32>
    %cst_70 = arith.constant 6.400000e+01 : f32
    %201 = vector.broadcast %cst_70 : f32 to vector<11x1xf32>
    %202 = arith.divf %200, %201 : vector<11x1xf32>
    %203 = vector.broadcast %195 : vector<11x1xf32> to vector<11x64xf32>
    %204 = arith.subf %191, %203 : vector<11x64xf32>
    %cst_71 = arith.constant 9.99999974E-6 : f32
    %205 = vector.broadcast %cst_71 : f32 to vector<11x1xf32>
    %206 = arith.addf %202, %205 : vector<11x1xf32>
    %207 = math.rsqrt %206 : vector<11x1xf32>
    %208 = vector.broadcast %207 : vector<11x1xf32> to vector<11x64xf32>
    %209 = arith.mulf %204, %208 : vector<11x64xf32>
    %210 = vector.broadcast %4 : vector<1x64xf32> to vector<11x64xf32>
    %211 = arith.mulf %209, %210 : vector<11x64xf32>
    %212 = vector.broadcast %5 : vector<1x64xf32> to vector<11x64xf32>
    %213 = arith.addf %211, %212 : vector<11x64xf32>
    %214 = arith.truncf %213 : vector<11x64xf32> to vector<11x64xbf16>
    %cst_72 = arith.constant dense<0.000000e+00> : vector<11x64xf32>
    %215 = tpu.matmul %214, %6, %cst_72 {dimension_numbers = #tpu.dot_dimension_numbers<[1], [0], [0], [1], [0, 0, 1, 1], [], []>} : vector<11x64xbf16>, vector<64x64xbf16>, vector<11x64xf32> -> vector<11x64xf32>
    %216 = vector.broadcast %7 : vector<1x64xf32> to vector<11x64xf32>
    %217 = arith.addf %215, %216 : vector<11x64xf32>
    %cst_73 = arith.constant 5.000000e-01 : f32
    %218 = vector.broadcast %cst_73 : f32 to vector<11x64xf32>
    %219 = arith.mulf %218, %217 : vector<11x64xf32>
    %cst_74 = arith.constant 4.471500e-02 : f32
    %220 = vector.broadcast %cst_74 : f32 to vector<11x64xf32>
    %221 = arith.mulf %220, %217 : vector<11x64xf32>
    %222 = arith.mulf %221, %217 : vector<11x64xf32>
    %223 = arith.mulf %222, %217 : vector<11x64xf32>
    %224 = arith.addf %217, %223 : vector<11x64xf32>
    %cst_75 = arith.constant 0.797884583 : f32
    %225 = vector.broadcast %cst_75 : f32 to vector<11x64xf32>
    %226 = arith.mulf %225, %224 : vector<11x64xf32>
    %227 = math.tanh %226 : vector<11x64xf32>
    %cst_76 = arith.constant 1.000000e+00 : f32
    %228 = vector.broadcast %cst_76 : f32 to vector<11x64xf32>
    %229 = arith.addf %228, %227 : vector<11x64xf32>
    %230 = arith.mulf %219, %229 : vector<11x64xf32>
    %231 = arith.truncf %230 : vector<11x64xf32> to vector<11x64xbf16>
    %cst_77 = arith.constant dense<0.000000e+00> : vector<11x64xf32>
    %232 = tpu.matmul %231, %8, %cst_77 {dimension_numbers = #tpu.dot_dimension_numbers<[1], [0], [0], [1], [0, 0, 1, 1], [], []>} : vector<11x64xbf16>, vector<64x64xbf16>, vector<11x64xf32> -> vector<11x64xf32>
    %233 = vector.broadcast %9 : vector<1x64xf32> to vector<11x64xf32>
    %234 = arith.addf %232, %233 : vector<11x64xf32>
    %235 = arith.addf %213, %234 : vector<11x64xf32>
    %cst_78 = arith.constant dense<0.000000e+00> : vector<11xf32>
    %236 = vector.multi_reduction <add>, %235, %cst_78 [1] : vector<11x64xf32> to vector<11xf32>
    %237 = vector.shape_cast %236 : vector<11xf32> to vector<11x1xf32>
    %cst_79 = arith.constant 6.400000e+01 : f32
    %238 = vector.broadcast %cst_79 : f32 to vector<11x1xf32>
    %239 = arith.divf %237, %238 : vector<11x1xf32>
    %240 = vector.broadcast %239 : vector<11x1xf32> to vector<11x64xf32>
    %241 = arith.subf %235, %240 : vector<11x64xf32>
    %242 = arith.mulf %241, %241 : vector<11x64xf32>
    %cst_80 = arith.constant dense<0.000000e+00> : vector<11xf32>
    %243 = vector.multi_reduction <add>, %242, %cst_80 [1] : vector<11x64xf32> to vector<11xf32>
    %244 = vector.shape_cast %243 : vector<11xf32> to vector<11x1xf32>
    %cst_81 = arith.constant 6.400000e+01 : f32
    %245 = vector.broadcast %cst_81 : f32 to vector<11x1xf32>
    %246 = arith.divf %244, %245 : vector<11x1xf32>
    %247 = vector.broadcast %239 : vector<11x1xf32> to vector<11x64xf32>
    %248 = arith.subf %235, %247 : vector<11x64xf32>
    %cst_82 = arith.constant 9.99999974E-6 : f32
    %249 = vector.broadcast %cst_82 : f32 to vector<11x1xf32>
    %250 = arith.addf %246, %249 : vector<11x1xf32>
    %251 = math.rsqrt %250 : vector<11x1xf32>
    %252 = vector.broadcast %251 : vector<11x1xf32> to vector<11x64xf32>
    %253 = arith.mulf %248, %252 : vector<11x64xf32>
    %254 = vector.broadcast %10 : vector<1x64xf32> to vector<11x64xf32>
    %255 = arith.mulf %253, %254 : vector<11x64xf32>
    %256 = vector.broadcast %11 : vector<1x64xf32> to vector<11x64xf32>
    %257 = arith.addf %255, %256 : vector<11x64xf32>
    %c0_83 = arith.constant 0 : index
    %c0_84 = arith.constant 0 : index
    %c0_85 = arith.constant 0 : index
    %258 = vector.load %arg14[%c0_83, %c0_84, %c0_85] : memref<4x11x64xf32, #tpu.memory_space<vmem>>, vector<1x11x64xf32>
    %259 = vector.shape_cast %258 : vector<1x11x64xf32> to vector<11x64xf32>
    %260 = vector.shape_cast %257 : vector<11x64xf32> to vector<1x11x64xf32>
    tpu.vector_store %arg14[%c0_83, %c0_84, %c0_85], %260 {strides = array<i32>} : memref<4x11x64xf32, #tpu.memory_space<vmem>>, vector<1x11x64xf32>,
    %c1 = arith.constant 1 : index
    %c0_86 = arith.constant 0 : index
    %c0_87 = arith.constant 0 : index
    %261 = vector.load %arg1[%c1, %c0_86, %c0_87] : memref<4x11x64xf32, #tpu.memory_space<vmem>>, vector<1x11x64xf32>
    %262 = vector.shape_cast %261 : vector<1x11x64xf32> to vector<11x64xf32>
    %263 = arith.truncf %262 : vector<11x64xf32> to vector<11x64xbf16>
    %cst_88 = arith.constant dense<0.000000e+00> : vector<11x192xf32>
    %264 = tpu.matmul %263, %0, %cst_88 {dimension_numbers = #tpu.dot_dimension_numbers<[1], [0], [0], [1], [0, 0, 1, 1], [], []>} : vector<11x64xbf16>, vector<64x192xbf16>, vector<11x192xf32> -> vector<11x192xf32>
    %265 = vector.broadcast %1 : vector<1x192xf32> to vector<11x192xf32>
    %266 = arith.addf %264, %265 : vector<11x192xf32>
    %267 = vector.extract_strided_slice %266 {offsets = [0, 0], sizes = [11, 8], strides = [1, 1]} : vector<11x192xf32> to vector<11x8xf32>
    %cst_89 = arith.constant 0.353553385 : f32
    %268 = vector.broadcast %cst_89 : f32 to vector<11x8xf32>
    %269 = arith.mulf %267, %268 : vector<11x8xf32>
    %270 = arith.truncf %269 : vector<11x8xf32> to vector<11x8xbf16>
    %271 = vector.extract_strided_slice %266 {offsets = [0, 64], sizes = [11, 8], strides = [1, 1]} : vector<11x192xf32> to vector<11x8xf32>
    %272 = arith.truncf %271 : vector<11x8xf32> to vector<11x8xbf16>
    %273 = vector.extract_strided_slice %266 {offsets = [0, 128], sizes = [11, 8], strides = [1, 1]} : vector<11x192xf32> to vector<11x8xf32>
    %274 = arith.truncf %273 : vector<11x8xf32> to vector<11x8xbf16>
    "tpu.trace_start"() <{level = 10 : i32, message = "qd,kd->qk"}> : () -> ()
    %cst_90 = arith.constant dense<0.000000e+00> : vector<11x11xf32>
    %275 = tpu.matmul %270, %272, %cst_90 {dimension_numbers = #tpu.dot_dimension_numbers<[1], [1], [0], [0], [0, 0, 1, 0], [], []>} : vector<11x8xbf16>, vector<11x8xbf16>, vector<11x11xf32> -> vector<11x11xf32>
    "tpu.trace_stop"() : () -> ()
    %cst_91 = arith.constant dense<0xFF800000> : vector<11xf32>
    %276 = vector.multi_reduction <maximumf>, %275, %cst_91 [1] : vector<11x11xf32> to vector<11xf32>
    %277 = vector.shape_cast %276 : vector<11xf32> to vector<11x1xf32>
    %278 = vector.broadcast %277 : vector<11x1xf32> to vector<11x11xf32>
    %279 = arith.subf %275, %278 : vector<11x11xf32>
    %280 = math.exp %279 : vector<11x11xf32>
    %cst_92 = arith.constant dense<0.000000e+00> : vector<11xf32>
    %281 = vector.multi_reduction <add>, %280, %cst_92 [1] : vector<11x11xf32> to vector<11xf32>
    %282 = vector.shape_cast %281 : vector<11xf32> to vector<11x1xf32>
    %283 = tpu.reciprocal %282 {approx = true} : vector<11x1xf32> -> vector<11x1xf32>
    %284 = vector.broadcast %283 : vector<11x1xf32> to vector<11x11xf32>
    %285 = arith.mulf %280, %284 : vector<11x11xf32>
    %286 = arith.truncf %285 : vector<11x11xf32> to vector<11x11xbf16>
    %cst_93 = arith.constant dense<0.000000e+00> : vector<11x8xf32>
    %287 = tpu.matmul %286, %274, %cst_93 {dimension_numbers = #tpu.dot_dimension_numbers<[1], [0], [0], [1], [0, 0, 1, 1], [], []>} : vector<11x11xbf16>, vector<11x8xbf16>, vector<11x8xf32> -> vector<11x8xf32>
    %288 = vector.extract_strided_slice %266 {offsets = [0, 8], sizes = [11, 8], strides = [1, 1]} : vector<11x192xf32> to vector<11x8xf32>
    %cst_94 = arith.constant 0.353553385 : f32
    %289 = vector.broadcast %cst_94 : f32 to vector<11x8xf32>
    %290 = arith.mulf %288, %289 : vector<11x8xf32>
    %291 = arith.truncf %290 : vector<11x8xf32> to vector<11x8xbf16>
    %292 = vector.extract_strided_slice %266 {offsets = [0, 72], sizes = [11, 8], strides = [1, 1]} : vector<11x192xf32> to vector<11x8xf32>
    %293 = arith.truncf %292 : vector<11x8xf32> to vector<11x8xbf16>
    %294 = vector.extract_strided_slice %266 {offsets = [0, 136], sizes = [11, 8], strides = [1, 1]} : vector<11x192xf32> to vector<11x8xf32>
    %295 = arith.truncf %294 : vector<11x8xf32> to vector<11x8xbf16>
    "tpu.trace_start"() <{level = 10 : i32, message = "qd,kd->qk"}> : () -> ()
    %cst_95 = arith.constant dense<0.000000e+00> : vector<11x11xf32>
    %296 = tpu.matmul %291, %293, %cst_95 {dimension_numbers = #tpu.dot_dimension_numbers<[1], [1], [0], [0], [0, 0, 1, 0], [], []>} : vector<11x8xbf16>, vector<11x8xbf16>, vector<11x11xf32> -> vector<11x11xf32>
    "tpu.trace_stop"() : () -> ()
    %cst_96 = arith.constant dense<0xFF800000> : vector<11xf32>
    %297 = vector.multi_reduction <maximumf>, %296, %cst_96 [1] : vector<11x11xf32> to vector<11xf32>
    %298 = vector.shape_cast %297 : vector<11xf32> to vector<11x1xf32>
    %299 = vector.broadcast %298 : vector<11x1xf32> to vector<11x11xf32>
    %300 = arith.subf %296, %299 : vector<11x11xf32>
    %301 = math.exp %300 : vector<11x11xf32>
    %cst_97 = arith.constant dense<0.000000e+00> : vector<11xf32>
    %302 = vector.multi_reduction <add>, %301, %cst_97 [1] : vector<11x11xf32> to vector<11xf32>
    %303 = vector.shape_cast %302 : vector<11xf32> to vector<11x1xf32>
    %304 = tpu.reciprocal %303 {approx = true} : vector<11x1xf32> -> vector<11x1xf32>
    %305 = vector.broadcast %304 : vector<11x1xf32> to vector<11x11xf32>
    %306 = arith.mulf %301, %305 : vector<11x11xf32>
    %307 = arith.truncf %306 : vector<11x11xf32> to vector<11x11xbf16>
    %cst_98 = arith.constant dense<0.000000e+00> : vector<11x8xf32>
    %308 = tpu.matmul %307, %295, %cst_98 {dimension_numbers = #tpu.dot_dimension_numbers<[1], [0], [0], [1], [0, 0, 1, 1], [], []>} : vector<11x11xbf16>, vector<11x8xbf16>, vector<11x8xf32> -> vector<11x8xf32>
    %309 = vector.extract_strided_slice %266 {offsets = [0, 16], sizes = [11, 8], strides = [1, 1]} : vector<11x192xf32> to vector<11x8xf32>
    %cst_99 = arith.constant 0.353553385 : f32
    %310 = vector.broadcast %cst_99 : f32 to vector<11x8xf32>
    %311 = arith.mulf %309, %310 : vector<11x8xf32>
    %312 = arith.truncf %311 : vector<11x8xf32> to vector<11x8xbf16>
    %313 = vector.extract_strided_slice %266 {offsets = [0, 80], sizes = [11, 8], strides = [1, 1]} : vector<11x192xf32> to vector<11x8xf32>
    %314 = arith.truncf %313 : vector<11x8xf32> to vector<11x8xbf16>
    %315 = vector.extract_strided_slice %266 {offsets = [0, 144], sizes = [11, 8], strides = [1, 1]} : vector<11x192xf32> to vector<11x8xf32>
    %316 = arith.truncf %315 : vector<11x8xf32> to vector<11x8xbf16>
    "tpu.trace_start"() <{level = 10 : i32, message = "qd,kd->qk"}> : () -> ()
    %cst_100 = arith.constant dense<0.000000e+00> : vector<11x11xf32>
    %317 = tpu.matmul %312, %314, %cst_100 {dimension_numbers = #tpu.dot_dimension_numbers<[1], [1], [0], [0], [0, 0, 1, 0], [], []>} : vector<11x8xbf16>, vector<11x8xbf16>, vector<11x11xf32> -> vector<11x11xf32>
    "tpu.trace_stop"() : () -> ()
    %cst_101 = arith.constant dense<0xFF800000> : vector<11xf32>
    %318 = vector.multi_reduction <maximumf>, %317, %cst_101 [1] : vector<11x11xf32> to vector<11xf32>
    %319 = vector.shape_cast %318 : vector<11xf32> to vector<11x1xf32>
    %320 = vector.broadcast %319 : vector<11x1xf32> to vector<11x11xf32>
    %321 = arith.subf %317, %320 : vector<11x11xf32>
    %322 = math.exp %321 : vector<11x11xf32>
    %cst_102 = arith.constant dense<0.000000e+00> : vector<11xf32>
    %323 = vector.multi_reduction <add>, %322, %cst_102 [1] : vector<11x11xf32> to vector<11xf32>
    %324 = vector.shape_cast %323 : vector<11xf32> to vector<11x1xf32>
    %325 = tpu.reciprocal %324 {approx = true} : vector<11x1xf32> -> vector<11x1xf32>
    %326 = vector.broadcast %325 : vector<11x1xf32> to vector<11x11xf32>
    %327 = arith.mulf %322, %326 : vector<11x11xf32>
    %328 = arith.truncf %327 : vector<11x11xf32> to vector<11x11xbf16>
    %cst_103 = arith.constant dense<0.000000e+00> : vector<11x8xf32>
    %329 = tpu.matmul %328, %316, %cst_103 {dimension_numbers = #tpu.dot_dimension_numbers<[1], [0], [0], [1], [0, 0, 1, 1], [], []>} : vector<11x11xbf16>, vector<11x8xbf16>, vector<11x8xf32> -> vector<11x8xf32>
    %330 = vector.extract_strided_slice %266 {offsets = [0, 24], sizes = [11, 8], strides = [1, 1]} : vector<11x192xf32> to vector<11x8xf32>
    %cst_104 = arith.constant 0.353553385 : f32
    %331 = vector.broadcast %cst_104 : f32 to vector<11x8xf32>
    %332 = arith.mulf %330, %331 : vector<11x8xf32>
    %333 = arith.truncf %332 : vector<11x8xf32> to vector<11x8xbf16>
    %334 = vector.extract_strided_slice %266 {offsets = [0, 88], sizes = [11, 8], strides = [1, 1]} : vector<11x192xf32> to vector<11x8xf32>
    %335 = arith.truncf %334 : vector<11x8xf32> to vector<11x8xbf16>
    %336 = vector.extract_strided_slice %266 {offsets = [0, 152], sizes = [11, 8], strides = [1, 1]} : vector<11x192xf32> to vector<11x8xf32>
    %337 = arith.truncf %336 : vector<11x8xf32> to vector<11x8xbf16>
    "tpu.trace_start"() <{level = 10 : i32, message = "qd,kd->qk"}> : () -> ()
    %cst_105 = arith.constant dense<0.000000e+00> : vector<11x11xf32>
    %338 = tpu.matmul %333, %335, %cst_105 {dimension_numbers = #tpu.dot_dimension_numbers<[1], [1], [0], [0], [0, 0, 1, 0], [], []>} : vector<11x8xbf16>, vector<11x8xbf16>, vector<11x11xf32> -> vector<11x11xf32>
    "tpu.trace_stop"() : () -> ()
    %cst_106 = arith.constant dense<0xFF800000> : vector<11xf32>
    %339 = vector.multi_reduction <maximumf>, %338, %cst_106 [1] : vector<11x11xf32> to vector<11xf32>
    %340 = vector.shape_cast %339 : vector<11xf32> to vector<11x1xf32>
    %341 = vector.broadcast %340 : vector<11x1xf32> to vector<11x11xf32>
    %342 = arith.subf %338, %341 : vector<11x11xf32>
    %343 = math.exp %342 : vector<11x11xf32>
    %cst_107 = arith.constant dense<0.000000e+00> : vector<11xf32>
    %344 = vector.multi_reduction <add>, %343, %cst_107 [1] : vector<11x11xf32> to vector<11xf32>
    %345 = vector.shape_cast %344 : vector<11xf32> to vector<11x1xf32>
    %346 = tpu.reciprocal %345 {approx = true} : vector<11x1xf32> -> vector<11x1xf32>
    %347 = vector.broadcast %346 : vector<11x1xf32> to vector<11x11xf32>
    %348 = arith.mulf %343, %347 : vector<11x11xf32>
    %349 = arith.truncf %348 : vector<11x11xf32> to vector<11x11xbf16>
    %cst_108 = arith.constant dense<0.000000e+00> : vector<11x8xf32>
    %350 = tpu.matmul %349, %337, %cst_108 {dimension_numbers = #tpu.dot_dimension_numbers<[1], [0], [0], [1], [0, 0, 1, 1], [], []>} : vector<11x11xbf16>, vector<11x8xbf16>, vector<11x8xf32> -> vector<11x8xf32>
    %351 = vector.extract_strided_slice %266 {offsets = [0, 32], sizes = [11, 8], strides = [1, 1]} : vector<11x192xf32> to vector<11x8xf32>
    %cst_109 = arith.constant 0.353553385 : f32
    %352 = vector.broadcast %cst_109 : f32 to vector<11x8xf32>
    %353 = arith.mulf %351, %352 : vector<11x8xf32>
    %354 = arith.truncf %353 : vector<11x8xf32> to vector<11x8xbf16>
    %355 = vector.extract_strided_slice %266 {offsets = [0, 96], sizes = [11, 8], strides = [1, 1]} : vector<11x192xf32> to vector<11x8xf32>
    %356 = arith.truncf %355 : vector<11x8xf32> to vector<11x8xbf16>
    %357 = vector.extract_strided_slice %266 {offsets = [0, 160], sizes = [11, 8], strides = [1, 1]} : vector<11x192xf32> to vector<11x8xf32>
    %358 = arith.truncf %357 : vector<11x8xf32> to vector<11x8xbf16>
    "tpu.trace_start"() <{level = 10 : i32, message = "qd,kd->qk"}> : () -> ()
    %cst_110 = arith.constant dense<0.000000e+00> : vector<11x11xf32>
    %359 = tpu.matmul %354, %356, %cst_110 {dimension_numbers = #tpu.dot_dimension_numbers<[1], [1], [0], [0], [0, 0, 1, 0], [], []>} : vector<11x8xbf16>, vector<11x8xbf16>, vector<11x11xf32> -> vector<11x11xf32>
    "tpu.trace_stop"() : () -> ()
    %cst_111 = arith.constant dense<0xFF800000> : vector<11xf32>
    %360 = vector.multi_reduction <maximumf>, %359, %cst_111 [1] : vector<11x11xf32> to vector<11xf32>
    %361 = vector.shape_cast %360 : vector<11xf32> to vector<11x1xf32>
    %362 = vector.broadcast %361 : vector<11x1xf32> to vector<11x11xf32>
    %363 = arith.subf %359, %362 : vector<11x11xf32>
    %364 = math.exp %363 : vector<11x11xf32>
    %cst_112 = arith.constant dense<0.000000e+00> : vector<11xf32>
    %365 = vector.multi_reduction <add>, %364, %cst_112 [1] : vector<11x11xf32> to vector<11xf32>
    %366 = vector.shape_cast %365 : vector<11xf32> to vector<11x1xf32>
    %367 = tpu.reciprocal %366 {approx = true} : vector<11x1xf32> -> vector<11x1xf32>
    %368 = vector.broadcast %367 : vector<11x1xf32> to vector<11x11xf32>
    %369 = arith.mulf %364, %368 : vector<11x11xf32>
    %370 = arith.truncf %369 : vector<11x11xf32> to vector<11x11xbf16>
    %cst_113 = arith.constant dense<0.000000e+00> : vector<11x8xf32>
    %371 = tpu.matmul %370, %358, %cst_113 {dimension_numbers = #tpu.dot_dimension_numbers<[1], [0], [0], [1], [0, 0, 1, 1], [], []>} : vector<11x11xbf16>, vector<11x8xbf16>, vector<11x8xf32> -> vector<11x8xf32>
    %372 = vector.extract_strided_slice %266 {offsets = [0, 40], sizes = [11, 8], strides = [1, 1]} : vector<11x192xf32> to vector<11x8xf32>
    %cst_114 = arith.constant 0.353553385 : f32
    %373 = vector.broadcast %cst_114 : f32 to vector<11x8xf32>
    %374 = arith.mulf %372, %373 : vector<11x8xf32>
    %375 = arith.truncf %374 : vector<11x8xf32> to vector<11x8xbf16>
    %376 = vector.extract_strided_slice %266 {offsets = [0, 104], sizes = [11, 8], strides = [1, 1]} : vector<11x192xf32> to vector<11x8xf32>
    %377 = arith.truncf %376 : vector<11x8xf32> to vector<11x8xbf16>
    %378 = vector.extract_strided_slice %266 {offsets = [0, 168], sizes = [11, 8], strides = [1, 1]} : vector<11x192xf32> to vector<11x8xf32>
    %379 = arith.truncf %378 : vector<11x8xf32> to vector<11x8xbf16>
    "tpu.trace_start"() <{level = 10 : i32, message = "qd,kd->qk"}> : () -> ()
    %cst_115 = arith.constant dense<0.000000e+00> : vector<11x11xf32>
    %380 = tpu.matmul %375, %377, %cst_115 {dimension_numbers = #tpu.dot_dimension_numbers<[1], [1], [0], [0], [0, 0, 1, 0], [], []>} : vector<11x8xbf16>, vector<11x8xbf16>, vector<11x11xf32> -> vector<11x11xf32>
    "tpu.trace_stop"() : () -> ()
    %cst_116 = arith.constant dense<0xFF800000> : vector<11xf32>
    %381 = vector.multi_reduction <maximumf>, %380, %cst_116 [1] : vector<11x11xf32> to vector<11xf32>
    %382 = vector.shape_cast %381 : vector<11xf32> to vector<11x1xf32>
    %383 = vector.broadcast %382 : vector<11x1xf32> to vector<11x11xf32>
    %384 = arith.subf %380, %383 : vector<11x11xf32>
    %385 = math.exp %384 : vector<11x11xf32>
    %cst_117 = arith.constant dense<0.000000e+00> : vector<11xf32>
    %386 = vector.multi_reduction <add>, %385, %cst_117 [1] : vector<11x11xf32> to vector<11xf32>
    %387 = vector.shape_cast %386 : vector<11xf32> to vector<11x1xf32>
    %388 = tpu.reciprocal %387 {approx = true} : vector<11x1xf32> -> vector<11x1xf32>
    %389 = vector.broadcast %388 : vector<11x1xf32> to vector<11x11xf32>
    %390 = arith.mulf %385, %389 : vector<11x11xf32>
    %391 = arith.truncf %390 : vector<11x11xf32> to vector<11x11xbf16>
    %cst_118 = arith.constant dense<0.000000e+00> : vector<11x8xf32>
    %392 = tpu.matmul %391, %379, %cst_118 {dimension_numbers = #tpu.dot_dimension_numbers<[1], [0], [0], [1], [0, 0, 1, 1], [], []>} : vector<11x11xbf16>, vector<11x8xbf16>, vector<11x8xf32> -> vector<11x8xf32>
    %393 = vector.extract_strided_slice %266 {offsets = [0, 48], sizes = [11, 8], strides = [1, 1]} : vector<11x192xf32> to vector<11x8xf32>
    %cst_119 = arith.constant 0.353553385 : f32
    %394 = vector.broadcast %cst_119 : f32 to vector<11x8xf32>
    %395 = arith.mulf %393, %394 : vector<11x8xf32>
    %396 = arith.truncf %395 : vector<11x8xf32> to vector<11x8xbf16>
    %397 = vector.extract_strided_slice %266 {offsets = [0, 112], sizes = [11, 8], strides = [1, 1]} : vector<11x192xf32> to vector<11x8xf32>
    %398 = arith.truncf %397 : vector<11x8xf32> to vector<11x8xbf16>
    %399 = vector.extract_strided_slice %266 {offsets = [0, 176], sizes = [11, 8], strides = [1, 1]} : vector<11x192xf32> to vector<11x8xf32>
    %400 = arith.truncf %399 : vector<11x8xf32> to vector<11x8xbf16>
    "tpu.trace_start"() <{level = 10 : i32, message = "qd,kd->qk"}> : () -> ()
    %cst_120 = arith.constant dense<0.000000e+00> : vector<11x11xf32>
    %401 = tpu.matmul %396, %398, %cst_120 {dimension_numbers = #tpu.dot_dimension_numbers<[1], [1], [0], [0], [0, 0, 1, 0], [], []>} : vector<11x8xbf16>, vector<11x8xbf16>, vector<11x11xf32> -> vector<11x11xf32>
    "tpu.trace_stop"() : () -> ()
    %cst_121 = arith.constant dense<0xFF800000> : vector<11xf32>
    %402 = vector.multi_reduction <maximumf>, %401, %cst_121 [1] : vector<11x11xf32> to vector<11xf32>
    %403 = vector.shape_cast %402 : vector<11xf32> to vector<11x1xf32>
    %404 = vector.broadcast %403 : vector<11x1xf32> to vector<11x11xf32>
    %405 = arith.subf %401, %404 : vector<11x11xf32>
    %406 = math.exp %405 : vector<11x11xf32>
    %cst_122 = arith.constant dense<0.000000e+00> : vector<11xf32>
    %407 = vector.multi_reduction <add>, %406, %cst_122 [1] : vector<11x11xf32> to vector<11xf32>
    %408 = vector.shape_cast %407 : vector<11xf32> to vector<11x1xf32>
    %409 = tpu.reciprocal %408 {approx = true} : vector<11x1xf32> -> vector<11x1xf32>
    %410 = vector.broadcast %409 : vector<11x1xf32> to vector<11x11xf32>
    %411 = arith.mulf %406, %410 : vector<11x11xf32>
    %412 = arith.truncf %411 : vector<11x11xf32> to vector<11x11xbf16>
    %cst_123 = arith.constant dense<0.000000e+00> : vector<11x8xf32>
    %413 = tpu.matmul %412, %400, %cst_123 {dimension_numbers = #tpu.dot_dimension_numbers<[1], [0], [0], [1], [0, 0, 1, 1], [], []>} : vector<11x11xbf16>, vector<11x8xbf16>, vector<11x8xf32> -> vector<11x8xf32>
    %414 = vector.extract_strided_slice %266 {offsets = [0, 56], sizes = [11, 8], strides = [1, 1]} : vector<11x192xf32> to vector<11x8xf32>
    %cst_124 = arith.constant 0.353553385 : f32
    %415 = vector.broadcast %cst_124 : f32 to vector<11x8xf32>
    %416 = arith.mulf %414, %415 : vector<11x8xf32>
    %417 = arith.truncf %416 : vector<11x8xf32> to vector<11x8xbf16>
    %418 = vector.extract_strided_slice %266 {offsets = [0, 120], sizes = [11, 8], strides = [1, 1]} : vector<11x192xf32> to vector<11x8xf32>
    %419 = arith.truncf %418 : vector<11x8xf32> to vector<11x8xbf16>
    %420 = vector.extract_strided_slice %266 {offsets = [0, 184], sizes = [11, 8], strides = [1, 1]} : vector<11x192xf32> to vector<11x8xf32>
    %421 = arith.truncf %420 : vector<11x8xf32> to vector<11x8xbf16>
    "tpu.trace_start"() <{level = 10 : i32, message = "qd,kd->qk"}> : () -> ()
    %cst_125 = arith.constant dense<0.000000e+00> : vector<11x11xf32>
    %422 = tpu.matmul %417, %419, %cst_125 {dimension_numbers = #tpu.dot_dimension_numbers<[1], [1], [0], [0], [0, 0, 1, 0], [], []>} : vector<11x8xbf16>, vector<11x8xbf16>, vector<11x11xf32> -> vector<11x11xf32>
    "tpu.trace_stop"() : () -> ()
    %cst_126 = arith.constant dense<0xFF800000> : vector<11xf32>
    %423 = vector.multi_reduction <maximumf>, %422, %cst_126 [1] : vector<11x11xf32> to vector<11xf32>
    %424 = vector.shape_cast %423 : vector<11xf32> to vector<11x1xf32>
    %425 = vector.broadcast %424 : vector<11x1xf32> to vector<11x11xf32>
    %426 = arith.subf %422, %425 : vector<11x11xf32>
    %427 = math.exp %426 : vector<11x11xf32>
    %cst_127 = arith.constant dense<0.000000e+00> : vector<11xf32>
    %428 = vector.multi_reduction <add>, %427, %cst_127 [1] : vector<11x11xf32> to vector<11xf32>
    %429 = vector.shape_cast %428 : vector<11xf32> to vector<11x1xf32>
    %430 = tpu.reciprocal %429 {approx = true} : vector<11x1xf32> -> vector<11x1xf32>
    %431 = vector.broadcast %430 : vector<11x1xf32> to vector<11x11xf32>
    %432 = arith.mulf %427, %431 : vector<11x11xf32>
    %433 = arith.truncf %432 : vector<11x11xf32> to vector<11x11xbf16>
    %cst_128 = arith.constant dense<0.000000e+00> : vector<11x8xf32>
    %434 = tpu.matmul %433, %421, %cst_128 {dimension_numbers = #tpu.dot_dimension_numbers<[1], [0], [0], [1], [0, 0, 1, 1], [], []>} : vector<11x11xbf16>, vector<11x8xbf16>, vector<11x8xf32> -> vector<11x8xf32>
    %435 = tpu.concatenate %287, %308, %329, %350, %371, %392, %413, %434 in 1 : vector<11x8xf32>, vector<11x8xf32>, vector<11x8xf32>, vector<11x8xf32>, vector<11x8xf32>, vector<11x8xf32>, vector<11x8xf32>, vector<11x8xf32> -> vector<11x64xf32>
    %436 = arith.truncf %435 : vector<11x64xf32> to vector<11x64xbf16>
    %cst_129 = arith.constant dense<0.000000e+00> : vector<11x64xf32>
    %437 = tpu.matmul %436, %2, %cst_129 {dimension_numbers = #tpu.dot_dimension_numbers<[1], [0], [0], [1], [0, 0, 1, 1], [], []>} : vector<11x64xbf16>, vector<64x64xbf16>, vector<11x64xf32> -> vector<11x64xf32>
    %438 = arith.addf %262, %437 : vector<11x64xf32>
    %439 = vector.broadcast %3 : vector<1x64xf32> to vector<11x64xf32>
    %440 = arith.addf %438, %439 : vector<11x64xf32>
    %cst_130 = arith.constant dense<0.000000e+00> : vector<11xf32>
    %441 = vector.multi_reduction <add>, %440, %cst_130 [1] : vector<11x64xf32> to vector<11xf32>
    %442 = vector.shape_cast %441 : vector<11xf32> to vector<11x1xf32>
    %cst_131 = arith.constant 6.400000e+01 : f32
    %443 = vector.broadcast %cst_131 : f32 to vector<11x1xf32>
    %444 = arith.divf %442, %443 : vector<11x1xf32>
    %445 = vector.broadcast %444 : vector<11x1xf32> to vector<11x64xf32>
    %446 = arith.subf %440, %445 : vector<11x64xf32>
    %447 = arith.mulf %446, %446 : vector<11x64xf32>
    %cst_132 = arith.constant dense<0.000000e+00> : vector<11xf32>
    %448 = vector.multi_reduction <add>, %447, %cst_132 [1] : vector<11x64xf32> to vector<11xf32>
    %449 = vector.shape_cast %448 : vector<11xf32> to vector<11x1xf32>
    %cst_133 = arith.constant 6.400000e+01 : f32
    %450 = vector.broadcast %cst_133 : f32 to vector<11x1xf32>
    %451 = arith.divf %449, %450 : vector<11x1xf32>
    %452 = vector.broadcast %444 : vector<11x1xf32> to vector<11x64xf32>
    %453 = arith.subf %440, %452 : vector<11x64xf32>
    %cst_134 = arith.constant 9.99999974E-6 : f32
    %454 = vector.broadcast %cst_134 : f32 to vector<11x1xf32>
    %455 = arith.addf %451, %454 : vector<11x1xf32>
    %456 = math.rsqrt %455 : vector<11x1xf32>
    %457 = vector.broadcast %456 : vector<11x1xf32> to vector<11x64xf32>
    %458 = arith.mulf %453, %457 : vector<11x64xf32>
    %459 = vector.broadcast %4 : vector<1x64xf32> to vector<11x64xf32>
    %460 = arith.mulf %458, %459 : vector<11x64xf32>
    %461 = vector.broadcast %5 : vector<1x64xf32> to vector<11x64xf32>
    %462 = arith.addf %460, %461 : vector<11x64xf32>
    %463 = arith.truncf %462 : vector<11x64xf32> to vector<11x64xbf16>
    %cst_135 = arith.constant dense<0.000000e+00> : vector<11x64xf32>
    %464 = tpu.matmul %463, %6, %cst_135 {dimension_numbers = #tpu.dot_dimension_numbers<[1], [0], [0], [1], [0, 0, 1, 1], [], []>} : vector<11x64xbf16>, vector<64x64xbf16>, vector<11x64xf32> -> vector<11x64xf32>
    %465 = vector.broadcast %7 : vector<1x64xf32> to vector<11x64xf32>
    %466 = arith.addf %464, %465 : vector<11x64xf32>
    %cst_136 = arith.constant 5.000000e-01 : f32
    %467 = vector.broadcast %cst_136 : f32 to vector<11x64xf32>
    %468 = arith.mulf %467, %466 : vector<11x64xf32>
    %cst_137 = arith.constant 4.471500e-02 : f32
    %469 = vector.broadcast %cst_137 : f32 to vector<11x64xf32>
    %470 = arith.mulf %469, %466 : vector<11x64xf32>
    %471 = arith.mulf %470, %466 : vector<11x64xf32>
    %472 = arith.mulf %471, %466 : vector<11x64xf32>
    %473 = arith.addf %466, %472 : vector<11x64xf32>
    %cst_138 = arith.constant 0.797884583 : f32
    %474 = vector.broadcast %cst_138 : f32 to vector<11x64xf32>
    %475 = arith.mulf %474, %473 : vector<11x64xf32>
    %476 = math.tanh %475 : vector<11x64xf32>
    %cst_139 = arith.constant 1.000000e+00 : f32
    %477 = vector.broadcast %cst_139 : f32 to vector<11x64xf32>
    %478 = arith.addf %477, %476 : vector<11x64xf32>
    %479 = arith.mulf %468, %478 : vector<11x64xf32>
    %480 = arith.truncf %479 : vector<11x64xf32> to vector<11x64xbf16>
    %cst_140 = arith.constant dense<0.000000e+00> : vector<11x64xf32>
    %481 = tpu.matmul %480, %8, %cst_140 {dimension_numbers = #tpu.dot_dimension_numbers<[1], [0], [0], [1], [0, 0, 1, 1], [], []>} : vector<11x64xbf16>, vector<64x64xbf16>, vector<11x64xf32> -> vector<11x64xf32>
    %482 = vector.broadcast %9 : vector<1x64xf32> to vector<11x64xf32>
    %483 = arith.addf %481, %482 : vector<11x64xf32>
    %484 = arith.addf %462, %483 : vector<11x64xf32>
    %cst_141 = arith.constant dense<0.000000e+00> : vector<11xf32>
    %485 = vector.multi_reduction <add>, %484, %cst_141 [1] : vector<11x64xf32> to vector<11xf32>
    %486 = vector.shape_cast %485 : vector<11xf32> to vector<11x1xf32>
    %cst_142 = arith.constant 6.400000e+01 : f32
    %487 = vector.broadcast %cst_142 : f32 to vector<11x1xf32>
    %488 = arith.divf %486, %487 : vector<11x1xf32>
    %489 = vector.broadcast %488 : vector<11x1xf32> to vector<11x64xf32>
    %490 = arith.subf %484, %489 : vector<11x64xf32>
    %491 = arith.mulf %490, %490 : vector<11x64xf32>
    %cst_143 = arith.constant dense<0.000000e+00> : vector<11xf32>
    %492 = vector.multi_reduction <add>, %491, %cst_143 [1] : vector<11x64xf32> to vector<11xf32>
    %493 = vector.shape_cast %492 : vector<11xf32> to vector<11x1xf32>
    %cst_144 = arith.constant 6.400000e+01 : f32
    %494 = vector.broadcast %cst_144 : f32 to vector<11x1xf32>
    %495 = arith.divf %493, %494 : vector<11x1xf32>
    %496 = vector.broadcast %488 : vector<11x1xf32> to vector<11x64xf32>
    %497 = arith.subf %484, %496 : vector<11x64xf32>
    %cst_145 = arith.constant 9.99999974E-6 : f32
    %498 = vector.broadcast %cst_145 : f32 to vector<11x1xf32>
    %499 = arith.addf %495, %498 : vector<11x1xf32>
    %500 = math.rsqrt %499 : vector<11x1xf32>
    %501 = vector.broadcast %500 : vector<11x1xf32> to vector<11x64xf32>
    %502 = arith.mulf %497, %501 : vector<11x64xf32>
    %503 = vector.broadcast %10 : vector<1x64xf32> to vector<11x64xf32>
    %504 = arith.mulf %502, %503 : vector<11x64xf32>
    %505 = vector.broadcast %11 : vector<1x64xf32> to vector<11x64xf32>
    %506 = arith.addf %504, %505 : vector<11x64xf32>
    %c1_146 = arith.constant 1 : index
    %c0_147 = arith.constant 0 : index
    %c0_148 = arith.constant 0 : index
    %507 = vector.load %arg14[%c1_146, %c0_147, %c0_148] : memref<4x11x64xf32, #tpu.memory_space<vmem>>, vector<1x11x64xf32>
    %508 = vector.shape_cast %507 : vector<1x11x64xf32> to vector<11x64xf32>
    %509 = vector.shape_cast %506 : vector<11x64xf32> to vector<1x11x64xf32>
    tpu.vector_store %arg14[%c1_146, %c0_147, %c0_148], %509 {strides = array<i32>} : memref<4x11x64xf32, #tpu.memory_space<vmem>>, vector<1x11x64xf32>,
    %c2 = arith.constant 2 : index
    %c0_149 = arith.constant 0 : index
    %c0_150 = arith.constant 0 : index
    %510 = vector.load %arg1[%c2, %c0_149, %c0_150] : memref<4x11x64xf32, #tpu.memory_space<vmem>>, vector<1x11x64xf32>
    %511 = vector.shape_cast %510 : vector<1x11x64xf32> to vector<11x64xf32>
    %512 = arith.truncf %511 : vector<11x64xf32> to vector<11x64xbf16>
    %cst_151 = arith.constant dense<0.000000e+00> : vector<11x192xf32>
    %513 = tpu.matmul %512, %0, %cst_151 {dimension_numbers = #tpu.dot_dimension_numbers<[1], [0], [0], [1], [0, 0, 1, 1], [], []>} : vector<11x64xbf16>, vector<64x192xbf16>, vector<11x192xf32> -> vector<11x192xf32>
    %514 = vector.broadcast %1 : vector<1x192xf32> to vector<11x192xf32>
    %515 = arith.addf %513, %514 : vector<11x192xf32>
    %516 = vector.extract_strided_slice %515 {offsets = [0, 0], sizes = [11, 8], strides = [1, 1]} : vector<11x192xf32> to vector<11x8xf32>
    %cst_152 = arith.constant 0.353553385 : f32
    %517 = vector.broadcast %cst_152 : f32 to vector<11x8xf32>
    %518 = arith.mulf %516, %517 : vector<11x8xf32>
    %519 = arith.truncf %518 : vector<11x8xf32> to vector<11x8xbf16>
    %520 = vector.extract_strided_slice %515 {offsets = [0, 64], sizes = [11, 8], strides = [1, 1]} : vector<11x192xf32> to vector<11x8xf32>
    %521 = arith.truncf %520 : vector<11x8xf32> to vector<11x8xbf16>
    %522 = vector.extract_strided_slice %515 {offsets = [0, 128], sizes = [11, 8], strides = [1, 1]} : vector<11x192xf32> to vector<11x8xf32>
    %523 = arith.truncf %522 : vector<11x8xf32> to vector<11x8xbf16>
    "tpu.trace_start"() <{level = 10 : i32, message = "qd,kd->qk"}> : () -> ()
    %cst_153 = arith.constant dense<0.000000e+00> : vector<11x11xf32>
    %524 = tpu.matmul %519, %521, %cst_153 {dimension_numbers = #tpu.dot_dimension_numbers<[1], [1], [0], [0], [0, 0, 1, 0], [], []>} : vector<11x8xbf16>, vector<11x8xbf16>, vector<11x11xf32> -> vector<11x11xf32>
    "tpu.trace_stop"() : () -> ()
    %cst_154 = arith.constant dense<0xFF800000> : vector<11xf32>
    %525 = vector.multi_reduction <maximumf>, %524, %cst_154 [1] : vector<11x11xf32> to vector<11xf32>
    %526 = vector.shape_cast %525 : vector<11xf32> to vector<11x1xf32>
    %527 = vector.broadcast %526 : vector<11x1xf32> to vector<11x11xf32>
    %528 = arith.subf %524, %527 : vector<11x11xf32>
    %529 = math.exp %528 : vector<11x11xf32>
    %cst_155 = arith.constant dense<0.000000e+00> : vector<11xf32>
    %530 = vector.multi_reduction <add>, %529, %cst_155 [1] : vector<11x11xf32> to vector<11xf32>
    %531 = vector.shape_cast %530 : vector<11xf32> to vector<11x1xf32>
    %532 = tpu.reciprocal %531 {approx = true} : vector<11x1xf32> -> vector<11x1xf32>
    %533 = vector.broadcast %532 : vector<11x1xf32> to vector<11x11xf32>
    %534 = arith.mulf %529, %533 : vector<11x11xf32>
    %535 = arith.truncf %534 : vector<11x11xf32> to vector<11x11xbf16>
    %cst_156 = arith.constant dense<0.000000e+00> : vector<11x8xf32>
    %536 = tpu.matmul %535, %523, %cst_156 {dimension_numbers = #tpu.dot_dimension_numbers<[1], [0], [0], [1], [0, 0, 1, 1], [], []>} : vector<11x11xbf16>, vector<11x8xbf16>, vector<11x8xf32> -> vector<11x8xf32>
    %537 = vector.extract_strided_slice %515 {offsets = [0, 8], sizes = [11, 8], strides = [1, 1]} : vector<11x192xf32> to vector<11x8xf32>
    %cst_157 = arith.constant 0.353553385 : f32
    %538 = vector.broadcast %cst_157 : f32 to vector<11x8xf32>
    %539 = arith.mulf %537, %538 : vector<11x8xf32>
    %540 = arith.truncf %539 : vector<11x8xf32> to vector<11x8xbf16>
    %541 = vector.extract_strided_slice %515 {offsets = [0, 72], sizes = [11, 8], strides = [1, 1]} : vector<11x192xf32> to vector<11x8xf32>
    %542 = arith.truncf %541 : vector<11x8xf32> to vector<11x8xbf16>
    %543 = vector.extract_strided_slice %515 {offsets = [0, 136], sizes = [11, 8], strides = [1, 1]} : vector<11x192xf32> to vector<11x8xf32>
    %544 = arith.truncf %543 : vector<11x8xf32> to vector<11x8xbf16>
    "tpu.trace_start"() <{level = 10 : i32, message = "qd,kd->qk"}> : () -> ()
    %cst_158 = arith.constant dense<0.000000e+00> : vector<11x11xf32>
    %545 = tpu.matmul %540, %542, %cst_158 {dimension_numbers = #tpu.dot_dimension_numbers<[1], [1], [0], [0], [0, 0, 1, 0], [], []>} : vector<11x8xbf16>, vector<11x8xbf16>, vector<11x11xf32> -> vector<11x11xf32>
    "tpu.trace_stop"() : () -> ()
    %cst_159 = arith.constant dense<0xFF800000> : vector<11xf32>
    %546 = vector.multi_reduction <maximumf>, %545, %cst_159 [1] : vector<11x11xf32> to vector<11xf32>
    %547 = vector.shape_cast %546 : vector<11xf32> to vector<11x1xf32>
    %548 = vector.broadcast %547 : vector<11x1xf32> to vector<11x11xf32>
    %549 = arith.subf %545, %548 : vector<11x11xf32>
    %550 = math.exp %549 : vector<11x11xf32>
    %cst_160 = arith.constant dense<0.000000e+00> : vector<11xf32>
    %551 = vector.multi_reduction <add>, %550, %cst_160 [1] : vector<11x11xf32> to vector<11xf32>
    %552 = vector.shape_cast %551 : vector<11xf32> to vector<11x1xf32>
    %553 = tpu.reciprocal %552 {approx = true} : vector<11x1xf32> -> vector<11x1xf32>
    %554 = vector.broadcast %553 : vector<11x1xf32> to vector<11x11xf32>
    %555 = arith.mulf %550, %554 : vector<11x11xf32>
    %556 = arith.truncf %555 : vector<11x11xf32> to vector<11x11xbf16>
    %cst_161 = arith.constant dense<0.000000e+00> : vector<11x8xf32>
    %557 = tpu.matmul %556, %544, %cst_161 {dimension_numbers = #tpu.dot_dimension_numbers<[1], [0], [0], [1], [0, 0, 1, 1], [], []>} : vector<11x11xbf16>, vector<11x8xbf16>, vector<11x8xf32> -> vector<11x8xf32>
    %558 = vector.extract_strided_slice %515 {offsets = [0, 16], sizes = [11, 8], strides = [1, 1]} : vector<11x192xf32> to vector<11x8xf32>
    %cst_162 = arith.constant 0.353553385 : f32
    %559 = vector.broadcast %cst_162 : f32 to vector<11x8xf32>
    %560 = arith.mulf %558, %559 : vector<11x8xf32>
    %561 = arith.truncf %560 : vector<11x8xf32> to vector<11x8xbf16>
    %562 = vector.extract_strided_slice %515 {offsets = [0, 80], sizes = [11, 8], strides = [1, 1]} : vector<11x192xf32> to vector<11x8xf32>
    %563 = arith.truncf %562 : vector<11x8xf32> to vector<11x8xbf16>
    %564 = vector.extract_strided_slice %515 {offsets = [0, 144], sizes = [11, 8], strides = [1, 1]} : vector<11x192xf32> to vector<11x8xf32>
    %565 = arith.truncf %564 : vector<11x8xf32> to vector<11x8xbf16>
    "tpu.trace_start"() <{level = 10 : i32, message = "qd,kd->qk"}> : () -> ()
    %cst_163 = arith.constant dense<0.000000e+00> : vector<11x11xf32>
    %566 = tpu.matmul %561, %563, %cst_163 {dimension_numbers = #tpu.dot_dimension_numbers<[1], [1], [0], [0], [0, 0, 1, 0], [], []>} : vector<11x8xbf16>, vector<11x8xbf16>, vector<11x11xf32> -> vector<11x11xf32>
    "tpu.trace_stop"() : () -> ()
    %cst_164 = arith.constant dense<0xFF800000> : vector<11xf32>
    %567 = vector.multi_reduction <maximumf>, %566, %cst_164 [1] : vector<11x11xf32> to vector<11xf32>
    %568 = vector.shape_cast %567 : vector<11xf32> to vector<11x1xf32>
    %569 = vector.broadcast %568 : vector<11x1xf32> to vector<11x11xf32>
    %570 = arith.subf %566, %569 : vector<11x11xf32>
    %571 = math.exp %570 : vector<11x11xf32>
    %cst_165 = arith.constant dense<0.000000e+00> : vector<11xf32>
    %572 = vector.multi_reduction <add>, %571, %cst_165 [1] : vector<11x11xf32> to vector<11xf32>
    %573 = vector.shape_cast %572 : vector<11xf32> to vector<11x1xf32>
    %574 = tpu.reciprocal %573 {approx = true} : vector<11x1xf32> -> vector<11x1xf32>
    %575 = vector.broadcast %574 : vector<11x1xf32> to vector<11x11xf32>
    %576 = arith.mulf %571, %575 : vector<11x11xf32>
    %577 = arith.truncf %576 : vector<11x11xf32> to vector<11x11xbf16>
    %cst_166 = arith.constant dense<0.000000e+00> : vector<11x8xf32>
    %578 = tpu.matmul %577, %565, %cst_166 {dimension_numbers = #tpu.dot_dimension_numbers<[1], [0], [0], [1], [0, 0, 1, 1], [], []>} : vector<11x11xbf16>, vector<11x8xbf16>, vector<11x8xf32> -> vector<11x8xf32>
    %579 = vector.extract_strided_slice %515 {offsets = [0, 24], sizes = [11, 8], strides = [1, 1]} : vector<11x192xf32> to vector<11x8xf32>
    %cst_167 = arith.constant 0.353553385 : f32
    %580 = vector.broadcast %cst_167 : f32 to vector<11x8xf32>
    %581 = arith.mulf %579, %580 : vector<11x8xf32>
    %582 = arith.truncf %581 : vector<11x8xf32> to vector<11x8xbf16>
    %583 = vector.extract_strided_slice %515 {offsets = [0, 88], sizes = [11, 8], strides = [1, 1]} : vector<11x192xf32> to vector<11x8xf32>
    %584 = arith.truncf %583 : vector<11x8xf32> to vector<11x8xbf16>
    %585 = vector.extract_strided_slice %515 {offsets = [0, 152], sizes = [11, 8], strides = [1, 1]} : vector<11x192xf32> to vector<11x8xf32>
    %586 = arith.truncf %585 : vector<11x8xf32> to vector<11x8xbf16>
    "tpu.trace_start"() <{level = 10 : i32, message = "qd,kd->qk"}> : () -> ()
    %cst_168 = arith.constant dense<0.000000e+00> : vector<11x11xf32>
    %587 = tpu.matmul %582, %584, %cst_168 {dimension_numbers = #tpu.dot_dimension_numbers<[1], [1], [0], [0], [0, 0, 1, 0], [], []>} : vector<11x8xbf16>, vector<11x8xbf16>, vector<11x11xf32> -> vector<11x11xf32>
    "tpu.trace_stop"() : () -> ()
    %cst_169 = arith.constant dense<0xFF800000> : vector<11xf32>
    %588 = vector.multi_reduction <maximumf>, %587, %cst_169 [1] : vector<11x11xf32> to vector<11xf32>
    %589 = vector.shape_cast %588 : vector<11xf32> to vector<11x1xf32>
    %590 = vector.broadcast %589 : vector<11x1xf32> to vector<11x11xf32>
    %591 = arith.subf %587, %590 : vector<11x11xf32>
    %592 = math.exp %591 : vector<11x11xf32>
    %cst_170 = arith.constant dense<0.000000e+00> : vector<11xf32>
    %593 = vector.multi_reduction <add>, %592, %cst_170 [1] : vector<11x11xf32> to vector<11xf32>
    %594 = vector.shape_cast %593 : vector<11xf32> to vector<11x1xf32>
    %595 = tpu.reciprocal %594 {approx = true} : vector<11x1xf32> -> vector<11x1xf32>
    %596 = vector.broadcast %595 : vector<11x1xf32> to vector<11x11xf32>
    %597 = arith.mulf %592, %596 : vector<11x11xf32>
    %598 = arith.truncf %597 : vector<11x11xf32> to vector<11x11xbf16>
    %cst_171 = arith.constant dense<0.000000e+00> : vector<11x8xf32>
    %599 = tpu.matmul %598, %586, %cst_171 {dimension_numbers = #tpu.dot_dimension_numbers<[1], [0], [0], [1], [0, 0, 1, 1], [], []>} : vector<11x11xbf16>, vector<11x8xbf16>, vector<11x8xf32> -> vector<11x8xf32>
    %600 = vector.extract_strided_slice %515 {offsets = [0, 32], sizes = [11, 8], strides = [1, 1]} : vector<11x192xf32> to vector<11x8xf32>
    %cst_172 = arith.constant 0.353553385 : f32
    %601 = vector.broadcast %cst_172 : f32 to vector<11x8xf32>
    %602 = arith.mulf %600, %601 : vector<11x8xf32>
    %603 = arith.truncf %602 : vector<11x8xf32> to vector<11x8xbf16>
    %604 = vector.extract_strided_slice %515 {offsets = [0, 96], sizes = [11, 8], strides = [1, 1]} : vector<11x192xf32> to vector<11x8xf32>
    %605 = arith.truncf %604 : vector<11x8xf32> to vector<11x8xbf16>
    %606 = vector.extract_strided_slice %515 {offsets = [0, 160], sizes = [11, 8], strides = [1, 1]} : vector<11x192xf32> to vector<11x8xf32>
    %607 = arith.truncf %606 : vector<11x8xf32> to vector<11x8xbf16>
    "tpu.trace_start"() <{level = 10 : i32, message = "qd,kd->qk"}> : () -> ()
    %cst_173 = arith.constant dense<0.000000e+00> : vector<11x11xf32>
    %608 = tpu.matmul %603, %605, %cst_173 {dimension_numbers = #tpu.dot_dimension_numbers<[1], [1], [0], [0], [0, 0, 1, 0], [], []>} : vector<11x8xbf16>, vector<11x8xbf16>, vector<11x11xf32> -> vector<11x11xf32>
    "tpu.trace_stop"() : () -> ()
    %cst_174 = arith.constant dense<0xFF800000> : vector<11xf32>
    %609 = vector.multi_reduction <maximumf>, %608, %cst_174 [1] : vector<11x11xf32> to vector<11xf32>
    %610 = vector.shape_cast %609 : vector<11xf32> to vector<11x1xf32>
    %611 = vector.broadcast %610 : vector<11x1xf32> to vector<11x11xf32>
    %612 = arith.subf %608, %611 : vector<11x11xf32>
    %613 = math.exp %612 : vector<11x11xf32>
    %cst_175 = arith.constant dense<0.000000e+00> : vector<11xf32>
    %614 = vector.multi_reduction <add>, %613, %cst_175 [1] : vector<11x11xf32> to vector<11xf32>
    %615 = vector.shape_cast %614 : vector<11xf32> to vector<11x1xf32>
    %616 = tpu.reciprocal %615 {approx = true} : vector<11x1xf32> -> vector<11x1xf32>
    %617 = vector.broadcast %616 : vector<11x1xf32> to vector<11x11xf32>
    %618 = arith.mulf %613, %617 : vector<11x11xf32>
    %619 = arith.truncf %618 : vector<11x11xf32> to vector<11x11xbf16>
    %cst_176 = arith.constant dense<0.000000e+00> : vector<11x8xf32>
    %620 = tpu.matmul %619, %607, %cst_176 {dimension_numbers = #tpu.dot_dimension_numbers<[1], [0], [0], [1], [0, 0, 1, 1], [], []>} : vector<11x11xbf16>, vector<11x8xbf16>, vector<11x8xf32> -> vector<11x8xf32>
    %621 = vector.extract_strided_slice %515 {offsets = [0, 40], sizes = [11, 8], strides = [1, 1]} : vector<11x192xf32> to vector<11x8xf32>
    %cst_177 = arith.constant 0.353553385 : f32
    %622 = vector.broadcast %cst_177 : f32 to vector<11x8xf32>
    %623 = arith.mulf %621, %622 : vector<11x8xf32>
    %624 = arith.truncf %623 : vector<11x8xf32> to vector<11x8xbf16>
    %625 = vector.extract_strided_slice %515 {offsets = [0, 104], sizes = [11, 8], strides = [1, 1]} : vector<11x192xf32> to vector<11x8xf32>
    %626 = arith.truncf %625 : vector<11x8xf32> to vector<11x8xbf16>
    %627 = vector.extract_strided_slice %515 {offsets = [0, 168], sizes = [11, 8], strides = [1, 1]} : vector<11x192xf32> to vector<11x8xf32>
    %628 = arith.truncf %627 : vector<11x8xf32> to vector<11x8xbf16>
    "tpu.trace_start"() <{level = 10 : i32, message = "qd,kd->qk"}> : () -> ()
    %cst_178 = arith.constant dense<0.000000e+00> : vector<11x11xf32>
    %629 = tpu.matmul %624, %626, %cst_178 {dimension_numbers = #tpu.dot_dimension_numbers<[1], [1], [0], [0], [0, 0, 1, 0], [], []>} : vector<11x8xbf16>, vector<11x8xbf16>, vector<11x11xf32> -> vector<11x11xf32>
    "tpu.trace_stop"() : () -> ()
    %cst_179 = arith.constant dense<0xFF800000> : vector<11xf32>
    %630 = vector.multi_reduction <maximumf>, %629, %cst_179 [1] : vector<11x11xf32> to vector<11xf32>
    %631 = vector.shape_cast %630 : vector<11xf32> to vector<11x1xf32>
    %632 = vector.broadcast %631 : vector<11x1xf32> to vector<11x11xf32>
    %633 = arith.subf %629, %632 : vector<11x11xf32>
    %634 = math.exp %633 : vector<11x11xf32>
    %cst_180 = arith.constant dense<0.000000e+00> : vector<11xf32>
    %635 = vector.multi_reduction <add>, %634, %cst_180 [1] : vector<11x11xf32> to vector<11xf32>
    %636 = vector.shape_cast %635 : vector<11xf32> to vector<11x1xf32>
    %637 = tpu.reciprocal %636 {approx = true} : vector<11x1xf32> -> vector<11x1xf32>
    %638 = vector.broadcast %637 : vector<11x1xf32> to vector<11x11xf32>
    %639 = arith.mulf %634, %638 : vector<11x11xf32>
    %640 = arith.truncf %639 : vector<11x11xf32> to vector<11x11xbf16>
    %cst_181 = arith.constant dense<0.000000e+00> : vector<11x8xf32>
    %641 = tpu.matmul %640, %628, %cst_181 {dimension_numbers = #tpu.dot_dimension_numbers<[1], [0], [0], [1], [0, 0, 1, 1], [], []>} : vector<11x11xbf16>, vector<11x8xbf16>, vector<11x8xf32> -> vector<11x8xf32>
    %642 = vector.extract_strided_slice %515 {offsets = [0, 48], sizes = [11, 8], strides = [1, 1]} : vector<11x192xf32> to vector<11x8xf32>
    %cst_182 = arith.constant 0.353553385 : f32
    %643 = vector.broadcast %cst_182 : f32 to vector<11x8xf32>
    %644 = arith.mulf %642, %643 : vector<11x8xf32>
    %645 = arith.truncf %644 : vector<11x8xf32> to vector<11x8xbf16>
    %646 = vector.extract_strided_slice %515 {offsets = [0, 112], sizes = [11, 8], strides = [1, 1]} : vector<11x192xf32> to vector<11x8xf32>
    %647 = arith.truncf %646 : vector<11x8xf32> to vector<11x8xbf16>
    %648 = vector.extract_strided_slice %515 {offsets = [0, 176], sizes = [11, 8], strides = [1, 1]} : vector<11x192xf32> to vector<11x8xf32>
    %649 = arith.truncf %648 : vector<11x8xf32> to vector<11x8xbf16>
    "tpu.trace_start"() <{level = 10 : i32, message = "qd,kd->qk"}> : () -> ()
    %cst_183 = arith.constant dense<0.000000e+00> : vector<11x11xf32>
    %650 = tpu.matmul %645, %647, %cst_183 {dimension_numbers = #tpu.dot_dimension_numbers<[1], [1], [0], [0], [0, 0, 1, 0], [], []>} : vector<11x8xbf16>, vector<11x8xbf16>, vector<11x11xf32> -> vector<11x11xf32>
    "tpu.trace_stop"() : () -> ()
    %cst_184 = arith.constant dense<0xFF800000> : vector<11xf32>
    %651 = vector.multi_reduction <maximumf>, %650, %cst_184 [1] : vector<11x11xf32> to vector<11xf32>
    %652 = vector.shape_cast %651 : vector<11xf32> to vector<11x1xf32>
    %653 = vector.broadcast %652 : vector<11x1xf32> to vector<11x11xf32>
    %654 = arith.subf %650, %653 : vector<11x11xf32>
    %655 = math.exp %654 : vector<11x11xf32>
    %cst_185 = arith.constant dense<0.000000e+00> : vector<11xf32>
    %656 = vector.multi_reduction <add>, %655, %cst_185 [1] : vector<11x11xf32> to vector<11xf32>
    %657 = vector.shape_cast %656 : vector<11xf32> to vector<11x1xf32>
    %658 = tpu.reciprocal %657 {approx = true} : vector<11x1xf32> -> vector<11x1xf32>
    %659 = vector.broadcast %658 : vector<11x1xf32> to vector<11x11xf32>
    %660 = arith.mulf %655, %659 : vector<11x11xf32>
    %661 = arith.truncf %660 : vector<11x11xf32> to vector<11x11xbf16>
    %cst_186 = arith.constant dense<0.000000e+00> : vector<11x8xf32>
    %662 = tpu.matmul %661, %649, %cst_186 {dimension_numbers = #tpu.dot_dimension_numbers<[1], [0], [0], [1], [0, 0, 1, 1], [], []>} : vector<11x11xbf16>, vector<11x8xbf16>, vector<11x8xf32> -> vector<11x8xf32>
    %663 = vector.extract_strided_slice %515 {offsets = [0, 56], sizes = [11, 8], strides = [1, 1]} : vector<11x192xf32> to vector<11x8xf32>
    %cst_187 = arith.constant 0.353553385 : f32
    %664 = vector.broadcast %cst_187 : f32 to vector<11x8xf32>
    %665 = arith.mulf %663, %664 : vector<11x8xf32>
    %666 = arith.truncf %665 : vector<11x8xf32> to vector<11x8xbf16>
    %667 = vector.extract_strided_slice %515 {offsets = [0, 120], sizes = [11, 8], strides = [1, 1]} : vector<11x192xf32> to vector<11x8xf32>
    %668 = arith.truncf %667 : vector<11x8xf32> to vector<11x8xbf16>
    %669 = vector.extract_strided_slice %515 {offsets = [0, 184], sizes = [11, 8], strides = [1, 1]} : vector<11x192xf32> to vector<11x8xf32>
    %670 = arith.truncf %669 : vector<11x8xf32> to vector<11x8xbf16>
    "tpu.trace_start"() <{level = 10 : i32, message = "qd,kd->qk"}> : () -> ()
    %cst_188 = arith.constant dense<0.000000e+00> : vector<11x11xf32>
    %671 = tpu.matmul %666, %668, %cst_188 {dimension_numbers = #tpu.dot_dimension_numbers<[1], [1], [0], [0], [0, 0, 1, 0], [], []>} : vector<11x8xbf16>, vector<11x8xbf16>, vector<11x11xf32> -> vector<11x11xf32>
    "tpu.trace_stop"() : () -> ()
    %cst_189 = arith.constant dense<0xFF800000> : vector<11xf32>
    %672 = vector.multi_reduction <maximumf>, %671, %cst_189 [1] : vector<11x11xf32> to vector<11xf32>
    %673 = vector.shape_cast %672 : vector<11xf32> to vector<11x1xf32>
    %674 = vector.broadcast %673 : vector<11x1xf32> to vector<11x11xf32>
    %675 = arith.subf %671, %674 : vector<11x11xf32>
    %676 = math.exp %675 : vector<11x11xf32>
    %cst_190 = arith.constant dense<0.000000e+00> : vector<11xf32>
    %677 = vector.multi_reduction <add>, %676, %cst_190 [1] : vector<11x11xf32> to vector<11xf32>
    %678 = vector.shape_cast %677 : vector<11xf32> to vector<11x1xf32>
    %679 = tpu.reciprocal %678 {approx = true} : vector<11x1xf32> -> vector<11x1xf32>
    %680 = vector.broadcast %679 : vector<11x1xf32> to vector<11x11xf32>
    %681 = arith.mulf %676, %680 : vector<11x11xf32>
    %682 = arith.truncf %681 : vector<11x11xf32> to vector<11x11xbf16>
    %cst_191 = arith.constant dense<0.000000e+00> : vector<11x8xf32>
    %683 = tpu.matmul %682, %670, %cst_191 {dimension_numbers = #tpu.dot_dimension_numbers<[1], [0], [0], [1], [0, 0, 1, 1], [], []>} : vector<11x11xbf16>, vector<11x8xbf16>, vector<11x8xf32> -> vector<11x8xf32>
    %684 = tpu.concatenate %536, %557, %578, %599, %620, %641, %662, %683 in 1 : vector<11x8xf32>, vector<11x8xf32>, vector<11x8xf32>, vector<11x8xf32>, vector<11x8xf32>, vector<11x8xf32>, vector<11x8xf32>, vector<11x8xf32> -> vector<11x64xf32>
    %685 = arith.truncf %684 : vector<11x64xf32> to vector<11x64xbf16>
    %cst_192 = arith.constant dense<0.000000e+00> : vector<11x64xf32>
    %686 = tpu.matmul %685, %2, %cst_192 {dimension_numbers = #tpu.dot_dimension_numbers<[1], [0], [0], [1], [0, 0, 1, 1], [], []>} : vector<11x64xbf16>, vector<64x64xbf16>, vector<11x64xf32> -> vector<11x64xf32>
    %687 = arith.addf %511, %686 : vector<11x64xf32>
    %688 = vector.broadcast %3 : vector<1x64xf32> to vector<11x64xf32>
    %689 = arith.addf %687, %688 : vector<11x64xf32>
    %cst_193 = arith.constant dense<0.000000e+00> : vector<11xf32>
    %690 = vector.multi_reduction <add>, %689, %cst_193 [1] : vector<11x64xf32> to vector<11xf32>
    %691 = vector.shape_cast %690 : vector<11xf32> to vector<11x1xf32>
    %cst_194 = arith.constant 6.400000e+01 : f32
    %692 = vector.broadcast %cst_194 : f32 to vector<11x1xf32>
    %693 = arith.divf %691, %692 : vector<11x1xf32>
    %694 = vector.broadcast %693 : vector<11x1xf32> to vector<11x64xf32>
    %695 = arith.subf %689, %694 : vector<11x64xf32>
    %696 = arith.mulf %695, %695 : vector<11x64xf32>
    %cst_195 = arith.constant dense<0.000000e+00> : vector<11xf32>
    %697 = vector.multi_reduction <add>, %696, %cst_195 [1] : vector<11x64xf32> to vector<11xf32>
    %698 = vector.shape_cast %697 : vector<11xf32> to vector<11x1xf32>
    %cst_196 = arith.constant 6.400000e+01 : f32
    %699 = vector.broadcast %cst_196 : f32 to vector<11x1xf32>
    %700 = arith.divf %698, %699 : vector<11x1xf32>
    %701 = vector.broadcast %693 : vector<11x1xf32> to vector<11x64xf32>
    %702 = arith.subf %689, %701 : vector<11x64xf32>
    %cst_197 = arith.constant 9.99999974E-6 : f32
    %703 = vector.broadcast %cst_197 : f32 to vector<11x1xf32>
    %704 = arith.addf %700, %703 : vector<11x1xf32>
    %705 = math.rsqrt %704 : vector<11x1xf32>
    %706 = vector.broadcast %705 : vector<11x1xf32> to vector<11x64xf32>
    %707 = arith.mulf %702, %706 : vector<11x64xf32>
    %708 = vector.broadcast %4 : vector<1x64xf32> to vector<11x64xf32>
    %709 = arith.mulf %707, %708 : vector<11x64xf32>
    %710 = vector.broadcast %5 : vector<1x64xf32> to vector<11x64xf32>
    %711 = arith.addf %709, %710 : vector<11x64xf32>
    %712 = arith.truncf %711 : vector<11x64xf32> to vector<11x64xbf16>
    %cst_198 = arith.constant dense<0.000000e+00> : vector<11x64xf32>
    %713 = tpu.matmul %712, %6, %cst_198 {dimension_numbers = #tpu.dot_dimension_numbers<[1], [0], [0], [1], [0, 0, 1, 1], [], []>} : vector<11x64xbf16>, vector<64x64xbf16>, vector<11x64xf32> -> vector<11x64xf32>
    %714 = vector.broadcast %7 : vector<1x64xf32> to vector<11x64xf32>
    %715 = arith.addf %713, %714 : vector<11x64xf32>
    %cst_199 = arith.constant 5.000000e-01 : f32
    %716 = vector.broadcast %cst_199 : f32 to vector<11x64xf32>
    %717 = arith.mulf %716, %715 : vector<11x64xf32>
    %cst_200 = arith.constant 4.471500e-02 : f32
    %718 = vector.broadcast %cst_200 : f32 to vector<11x64xf32>
    %719 = arith.mulf %718, %715 : vector<11x64xf32>
    %720 = arith.mulf %719, %715 : vector<11x64xf32>
    %721 = arith.mulf %720, %715 : vector<11x64xf32>
    %722 = arith.addf %715, %721 : vector<11x64xf32>
    %cst_201 = arith.constant 0.797884583 : f32
    %723 = vector.broadcast %cst_201 : f32 to vector<11x64xf32>
    %724 = arith.mulf %723, %722 : vector<11x64xf32>
    %725 = math.tanh %724 : vector<11x64xf32>
    %cst_202 = arith.constant 1.000000e+00 : f32
    %726 = vector.broadcast %cst_202 : f32 to vector<11x64xf32>
    %727 = arith.addf %726, %725 : vector<11x64xf32>
    %728 = arith.mulf %717, %727 : vector<11x64xf32>
    %729 = arith.truncf %728 : vector<11x64xf32> to vector<11x64xbf16>
    %cst_203 = arith.constant dense<0.000000e+00> : vector<11x64xf32>
    %730 = tpu.matmul %729, %8, %cst_203 {dimension_numbers = #tpu.dot_dimension_numbers<[1], [0], [0], [1], [0, 0, 1, 1], [], []>} : vector<11x64xbf16>, vector<64x64xbf16>, vector<11x64xf32> -> vector<11x64xf32>
    %731 = vector.broadcast %9 : vector<1x64xf32> to vector<11x64xf32>
    %732 = arith.addf %730, %731 : vector<11x64xf32>
    %733 = arith.addf %711, %732 : vector<11x64xf32>
    %cst_204 = arith.constant dense<0.000000e+00> : vector<11xf32>
    %734 = vector.multi_reduction <add>, %733, %cst_204 [1] : vector<11x64xf32> to vector<11xf32>
    %735 = vector.shape_cast %734 : vector<11xf32> to vector<11x1xf32>
    %cst_205 = arith.constant 6.400000e+01 : f32
    %736 = vector.broadcast %cst_205 : f32 to vector<11x1xf32>
    %737 = arith.divf %735, %736 : vector<11x1xf32>
    %738 = vector.broadcast %737 : vector<11x1xf32> to vector<11x64xf32>
    %739 = arith.subf %733, %738 : vector<11x64xf32>
    %740 = arith.mulf %739, %739 : vector<11x64xf32>
    %cst_206 = arith.constant dense<0.000000e+00> : vector<11xf32>
    %741 = vector.multi_reduction <add>, %740, %cst_206 [1] : vector<11x64xf32> to vector<11xf32>
    %742 = vector.shape_cast %741 : vector<11xf32> to vector<11x1xf32>
    %cst_207 = arith.constant 6.400000e+01 : f32
    %743 = vector.broadcast %cst_207 : f32 to vector<11x1xf32>
    %744 = arith.divf %742, %743 : vector<11x1xf32>
    %745 = vector.broadcast %737 : vector<11x1xf32> to vector<11x64xf32>
    %746 = arith.subf %733, %745 : vector<11x64xf32>
    %cst_208 = arith.constant 9.99999974E-6 : f32
    %747 = vector.broadcast %cst_208 : f32 to vector<11x1xf32>
    %748 = arith.addf %744, %747 : vector<11x1xf32>
    %749 = math.rsqrt %748 : vector<11x1xf32>
    %750 = vector.broadcast %749 : vector<11x1xf32> to vector<11x64xf32>
    %751 = arith.mulf %746, %750 : vector<11x64xf32>
    %752 = vector.broadcast %10 : vector<1x64xf32> to vector<11x64xf32>
    %753 = arith.mulf %751, %752 : vector<11x64xf32>
    %754 = vector.broadcast %11 : vector<1x64xf32> to vector<11x64xf32>
    %755 = arith.addf %753, %754 : vector<11x64xf32>
    %c2_209 = arith.constant 2 : index
    %c0_210 = arith.constant 0 : index
    %c0_211 = arith.constant 0 : index
    %756 = vector.load %arg14[%c2_209, %c0_210, %c0_211] : memref<4x11x64xf32, #tpu.memory_space<vmem>>, vector<1x11x64xf32>
    %757 = vector.shape_cast %756 : vector<1x11x64xf32> to vector<11x64xf32>
    %758 = vector.shape_cast %755 : vector<11x64xf32> to vector<1x11x64xf32>
    tpu.vector_store %arg14[%c2_209, %c0_210, %c0_211], %758 {strides = array<i32>} : memref<4x11x64xf32, #tpu.memory_space<vmem>>, vector<1x11x64xf32>,
    %c3 = arith.constant 3 : index
    %c0_212 = arith.constant 0 : index
    %c0_213 = arith.constant 0 : index
    %759 = vector.load %arg1[%c3, %c0_212, %c0_213] : memref<4x11x64xf32, #tpu.memory_space<vmem>>, vector<1x11x64xf32>
    %760 = vector.shape_cast %759 : vector<1x11x64xf32> to vector<11x64xf32>
    %761 = arith.truncf %760 : vector<11x64xf32> to vector<11x64xbf16>
    %cst_214 = arith.constant dense<0.000000e+00> : vector<11x192xf32>
    %762 = tpu.matmul %761, %0, %cst_214 {dimension_numbers = #tpu.dot_dimension_numbers<[1], [0], [0], [1], [0, 0, 1, 1], [], []>} : vector<11x64xbf16>, vector<64x192xbf16>, vector<11x192xf32> -> vector<11x192xf32>
    %763 = vector.broadcast %1 : vector<1x192xf32> to vector<11x192xf32>
    %764 = arith.addf %762, %763 : vector<11x192xf32>
    %765 = vector.extract_strided_slice %764 {offsets = [0, 0], sizes = [11, 8], strides = [1, 1]} : vector<11x192xf32> to vector<11x8xf32>
    %cst_215 = arith.constant 0.353553385 : f32
    %766 = vector.broadcast %cst_215 : f32 to vector<11x8xf32>
    %767 = arith.mulf %765, %766 : vector<11x8xf32>
    %768 = arith.truncf %767 : vector<11x8xf32> to vector<11x8xbf16>
    %769 = vector.extract_strided_slice %764 {offsets = [0, 64], sizes = [11, 8], strides = [1, 1]} : vector<11x192xf32> to vector<11x8xf32>
    %770 = arith.truncf %769 : vector<11x8xf32> to vector<11x8xbf16>
    %771 = vector.extract_strided_slice %764 {offsets = [0, 128], sizes = [11, 8], strides = [1, 1]} : vector<11x192xf32> to vector<11x8xf32>
    %772 = arith.truncf %771 : vector<11x8xf32> to vector<11x8xbf16>
    "tpu.trace_start"() <{level = 10 : i32, message = "qd,kd->qk"}> : () -> ()
    %cst_216 = arith.constant dense<0.000000e+00> : vector<11x11xf32>
    %773 = tpu.matmul %768, %770, %cst_216 {dimension_numbers = #tpu.dot_dimension_numbers<[1], [1], [0], [0], [0, 0, 1, 0], [], []>} : vector<11x8xbf16>, vector<11x8xbf16>, vector<11x11xf32> -> vector<11x11xf32>
    "tpu.trace_stop"() : () -> ()
    %cst_217 = arith.constant dense<0xFF800000> : vector<11xf32>
    %774 = vector.multi_reduction <maximumf>, %773, %cst_217 [1] : vector<11x11xf32> to vector<11xf32>
    %775 = vector.shape_cast %774 : vector<11xf32> to vector<11x1xf32>
    %776 = vector.broadcast %775 : vector<11x1xf32> to vector<11x11xf32>
    %777 = arith.subf %773, %776 : vector<11x11xf32>
    %778 = math.exp %777 : vector<11x11xf32>
    %cst_218 = arith.constant dense<0.000000e+00> : vector<11xf32>
    %779 = vector.multi_reduction <add>, %778, %cst_218 [1] : vector<11x11xf32> to vector<11xf32>
    %780 = vector.shape_cast %779 : vector<11xf32> to vector<11x1xf32>
    %781 = tpu.reciprocal %780 {approx = true} : vector<11x1xf32> -> vector<11x1xf32>
    %782 = vector.broadcast %781 : vector<11x1xf32> to vector<11x11xf32>
    %783 = arith.mulf %778, %782 : vector<11x11xf32>
    %784 = arith.truncf %783 : vector<11x11xf32> to vector<11x11xbf16>
    %cst_219 = arith.constant dense<0.000000e+00> : vector<11x8xf32>
    %785 = tpu.matmul %784, %772, %cst_219 {dimension_numbers = #tpu.dot_dimension_numbers<[1], [0], [0], [1], [0, 0, 1, 1], [], []>} : vector<11x11xbf16>, vector<11x8xbf16>, vector<11x8xf32> -> vector<11x8xf32>
    %786 = vector.extract_strided_slice %764 {offsets = [0, 8], sizes = [11, 8], strides = [1, 1]} : vector<11x192xf32> to vector<11x8xf32>
    %cst_220 = arith.constant 0.353553385 : f32
    %787 = vector.broadcast %cst_220 : f32 to vector<11x8xf32>
    %788 = arith.mulf %786, %787 : vector<11x8xf32>
    %789 = arith.truncf %788 : vector<11x8xf32> to vector<11x8xbf16>
    %790 = vector.extract_strided_slice %764 {offsets = [0, 72], sizes = [11, 8], strides = [1, 1]} : vector<11x192xf32> to vector<11x8xf32>
    %791 = arith.truncf %790 : vector<11x8xf32> to vector<11x8xbf16>
    %792 = vector.extract_strided_slice %764 {offsets = [0, 136], sizes = [11, 8], strides = [1, 1]} : vector<11x192xf32> to vector<11x8xf32>
    %793 = arith.truncf %792 : vector<11x8xf32> to vector<11x8xbf16>
    "tpu.trace_start"() <{level = 10 : i32, message = "qd,kd->qk"}> : () -> ()
    %cst_221 = arith.constant dense<0.000000e+00> : vector<11x11xf32>
    %794 = tpu.matmul %789, %791, %cst_221 {dimension_numbers = #tpu.dot_dimension_numbers<[1], [1], [0], [0], [0, 0, 1, 0], [], []>} : vector<11x8xbf16>, vector<11x8xbf16>, vector<11x11xf32> -> vector<11x11xf32>
    "tpu.trace_stop"() : () -> ()
    %cst_222 = arith.constant dense<0xFF800000> : vector<11xf32>
    %795 = vector.multi_reduction <maximumf>, %794, %cst_222 [1] : vector<11x11xf32> to vector<11xf32>
    %796 = vector.shape_cast %795 : vector<11xf32> to vector<11x1xf32>
    %797 = vector.broadcast %796 : vector<11x1xf32> to vector<11x11xf32>
    %798 = arith.subf %794, %797 : vector<11x11xf32>
    %799 = math.exp %798 : vector<11x11xf32>
    %cst_223 = arith.constant dense<0.000000e+00> : vector<11xf32>
    %800 = vector.multi_reduction <add>, %799, %cst_223 [1] : vector<11x11xf32> to vector<11xf32>
    %801 = vector.shape_cast %800 : vector<11xf32> to vector<11x1xf32>
    %802 = tpu.reciprocal %801 {approx = true} : vector<11x1xf32> -> vector<11x1xf32>
    %803 = vector.broadcast %802 : vector<11x1xf32> to vector<11x11xf32>
    %804 = arith.mulf %799, %803 : vector<11x11xf32>
    %805 = arith.truncf %804 : vector<11x11xf32> to vector<11x11xbf16>
    %cst_224 = arith.constant dense<0.000000e+00> : vector<11x8xf32>
    %806 = tpu.matmul %805, %793, %cst_224 {dimension_numbers = #tpu.dot_dimension_numbers<[1], [0], [0], [1], [0, 0, 1, 1], [], []>} : vector<11x11xbf16>, vector<11x8xbf16>, vector<11x8xf32> -> vector<11x8xf32>
    %807 = vector.extract_strided_slice %764 {offsets = [0, 16], sizes = [11, 8], strides = [1, 1]} : vector<11x192xf32> to vector<11x8xf32>
    %cst_225 = arith.constant 0.353553385 : f32
    %808 = vector.broadcast %cst_225 : f32 to vector<11x8xf32>
    %809 = arith.mulf %807, %808 : vector<11x8xf32>
    %810 = arith.truncf %809 : vector<11x8xf32> to vector<11x8xbf16>
    %811 = vector.extract_strided_slice %764 {offsets = [0, 80], sizes = [11, 8], strides = [1, 1]} : vector<11x192xf32> to vector<11x8xf32>
    %812 = arith.truncf %811 : vector<11x8xf32> to vector<11x8xbf16>
    %813 = vector.extract_strided_slice %764 {offsets = [0, 144], sizes = [11, 8], strides = [1, 1]} : vector<11x192xf32> to vector<11x8xf32>
    %814 = arith.truncf %813 : vector<11x8xf32> to vector<11x8xbf16>
    "tpu.trace_start"() <{level = 10 : i32, message = "qd,kd->qk"}> : () -> ()
    %cst_226 = arith.constant dense<0.000000e+00> : vector<11x11xf32>
    %815 = tpu.matmul %810, %812, %cst_226 {dimension_numbers = #tpu.dot_dimension_numbers<[1], [1], [0], [0], [0, 0, 1, 0], [], []>} : vector<11x8xbf16>, vector<11x8xbf16>, vector<11x11xf32> -> vector<11x11xf32>
    "tpu.trace_stop"() : () -> ()
    %cst_227 = arith.constant dense<0xFF800000> : vector<11xf32>
    %816 = vector.multi_reduction <maximumf>, %815, %cst_227 [1] : vector<11x11xf32> to vector<11xf32>
    %817 = vector.shape_cast %816 : vector<11xf32> to vector<11x1xf32>
    %818 = vector.broadcast %817 : vector<11x1xf32> to vector<11x11xf32>
    %819 = arith.subf %815, %818 : vector<11x11xf32>
    %820 = math.exp %819 : vector<11x11xf32>
    %cst_228 = arith.constant dense<0.000000e+00> : vector<11xf32>
    %821 = vector.multi_reduction <add>, %820, %cst_228 [1] : vector<11x11xf32> to vector<11xf32>
    %822 = vector.shape_cast %821 : vector<11xf32> to vector<11x1xf32>
    %823 = tpu.reciprocal %822 {approx = true} : vector<11x1xf32> -> vector<11x1xf32>
    %824 = vector.broadcast %823 : vector<11x1xf32> to vector<11x11xf32>
    %825 = arith.mulf %820, %824 : vector<11x11xf32>
    %826 = arith.truncf %825 : vector<11x11xf32> to vector<11x11xbf16>
    %cst_229 = arith.constant dense<0.000000e+00> : vector<11x8xf32>
    %827 = tpu.matmul %826, %814, %cst_229 {dimension_numbers = #tpu.dot_dimension_numbers<[1], [0], [0], [1], [0, 0, 1, 1], [], []>} : vector<11x11xbf16>, vector<11x8xbf16>, vector<11x8xf32> -> vector<11x8xf32>
    %828 = vector.extract_strided_slice %764 {offsets = [0, 24], sizes = [11, 8], strides = [1, 1]} : vector<11x192xf32> to vector<11x8xf32>
    %cst_230 = arith.constant 0.353553385 : f32
    %829 = vector.broadcast %cst_230 : f32 to vector<11x8xf32>
    %830 = arith.mulf %828, %829 : vector<11x8xf32>
    %831 = arith.truncf %830 : vector<11x8xf32> to vector<11x8xbf16>
    %832 = vector.extract_strided_slice %764 {offsets = [0, 88], sizes = [11, 8], strides = [1, 1]} : vector<11x192xf32> to vector<11x8xf32>
    %833 = arith.truncf %832 : vector<11x8xf32> to vector<11x8xbf16>
    %834 = vector.extract_strided_slice %764 {offsets = [0, 152], sizes = [11, 8], strides = [1, 1]} : vector<11x192xf32> to vector<11x8xf32>
    %835 = arith.truncf %834 : vector<11x8xf32> to vector<11x8xbf16>
    "tpu.trace_start"() <{level = 10 : i32, message = "qd,kd->qk"}> : () -> ()
    %cst_231 = arith.constant dense<0.000000e+00> : vector<11x11xf32>
    %836 = tpu.matmul %831, %833, %cst_231 {dimension_numbers = #tpu.dot_dimension_numbers<[1], [1], [0], [0], [0, 0, 1, 0], [], []>} : vector<11x8xbf16>, vector<11x8xbf16>, vector<11x11xf32> -> vector<11x11xf32>
    "tpu.trace_stop"() : () -> ()
    %cst_232 = arith.constant dense<0xFF800000> : vector<11xf32>
    %837 = vector.multi_reduction <maximumf>, %836, %cst_232 [1] : vector<11x11xf32> to vector<11xf32>
    %838 = vector.shape_cast %837 : vector<11xf32> to vector<11x1xf32>
    %839 = vector.broadcast %838 : vector<11x1xf32> to vector<11x11xf32>
    %840 = arith.subf %836, %839 : vector<11x11xf32>
    %841 = math.exp %840 : vector<11x11xf32>
    %cst_233 = arith.constant dense<0.000000e+00> : vector<11xf32>
    %842 = vector.multi_reduction <add>, %841, %cst_233 [1] : vector<11x11xf32> to vector<11xf32>
    %843 = vector.shape_cast %842 : vector<11xf32> to vector<11x1xf32>
    %844 = tpu.reciprocal %843 {approx = true} : vector<11x1xf32> -> vector<11x1xf32>
    %845 = vector.broadcast %844 : vector<11x1xf32> to vector<11x11xf32>
    %846 = arith.mulf %841, %845 : vector<11x11xf32>
    %847 = arith.truncf %846 : vector<11x11xf32> to vector<11x11xbf16>
    %cst_234 = arith.constant dense<0.000000e+00> : vector<11x8xf32>
    %848 = tpu.matmul %847, %835, %cst_234 {dimension_numbers = #tpu.dot_dimension_numbers<[1], [0], [0], [1], [0, 0, 1, 1], [], []>} : vector<11x11xbf16>, vector<11x8xbf16>, vector<11x8xf32> -> vector<11x8xf32>
    %849 = vector.extract_strided_slice %764 {offsets = [0, 32], sizes = [11, 8], strides = [1, 1]} : vector<11x192xf32> to vector<11x8xf32>
    %cst_235 = arith.constant 0.353553385 : f32
    %850 = vector.broadcast %cst_235 : f32 to vector<11x8xf32>
    %851 = arith.mulf %849, %850 : vector<11x8xf32>
    %852 = arith.truncf %851 : vector<11x8xf32> to vector<11x8xbf16>
    %853 = vector.extract_strided_slice %764 {offsets = [0, 96], sizes = [11, 8], strides = [1, 1]} : vector<11x192xf32> to vector<11x8xf32>
    %854 = arith.truncf %853 : vector<11x8xf32> to vector<11x8xbf16>
    %855 = vector.extract_strided_slice %764 {offsets = [0, 160], sizes = [11, 8], strides = [1, 1]} : vector<11x192xf32> to vector<11x8xf32>
    %856 = arith.truncf %855 : vector<11x8xf32> to vector<11x8xbf16>
    "tpu.trace_start"() <{level = 10 : i32, message = "qd,kd->qk"}> : () -> ()
    %cst_236 = arith.constant dense<0.000000e+00> : vector<11x11xf32>
    %857 = tpu.matmul %852, %854, %cst_236 {dimension_numbers = #tpu.dot_dimension_numbers<[1], [1], [0], [0], [0, 0, 1, 0], [], []>} : vector<11x8xbf16>, vector<11x8xbf16>, vector<11x11xf32> -> vector<11x11xf32>
    "tpu.trace_stop"() : () -> ()
    %cst_237 = arith.constant dense<0xFF800000> : vector<11xf32>
    %858 = vector.multi_reduction <maximumf>, %857, %cst_237 [1] : vector<11x11xf32> to vector<11xf32>
    %859 = vector.shape_cast %858 : vector<11xf32> to vector<11x1xf32>
    %860 = vector.broadcast %859 : vector<11x1xf32> to vector<11x11xf32>
    %861 = arith.subf %857, %860 : vector<11x11xf32>
    %862 = math.exp %861 : vector<11x11xf32>
    %cst_238 = arith.constant dense<0.000000e+00> : vector<11xf32>
    %863 = vector.multi_reduction <add>, %862, %cst_238 [1] : vector<11x11xf32> to vector<11xf32>
    %864 = vector.shape_cast %863 : vector<11xf32> to vector<11x1xf32>
    %865 = tpu.reciprocal %864 {approx = true} : vector<11x1xf32> -> vector<11x1xf32>
    %866 = vector.broadcast %865 : vector<11x1xf32> to vector<11x11xf32>
    %867 = arith.mulf %862, %866 : vector<11x11xf32>
    %868 = arith.truncf %867 : vector<11x11xf32> to vector<11x11xbf16>
    %cst_239 = arith.constant dense<0.000000e+00> : vector<11x8xf32>
    %869 = tpu.matmul %868, %856, %cst_239 {dimension_numbers = #tpu.dot_dimension_numbers<[1], [0], [0], [1], [0, 0, 1, 1], [], []>} : vector<11x11xbf16>, vector<11x8xbf16>, vector<11x8xf32> -> vector<11x8xf32>
    %870 = vector.extract_strided_slice %764 {offsets = [0, 40], sizes = [11, 8], strides = [1, 1]} : vector<11x192xf32> to vector<11x8xf32>
    %cst_240 = arith.constant 0.353553385 : f32
    %871 = vector.broadcast %cst_240 : f32 to vector<11x8xf32>
    %872 = arith.mulf %870, %871 : vector<11x8xf32>
    %873 = arith.truncf %872 : vector<11x8xf32> to vector<11x8xbf16>
    %874 = vector.extract_strided_slice %764 {offsets = [0, 104], sizes = [11, 8], strides = [1, 1]} : vector<11x192xf32> to vector<11x8xf32>
    %875 = arith.truncf %874 : vector<11x8xf32> to vector<11x8xbf16>
    %876 = vector.extract_strided_slice %764 {offsets = [0, 168], sizes = [11, 8], strides = [1, 1]} : vector<11x192xf32> to vector<11x8xf32>
    %877 = arith.truncf %876 : vector<11x8xf32> to vector<11x8xbf16>
    "tpu.trace_start"() <{level = 10 : i32, message = "qd,kd->qk"}> : () -> ()
    %cst_241 = arith.constant dense<0.000000e+00> : vector<11x11xf32>
    %878 = tpu.matmul %873, %875, %cst_241 {dimension_numbers = #tpu.dot_dimension_numbers<[1], [1], [0], [0], [0, 0, 1, 0], [], []>} : vector<11x8xbf16>, vector<11x8xbf16>, vector<11x11xf32> -> vector<11x11xf32>
    "tpu.trace_stop"() : () -> ()
    %cst_242 = arith.constant dense<0xFF800000> : vector<11xf32>
    %879 = vector.multi_reduction <maximumf>, %878, %cst_242 [1] : vector<11x11xf32> to vector<11xf32>
    %880 = vector.shape_cast %879 : vector<11xf32> to vector<11x1xf32>
    %881 = vector.broadcast %880 : vector<11x1xf32> to vector<11x11xf32>
    %882 = arith.subf %878, %881 : vector<11x11xf32>
    %883 = math.exp %882 : vector<11x11xf32>
    %cst_243 = arith.constant dense<0.000000e+00> : vector<11xf32>
    %884 = vector.multi_reduction <add>, %883, %cst_243 [1] : vector<11x11xf32> to vector<11xf32>
    %885 = vector.shape_cast %884 : vector<11xf32> to vector<11x1xf32>
    %886 = tpu.reciprocal %885 {approx = true} : vector<11x1xf32> -> vector<11x1xf32>
    %887 = vector.broadcast %886 : vector<11x1xf32> to vector<11x11xf32>
    %888 = arith.mulf %883, %887 : vector<11x11xf32>
    %889 = arith.truncf %888 : vector<11x11xf32> to vector<11x11xbf16>
    %cst_244 = arith.constant dense<0.000000e+00> : vector<11x8xf32>
    %890 = tpu.matmul %889, %877, %cst_244 {dimension_numbers = #tpu.dot_dimension_numbers<[1], [0], [0], [1], [0, 0, 1, 1], [], []>} : vector<11x11xbf16>, vector<11x8xbf16>, vector<11x8xf32> -> vector<11x8xf32>
    %891 = vector.extract_strided_slice %764 {offsets = [0, 48], sizes = [11, 8], strides = [1, 1]} : vector<11x192xf32> to vector<11x8xf32>
    %cst_245 = arith.constant 0.353553385 : f32
    %892 = vector.broadcast %cst_245 : f32 to vector<11x8xf32>
    %893 = arith.mulf %891, %892 : vector<11x8xf32>
    %894 = arith.truncf %893 : vector<11x8xf32> to vector<11x8xbf16>
    %895 = vector.extract_strided_slice %764 {offsets = [0, 112], sizes = [11, 8], strides = [1, 1]} : vector<11x192xf32> to vector<11x8xf32>
    %896 = arith.truncf %895 : vector<11x8xf32> to vector<11x8xbf16>
    %897 = vector.extract_strided_slice %764 {offsets = [0, 176], sizes = [11, 8], strides = [1, 1]} : vector<11x192xf32> to vector<11x8xf32>
    %898 = arith.truncf %897 : vector<11x8xf32> to vector<11x8xbf16>
    "tpu.trace_start"() <{level = 10 : i32, message = "qd,kd->qk"}> : () -> ()
    %cst_246 = arith.constant dense<0.000000e+00> : vector<11x11xf32>
    %899 = tpu.matmul %894, %896, %cst_246 {dimension_numbers = #tpu.dot_dimension_numbers<[1], [1], [0], [0], [0, 0, 1, 0], [], []>} : vector<11x8xbf16>, vector<11x8xbf16>, vector<11x11xf32> -> vector<11x11xf32>
    "tpu.trace_stop"() : () -> ()
    %cst_247 = arith.constant dense<0xFF800000> : vector<11xf32>
    %900 = vector.multi_reduction <maximumf>, %899, %cst_247 [1] : vector<11x11xf32> to vector<11xf32>
    %901 = vector.shape_cast %900 : vector<11xf32> to vector<11x1xf32>
    %902 = vector.broadcast %901 : vector<11x1xf32> to vector<11x11xf32>
    %903 = arith.subf %899, %902 : vector<11x11xf32>
    %904 = math.exp %903 : vector<11x11xf32>
    %cst_248 = arith.constant dense<0.000000e+00> : vector<11xf32>
    %905 = vector.multi_reduction <add>, %904, %cst_248 [1] : vector<11x11xf32> to vector<11xf32>
    %906 = vector.shape_cast %905 : vector<11xf32> to vector<11x1xf32>
    %907 = tpu.reciprocal %906 {approx = true} : vector<11x1xf32> -> vector<11x1xf32>
    %908 = vector.broadcast %907 : vector<11x1xf32> to vector<11x11xf32>
    %909 = arith.mulf %904, %908 : vector<11x11xf32>
    %910 = arith.truncf %909 : vector<11x11xf32> to vector<11x11xbf16>
    %cst_249 = arith.constant dense<0.000000e+00> : vector<11x8xf32>
    %911 = tpu.matmul %910, %898, %cst_249 {dimension_numbers = #tpu.dot_dimension_numbers<[1], [0], [0], [1], [0, 0, 1, 1], [], []>} : vector<11x11xbf16>, vector<11x8xbf16>, vector<11x8xf32> -> vector<11x8xf32>
    %912 = vector.extract_strided_slice %764 {offsets = [0, 56], sizes = [11, 8], strides = [1, 1]} : vector<11x192xf32> to vector<11x8xf32>
    %cst_250 = arith.constant 0.353553385 : f32
    %913 = vector.broadcast %cst_250 : f32 to vector<11x8xf32>
    %914 = arith.mulf %912, %913 : vector<11x8xf32>
    %915 = arith.truncf %914 : vector<11x8xf32> to vector<11x8xbf16>
    %916 = vector.extract_strided_slice %764 {offsets = [0, 120], sizes = [11, 8], strides = [1, 1]} : vector<11x192xf32> to vector<11x8xf32>
    %917 = arith.truncf %916 : vector<11x8xf32> to vector<11x8xbf16>
    %918 = vector.extract_strided_slice %764 {offsets = [0, 184], sizes = [11, 8], strides = [1, 1]} : vector<11x192xf32> to vector<11x8xf32>
    %919 = arith.truncf %918 : vector<11x8xf32> to vector<11x8xbf16>
    "tpu.trace_start"() <{level = 10 : i32, message = "qd,kd->qk"}> : () -> ()
    %cst_251 = arith.constant dense<0.000000e+00> : vector<11x11xf32>
    %920 = tpu.matmul %915, %917, %cst_251 {dimension_numbers = #tpu.dot_dimension_numbers<[1], [1], [0], [0], [0, 0, 1, 0], [], []>} : vector<11x8xbf16>, vector<11x8xbf16>, vector<11x11xf32> -> vector<11x11xf32>
    "tpu.trace_stop"() : () -> ()
    %cst_252 = arith.constant dense<0xFF800000> : vector<11xf32>
    %921 = vector.multi_reduction <maximumf>, %920, %cst_252 [1] : vector<11x11xf32> to vector<11xf32>
    %922 = vector.shape_cast %921 : vector<11xf32> to vector<11x1xf32>
    %923 = vector.broadcast %922 : vector<11x1xf32> to vector<11x11xf32>
    %924 = arith.subf %920, %923 : vector<11x11xf32>
    %925 = math.exp %924 : vector<11x11xf32>
    %cst_253 = arith.constant dense<0.000000e+00> : vector<11xf32>
    %926 = vector.multi_reduction <add>, %925, %cst_253 [1] : vector<11x11xf32> to vector<11xf32>
    %927 = vector.shape_cast %926 : vector<11xf32> to vector<11x1xf32>
    %928 = tpu.reciprocal %927 {approx = true} : vector<11x1xf32> -> vector<11x1xf32>
    %929 = vector.broadcast %928 : vector<11x1xf32> to vector<11x11xf32>
    %930 = arith.mulf %925, %929 : vector<11x11xf32>
    %931 = arith.truncf %930 : vector<11x11xf32> to vector<11x11xbf16>
    %cst_254 = arith.constant dense<0.000000e+00> : vector<11x8xf32>
    %932 = tpu.matmul %931, %919, %cst_254 {dimension_numbers = #tpu.dot_dimension_numbers<[1], [0], [0], [1], [0, 0, 1, 1], [], []>} : vector<11x11xbf16>, vector<11x8xbf16>, vector<11x8xf32> -> vector<11x8xf32>
    %933 = tpu.concatenate %785, %806, %827, %848, %869, %890, %911, %932 in 1 : vector<11x8xf32>, vector<11x8xf32>, vector<11x8xf32>, vector<11x8xf32>, vector<11x8xf32>, vector<11x8xf32>, vector<11x8xf32>, vector<11x8xf32> -> vector<11x64xf32>
    %934 = arith.truncf %933 : vector<11x64xf32> to vector<11x64xbf16>
    %cst_255 = arith.constant dense<0.000000e+00> : vector<11x64xf32>
    %935 = tpu.matmul %934, %2, %cst_255 {dimension_numbers = #tpu.dot_dimension_numbers<[1], [0], [0], [1], [0, 0, 1, 1], [], []>} : vector<11x64xbf16>, vector<64x64xbf16>, vector<11x64xf32> -> vector<11x64xf32>
    %936 = arith.addf %760, %935 : vector<11x64xf32>
    %937 = vector.broadcast %3 : vector<1x64xf32> to vector<11x64xf32>
    %938 = arith.addf %936, %937 : vector<11x64xf32>
    %cst_256 = arith.constant dense<0.000000e+00> : vector<11xf32>
    %939 = vector.multi_reduction <add>, %938, %cst_256 [1] : vector<11x64xf32> to vector<11xf32>
    %940 = vector.shape_cast %939 : vector<11xf32> to vector<11x1xf32>
    %cst_257 = arith.constant 6.400000e+01 : f32
    %941 = vector.broadcast %cst_257 : f32 to vector<11x1xf32>
    %942 = arith.divf %940, %941 : vector<11x1xf32>
    %943 = vector.broadcast %942 : vector<11x1xf32> to vector<11x64xf32>
    %944 = arith.subf %938, %943 : vector<11x64xf32>
    %945 = arith.mulf %944, %944 : vector<11x64xf32>
    %cst_258 = arith.constant dense<0.000000e+00> : vector<11xf32>
    %946 = vector.multi_reduction <add>, %945, %cst_258 [1] : vector<11x64xf32> to vector<11xf32>
    %947 = vector.shape_cast %946 : vector<11xf32> to vector<11x1xf32>
    %cst_259 = arith.constant 6.400000e+01 : f32
    %948 = vector.broadcast %cst_259 : f32 to vector<11x1xf32>
    %949 = arith.divf %947, %948 : vector<11x1xf32>
    %950 = vector.broadcast %942 : vector<11x1xf32> to vector<11x64xf32>
    %951 = arith.subf %938, %950 : vector<11x64xf32>
    %cst_260 = arith.constant 9.99999974E-6 : f32
    %952 = vector.broadcast %cst_260 : f32 to vector<11x1xf32>
    %953 = arith.addf %949, %952 : vector<11x1xf32>
    %954 = math.rsqrt %953 : vector<11x1xf32>
    %955 = vector.broadcast %954 : vector<11x1xf32> to vector<11x64xf32>
    %956 = arith.mulf %951, %955 : vector<11x64xf32>
    %957 = vector.broadcast %4 : vector<1x64xf32> to vector<11x64xf32>
    %958 = arith.mulf %956, %957 : vector<11x64xf32>
    %959 = vector.broadcast %5 : vector<1x64xf32> to vector<11x64xf32>
    %960 = arith.addf %958, %959 : vector<11x64xf32>
    %961 = arith.truncf %960 : vector<11x64xf32> to vector<11x64xbf16>
    %cst_261 = arith.constant dense<0.000000e+00> : vector<11x64xf32>
    %962 = tpu.matmul %961, %6, %cst_261 {dimension_numbers = #tpu.dot_dimension_numbers<[1], [0], [0], [1], [0, 0, 1, 1], [], []>} : vector<11x64xbf16>, vector<64x64xbf16>, vector<11x64xf32> -> vector<11x64xf32>
    %963 = vector.broadcast %7 : vector<1x64xf32> to vector<11x64xf32>
    %964 = arith.addf %962, %963 : vector<11x64xf32>
    %cst_262 = arith.constant 5.000000e-01 : f32
    %965 = vector.broadcast %cst_262 : f32 to vector<11x64xf32>
    %966 = arith.mulf %965, %964 : vector<11x64xf32>
    %cst_263 = arith.constant 4.471500e-02 : f32
    %967 = vector.broadcast %cst_263 : f32 to vector<11x64xf32>
    %968 = arith.mulf %967, %964 : vector<11x64xf32>
    %969 = arith.mulf %968, %964 : vector<11x64xf32>
    %970 = arith.mulf %969, %964 : vector<11x64xf32>
    %971 = arith.addf %964, %970 : vector<11x64xf32>
    %cst_264 = arith.constant 0.797884583 : f32
    %972 = vector.broadcast %cst_264 : f32 to vector<11x64xf32>
    %973 = arith.mulf %972, %971 : vector<11x64xf32>
    %974 = math.tanh %973 : vector<11x64xf32>
    %cst_265 = arith.constant 1.000000e+00 : f32
    %975 = vector.broadcast %cst_265 : f32 to vector<11x64xf32>
    %976 = arith.addf %975, %974 : vector<11x64xf32>
    %977 = arith.mulf %966, %976 : vector<11x64xf32>
    %978 = arith.truncf %977 : vector<11x64xf32> to vector<11x64xbf16>
    %cst_266 = arith.constant dense<0.000000e+00> : vector<11x64xf32>
    %979 = tpu.matmul %978, %8, %cst_266 {dimension_numbers = #tpu.dot_dimension_numbers<[1], [0], [0], [1], [0, 0, 1, 1], [], []>} : vector<11x64xbf16>, vector<64x64xbf16>, vector<11x64xf32> -> vector<11x64xf32>
    %980 = vector.broadcast %9 : vector<1x64xf32> to vector<11x64xf32>
    %981 = arith.addf %979, %980 : vector<11x64xf32>
    %982 = arith.addf %960, %981 : vector<11x64xf32>
    %cst_267 = arith.constant dense<0.000000e+00> : vector<11xf32>
    %983 = vector.multi_reduction <add>, %982, %cst_267 [1] : vector<11x64xf32> to vector<11xf32>
    %984 = vector.shape_cast %983 : vector<11xf32> to vector<11x1xf32>
    %cst_268 = arith.constant 6.400000e+01 : f32
    %985 = vector.broadcast %cst_268 : f32 to vector<11x1xf32>
    %986 = arith.divf %984, %985 : vector<11x1xf32>
    %987 = vector.broadcast %986 : vector<11x1xf32> to vector<11x64xf32>
    %988 = arith.subf %982, %987 : vector<11x64xf32>
    %989 = arith.mulf %988, %988 : vector<11x64xf32>
    %cst_269 = arith.constant dense<0.000000e+00> : vector<11xf32>
    %990 = vector.multi_reduction <add>, %989, %cst_269 [1] : vector<11x64xf32> to vector<11xf32>
    %991 = vector.shape_cast %990 : vector<11xf32> to vector<11x1xf32>
    %cst_270 = arith.constant 6.400000e+01 : f32
    %992 = vector.broadcast %cst_270 : f32 to vector<11x1xf32>
    %993 = arith.divf %991, %992 : vector<11x1xf32>
    %994 = vector.broadcast %986 : vector<11x1xf32> to vector<11x64xf32>
    %995 = arith.subf %982, %994 : vector<11x64xf32>
    %cst_271 = arith.constant 9.99999974E-6 : f32
    %996 = vector.broadcast %cst_271 : f32 to vector<11x1xf32>
    %997 = arith.addf %993, %996 : vector<11x1xf32>
    %998 = math.rsqrt %997 : vector<11x1xf32>
    %999 = vector.broadcast %998 : vector<11x1xf32> to vector<11x64xf32>
    %1000 = arith.mulf %995, %999 : vector<11x64xf32>
    %1001 = vector.broadcast %10 : vector<1x64xf32> to vector<11x64xf32>
    %1002 = arith.mulf %1000, %1001 : vector<11x64xf32>
    %1003 = vector.broadcast %11 : vector<1x64xf32> to vector<11x64xf32>
    %1004 = arith.addf %1002, %1003 : vector<11x64xf32>
    %c3_272 = arith.constant 3 : index
    %c0_273 = arith.constant 0 : index
    %c0_274 = arith.constant 0 : index
    %1005 = vector.load %arg14[%c3_272, %c0_273, %c0_274] : memref<4x11x64xf32, #tpu.memory_space<vmem>>, vector<1x11x64xf32>
    %1006 = vector.shape_cast %1005 : vector<1x11x64xf32> to vector<11x64xf32>
    %1007 = vector.shape_cast %1004 : vector<11x64xf32> to vector<1x11x64xf32>
    tpu.vector_store %arg14[%c3_272, %c0_273, %c0_274], %1007 {strides = array<i32>} : memref<4x11x64xf32, #tpu.memory_space<vmem>>, vector<1x11x64xf32>,
    return
  }
  func.func @transform_0(%arg0: i32) -> (i32, i32, i32) {
    %c0_i32 = arith.constant 0 : i32
    %c0_i32_0 = arith.constant 0 : i32
    %c0_i32_1 = arith.constant 0 : i32
    return %arg0, %c0_i32, %c0_i32_0 : i32, i32, i32
  }
  func.func @transform_1(%arg0: i32) -> (i32, i32) {
    %c0_i32 = arith.constant 0 : i32
    %c0_i32_0 = arith.constant 0 : i32
    %c0_i32_1 = arith.constant 0 : i32
    return %c0_i32, %c0_i32_0 : i32, i32
  }
  func.func @transform_2(%arg0: i32) -> (i32, i32) {
    %c0_i32 = arith.constant 0 : i32
    %c0_i32_0 = arith.constant 0 : i32
    %c0_i32_1 = arith.constant 0 : i32
    return %c0_i32, %c0_i32_0 : i32, i32
  }
  func.func @transform_3(%arg0: i32) -> (i32, i32) {
    %c0_i32 = arith.constant 0 : i32
    %c0_i32_0 = arith.constant 0 : i32
    %c0_i32_1 = arith.constant 0 : i32
    return %c0_i32, %c0_i32_0 : i32, i32
  }
  func.func @transform_4(%arg0: i32) -> (i32, i32) {
    %c0_i32 = arith.constant 0 : i32
    %c0_i32_0 = arith.constant 0 : i32
    %c0_i32_1 = arith.constant 0 : i32
    return %c0_i32, %c0_i32_0 : i32, i32
  }
  func.func @transform_5(%arg0: i32) -> (i32, i32) {
    %c0_i32 = arith.constant 0 : i32
    %c0_i32_0 = arith.constant 0 : i32
    %c0_i32_1 = arith.constant 0 : i32
    return %c0_i32, %c0_i32_0 : i32, i32
  }
  func.func @transform_6(%arg0: i32) -> (i32, i32) {
    %c0_i32 = arith.constant 0 : i32
    %c0_i32_0 = arith.constant 0 : i32
    %c0_i32_1 = arith.constant 0 : i32
    return %c0_i32, %c0_i32_0 : i32, i32
  }
  func.func @transform_7(%arg0: i32) -> (i32, i32) {
    %c0_i32 = arith.constant 0 : i32
    %c0_i32_0 = arith.constant 0 : i32
    %c0_i32_1 = arith.constant 0 : i32
    return %c0_i32, %c0_i32_0 : i32, i32
  }
  func.func @transform_8(%arg0: i32) -> (i32, i32) {
    %c0_i32 = arith.constant 0 : i32
    %c0_i32_0 = arith.constant 0 : i32
    %c0_i32_1 = arith.constant 0 : i32
    return %c0_i32, %c0_i32_0 : i32, i32
  }
  func.func @transform_9(%arg0: i32) -> (i32, i32) {
    %c0_i32 = arith.constant 0 : i32
    %c0_i32_0 = arith.constant 0 : i32
    %c0_i32_1 = arith.constant 0 : i32
    return %c0_i32, %c0_i32_0 : i32, i32
  }
  func.func @transform_10(%arg0: i32) -> (i32, i32) {
    %c0_i32 = arith.constant 0 : i32
    %c0_i32_0 = arith.constant 0 : i32
    %c0_i32_1 = arith.constant 0 : i32
    return %c0_i32, %c0_i32_0 : i32, i32
  }
  func.func @transform_11(%arg0: i32) -> (i32, i32) {
    %c0_i32 = arith.constant 0 : i32
    %c0_i32_0 = arith.constant 0 : i32
    %c0_i32_1 = arith.constant 0 : i32
    return %c0_i32, %c0_i32_0 : i32, i32
  }
  func.func @transform_12(%arg0: i32) -> (i32, i32) {
    %c0_i32 = arith.constant 0 : i32
    %c0_i32_0 = arith.constant 0 : i32
    %c0_i32_1 = arith.constant 0 : i32
    return %c0_i32, %c0_i32_0 : i32, i32
  }
  func.func @transform_13(%arg0: i32) -> (i32, i32, i32) {
    %c0_i32 = arith.constant 0 : i32
    %c0_i32_0 = arith.constant 0 : i32
    %c0_i32_1 = arith.constant 0 : i32
    return %arg0, %c0_i32, %c0_i32_0 : i32, i32, i32
  }
}

module attributes {stable_mosaic.version = 11 : i64} {
  func.func @_tail_kernel(%arg0: i32, %arg1: memref<32x64xf32, #tpu.memory_space<vmem>>, %arg2: memref<32x16xf32, #tpu.memory_space<vmem>>, %arg3: memref<32x64xf32, #tpu.memory_space<vmem>>, %arg4: memref<32x64xf32, #tpu.memory_space<vmem>>, %arg5: memref<80x128xbf16, #tpu.memory_space<vmem>>, %arg6: memref<1x128xf32, #tpu.memory_space<vmem>>, %arg7: memref<64x128xbf16, #tpu.memory_space<vmem>>, %arg8: memref<1x128xf32, #tpu.memory_space<vmem>>, %arg9: memref<32x128xf32, #tpu.memory_space<vmem>>) attributes {dimension_semantics = [#tpu.dimension_semantics<parallel>], iteration_bounds = array<i64: 2>, scalar_prefetch = 0 : i64, scratch_operands = 0 : i64, tpu.core_type = #tpu.core_type<tc>, window_params = [{transform_indices = @transform_0, window_bounds = array<i64: 32, 64>}, {transform_indices = @transform_1, window_bounds = array<i64: 32, 16>}, {transform_indices = @transform_2, window_bounds = array<i64: 32, 64>}, {transform_indices = @transform_3, window_bounds = array<i64: 32, 64>}, {pipeline_mode = #tpu.pipeline_mode<synchronous>, transform_indices = @transform_4, window_bounds = array<i64: 80, 128>}, {pipeline_mode = #tpu.pipeline_mode<synchronous>, transform_indices = @transform_5, window_bounds = array<i64: 1, 128>}, {pipeline_mode = #tpu.pipeline_mode<synchronous>, transform_indices = @transform_6, window_bounds = array<i64: 64, 128>}, {pipeline_mode = #tpu.pipeline_mode<synchronous>, transform_indices = @transform_7, window_bounds = array<i64: 1, 128>}, {transform_indices = @transform_8, window_bounds = array<i64: 32, 128>}]} {
    %c0 = arith.constant 0 : index
    %c0_0 = arith.constant 0 : index
    %0 = vector.load %arg1[%c0, %c0_0] : memref<32x64xf32, #tpu.memory_space<vmem>>, vector<32x64xf32>
    %c0_1 = arith.constant 0 : index
    %c0_2 = arith.constant 0 : index
    %1 = vector.load %arg2[%c0_1, %c0_2] : memref<32x16xf32, #tpu.memory_space<vmem>>, vector<32x16xf32>
    %2 = tpu.concatenate %0, %1 in 1 : vector<32x64xf32>, vector<32x16xf32> -> vector<32x80xf32>
    %3 = arith.truncf %2 : vector<32x80xf32> to vector<32x80xbf16>
    %c0_3 = arith.constant 0 : index
    %c0_4 = arith.constant 0 : index
    %4 = vector.load %arg5[%c0_3, %c0_4] : memref<80x128xbf16, #tpu.memory_space<vmem>>, vector<80x128xbf16>
    %cst = arith.constant dense<0.000000e+00> : vector<32x128xf32>
    %5 = tpu.matmul %3, %4, %cst {dimension_numbers = #tpu.dot_dimension_numbers<[1], [0], [0], [1], [0, 0, 1, 1], [], []>} : vector<32x80xbf16>, vector<80x128xbf16>, vector<32x128xf32> -> vector<32x128xf32>
    %c0_5 = arith.constant 0 : index
    %c0_6 = arith.constant 0 : index
    %6 = vector.load %arg6[%c0_5, %c0_6] : memref<1x128xf32, #tpu.memory_space<vmem>>, vector<1x128xf32>
    %7 = vector.broadcast %6 : vector<1x128xf32> to vector<32x128xf32>
    %8 = arith.addf %5, %7 : vector<32x128xf32>
    %9 = vector.extract_strided_slice %8 {offsets = [0, 0], sizes = [32, 64], strides = [1, 1]} : vector<32x128xf32> to vector<32x64xf32>
    %10 = arith.negf %9 : vector<32x64xf32>
    %11 = math.exp %10 : vector<32x64xf32>
    %cst_7 = arith.constant 1.000000e+00 : f32
    %12 = vector.broadcast %cst_7 : f32 to vector<32x64xf32>
    %13 = arith.addf %12, %11 : vector<32x64xf32>
    %14 = arith.divf %12, %13 : vector<32x64xf32>
    %15 = vector.extract_strided_slice %8 {offsets = [0, 64], sizes = [32, 64], strides = [1, 1]} : vector<32x128xf32> to vector<32x64xf32>
    %16 = math.tanh %15 : vector<32x64xf32>
    %17 = arith.mulf %14, %16 : vector<32x64xf32>
    %18 = arith.truncf %17 : vector<32x64xf32> to vector<32x64xbf16>
    %c0_8 = arith.constant 0 : index
    %c0_9 = arith.constant 0 : index
    %19 = vector.load %arg7[%c0_8, %c0_9] : memref<64x128xbf16, #tpu.memory_space<vmem>>, vector<64x128xbf16>
    %cst_10 = arith.constant dense<0.000000e+00> : vector<32x128xf32>
    %20 = tpu.matmul %18, %19, %cst_10 {dimension_numbers = #tpu.dot_dimension_numbers<[1], [0], [0], [1], [0, 0, 1, 1], [], []>} : vector<32x64xbf16>, vector<64x128xbf16>, vector<32x128xf32> -> vector<32x128xf32>
    %c0_11 = arith.constant 0 : index
    %c0_12 = arith.constant 0 : index
    %21 = vector.load %arg8[%c0_11, %c0_12] : memref<1x128xf32, #tpu.memory_space<vmem>>, vector<1x128xf32>
    %22 = vector.broadcast %21 : vector<1x128xf32> to vector<32x128xf32>
    %23 = arith.addf %20, %22 : vector<32x128xf32>
    %c0_13 = arith.constant 0 : index
    %c0_14 = arith.constant 0 : index
    %24 = vector.load %arg3[%c0_13, %c0_14] : memref<32x64xf32, #tpu.memory_space<vmem>>, vector<32x64xf32>
    %25 = vector.extract_strided_slice %23 {offsets = [0, 0], sizes = [32, 64], strides = [1, 1]} : vector<32x128xf32> to vector<32x64xf32>
    %26 = arith.addf %24, %25 : vector<32x64xf32>
    %cst_15 = arith.constant 0.707106769 : f32
    %27 = vector.broadcast %cst_15 : f32 to vector<32x64xf32>
    %28 = arith.mulf %26, %27 : vector<32x64xf32>
    %c0_16 = arith.constant 0 : index
    %c0_17 = arith.constant 0 : index
    %29 = vector.load %arg4[%c0_16, %c0_17] : memref<32x64xf32, #tpu.memory_space<vmem>>, vector<32x64xf32>
    %30 = vector.extract_strided_slice %23 {offsets = [0, 64], sizes = [32, 64], strides = [1, 1]} : vector<32x128xf32> to vector<32x64xf32>
    %31 = arith.addf %29, %30 : vector<32x64xf32>
    %32 = tpu.concatenate %28, %31 in 1 : vector<32x64xf32>, vector<32x64xf32> -> vector<32x128xf32>
    %c0_18 = arith.constant 0 : index
    %c0_19 = arith.constant 0 : index
    %33 = vector.load %arg9[%c0_18, %c0_19] : memref<32x128xf32, #tpu.memory_space<vmem>>, vector<32x128xf32>
    tpu.vector_store %arg9[%c0_18, %c0_19], %32 {strides = array<i32>} : memref<32x128xf32, #tpu.memory_space<vmem>>, vector<32x128xf32>,
    return
  }
  func.func @transform_0(%arg0: i32) -> (i32, i32) {
    %c0_i32 = arith.constant 0 : i32
    %c0_i32_0 = arith.constant 0 : i32
    return %arg0, %c0_i32 : i32, i32
  }
  func.func @transform_1(%arg0: i32) -> (i32, i32) {
    %c0_i32 = arith.constant 0 : i32
    %c0_i32_0 = arith.constant 0 : i32
    return %arg0, %c0_i32 : i32, i32
  }
  func.func @transform_2(%arg0: i32) -> (i32, i32) {
    %c0_i32 = arith.constant 0 : i32
    %c0_i32_0 = arith.constant 0 : i32
    return %arg0, %c0_i32 : i32, i32
  }
  func.func @transform_3(%arg0: i32) -> (i32, i32) {
    %c0_i32 = arith.constant 0 : i32
    %c0_i32_0 = arith.constant 0 : i32
    return %arg0, %c0_i32 : i32, i32
  }
  func.func @transform_4(%arg0: i32) -> (i32, i32) {
    %c0_i32 = arith.constant 0 : i32
    %c0_i32_0 = arith.constant 0 : i32
    %c0_i32_1 = arith.constant 0 : i32
    return %c0_i32, %c0_i32_0 : i32, i32
  }
  func.func @transform_5(%arg0: i32) -> (i32, i32) {
    %c0_i32 = arith.constant 0 : i32
    %c0_i32_0 = arith.constant 0 : i32
    %c0_i32_1 = arith.constant 0 : i32
    return %c0_i32, %c0_i32_0 : i32, i32
  }
  func.func @transform_6(%arg0: i32) -> (i32, i32) {
    %c0_i32 = arith.constant 0 : i32
    %c0_i32_0 = arith.constant 0 : i32
    %c0_i32_1 = arith.constant 0 : i32
    return %c0_i32, %c0_i32_0 : i32, i32
  }
  func.func @transform_7(%arg0: i32) -> (i32, i32) {
    %c0_i32 = arith.constant 0 : i32
    %c0_i32_0 = arith.constant 0 : i32
    %c0_i32_1 = arith.constant 0 : i32
    return %c0_i32, %c0_i32_0 : i32, i32
  }
  func.func @transform_8(%arg0: i32) -> (i32, i32) {
    %c0_i32 = arith.constant 0 : i32
    %c0_i32_0 = arith.constant 0 : i32
    return %arg0, %c0_i32 : i32, i32
  }
}

module attributes {stable_mosaic.version = 11 : i64} {
  func.func @kernel(%arg0: i32, %arg1: memref<32x64xf32, #tpu.memory_space<vmem>>, %arg2: memref<64x64xbf16, #tpu.memory_space<vmem>>, %arg3: memref<1x64xf32, #tpu.memory_space<vmem>>, %arg4: memref<1x64xf32, #tpu.memory_space<vmem>>, %arg5: memref<1x1xf32, #tpu.memory_space<vmem>>, %arg6: memref<32x1xf32, #tpu.memory_space<vmem>>) attributes {dimension_semantics = [#tpu.dimension_semantics<parallel>], iteration_bounds = array<i64: 2>, scalar_prefetch = 0 : i64, scratch_operands = 0 : i64, tpu.core_type = #tpu.core_type<tc>, window_params = [{transform_indices = @transform_0, window_bounds = array<i64: 32, 64>}, {pipeline_mode = #tpu.pipeline_mode<synchronous>, transform_indices = @transform_1, window_bounds = array<i64: 64, 64>}, {pipeline_mode = #tpu.pipeline_mode<synchronous>, transform_indices = @transform_2, window_bounds = array<i64: 1, 64>}, {pipeline_mode = #tpu.pipeline_mode<synchronous>, transform_indices = @transform_3, window_bounds = array<i64: 1, 64>}, {pipeline_mode = #tpu.pipeline_mode<synchronous>, transform_indices = @transform_4, window_bounds = array<i64: 1, 1>}, {transform_indices = @transform_5, window_bounds = array<i64: 32, 1>}]} {
    %c0 = arith.constant 0 : index
    %c0_0 = arith.constant 0 : index
    %0 = vector.load %arg1[%c0, %c0_0] : memref<32x64xf32, #tpu.memory_space<vmem>>, vector<32x64xf32>
    %cst = arith.constant 0.707106769 : f32
    %1 = vector.broadcast %cst : f32 to vector<32x64xf32>
    %2 = arith.mulf %0, %1 : vector<32x64xf32>
    %3 = arith.truncf %2 : vector<32x64xf32> to vector<32x64xbf16>
    %c0_1 = arith.constant 0 : index
    %c0_2 = arith.constant 0 : index
    %4 = vector.load %arg2[%c0_1, %c0_2] : memref<64x64xbf16, #tpu.memory_space<vmem>>, vector<64x64xbf16>
    %cst_3 = arith.constant dense<0.000000e+00> : vector<32x64xf32>
    %5 = tpu.matmul %3, %4, %cst_3 {dimension_numbers = #tpu.dot_dimension_numbers<[1], [0], [0], [1], [0, 0, 1, 1], [], []>} : vector<32x64xbf16>, vector<64x64xbf16>, vector<32x64xf32> -> vector<32x64xf32>
    %c0_4 = arith.constant 0 : index
    %c0_5 = arith.constant 0 : index
    %6 = vector.load %arg3[%c0_4, %c0_5] : memref<1x64xf32, #tpu.memory_space<vmem>>, vector<1x64xf32>
    %7 = vector.broadcast %6 : vector<1x64xf32> to vector<32x64xf32>
    %8 = arith.addf %5, %7 : vector<32x64xf32>
    %cst_6 = arith.constant 0.000000e+00 : f32
    %9 = vector.broadcast %cst_6 : f32 to vector<32x64xf32>
    %10 = arith.maximumf %8, %9 : vector<32x64xf32>
    %c0_7 = arith.constant 0 : index
    %c0_8 = arith.constant 0 : index
    %11 = vector.load %arg4[%c0_7, %c0_8] : memref<1x64xf32, #tpu.memory_space<vmem>>, vector<1x64xf32>
    %12 = vector.broadcast %11 : vector<1x64xf32> to vector<32x64xf32>
    %13 = arith.mulf %10, %12 : vector<32x64xf32>
    %cst_9 = arith.constant dense<0.000000e+00> : vector<32xf32>
    %14 = vector.multi_reduction <add>, %13, %cst_9 [1] : vector<32x64xf32> to vector<32xf32>
    %15 = vector.shape_cast %14 : vector<32xf32> to vector<32x1xf32>
    %c0_10 = arith.constant 0 : index
    %c0_11 = arith.constant 0 : index
    %16 = vector.load %arg5[%c0_10, %c0_11] : memref<1x1xf32, #tpu.memory_space<vmem>>, vector<1x1xf32>
    %17 = vector.broadcast %16 : vector<1x1xf32> to vector<32x1xf32>
    %18 = arith.addf %15, %17 : vector<32x1xf32>
    %c0_12 = arith.constant 0 : index
    %c0_13 = arith.constant 0 : index
    %19 = vector.load %arg6[%c0_12, %c0_13] : memref<32x1xf32, #tpu.memory_space<vmem>>, vector<32x1xf32>
    tpu.vector_store %arg6[%c0_12, %c0_13], %18 {strides = array<i32>} : memref<32x1xf32, #tpu.memory_space<vmem>>, vector<32x1xf32>,
    return
  }
  func.func @transform_0(%arg0: i32) -> (i32, i32) {
    %c0_i32 = arith.constant 0 : i32
    %c0_i32_0 = arith.constant 0 : i32
    return %arg0, %c0_i32 : i32, i32
  }
  func.func @transform_1(%arg0: i32) -> (i32, i32) {
    %c0_i32 = arith.constant 0 : i32
    %c0_i32_0 = arith.constant 0 : i32
    %c0_i32_1 = arith.constant 0 : i32
    return %c0_i32, %c0_i32_0 : i32, i32
  }
  func.func @transform_2(%arg0: i32) -> (i32, i32) {
    %c0_i32 = arith.constant 0 : i32
    %c0_i32_0 = arith.constant 0 : i32
    %c0_i32_1 = arith.constant 0 : i32
    return %c0_i32, %c0_i32_0 : i32, i32
  }
  func.func @transform_3(%arg0: i32) -> (i32, i32) {
    %c0_i32 = arith.constant 0 : i32
    %c0_i32_0 = arith.constant 0 : i32
    %c0_i32_1 = arith.constant 0 : i32
    return %c0_i32, %c0_i32_0 : i32, i32
  }
  func.func @transform_4(%arg0: i32) -> (i32, i32) {
    %c0_i32 = arith.constant 0 : i32
    %c0_i32_0 = arith.constant 0 : i32
    %c0_i32_1 = arith.constant 0 : i32
    return %c0_i32, %c0_i32_0 : i32, i32
  }
  func.func @transform_5(%arg0: i32) -> (i32, i32) {
    %c0_i32 = arith.constant 0 : i32
    %c0_i32_0 = arith.constant 0 : i32
    return %arg0, %c0_i32 : i32, i32
  }
}

</mosaic_0001>

<bundles_post_ra>
// kernel: diff_csdi_forward.8
= control target key start
LH: loop header
LB: loop body
LE: loop exit
PB: predicated region body
PF: predicated region fallthrough
CT: control target
= control target key end

     0   :  { %s374_s12 = smov 0   ;;  %s397_s0 = inlined_call_operand.vmem [shape: f32[64,2], index: 0, kind: input, shape index: {}]   ;;  %s398_s1 = inlined_call_operand.vmem [shape: bf16[2,64], index: 1, kind: input, shape index: {}]   ;;  %s399_s2 = inlined_call_operand.vmem [shape: f32[1,64], index: 2, kind: input, shape index: {}]   ;;  %s400_s3 = inlined_call_operand.vmem [shape: f32[64,64], index: 3, kind: output, shape index: {}]  }
   0x1 LB: > { %s314_s13 = sadd.s32 4294967295, %s352_s12   ;;  %p318_p0 = scmp.ge.s32.totalorder %s352_s12, 1  ;;  %s352_s12 = sphi %s374_s12, %s13_s12  }
   0x2   : > { %p138_p1 = scmp.lt.s32.totalorder %s352_s12, 3 }
   0x4   : > { %p139_p2 = pnand %p318_p0, %p138_p1 }
   0x5   : > { %v181_v0 = vld [vmem:[%s398_s1] sm:$0x1] (!%p139_p2)  ;;  %vm196_vm0 = vcmask (!%p139_p2), 1040384   ;;  %s319_s16 = sshll.u32 (!%p139_p2), %s314_s13, 2  ;;  %vm189_vm1 = vcmask (!%p139_p2), 15360   ;;  %vm253_vm2 = vcmask (!%p139_p2), 523264  }
   0x6   : > { %142 = sbr.rel (%p139_p2) target bundleno = 240 (0xf0), region = 32  ;;  %337 = vmatprep.subr.msk.bf16.mxu0 (!%p139_p2), %vm196_vm0, %v181_v0  ;;  %v198_v1 = vsel (!%p139_p2), %vm196_vm0, %v181_v0, 0  ;;  %p163_p3 = scmp.lt.s32.totalorder (!%p139_p2), %s319_s16, 7  ;;  %v323_v8 = vld [vmem:[%s399_s2] ss:$0 sm:$0xff] (!%p139_p2) }
   0x7   : > { %332 = vmatpush3.bf16.msra.mxu0 (!%p139_p2), %v198_v1 }
   0xd   : > { %s402_s16 = smov (!%p163_p3, %s319_s16), 7 }
   0xe   : > { %s320_s17 = sshll.u32 %s402_s16, 3 }
   0xf   : > { %s166_s20 = scalar_lea.vmem %s397_s0, %s320_s17  ;;  %s172_s25 = scalar_lea.vmem %s400_s3, %s320_s17 }
  0x10   : > { %v175_v2 = vld [vmem:[%s166_s20] sm:$0xff]  ;;  %v176_v3 = vld [vmem:[%s166_s20 + $0x8] sm:$0xff]  ;;  %v177_v4 = vld [vmem:[%s166_s20 + $0x10] sm:$0xff] }
  0x11   : > { %v179_v5 = vpack.c.bf16 %v176_v3, %v175_v2  ;;  %v178_v6 = vld [vmem:[%s166_s20 + $0x18] sm:$0xff] }
  0x12   : > { %v180_v7 = vpack.c.bf16 %v178_v6, %v177_v4 }
  0x13   : > { %333 = vmatprep.mubr.msk.bf16.mxu0 %vm189_vm1, %v179_v5 }
  0x14   : > { %334 = vmatmul.mubr.msk.bf16.vlgmr.msra.gmra.mrb[0].mxu0 %vm189_vm1, %v180_v7 }
  0xe7   : > { %v335_v9 = vpop.f32.mrb[0].mxu0 }
  0xe8   : > { %v234_v10 = vpop.f32.mrb[1].mxu0  ;;  %v243_v13 = vadd.f32 %v335_v9, %v323_v8 }
  0xe9   : > { %v235_v11 = vadd.f32 %v323_v8, %v234_v10  ;;  %v336_v12 = vpop.f32.mrb[2].mxu0 }
  0xea   : > { %v237_v14 = vpop.f32.mrb[3].mxu0  ;;  %v246_v16 = vadd.f32 %v336_v12, %v323_v8  ;;  %v251_v19 = vmax.f32 %v243_v13, 0.0 }
  0xeb   : > { %v249_v15 = vmax.f32 %v235_v11, 0.0  ;;  %v238_v17 = vadd.f32 %v323_v8, %v237_v14 }
  0xec   : > { %v252_v20 = vmax.f32 %v246_v16, 0.0  ;;  %256 = vst.msk [vmem:[%s172_s25 + $0x10] sm:$0xff] %vm253_vm2, %v251_v19 }
  0xed   : > { %254 = vst.msk [vmem:[%s172_s25] sm:$0xff] %vm253_vm2, %v249_v15  ;;  %v250_v18 = vmax.f32 %v238_v17, 0.0 }
  0xee   : > { %257 = vst.msk [vmem:[%s172_s25 + $0x18] sm:$0xff] %vm253_vm2, %v252_v20 }
  0xef   : > { %255 = vst.msk [vmem:[%s172_s25 + $0x8] sm:$0xff] %vm253_vm2, %v250_v18 }
  0xf0 PF: > { %s13_s12 = sadd.s32 1, %s352_s12  }
  0xf1   : > { %p10_p4 = scmp.ge.s32.totalorder %s13_s12, 4  }
  0xf3   :  { %12 = sbr.rel (!%p10_p4) target bundleno = 1 (0x1), region = 62 }

// kernel: diff_csdi_forward.11
= control target key start
LH: loop header
LB: loop body
LE: loop exit
PB: predicated region body
PF: predicated region fallthrough
CT: control target
= control target key end

     0   :  { %s987_s27 = smov 0   ;;  %s1077_s0 = inlined_call_operand.vmem [shape: f32[64,64], index: 0, kind: input, shape index: {}]   ;;  %s1078_s1 = inlined_call_operand.vmem [shape: f32[64,16], index: 1, kind: input, shape index: {}]   ;;  %s1079_s2 = inlined_call_operand.vmem [shape: f32[64,64], index: 2, kind: input, shape index: {}]   ;;  %s1080_s3 = inlined_call_operand.vmem [shape: f32[64,64], index: 3, kind: input, shape index: {}]   ;;  %s1081_s4 = inlined_call_operand.vmem [shape: bf16[80,128], index: 4, kind: input, shape index: {}]   ;;  %s1082_s5 = inlined_call_operand.vmem [shape: f32[1,128], index: 5, kind: input, shape index: {}]   ;;  %s1083_s6 = inlined_call_operand.vmem [shape: bf16[64,128], index: 6, kind: input, shape index: {}]   ;;  %s1084_s7 = inlined_call_operand.vmem [shape: f32[1,128], index: 7, kind: input, shape index: {}]   ;;  %s1085_s8 = inlined_call_operand.vmem [shape: f32[64,128], index: 8, kind: output, shape index: {}]  }
   0x1 LB: > { %s806_s28 = sadd.s32 4294967295, %s939_s27   ;;  %p810_p0 = scmp.ge.s32.totalorder %s939_s27, 1  ;;  %s939_s27 = sphi %s987_s27, %s18_s27  }
   0x2   : > { %p296_p1 = scmp.lt.s32.totalorder %s939_s27, 3 }
   0x4   : > { %p297_p2 = pnand %p810_p0, %p296_p1 }
   0x5   : > { %s811_s29 = sshll.u32 (!%p297_p2), %s806_s28, 2  ;;  %v900_v0 = vld [vmem:[%s1081_s4] sm:$0xff] (!%p297_p2)   ;;  %v901_v1 = vld [vmem:[%s1081_s4 + $0x8] sm:$0xff] (!%p297_p2)   ;;  %v902_v2 = vld [vmem:[%s1081_s4 + $0x10] sm:$0xff] (!%p297_p2)   ;;  %s941_s20 = smov (!%p297_p2), 64   ;;  %vm400_vm0 = vcmask (!%p297_p2), 523264  }
   0x6   : > { %300 = sbr.rel (%p297_p2) target bundleno = 951 (0x3b7), region = 52  ;;  %p346_p3 = scmp.lt.s32.totalorder (!%p297_p2), %s811_s29, 7  ;;  %855 = vmatprep.subr.bf16.mxu0 (!%p297_p2), %v900_v0  ;;  %v903_v8 = vld [vmem:[%s1081_s4 + $0x18] sm:$0xff] (!%p297_p2)   ;;  %v904_v10 = vld [vmem:[%s1081_s4 + $0x20] sm:$0xff] (!%p297_p2)   ;;  %vm454_vm1 = vcmask (!%p297_p2), 654336   ;;  %v906_v34 = vld [vmem:[%s1083_s6 + $0x8] sm:$0xff] (!%p297_p2)  }
   0x7   : > { %856 = vmatpush3.bf16.msra.mxu0 (!%p297_p2), %v900_v0  ;;  %v905_v27 = vld [vmem:[%s1083_s6] sm:$0xff] (!%p297_p2)   ;;  %v907_v37 = vld [vmem:[%s1083_s6 + $0x10] sm:$0xff] (!%p297_p2)   ;;  %v908_v39 = vld [vmem:[%s1083_s6 + $0x18] sm:$0xff] (!%p297_p2)  }
   0x8   : > { %857 = vmatprep.subr.bf16.mxu0 (!%p297_p2), %v901_v1  ;;  %869 = vmatprep.subr.bf16.mxu1 (!%p297_p2), %v905_v27  ;;  %v821_v28 = vld [vmem:[%s1082_s5] ss:$0 sm:$0xff] (!%p297_p2) }
   0x9   : > { %870 = vmatpush3.bf16.msra.mxu1 (!%p297_p2), %v905_v27 }
   0xa   : > { %871 = vmatprep.subr.bf16.mxu1 (!%p297_p2), %v906_v34 }
   0xb   : > { %858 = vmatpush3.bf16.msra.mxu0 (!%p297_p2), %v901_v1 }
   0xc   : > { %859 = vmatprep.subr.bf16.mxu0 (!%p297_p2), %v902_v2 }
   0xd   : > { %s1087_s29 = smov (!%p346_p3, %s811_s29), 7  ;;  %872 = vmatpush3.bf16.msra.mxu1 %v906_v34 }
   0xe   : > { %s1001_s12 = sshll.u32 %s1087_s29, 3  ;;  %873 = vmatprep.subr.bf16.mxu1 %v907_v37 }
   0xf   : > { %s355_s17 = scalar_lea.vmem %s1078_s1, %s1001_s12  ;;  %860 = vmatpush3.bf16.msra.mxu0 %v902_v2  ;;  %s349_s25 = scalar_lea.vmem %s1077_s0, %s1001_s12 }
  0x10   : > { %v380_v3 = vld [vmem:[%s355_s17] sm:$0xff]  ;;  %v381_v4 = vld [vmem:[%s355_s17 + $0x8] sm:$0xff]  ;;  %v382_v5 = vld [vmem:[%s355_s17 + $0x10] sm:$0xff]  ;;  %861 = vmatprep.subr.bf16.mxu0 %v903_v8  ;;  %s367_s21 = scalar_lea.vmem %s1080_s3, %s1001_s12  ;;  %s361_s24 = scalar_lea.vmem %s1079_s2, %s1001_s12 }
  0x11   : > { %v890_v6 = vpack.i.bf16 %v381_v4, %v380_v3  ;;  %v383_v7 = vld [vmem:[%s355_s17 + $0x18] sm:$0xff]  ;;  %v376_v12 = vld [vmem:[%s349_s25] sm:$0xff]  ;;  %v377_v13 = vld [vmem:[%s349_s25 + $0x8] sm:$0xff]  ;;  %874 = vmatpush3.bf16.msra.mxu1 %v907_v37  ;;  %s373_s28 = scalar_lea.vmem %s1085_s8, %s1001_s12 }
  0x12   : > { %v895_v9 = vpack.i.bf16 %v383_v7, %v382_v5  ;;  %v378_v19 = vld [vmem:[%s349_s25 + $0x10] sm:$0xff]  ;;  %v379_v20 = vld [vmem:[%s349_s25 + $0x18] sm:$0xff]  ;;  %875 = vmatprep.subr.bf16.mxu1 %v908_v39  ;;  %v654_v27 = vld [vmem:[%s361_s24] sm:$0xff] }
  0x13   : > { %891 = vrot.lane.b32.xlu0 %v890_v6, %s941_s20  ;;  %862 = vmatpush3.bf16.msra.mxu0 %v903_v8  ;;  %v833_v6 = vld [vmem:[%s1084_s7] ss:$0 sm:$0xff] }
  0x14   : > { %863 = vmatprep.subr.bf16.mxu0 %v904_v10 }
  0x15   : > { %876 = vmatpush3.bf16.msra.mxu1 %v908_v39 }
  0x17   : > { %896 = vrot.lane.b32.xlu0 %v895_v9, %s941_s20  ;;  %864 = vmatpush3.bf16.msra.mxu0 %v904_v10 }
  0x85   : > { %v892_v11 = vpop.permute.xlu0 %891 }
  0x86   : > { %v894_v14 = vunpack.i.h.bf16 %v892_v11  ;;  %v893_v15 = vunpack.i.l.bf16 %v892_v11 }
  0x88   : > { %v401_v16 = vsel %vm400_vm0, %v376_v12, %v893_v15  ;;  %v402_v17 = vsel %vm400_vm0, %v377_v13, %v894_v14  ;;  %v666_v15 = vld [vmem:[%s367_s21] sm:$0xff] }
  0x89   : > { %v897_v18 = vpop.permute.xlu0 %896  ;;  %v405_v21 = vpack.c.bf16 %v402_v17, %v401_v16  ;;  %v667_v17 = vld [vmem:[%s367_s21 + $0x8] sm:$0xff] }
  0x8a   : > { %v899_v22 = vunpack.i.h.bf16 %v897_v18  ;;  %v898_v23 = vunpack.i.l.bf16 %v897_v18 }
  0x8b   : > { %865 = vmatprep.mubr.msk.bf16.mxu0 %vm454_vm1, %v405_v21 }
  0x8c   : > { %v403_v24 = vsel %vm400_vm0, %v378_v19, %v898_v23  ;;  %v404_v25 = vsel %vm400_vm0, %v379_v20, %v899_v22  ;;  %v668_v20 = vld [vmem:[%s367_s21 + $0x10] sm:$0xff]  ;;  %v669_v23 = vld [vmem:[%s367_s21 + $0x18] sm:$0xff] }
  0x8d   : > { %v406_v26 = vpack.c.bf16 %v404_v25, %v403_v24 }
  0x8f   : > { %866 = vmatmul.mubr.msk.bf16.vlgmr.msra.gmra.mrb[0].mxu0 %vm454_vm1, %v406_v26 }
 0x162   : > { %v867_v29 = vpop.f32.mrb[0].mxu0 }
 0x163   : > { %v504_v30 = vadd.f32 %v867_v29, %v821_v28  ;;  %v495_v31 = vpop.f32.mrb[1].mxu0 }
 0x164   : > { %v496_v32 = vadd.f32 %v821_v28, %v495_v31  ;;  %v868_v33 = vpop.f32.mrb[2].mxu0 }
 0x165   : > { %909 = vtanh.f32 %v504_v30  ;;  %v498_v35 = vpop.f32.mrb[3].mxu0  ;;  %v507_v38 = vadd.f32 %v868_v33, %v821_v28  ;;  %v831_v46 = vmul.f32 -1.442695, %v504_v30  ;;  %v656_v30 = vld [vmem:[%s361_s24 + $0x10] sm:$0xff] }
 0x166   : > { %911 = vtanh.f32 %v496_v32  ;;  %v499_v36 = vadd.f32 %v821_v28, %v498_v35  ;;  %v829_v44 = vmul.f32 -1.442695, %v496_v32  ;;  %v655_v28 = vld [vmem:[%s361_s24 + $0x8] sm:$0xff]  ;;  %v657_v32 = vld [vmem:[%s361_s24 + $0x18] sm:$0xff] }
 0x167   : > { %v832_v47 = vmul.f32 -1.442695, %v507_v38 }
 0x168   : > { %913 = vtanh.f32 %v499_v36  ;;  %v830_v45 = vmul.f32 -1.442695, %v499_v36 }
 0x169   : > { %915 = vtanh.f32 %v507_v38 }
 0x16a   : > { %917 = vpow2.f32 %v829_v44 }
 0x16b   : > { %919 = vpow2.f32 %v830_v45 }
 0x16c   : > { %921 = vpow2.f32 %v831_v46 }
 0x16d   : > { %923 = vpow2.f32 %v832_v47 }
 0x16f   : > { %v910_v40 = vpop.eup %909 }
 0x170   : > { %v912_v41 = vpop.eup %911  ;;  %546 = vrot.lane.b32.xlu0 %v910_v40, %s941_s20 }
 0x171   : > { %542 = vrot.lane.b32.xlu1 %v912_v41, %s941_s20 }
 0x172   : > { %v914_v42 = vpop.eup %913 }
 0x173   : > { %v916_v43 = vpop.eup %915 }
 0x174   : > { %v918_v48 = vpop.eup %917 }
 0x175   : > { %544 = vrot.lane.b32.xlu1 %v914_v42, %s941_s20  ;;  %v920_v49 = vpop.eup %919  ;;  %v522_v50 = vadd.f32 1.0, %v918_v48 }
 0x176   : > { %v922_v51 = vpop.eup %921  ;;  %v523_v52 = vadd.f32 1.0, %v920_v49 }
 0x177   : > { %v924_v53 = vpop.eup %923  ;;  %v524_v54 = vadd.f32 1.0, %v922_v51  ;;  %925 = vrcp.f32 %v522_v50 }
 0x178   : > { %v525_v55 = vadd.f32 1.0, %v924_v53  ;;  %927 = vrcp.f32 %v523_v52 }
 0x179   : > { %548 = vrot.lane.b32.xlu1 %v916_v43, %s941_s20  ;;  %929 = vrcp.f32 %v524_v54 }
 0x17a   : > { %931 = vrcp.f32 %v525_v55 }
 0x181   : > { %v926_v57 = vpop.eup %925 }
 0x182   : > { %v928_v58 = vpop.eup %927 }
 0x183   : > { %v930_v63 = vpop.eup %929 }
 0x184   : > { %v932_v1 = vpop.eup %931 }
 0x1e2   : > { %v547_v62 = vpop.permute.xlu0 %546 }
 0x1e3   : > { %v543_v56 = vpop.permute.xlu1 %542  ;;  %v556_v3 = vmul.f32 %v930_v63, %v547_v62 }
 0x1e4   : > { %v554_v60 = vmul.f32 %v926_v57, %v543_v56 }
 0x1e7   : > { %v545_v59 = vpop.permute.xlu1 %544 }
 0x1e8   : > { %v555_v61 = vmul.f32 %v928_v58, %v545_v59 }
 0x1ea   : > { %v558_v0 = vpack.c.bf16 %v555_v61, %v554_v60 }
 0x1eb   : > { %v549_v2 = vpop.permute.xlu1 %548 }
 0x1ec   : > { %v557_v4 = vmul.f32 %v932_v1, %v549_v2  ;;  %877 = vmatprep.mubr.msk.bf16.mxu1 %vm400_vm0, %v558_v0 }
 0x1ee   : > { %v559_v5 = vpack.c.bf16 %v557_v4, %v556_v3 }
 0x1f0   : > { %878 = vmatmul.mubr.msk.bf16.vlgmr.msra.gmra.mrb[0].mxu1 %vm400_vm0, %v559_v5 }
 0x2c3   : > { %v879_v7 = vpop.f32.mrb[0].mxu1 }
 0x2c4   : > { %v639_v8 = vpop.f32.mrb[1].mxu1  ;;  %v648_v13 = vadd.f32 %v879_v7, %v833_v6 }
 0x2c5   : > { %v640_v9 = vadd.f32 %v833_v6, %v639_v8  ;;  %v880_v10 = vpop.f32.mrb[2].mxu1 }
 0x2c6   : > { %v642_v11 = vpop.f32.mrb[3].mxu1  ;;  %v651_v14 = vadd.f32 %v880_v10, %v833_v6  ;;  %v660_v33 = vadd.f32 %v656_v30, %v648_v13 }
 0x2c7   : > { %v643_v12 = vadd.f32 %v833_v6, %v642_v11  ;;  %674 = vrot.lane.b32.xlu0 %v640_v9, %s941_s20  ;;  %v658_v29 = vadd.f32 %v654_v27, %v640_v9 }
 0x2c8   : > { %v661_v36 = vadd.f32 %v657_v32, %v651_v14  ;;  %v664_v40 = vmul.f32 0.70710677, %v660_v33 }
 0x2c9   : > { %676 = vrot.lane.b32.xlu1 %v643_v12, %s941_s20  ;;  %v659_v31 = vadd.f32 %v655_v28, %v643_v12  ;;  %v662_v34 = vmul.f32 0.70710677, %v658_v29 }
 0x2ca   : > { %v665_v43 = vmul.f32 0.70710677, %v661_v36 }
 0x2cb   : > { %678 = vrot.lane.b32.xlu0 %v648_v13, %s941_s20  ;;  %v663_v37 = vmul.f32 0.70710677, %v659_v31 }
 0x2cd   : > { %680 = vrot.lane.b32.xlu1 %v651_v14, %s941_s20 }
 0x339   : > { %v675_v16 = vpop.permute.xlu0 %674 }
 0x33a   : > { %v686_v18 = vadd.f32 %v675_v16, %v666_v15 }
 0x33b   : > { %v677_v19 = vpop.permute.xlu1 %676 }
 0x33c   : > { %v687_v21 = vadd.f32 %v677_v19, %v667_v17  ;;  %694 = vrot.lane.b32.xlu0 %v686_v18, %s941_s20 }
 0x33d   : > { %v679_v22 = vpop.permute.xlu0 %678 }
 0x33e   : > { %v688_v24 = vadd.f32 %v679_v22, %v668_v20  ;;  %696 = vrot.lane.b32.xlu1 %v687_v21, %s941_s20 }
 0x33f   : > { %v681_v25 = vpop.permute.xlu1 %680 }
 0x340   : > { %v689_v26 = vadd.f32 %v681_v25, %v669_v23  ;;  %698 = vrot.lane.b32.xlu0 %v688_v24, %s941_s20 }
 0x342   : > { %700 = vrot.lane.b32.xlu1 %v689_v26, %s941_s20 }
 0x3ae   : > { %v695_v35 = vpop.permute.xlu0 %694 }
 0x3af   : > { %v706_v38 = vsel %vm400_vm0, %v662_v34, %v695_v35 }
 0x3b0   : > { %710 = vst [vmem:[%s373_s28] sm:$0xff] %v706_v38  ;;  %v697_v39 = vpop.permute.xlu1 %696 }
 0x3b1   : > { %v707_v41 = vsel %vm400_vm0, %v663_v37, %v697_v39 }
 0x3b2   : > { %711 = vst [vmem:[%s373_s28 + $0x8] sm:$0xff] %v707_v41  ;;  %v699_v42 = vpop.permute.xlu0 %698 }
 0x3b3   : > { %v708_v44 = vsel %vm400_vm0, %v664_v40, %v699_v42 }
 0x3b4   : > { %712 = vst [vmem:[%s373_s28 + $0x10] sm:$0xff] %v708_v44  ;;  %v701_v45 = vpop.permute.xlu1 %700 }
 0x3b5   : > { %v709_v46 = vsel %vm400_vm0, %v665_v43, %v701_v45 }
 0x3b6   : > { %713 = vst [vmem:[%s373_s28 + $0x18] sm:$0xff] %v709_v46 }
 0x3b7 PF: > { %s18_s27 = sadd.s32 1, %s939_s27  }
 0x3b8   : > { %p15_p4 = scmp.ge.s32.totalorder %s18_s27, 4  }
 0x3ba   :  { %17 = sbr.rel (!%p15_p4) target bundleno = 1 (0x1), region = 91 }

// kernel: diff_csdi_forward.15
= control target key start
LH: loop header
LB: loop body
LE: loop exit
PB: predicated region body
PF: predicated region fallthrough
CT: control target
= control target key end

     0   :  { %s526_s20 = smov 0   ;;  %s574_s0 = inlined_call_operand.vmem [shape: f32[64,64], index: 0, kind: input, shape index: {}]   ;;  %s575_s1 = inlined_call_operand.vmem [shape: bf16[64,64], index: 1, kind: input, shape index: {}]   ;;  %s576_s2 = inlined_call_operand.vmem [shape: f32[1,64], index: 2, kind: input, shape index: {}]   ;;  %s577_s3 = inlined_call_operand.vmem [shape: f32[1,64], index: 3, kind: input, shape index: {}]   ;;  %s578_s4 = inlined_call_operand.<no memory space> [shape: f32[1,1], index: 4, kind: input, shape index: {}]   ;;  %s579_s5 = inlined_call_operand.vmem [shape: f32[64,1], index: 5, kind: output, shape index: {}]  }
   0x1   :  { %v10_v0 = vstv %s578_s4 }
   0x2   :  { %11 = vst [vmem:[#allocation2] sm:$0x1] %v10_v0 }
   0x3 LB: > { %s435_s21 = sadd.s32 4294967295, %s491_s20   ;;  %p439_p0 = scmp.ge.s32.totalorder %s491_s20, 1  ;;  %s491_s20 = sphi %s526_s20, %s17_s20  }
   0x4   : > { %p190_p1 = scmp.lt.s32.totalorder %s491_s20, 3 }
   0x6   : > { %p191_p2 = pnand %p439_p0, %p190_p1 }
   0x7   : > { %v481_v1 = vld [vmem:[%s575_s1] sm:$0xff] (!%p191_p2)   ;;  %s440_s4 = sshll.u32 (!%p191_p2), %s435_s21, 2  ;;  %v482_v2 = vld [vmem:[%s575_s1 + $0x8] sm:$0xff] (!%p191_p2)   ;;  %v483_v3 = vld [vmem:[%s575_s1 + $0x10] sm:$0xff] (!%p191_p2)   ;;  %vm280_vm0 = vcmask (!%p191_p2), 523264   ;;  %vm374_vm1 = vcmask (!%p191_p2), 7168  }
   0x8   : > { %194 = sbr.rel (%p191_p2) target bundleno = 393 (0x189), region = 40  ;;  %p219_p3 = scmp.lt.s32.totalorder (!%p191_p2), %s440_s4, 7  ;;  %461 = vmatprep.subr.bf16.mxu0 (!%p191_p2), %v481_v1  ;;  %v484_v7 = vld [vmem:[%s575_s1 + $0x18] sm:$0xff] (!%p191_p2)   ;;  %v444_v15 = vld [vmem:[%s576_s2] ss:$0 sm:$0xff] (!%p191_p2) }
   0x9   : > { %462 = vmatpush3.bf16.msra.mxu0 (!%p191_p2), %v481_v1  ;;  %v451_v21 = vld [vmem:[%s577_s3] ss:$0 sm:$0xff] (!%p191_p2) }
   0xa   : > { %463 = vmatprep.subr.bf16.mxu0 (!%p191_p2), %v482_v2  ;;  %v452_v37 = vld [vmem:[#allocation2] ss:$0 sm:$0xff] (!%p191_p2) }
   0xd   : > { %464 = vmatpush3.bf16.msra.mxu0 (!%p191_p2), %v482_v2 }
   0xe   : > { %465 = vmatprep.subr.bf16.mxu0 (!%p191_p2), %v483_v3 }
   0xf   : > { %s581_s4 = smov (!%p219_p3, %s440_s4), 7 }
  0x10   : > { %s441_s28 = sshll.u32 %s581_s4, 3 }
  0x11   : > { %s222_s6 = scalar_lea.vmem %s574_s0, %s441_s28  ;;  %466 = vmatpush3.bf16.msra.mxu0 %v483_v3  ;;  %s228_s15 = scalar_lea.vmem %s579_s5, %s441_s28 }
  0x12   : > { %v231_v4 = vld [vmem:[%s222_s6] sm:$0xff]  ;;  %v232_v5 = vld [vmem:[%s222_s6 + $0x8] sm:$0xff]  ;;  %v233_v6 = vld [vmem:[%s222_s6 + $0x10] sm:$0xff]  ;;  %467 = vmatprep.subr.bf16.mxu0 %v484_v7 }
  0x13   : > { %v235_v8 = vmul.f32 0.70710677, %v231_v4  ;;  %v236_v9 = vmul.f32 0.70710677, %v232_v5  ;;  %v234_v10 = vld [vmem:[%s222_s6 + $0x18] sm:$0xff] }
  0x14   : > { %v237_v12 = vmul.f32 0.70710677, %v233_v6  ;;  %v238_v13 = vmul.f32 0.70710677, %v234_v10 }
  0x15   : > { %v239_v11 = vpack.c.bf16 %v236_v9, %v235_v8  ;;  %468 = vmatpush3.bf16.msra.mxu0 %v484_v7 }
  0x16   : > { %v240_v14 = vpack.c.bf16 %v238_v13, %v237_v12 }
  0x17   : > { %469 = vmatprep.mubr.msk.bf16.mxu0 %vm280_vm0, %v239_v11 }
  0x18   : > { %470 = vmatmul.mubr.msk.bf16.vlgmr.msra.gmra.mrb[0].mxu0 %vm280_vm0, %v240_v14 }
  0xeb   : > { %v471_v16 = vpop.f32.mrb[0].mxu0 }
  0xec   : > { %v330_v17 = vadd.f32 %v471_v16, %v444_v15  ;;  %v321_v18 = vpop.f32.mrb[1].mxu0 }
  0xed   : > { %v322_v19 = vadd.f32 %v444_v15, %v321_v18  ;;  %v472_v20 = vpop.f32.mrb[2].mxu0 }
  0xee   : > { %v338_v22 = vmax.f32 %v330_v17, 0.0  ;;  %v333_v23 = vadd.f32 %v472_v20, %v444_v15  ;;  %v324_v24 = vpop.f32.mrb[3].mxu0 }
  0xef   : > { %v336_v25 = vmax.f32 %v322_v19, 0.0  ;;  %v325_v26 = vadd.f32 %v444_v15, %v324_v24 }
  0xf0   : > { %v339_v27 = vmax.f32 %v333_v23, 0.0  ;;  %v349_v28 = vmul.f32 %v451_v21, %v338_v22 }
  0xf1   : > { %v337_v29 = vmax.f32 %v325_v26, 0.0  ;;  %v347_v30 = vmul.f32 %v451_v21, %v336_v25 }
  0xf2   : > { %v357_v31 = vsel %vm280_vm0, %v349_v28, 0.0  ;;  %v350_v32 = vmul.f32 %v451_v21, %v339_v27 }
  0xf3   : > { %358 = vadd.xlane.f32.xlu1 %v357_v31  ;;  %v351_v33 = vsel %vm280_vm0, %v347_v30, 0.0  ;;  %v348_v34 = vmul.f32 %v451_v21, %v337_v29 }
  0xf4   : > { %352 = vadd.xlane.f32.xlu0 %v351_v33  ;;  %v360_v35 = vsel %vm280_vm0, %v350_v32, 0.0 }
  0xf5   : > { %v354_v36 = vsel %vm280_vm0, %v348_v34, 0.0 }
  0xf7   : > { %361 = vadd.xlane.f32.xlu1 %v360_v35 }
  0xf8   : > { %355 = vadd.xlane.f32.xlu0 %v354_v36 }
 0x180   : > { %v359_v38 = vpop.xlane.xlu1 %358 }
 0x181   : > { %v353_v39 = vpop.xlane.xlu0 %352  ;;  %v372_v44 = vadd.f32 %v452_v37, %v359_v38 }
 0x182   : > { %v370_v40 = vadd.f32 %v452_v37, %v353_v39 }
 0x183   : > { %377 = vst.msk [vmem:[%s228_s15 + $0x10] sm:$0xff] %vm374_vm1, %v372_v44 }
 0x184   : > { %375 = vst.msk [vmem:[%s228_s15] sm:$0xff] %vm374_vm1, %v370_v40  ;;  %v362_v41 = vpop.xlane.xlu1 %361 }
 0x185   : > { %v356_v42 = vpop.xlane.xlu0 %355  ;;  %v373_v45 = vadd.f32 %v452_v37, %v362_v41 }
 0x186   : > { %v371_v43 = vadd.f32 %v452_v37, %v356_v42 }
 0x187   : > { %378 = vst.msk [vmem:[%s228_s15 + $0x18] sm:$0xff] %vm374_vm1, %v373_v45 }
 0x188   : > { %376 = vst.msk [vmem:[%s228_s15 + $0x8] sm:$0xff] %vm374_vm1, %v371_v43 }
 0x189 PF: > { %s17_s20 = sadd.s32 1, %s491_s20  }
 0x18a   : > { %p14_p4 = scmp.ge.s32.totalorder %s17_s20, 4  }
 0x18c   :  { %16 = sbr.rel (!%p14_p4) target bundleno = 3 (0x3), region = 70 }

// kernel: diff_csdi_forward.10
= control target key start
LH: loop header
LB: loop body
LE: loop exit
PB: predicated region body
PF: predicated region fallthrough
CT: control target
= control target key end

     0   :  { %s3659_s25 = smov 0   ;;  %s4296_s0 = inlined_call_operand.vmem [shape: f32[22,4,64], index: 0, kind: input, shape index: {}]   ;;  %s4297_s1 = inlined_call_operand.vmem [shape: bf16[64,192], index: 1, kind: input, shape index: {}]   ;;  %s4298_s2 = inlined_call_operand.vmem [shape: f32[1,192], index: 2, kind: input, shape index: {}]   ;;  %s4299_s3 = inlined_call_operand.vmem [shape: bf16[64,64], index: 3, kind: input, shape index: {}]   ;;  %s4300_s4 = inlined_call_operand.vmem [shape: f32[1,64], index: 4, kind: input, shape index: {}]   ;;  %s4301_s5 = inlined_call_operand.vmem [shape: f32[1,64], index: 5, kind: input, shape index: {}]   ;;  %s4302_s6 = inlined_call_operand.vmem [shape: f32[1,64], index: 6, kind: input, shape index: {}]   ;;  %s4303_s7 = inlined_call_operand.vmem [shape: bf16[64,64], index: 7, kind: input, shape index: {}]   ;;  %s4304_s8 = inlined_call_operand.vmem [shape: f32[1,64], index: 8, kind: input, shape index: {}]   ;;  %s4305_s9 = inlined_call_operand.vmem [shape: bf16[64,64], index: 9, kind: input, shape index: {}]   ;;  %s4306_s10 = inlined_call_operand.vmem [shape: f32[1,64], index: 10, kind: input, shape index: {}]   ;;  %s4307_s11 = inlined_call_operand.vmem [shape: f32[1,64], index: 11, kind: input, shape index: {}]   ;;  %s4308_s12 = inlined_call_operand.vmem [shape: f32[1,64], index: 12, kind: input, shape index: {}]   ;;  %s4309_s13 = inlined_call_operand.vmem [shape: f32[22,4,64], index: 13, kind: output, shape index: {}]  }
   0x1 LB: > { %s2999_s26 = sadd.s32 4294967295, %s3569_s25   ;;  %p3003_p0 = scmp.ge.s32.totalorder %s3569_s25, 1  ;;  %s3569_s25 = sphi %s3659_s25, %s23_s25  }
   0x2   : > { %p388_p1 = scmp.lt.s32.totalorder %s3569_s25, 12 }
   0x4   : > { %p389_p2 = pnand %p3003_p0, %p388_p1 }
   0x5   : > { %v3670_v0 = vld [vmem:[%s4297_s1 + $0x4] ss:$8 sps:$4 sm:$0xff] (!%p389_p2)   ;;  %s3004_s29 = sshll.u32 (!%p389_p2), %s2999_s26, 1  ;;  %v3675_v1 = vld [vmem:[%s4297_s1] ss:$8 sps:$4 sm:$0xff] (!%p389_p2)   ;;  %v3571_v2 = vmov (!%p389_p2), 0   ;;  %v488_v11 = vlaneseq (!%p389_p2) }
   0x6   : > { %392 = sbr.rel (%p389_p2) target bundleno = 4977 (0x1371), region = 72  ;;  %574 = vmatprep.mubr.bf16.mxu0 (!%p389_p2), %v3571_v2  ;;  %p433_p3 = scmp.lt.s32.totalorder (!%p389_p2), %s3004_s29, 21  ;;  %542 = vmatprep.subr.bf16.mxu0 (!%p389_p2), %v3670_v0  ;;  %v3682_v3 = vld [vmem:[%s4297_s1 + $0x14] ss:$8 sps:$4 sm:$0xff] (!%p389_p2)   ;;  %v3688_v4 = vld [vmem:[%s4297_s1 + $0x10] ss:$8 sps:$4 sm:$0xff] (!%p389_p2)  }
   0x7   : > { %543 = vmatpush1.bf16.msra.mxu0 (!%p389_p2), %v3675_v1  ;;  %v3696_v5 = vld [vmem:[%s4297_s1 + $0x24] ss:$8 sps:$4 sm:$0xff] (!%p389_p2)   ;;  %v3710_v6 = vld [vmem:[%s4297_s1 + $0x20] ss:$8 sps:$4 sm:$0xff] (!%p389_p2)   ;;  %v3715_v7 = vld [vmem:[%s4297_s1 + $0x34] ss:$8 sps:$4 sm:$0xff] (!%p389_p2)  }
   0x8   : > { %544 = vmatprep.subr.bf16.mxu0 (!%p389_p2), %v3682_v3  ;;  %v3721_v8 = vld [vmem:[%s4297_s1 + $0x30] ss:$8 sps:$4 sm:$0xff] (!%p389_p2)   ;;  %vm538_vm0 = vcmask (!%p389_p2), 523264   ;;  %v489_v12 = vshrl.u32 (!%p389_p2), %v488_v11, 7  ;;  %v3572_v13 = vmov (!%p389_p2), 0.0   ;;  %vm3573_vm1 = vmmov (!%p389_p2), 0  }
   0x9   : > { %3173 = vmatprep.subr.bf16.mxu1 (!%p389_p2), %v3572_v13  ;;  %v453_v15 = vld [vmem:[%s4298_s2] sm:$0x3] (!%p389_p2)  ;;  %3175 = vmatprep.mubr.msk.bf16.mxu1 (!%p389_p2), %vm3573_vm1, %v3572_v13  ;;  %s3574_s18 = smov (!%p389_p2), 56   ;;  %s4311_s19 = smov (!%p389_p2), 64   ;;  %vm590_vm2 = vcmask (!%p389_p2), 64512   ;;  %vm654_vm3 = vcmask (!%p389_p2), 1041408  }
   0xa   : > { %v490_v14 = vsub.s32 (!%p389_p2), 0, %v489_v12  ;;  %v494_v23 = vsub.s32 (!%p389_p2), 1, %v489_v12  ;;  %vm637_vm4 = vcmask (!%p389_p2), 27648   ;;  %s3576_s20 = smov (!%p389_p2), 104   ;;  %s4314_s22 = smov (!%p389_p2), 80   ;;  %vm650_vm5 = vcmask (!%p389_p2), 31744  }
   0xb   : > { %545 = vmatpush1.bf16.msra.mxu0 (!%p389_p2), %v3688_v4  ;;  %s4312_s23 = smov (!%p389_p2), 72   ;;  %s3579_s26 = smov (!%p389_p2), 120   ;;  %vm1499_vm6 = vcmask (!%p389_p2), 130048   ;;  %vm1501_vm7 = vcmask (!%p389_p2), 195584   ;;  %vm1503_vm8 = vcmask (!%p389_p2), 261120   ;;  %vm1505_vm9 = vcmask (!%p389_p2), 326656  }
   0xc   : > { %546 = vmatprep.subr.bf16.mxu0 (!%p389_p2), %v3696_v5  ;;  %v3741_v16 = vrot.slane (!%p389_p2), %v453_v15, %v490_v14  ;;  %v3746_v24 = vrot.slane (!%p389_p2), %v453_v15, %v494_v23  ;;  %s3580_s27 = smov (!%p389_p2), 48   ;;  %s3581_s28 = smov (!%p389_p2), 112   ;;  %vm1507_vm10 = vcmask (!%p389_p2), 392192   ;;  %vm1509_vm11 = vcmask (!%p389_p2), 457728  }
   0xd   : > { %s4333_s29 = smov (!%p433_p3, %s3004_s29), 21  ;;  %s3582_s30 = smov 40   ;;  %vm1587_vm12 = vcmask 519168  }
   0xe   : > { %s4310_s21 = sshll.u32 %s4333_s29, 2  ;;  %s3583_s14 = smov 32  }
   0xf   : > { %s3704_s24 = scalar_lea.vmem %s4296_s0, %s4310_s21  ;;  %547 = vmatpush1.bf16.msra.mxu0 %v3710_v6  ;;  %s4322_s15 = smov 96  }
  0x10   : > { %v3724_v9 = vld [vmem:[%s3704_s24] sm:$0xf]  ;;  %548 = vmatprep.subr.bf16.mxu0 %v3715_v7  ;;  %s3585_s16 = smov 24   ;;  %s4318_s17 = smov 88  }
  0x11   : > { %v486_v10 = vpack.c.bf16 %v3724_v9, %v3724_v9  ;;  %s4320_s21 = smov 16  }
  0x13   : > { %549 = vmatpush1.bf16.msra.mxu0 %v3721_v8 }
  0x14   : > { %3197 = vmatprep.subr.bf16.mxu0 %v3572_v13 }
  0x16   : > { %3016 = vmatmul.mubr.msk.bf16.vlgmr.msra.gmra.mrb[0].mxu0 %vm538_vm0, %v486_v10 }
  0x17   : > { %3199 = vmatprep.mubr.msk.bf16.mxu0 %vm3573_vm1, %v3572_v13 }
  0xe9   : > { %v576_v17 = vpop.f32.mrb[0].mxu0 }
  0xea   : > { %v577_v18 = vadd.f32 %v576_v17, %v3741_v16  ;;  %v578_v19 = vpop.f32.mrb[1].mxu0 }
  0xeb   : > { %v580_v20 = vpop.f32.mrb[2].mxu0  ;;  %v579_v26 = vadd.f32 %v578_v19, %v3746_v24 }
  0xec   : > { %v585_v21 = vpack.c.bf16 %v577_v18, %v577_v18  ;;  %v581_v22 = vpop.f32.mrb[3].mxu0  ;;  %v583_v28 = vmul.f32 0.35355338, %v577_v18 }
  0xed   : > { %v3751_v29 = vpack.c.bf16 %v579_v26, %v579_v26 }
  0xee   : > { %701 = vrot.lane.b32.xlu1 %v585_v21, %s3574_s18  ;;  %588 = vrot.lane.b32.xlu0 %v585_v21, %s4311_s19  ;;  %v584_v30 = vpack.c.bf16 %v583_v28, %v583_v28  ;;  %s4316_s19 = smov 8  }
  0xef   : > { %v656_v31 = vsel %vm654_vm3, %v3751_v29, 0 }
 0x160   : > { %v589_v25 = vpop.permute.xlu0 %588  ;;  %v702_v42 = vpop.permute.xlu1 %701 }
 0x161   : > { %v595_v27 = vsel %vm590_vm2, %v589_v25, 0  ;;  %v707_v51 = vsel %vm590_vm2, %v702_v42, 0 }
 0x162   : > { %3174 = vmatpush3.bf16.xpose.msra.mxu1 %v595_v27 }
 0x163   : > { %3179 = vmatprep.subr.bf16.mxu1 %v3572_v13 }
 0x169   : > { %3176 = vmatmul.mubr.msk.bf16.vlgmr.msra.gmra.mrb[0].mxu1 %vm590_vm2, %v584_v30 }
 0x16a   : > { %3180 = vmatpush3.bf16.msra.mxu1 %v656_v31  ;;  %3181 = vmatprep.mubr.msk.bf16.mxu1 %vm3573_vm1, %v3572_v13 }
 0x16b   : > { %3185 = vmatprep.subr.bf16.mxu1 %v3572_v13 }
 0x23c   : > { %v631_v32 = vpop.f32.mrb[0].mxu1 }
 0x23d   : > { %v3177_v33 = vpop.f32.mrb[1].mxu1  ;;  %v638_v34 = vsel %vm637_vm4, %v631_v32, -inf }
 0x23e   : > { %639 = vmax.xlane.f32.xlu0 %v638_v34  ;;  %v634_v35 = vpop.f32.mrb[2].mxu1 }
 0x23f   : > { %v3178_v36 = vpop.f32.mrb[3].mxu1 }
 0x254   : > { %920 = vrot.lane.b32.xlu0 %v584_v30, %s3576_s20 }
 0x258   : > { %1250 = vrot.lane.b32.xlu0 %v584_v30, %s4314_s22 }
 0x25c   : > { %1360 = vrot.lane.b32.xlu0 %v584_v30, %s4312_s23 }
 0x2cb   : > { %v640_v37 = vpop.xlane.xlu0 %639 }
 0x2cc   : > { %v641_v38 = vsub.f32 %v631_v32, %v640_v37 }
 0x2ce   : > { %v642_v39 = vmul.f32 1.442695, %v641_v38 }
 0x2cf   : > { %v921_v55 = vpop.permute.xlu0 %920 }
 0x2d0   : > { %3487 = vpow2.f32 %v642_v39 }
 0x2d3   : > { %v1251_v10 = vpop.permute.xlu0 %1250 }
 0x2d7   : > { %v1361_v12 = vpop.permute.xlu0 %1360 }
 0x2da   : > { %v3488_v40 = vpop.eup %3487 }
 0x2db   : > { %v644_v41 = vsel %vm637_vm4, %v3488_v40, 0.0 }
 0x2dc   : > { %645 = vadd.xlane.f32.xlu1 %v644_v41 }
 0x2ed   : > { %699 = vrot.lane.b32.xlu1 %v584_v30, %s3579_s26 }
 0x2f1   : > { %812 = vrot.lane.b32.xlu1 %v585_v21, %s3580_s27 }
 0x2f5   : > { %810 = vrot.lane.b32.xlu1 %v584_v30, %s3581_s28 }
 0x2f9   : > { %922 = vrot.lane.b32.xlu1 %v585_v21, %s3582_s30 }
 0x2fd   : > { %1032 = vrot.lane.b32.xlu1 %v585_v21, %s3583_s14 }
 0x301   : > { %1030 = vrot.lane.b32.xlu1 %v584_v30, %s4322_s15 }
 0x305   : > { %1142 = vrot.lane.b32.xlu1 %v585_v21, %s3585_s16 }
 0x309   : > { %1140 = vrot.lane.b32.xlu1 %v584_v30, %s4318_s17 }
 0x30d   : > { %1252 = vrot.lane.b32.xlu1 %v585_v21, %s4320_s21 }
 0x311   : > { %1362 = vrot.lane.b32.xlu1 %v585_v21, %s4316_s19 }
 0x369   : > { %v646_v43 = vpop.xlane.xlu1 %645 }
 0x36a   : > { %3489 = vrcp.f32 %v646_v43 }
 0x36d   : > { %v700_v44 = vpop.permute.xlu1 %699 }
 0x371   : > { %v813_v45 = vpop.permute.xlu1 %812 }
 0x372   : > { %v818_v46 = vsel %vm590_vm2, %v813_v45, 0 }
 0x373   : > { %3198 = vmatpush3.bf16.xpose.msra.mxu0 %v818_v46 }
 0x374   : > { %v3490_v47 = vpop.eup %3489  ;;  %3209 = vmatprep.subr.bf16.mxu0 %v3572_v13 }
 0x375   : > { %v811_v48 = vpop.permute.xlu1 %810  ;;  %v648_v49 = vmul.f32 %v3490_v47, %v3488_v40 }
 0x377   : > { %v649_v50 = vpack.c.bf16 %v648_v49, %v648_v49 }
 0x379   : > { %3182 = vmatmul.mubr.msk.bf16.vlgmr.msra.gmra.mrb[4].mxu1 %vm650_vm5, %v649_v50  ;;  %v923_v52 = vpop.permute.xlu1 %922 }
 0x37a   : > { %3186 = vmatpush3.bf16.xpose.msra.mxu1 %v707_v51  ;;  %v928_v53 = vsel %vm590_vm2, %v923_v52, 0  ;;  %3200 = vmatmul.mubr.msk.bf16.vlgmr.msra.gmra.mrb[4].mxu0 %vm590_vm2, %v811_v48 }
 0x37b   : > { %3210 = vmatpush3.bf16.xpose.msra.mxu0 %v928_v53  ;;  %3187 = vmatprep.mubr.msk.bf16.mxu1 %vm3573_vm1, %v3572_v13 }
 0x37c   : > { %3211 = vmatprep.mubr.msk.bf16.mxu0 %vm3573_vm1, %v3572_v13  ;;  %3221 = vmatprep.subr.bf16.mxu0 %v3572_v13 }
 0x37d   : > { %v1033_v54 = vpop.permute.xlu1 %1032  ;;  %3191 = vmatprep.subr.bf16.mxu1 %v3572_v13 }
 0x37e   : > { %v1038_v57 = vsel %vm590_vm2, %v1033_v54, 0 }
 0x381   : > { %3188 = vmatmul.mubr.msk.bf16.vlgmr.msra.gmra.mrb[8].mxu1 %vm590_vm2, %v700_v44  ;;  %v1031_v56 = vpop.permute.xlu1 %1030 }
 0x382   : > { %3212 = vmatmul.mubr.msk.bf16.vlgmr.msra.gmra.mrb[8].mxu0 %vm590_vm2, %v921_v55  ;;  %3193 = vmatprep.mubr.msk.bf16.mxu1 %vm3573_vm1, %v3572_v13 }
 0x383   : > { %3222 = vmatpush3.bf16.xpose.msra.mxu0 %v1038_v57  ;;  %3223 = vmatprep.mubr.msk.bf16.mxu0 %vm3573_vm1, %v3572_v13 }
 0x384   : > { %3233 = vmatprep.subr.bf16.mxu0 %v3572_v13 }
 0x385   : > { %v1143_v58 = vpop.permute.xlu1 %1142 }
 0x386   : > { %v1148_v60 = vsel %vm590_vm2, %v1143_v58, 0 }
 0x389   : > { %v1141_v59 = vpop.permute.xlu1 %1140 }
 0x38a   : > { %3224 = vmatmul.mubr.msk.bf16.vlgmr.msra.gmra.mrb[12].mxu0 %vm590_vm2, %v1031_v56 }
 0x38b   : > { %3234 = vmatpush3.bf16.xpose.msra.mxu0 %v1148_v60  ;;  %3235 = vmatprep.mubr.msk.bf16.mxu0 %vm3573_vm1, %v3572_v13 }
 0x38c   : > { %3245 = vmatprep.subr.bf16.mxu0 %v3572_v13 }
 0x38d   : > { %v1253_v61 = vpop.permute.xlu1 %1252 }
 0x38e   : > { %v1258_v62 = vsel %vm590_vm2, %v1253_v61, 0 }
 0x391   : > { %v1363_v63 = vpop.permute.xlu1 %1362 }
 0x392   : > { %3236 = vmatmul.mubr.msk.bf16.vlgmr.msra.gmra.mrb[16].mxu0 %vm590_vm2, %v1141_v59  ;;  %v1368_v11 = vsel %vm590_vm2, %v1363_v63, 0 }
 0x393   : > { %3246 = vmatpush3.bf16.xpose.msra.mxu0 %v1258_v62  ;;  %3247 = vmatprep.mubr.msk.bf16.mxu0 %vm3573_vm1, %v3572_v13 }
 0x394   : > { %3257 = vmatprep.subr.bf16.mxu0 %v3572_v13 }
 0x39a   : > { %3248 = vmatmul.mubr.msk.bf16.vlgmr.msra.gmra.mrb[20].mxu0 %vm590_vm2, %v1251_v10 }
 0x39b   : > { %3258 = vmatpush3.bf16.xpose.msra.mxu0 %v1368_v11  ;;  %3259 = vmatprep.mubr.msk.bf16.mxu0 %vm3573_vm1, %v3572_v13 }
 0x39c   : > { %3269 = vmatprep.subr.bf16.mxu0 %v3572_v13 }
 0x3a2   : > { %3260 = vmatmul.mubr.msk.bf16.vlgmr.msra.gmra.mrb[24].mxu0 %vm590_vm2, %v1361_v12 }
 0x3a3   : > { %3277 = vmatprep.mubr.msk.bf16.mxu0 %vm3573_vm1, %v3572_v13 }
 0x44c   : > { %v3812_v14 = vpop.f32.mrb[4].mxu1 }
 0x44d   : > { %v3183_v15 = vpop.f32.mrb[5].mxu1  ;;  %v854_v17 = vpop.f32.mrb[4].mxu0 }
 0x44e   : > { %v695_v18 = vpop.f32.mrb[6].mxu1  ;;  %v3201_v19 = vpop.f32.mrb[5].mxu0  ;;  %v860_v20 = vsel %vm637_vm4, %v854_v17, -inf }
 0x44f   : > { %861 = vmax.xlane.f32.xlu0 %v860_v20  ;;  %v3184_v21 = vpop.f32.mrb[7].mxu1  ;;  %v857_v22 = vpop.f32.mrb[6].mxu0 }
 0x450   : > { %v3202_v23 = vpop.f32.mrb[7].mxu0 }
 0x454   : > { %v743_v25 = vpop.f32.mrb[8].mxu1 }
 0x455   : > { %v3189_v26 = vpop.f32.mrb[9].mxu1  ;;  %v964_v27 = vpop.f32.mrb[8].mxu0  ;;  %v749_v28 = vsel %vm637_vm4, %v743_v25, -inf }
 0x456   : > { %v3213_v30 = vpop.f32.mrb[9].mxu0  ;;  %750 = vmax.xlane.f32.xlu1 %v749_v28  ;;  %v746_v31 = vpop.f32.mrb[10].mxu1  ;;  %v970_v32 = vsel %vm637_vm4, %v964_v27, -inf }
 0x457   : > { %971 = vmax.xlane.f32.xlu0 %v970_v32  ;;  %v3190_v33 = vpop.f32.mrb[11].mxu1  ;;  %v967_v34 = vpop.f32.mrb[10].mxu0 }
 0x458   : > { %v3214_v35 = vpop.f32.mrb[11].mxu0 }
 0x45d   : > { %v1074_v36 = vpop.f32.mrb[12].mxu0 }
 0x45e   : > { %v3225_v37 = vpop.f32.mrb[13].mxu0  ;;  %v1080_v38 = vsel %vm637_vm4, %v1074_v36, -inf }
 0x45f   : > { %v1077_v39 = vpop.f32.mrb[14].mxu0  ;;  %1081 = vmax.xlane.f32.xlu1 %v1080_v38 }
 0x460   : > { %v3226_v40 = vpop.f32.mrb[15].mxu0 }
 0x465   : > { %v1184_v41 = vpop.f32.mrb[16].mxu0 }
 0x466   : > { %v3237_v42 = vpop.f32.mrb[17].mxu0  ;;  %v1190_v43 = vsel %vm637_vm4, %v1184_v41, -inf }
 0x467   : > { %1191 = vmax.xlane.f32.xlu0 %v1190_v43  ;;  %v1187_v44 = vpop.f32.mrb[18].mxu0 }
 0x468   : > { %v3238_v45 = vpop.f32.mrb[19].mxu0 }
 0x46d   : > { %v1294_v46 = vpop.f32.mrb[20].mxu0 }
 0x46e   : > { %v3249_v47 = vpop.f32.mrb[21].mxu0  ;;  %v1300_v48 = vsel %vm637_vm4, %v1294_v46, -inf }
 0x46f   : > { %v1297_v49 = vpop.f32.mrb[22].mxu0  ;;  %1301 = vmax.xlane.f32.xlu1 %v1300_v48 }
 0x470   : > { %v3250_v50 = vpop.f32.mrb[23].mxu0 }
 0x475   : > { %v1404_v51 = vpop.f32.mrb[24].mxu0 }
 0x476   : > { %v3261_v52 = vpop.f32.mrb[25].mxu0  ;;  %v1410_v53 = vsel %vm637_vm4, %v1404_v51, -inf }
 0x477   : > { %1411 = vmax.xlane.f32.xlu0 %v1410_v53  ;;  %v1407_v54 = vpop.f32.mrb[26].mxu0 }
 0x478   : > { %v3262_v55 = vpop.f32.mrb[27].mxu0 }
 0x4dc   : > { %v862_v56 = vpop.xlane.xlu0 %861 }
 0x4dd   : > { %v863_v57 = vsub.f32 %v854_v17, %v862_v56 }
 0x4df   : > { %v864_v58 = vmul.f32 1.442695, %v863_v57 }
 0x4e1   : > { %3491 = vpow2.f32 %v864_v58 }
 0x4e3   : > { %v751_v59 = vpop.xlane.xlu1 %750 }
 0x4e4   : > { %v752_v60 = vsub.f32 %v743_v25, %v751_v59  ;;  %v972_v61 = vpop.xlane.xlu0 %971 }
 0x4e5   : > { %v973_v62 = vsub.f32 %v964_v27, %v972_v61 }
 0x4e6   : > { %v753_v63 = vmul.f32 1.442695, %v752_v60 }
 0x4e7   : > { %v974_v10 = vmul.f32 1.442695, %v973_v62 }
 0x4e9   : > { %3493 = vpow2.f32 %v974_v10 }
 0x4ea   : > { %3495 = vpow2.f32 %v753_v63 }
 0x4eb   : > { %v3821_v11 = vpop.eup %3491 }
 0x4ec   : > { %v1082_v12 = vpop.xlane.xlu1 %1081  ;;  %v866_v15 = vsel %vm637_vm4, %v3821_v11, 0.0 }
 0x4ed   : > { %v1083_v18 = vsub.f32 %v1074_v36, %v1082_v12  ;;  %867 = vadd.xlane.f32.xlu0 %v866_v15 }
 0x4ef   : > { %v1084_v19 = vmul.f32 1.442695, %v1083_v18 }
 0x4f1   : > { %3497 = vpow2.f32 %v1084_v19 }
 0x4f3   : > { %v3825_v17 = vpop.eup %3493 }
 0x4f4   : > { %v1192_v20 = vpop.xlane.xlu0 %1191  ;;  %v976_v21 = vsel %vm637_vm4, %v3825_v17, 0.0  ;;  %v3496_v22 = vpop.eup %3495 }
 0x4f5   : > { %v1193_v23 = vsub.f32 %v1184_v41, %v1192_v20  ;;  %977 = vadd.xlane.f32.xlu1 %v976_v21  ;;  %v755_v26 = vsel %vm637_vm4, %v3496_v22, 0.0 }
 0x4f7   : > { %v1194_v25 = vmul.f32 1.442695, %v1193_v23 }
 0x4f9   : > { %3499 = vpow2.f32 %v1194_v25  ;;  %756 = vadd.xlane.f32.xlu1 %v755_v26 }
 0x4fb   : > { %v3830_v27 = vpop.eup %3497 }
 0x4fc   : > { %v1086_v28 = vsel %vm637_vm4, %v3830_v27, 0.0  ;;  %v1302_v32 = vpop.xlane.xlu1 %1301 }
 0x4fd   : > { %1087 = vadd.xlane.f32.xlu0 %v1086_v28  ;;  %v1303_v33 = vsub.f32 %v1294_v46, %v1302_v32 }
 0x4ff   : > { %v1304_v34 = vmul.f32 1.442695, %v1303_v33 }
 0x501   : > { %3501 = vpow2.f32 %v1304_v34 }
 0x503   : > { %v3834_v30 = vpop.eup %3499 }
 0x504   : > { %v1196_v31 = vsel %vm637_vm4, %v3834_v30, 0.0  ;;  %v1412_v35 = vpop.xlane.xlu0 %1411 }
 0x505   : > { %1197 = vadd.xlane.f32.xlu0 %v1196_v31  ;;  %v1413_v36 = vsub.f32 %v1404_v51, %v1412_v35 }
 0x507   : > { %v1414_v38 = vmul.f32 1.442695, %v1413_v36 }
 0x509   : > { %3503 = vpow2.f32 %v1414_v38 }
 0x50a   : > { %762 = vrot.lane.b32.xlu1 %v3751_v29, %s3579_s26 }
 0x50b   : > { %v3844_v37 = vpop.eup %3501 }
 0x50c   : > { %v1306_v39 = vsel %vm637_vm4, %v3844_v37, 0.0 }
 0x513   : > { %v3848_v40 = vpop.eup %3503 }
 0x514   : > { %v1416_v41 = vsel %vm637_vm4, %v3848_v40, 0.0 }
 0x51b   : > { %872 = vrot.lane.b32.xlu0 %v3751_v29, %s3581_s28 }
 0x51f   : > { %982 = vrot.lane.b32.xlu0 %v3751_v29, %s3576_s20 }
 0x52e   : > { %1307 = vadd.xlane.f32.xlu1 %v1306_v39 }
 0x53e   : > { %1417 = vadd.xlane.f32.xlu0 %v1416_v41 }
 0x53f   : > { %1092 = vrot.lane.b32.xlu1 %v3751_v29, %s4322_s15  ;;  %s4328_s15 = smov 8  }
 0x543   : > { %1312 = vrot.lane.b32.xlu1 %v3751_v29, %s4314_s22  ;;  %s4325_s22 = smov 96  }
 0x547   : > { %1422 = vrot.lane.b32.xlu1 %v3751_v29, %s4312_s23  ;;  %s4327_s23 = smov 88  }
 0x554   : > { %1202 = vrot.lane.b32.xlu0 %v3751_v29, %s4318_s17  ;;  %s4329_s17 = smov 80  }
 0x57a   : > { %v868_v44 = vpop.xlane.xlu0 %867 }
 0x582   : > { %v978_v42 = vpop.xlane.xlu1 %977 }
 0x586   : > { %v757_v43 = vpop.xlane.xlu1 %756 }
 0x587   : > { %3505 = vrcp.f32 %v757_v43 }
 0x588   : > { %3507 = vrcp.f32 %v868_v44 }
 0x589   : > { %3509 = vrcp.f32 %v978_v42 }
 0x58a   : > { %v763_v45 = vpop.permute.xlu1 %762  ;;  %v1088_v47 = vpop.xlane.xlu0 %1087 }
 0x58b   : > { %v768_v46 = vsel %vm654_vm3, %v763_v45, 0  ;;  %3511 = vrcp.f32 %v1088_v47 }
 0x58c   : > { %3192 = vmatpush3.bf16.msra.mxu1 %v768_v46 }
 0x58d   : > { %3203 = vmatprep.subr.bf16.mxu1 %v3572_v13 }
 0x591   : > { %v3506_v48 = vpop.eup %3505 }
 0x592   : > { %v759_v49 = vmul.f32 %v3506_v48, %v3496_v22  ;;  %v1198_v50 = vpop.xlane.xlu0 %1197  ;;  %v3508_v52 = vpop.eup %3507 }
 0x593   : > { %v870_v54 = vmul.f32 %v3508_v52, %v3821_v11  ;;  %v3510_v57 = vpop.eup %3509  ;;  %3513 = vrcp.f32 %v1198_v50  ;;  %v3908_v50 = vld [vmem:[%s4299_s3] sm:$0xff]   ;;  %v3921_v52 = vld [vmem:[%s4299_s3 + $0x10] sm:$0xff]  }
 0x594   : > { %v760_v51 = vpack.c.bf16 %v759_v49, %v759_v49  ;;  %v980_v59 = vmul.f32 %v3510_v57, %v3825_v17  ;;  %3270 = vmatpush3.bf16.msra.mxu0 %v3908_v50 }
 0x595   : > { %v871_v56 = vpack.c.bf16 %v870_v54, %v870_v54  ;;  %v3512_v61 = vpop.eup %3511  ;;  %3271 = vmatprep.subr.bf16.mxu0 %v3572_v13 }
 0x596   : > { %v873_v53 = vpop.permute.xlu0 %872  ;;  %3194 = vmatmul.mubr.msk.bf16.vlgmr.msra.gmra.mrb[12].mxu1 %vm650_vm5, %v760_v51  ;;  %v981_v60 = vpack.c.bf16 %v980_v59, %v980_v59  ;;  %v1090_v63 = vmul.f32 %v3512_v61, %v3830_v27  ;;  %v3915_v51 = vld [vmem:[%s4299_s3 + $0x8] sm:$0xff]  }
 0x597   : > { %v878_v29 = vsel %vm654_vm3, %v873_v53, 0  ;;  %3205 = vmatprep.mubr.msk.bf16.mxu1 %vm3573_vm1, %v3572_v13 }
 0x598   : > { %3204 = vmatpush3.bf16.msra.mxu1 %v878_v29  ;;  %v1091_v12 = vpack.c.bf16 %v1090_v63, %v1090_v63  ;;  %3272 = vmatpush3.bf16.msra.mxu0 %v3915_v51 }
 0x599   : > { %3215 = vmatprep.subr.bf16.mxu1 %v3572_v13  ;;  %3273 = vmatprep.subr.bf16.mxu0 %v3572_v13 }
 0x59a   : > { %v983_v55 = vpop.permute.xlu0 %982 }
 0x59b   : > { %v988_v58 = vsel %vm654_vm3, %v983_v55, 0 }
 0x59c   : > { %3274 = vmatpush3.bf16.msra.mxu0 %v3921_v52 }
 0x59d   : > { %v3514_v15 = vpop.eup %3513  ;;  %3275 = vmatprep.subr.bf16.mxu0 %v3572_v13 }
 0x59e   : > { %3206 = vmatmul.mubr.msk.bf16.vlgmr.msra.gmra.mrb[16].mxu1 %vm650_vm5, %v871_v56  ;;  %v1200_v19 = vmul.f32 %v3514_v15, %v3834_v30  ;;  %v3930_v56 = vld [vmem:[%s4299_s3 + $0x18] sm:$0xff]  }
 0x59f   : > { %3216 = vmatpush3.bf16.msra.mxu1 %v988_v58  ;;  %3217 = vmatprep.mubr.msk.bf16.mxu1 %vm3573_vm1, %v3572_v13 }
 0x5a0   : > { %3227 = vmatprep.subr.bf16.mxu1 %v3572_v13  ;;  %v1201_v22 = vpack.c.bf16 %v1200_v19, %v1200_v19  ;;  %3276 = vmatpush3.bf16.msra.mxu0 %v3930_v56 }
 0x5a1   : > { %3293 = vmatprep.subr.bf16.mxu0 %v3572_v13 }
 0x5a6   : > { %3218 = vmatmul.mubr.msk.bf16.vlgmr.msra.gmra.mrb[20].mxu1 %vm650_vm5, %v981_v60 }
 0x5a7   : > { %3229 = vmatprep.mubr.msk.bf16.mxu1 %vm3573_vm1, %v3572_v13 }
 0x5bb   : > { %v1308_v62 = vpop.xlane.xlu1 %1307 }
 0x5bc   : > { %3515 = vrcp.f32 %v1308_v62 }
 0x5bf   : > { %v1093_v10 = vpop.permute.xlu1 %1092 }
 0x5c0   : > { %v1098_v11 = vsel %vm654_vm3, %v1093_v10, 0 }
 0x5c1   : > { %3228 = vmatpush3.bf16.msra.mxu1 %v1098_v11 }
 0x5c2   : > { %3239 = vmatprep.subr.bf16.mxu1 %v3572_v13 }
 0x5c3   : > { %v1313_v21 = vpop.permute.xlu1 %1312 }
 0x5c4   : > { %3230 = vmatmul.mubr.msk.bf16.vlgmr.msra.gmra.mrb[24].mxu1 %vm650_vm5, %v1091_v12  ;;  %v1318_v25 = vsel %vm654_vm3, %v1313_v21, 0 }
 0x5c5   : > { %3241 = vmatprep.mubr.msk.bf16.mxu1 %vm3573_vm1, %v3572_v13 }
 0x5c6   : > { %v3516_v23 = vpop.eup %3515 }
 0x5c7   : > { %v1310_v26 = vmul.f32 %v3516_v23, %v3844_v37  ;;  %v1423_v27 = vpop.permute.xlu1 %1422 }
 0x5c8   : > { %v1428_v31 = vsel %vm654_vm3, %v1423_v27, 0 }
 0x5c9   : > { %v1311_v28 = vpack.c.bf16 %v1310_v26, %v1310_v26 }
 0x5cb   : > { %v1418_v18 = vpop.xlane.xlu0 %1417 }
 0x5cc   : > { %3517 = vrcp.f32 %v1418_v18 }
 0x5cf   : > { %v1203_v17 = vpop.permute.xlu0 %1202 }
 0x5d0   : > { %v1208_v20 = vsel %vm654_vm3, %v1203_v17, 0 }
 0x5d1   : > { %3240 = vmatpush3.bf16.msra.mxu1 %v1208_v20 }
 0x5d2   : > { %3251 = vmatprep.subr.bf16.mxu1 %v3572_v13 }
 0x5d4   : > { %3242 = vmatmul.mubr.msk.bf16.vlgmr.msra.gmra.mrb[28].mxu1 %vm650_vm5, %v1201_v22 }
 0x5d5   : > { %3252 = vmatpush3.bf16.msra.mxu1 %v1318_v25  ;;  %3253 = vmatprep.mubr.msk.bf16.mxu1 %vm3573_vm1, %v3572_v13 }
 0x5d6   : > { %3263 = vmatprep.subr.bf16.mxu1 %v3572_v13  ;;  %v3518_v30 = vpop.eup %3517 }
 0x5d7   : > { %v1420_v32 = vmul.f32 %v3518_v30, %v3848_v40 }
 0x5d9   : > { %v1421_v33 = vpack.c.bf16 %v1420_v32, %v1420_v32 }
 0x5dc   : > { %3254 = vmatmul.mubr.msk.bf16.vlgmr.msra.gmra.mrb[32].mxu1 %vm650_vm5, %v1311_v28 }
 0x5dd   : > { %3264 = vmatpush3.bf16.msra.mxu1 %v1428_v31  ;;  %3265 = vmatprep.mubr.msk.bf16.mxu1 %vm3573_vm1, %v3572_v13  ;;  %v3950_v31 = vld [vmem:[%s4300_s4] ss:$0 sm:$0xff] }
 0x5de   : > { %3281 = vmatprep.subr.bf16.mxu1 %v3572_v13 }
 0x5e4   : > { %3266 = vmatmul.mubr.msk.bf16.vlgmr.msra.gmra.mrb[36].mxu1 %vm650_vm5, %v1421_v33 }
 0x5e5   : > { %3289 = vmatprep.mubr.msk.bf16.mxu1 %vm3573_vm1, %v3572_v13 }
 0x669   : > { %v804_v34 = vpop.f32.mrb[12].mxu1 }
 0x66a   : > { %1471 = vrot.lane.b32.xlu1 %v804_v34, %s4316_s19  ;;  %v3195_v35 = vpop.f32.mrb[13].mxu1  ;;  %s4324_s19 = smov 64  }
 0x66b   : > { %v807_v36 = vpop.f32.mrb[14].mxu1 }
 0x66c   : > { %v3196_v37 = vpop.f32.mrb[15].mxu1 }
 0x671   : > { %v914_v38 = vpop.f32.mrb[16].mxu1 }
 0x672   : > { %1475 = vrot.lane.b32.xlu1 %v914_v38, %s4320_s21  ;;  %v3207_v39 = vpop.f32.mrb[17].mxu1  ;;  %s4326_s21 = smov 16  }
 0x673   : > { %v917_v41 = vpop.f32.mrb[18].mxu1 }
 0x674   : > { %v3208_v40 = vpop.f32.mrb[19].mxu1 }
 0x679   : > { %v1024_v42 = vpop.f32.mrb[20].mxu1 }
 0x67a   : > { %1479 = vrot.lane.b32.xlu0 %v1024_v42, %s3585_s16  ;;  %v3219_v43 = vpop.f32.mrb[21].mxu1 }
 0x67b   : > { %v1027_v44 = vpop.f32.mrb[22].mxu1  ;;  %v3966_v43 = vld [vmem:[%s4303_s7 + $0x8] sm:$0xff]  }
 0x67c   : > { %v3220_v45 = vpop.f32.mrb[23].mxu1  ;;  %v3973_v44 = vld [vmem:[%s4303_s7 + $0x10] sm:$0xff]  }
 0x67d   : > { %v3980_v45 = vld [vmem:[%s4303_s7 + $0x18] sm:$0xff]  }
 0x697   : > { %v1134_v46 = vpop.f32.mrb[24].mxu1 }
 0x698   : > { %1483 = vrot.lane.b32.xlu1 %v1134_v46, %s3583_s14  ;;  %v3231_v47 = vpop.f32.mrb[25].mxu1 }
 0x699   : > { %v1137_v48 = vpop.f32.mrb[26].mxu1 }
 0x69a   : > { %v3232_v49 = vpop.f32.mrb[27].mxu1 }
 0x6a7   : > { %v1244_v53 = vpop.f32.mrb[28].mxu1 }
 0x6a8   : > { %1487 = vrot.lane.b32.xlu0 %v1244_v53, %s3582_s30  ;;  %v3243_v29 = vpop.f32.mrb[29].mxu1  ;;  %v3987_v53 = vld [vmem:[%s4301_s5] ss:$0 sm:$0xff] }
 0x6a9   : > { %v1247_v54 = vpop.f32.mrb[30].mxu1 }
 0x6aa   : > { %v3244_v55 = vpop.f32.mrb[31].mxu1  ;;  %v3992_v54 = vld [vmem:[%s4302_s6] ss:$0 sm:$0xff] }
 0x6af   : > { %v1354_v57 = vpop.f32.mrb[32].mxu1 }
 0x6b0   : > { %1491 = vrot.lane.b32.xlu1 %v1354_v57, %s3580_s27  ;;  %v3255_v58 = vpop.f32.mrb[33].mxu1 }
 0x6b1   : > { %v1357_v59 = vpop.f32.mrb[34].mxu1  ;;  %v4007_v58 = vld [vmem:[%s3704_s24 + $0x4] sm:$0xf]  ;;  %s4330_s24 = smov 72  }
 0x6b2   : > { %v3256_v60 = vpop.f32.mrb[35].mxu1  ;;  %v1804_v59 = vpack.c.bf16 %v4007_v58, %v4007_v58 }
 0x6b7   : > { %v1464_v61 = vpop.f32.mrb[36].mxu1 }
 0x6b8   : > { %1495 = vrot.lane.b32.xlu0 %v1464_v61, %s3574_s18  ;;  %v3267_v62 = vpop.f32.mrb[37].mxu1 }
 0x6b9   : > { %v1467_v63 = vpop.f32.mrb[38].mxu1 }
 0x6ba   : > { %v3268_v10 = vpop.f32.mrb[39].mxu1 }
 0x6dc   : > { %v1472_v11 = vpop.permute.xlu1 %1471 }
 0x6dd   : > { %v1498_v19 = vsel %vm590_vm2, %v3812_v14, %v1472_v11 }
 0x6e4   : > { %v1476_v12 = vpop.permute.xlu1 %1475 }
 0x6e5   : > { %v1500_v17 = vsel %vm1499_vm6, %v1498_v19, %v1476_v12 }
 0x6ec   : > { %v1480_v15 = vpop.permute.xlu0 %1479 }
 0x6ed   : > { %v1502_v21 = vsel %vm1501_vm7, %v1500_v17, %v1480_v15 }
 0x70a   : > { %v1484_v18 = vpop.permute.xlu1 %1483 }
 0x70b   : > { %v1504_v23 = vsel %vm1503_vm8, %v1502_v21, %v1484_v18 }
 0x71a   : > { %v1488_v20 = vpop.permute.xlu0 %1487 }
 0x71b   : > { %v1506_v25 = vsel %vm1505_vm9, %v1504_v23, %v1488_v20 }
 0x722   : > { %v1492_v22 = vpop.permute.xlu1 %1491 }
 0x723   : > { %v1508_v26 = vsel %vm1507_vm10, %v1506_v25, %v1492_v22 }
 0x72a   : > { %v1496_v27 = vpop.permute.xlu0 %1495 }
 0x72b   : > { %v1510_v28 = vsel %vm1509_vm11, %v1508_v26, %v1496_v27 }
 0x72c   : > { %v1511_v14 = vpack.c.bf16 %v1510_v28, %v1510_v28 }
 0x72e   : > { %3278 = vmatmul.mubr.msk.bf16.vlgmr.msra.gmra.mrb[28].mxu0 %vm538_vm0, %v1511_v14 }
 0x72f   : > { %3301 = vmatprep.mubr.msk.bf16.mxu0 %vm3573_vm1, %v3572_v13 }
 0x801   : > { %v1573_v30 = vpop.f32.mrb[28].mxu0 }
 0x802   : > { %v1579_v32 = vadd.f32 %v1573_v30, %v3724_v9  ;;  %v3279_v33 = vpop.f32.mrb[29].mxu0  ;;  %v3959_v9 = vld [vmem:[%s4303_s7] sm:$0xff]  }
 0x803   : > { %v1576_v34 = vpop.f32.mrb[30].mxu0  ;;  %3282 = vmatpush3.bf16.msra.mxu1 %v3959_v9 }
 0x804   : > { %v3280_v35 = vpop.f32.mrb[31].mxu0  ;;  %v1586_v36 = vadd.f32 %v3950_v31, %v1579_v32  ;;  %3283 = vmatprep.subr.bf16.mxu1 %v3572_v13 }
 0x806   : > { %v1588_v37 = vsel %vm1587_vm12, %v1586_v36, 0.0 }
 0x807   : > { %1589 = vadd.xlane.f32.xlu1 %v1588_v37  ;;  %3284 = vmatpush3.bf16.msra.mxu1 %v3966_v43 }
 0x808   : > { %3285 = vmatprep.subr.bf16.mxu1 %v3572_v13 }
 0x80b   : > { %3286 = vmatpush3.bf16.msra.mxu1 %v3973_v44 }
 0x80c   : > { %3287 = vmatprep.subr.bf16.mxu1 %v3572_v13 }
 0x80f   : > { %3288 = vmatpush3.bf16.msra.mxu1 %v3980_v45 }
 0x810   : > { %1808 = vmatprep.subr.bf16.mxu1 %v3670_v0 }
 0x894   : > { %v1590_v38 = vpop.xlane.xlu1 %1589 }
 0x895   : > { %v1592_v39 = vmul.f32 0.015625, %v1590_v38 }
 0x897   : > { %v1593_v41 = vsub.f32 %v1586_v36, %v1592_v39 }
 0x899   : > { %v1594_v40 = vmul.f32 %v1593_v41, %v1593_v41 }
 0x89b   : > { %v1595_v42 = vsel %vm1587_vm12, %v1594_v40, 0.0 }
 0x89c   : > { %1596 = vadd.xlane.f32.xlu0 %v1595_v42 }
 0x929   : > { %v1597_v46 = vpop.xlane.xlu0 %1596 }
 0x92a   : > { %v1598_v47 = vmul.f32 0.015625, %v1597_v46 }
 0x92c   : > { %v1599_v48 = vadd.f32 1e-05, %v1598_v47 }
 0x92e   : > { %3519 = vrsqrt.f32 %v1599_v48 }
 0x938   : > { %v3520_v49 = vpop.eup %3519 }
 0x939   : > { %v1601_v29 = vmul.f32 %v3520_v49, %v1593_v41 }
 0x93b   : > { %v1608_v55 = vmul.f32 %v3987_v53, %v1601_v29 }
 0x93d   : > { %v3996_v0 = vadd.f32 %v3992_v54, %v1608_v55 }
 0x93f   : > { %v1616_v57 = vpack.c.bf16 %v3996_v0, %v3996_v0 }
 0x941   : > { %3290 = vmatmul.mubr.msk.bf16.vlgmr.msra.gmra.mrb[40].mxu1 %vm538_vm0, %v1616_v57 }
 0x942   : > { %1809 = vmatpush1.bf16.msra.mxu1 %v3675_v1  ;;  %1840 = vmatprep.mubr.bf16.mxu1 %v3571_v2  ;;  %v4021_v1 = vld [vmem:[%s4305_s9] sm:$0xff]   ;;  %v4028_v2 = vld [vmem:[%s4305_s9 + $0x8] sm:$0xff]  }
 0x943   : > { %1810 = vmatprep.subr.bf16.mxu1 %v3682_v3  ;;  %3294 = vmatpush3.bf16.msra.mxu0 %v4021_v1  ;;  %v4035_v3 = vld [vmem:[%s4305_s9 + $0x10] sm:$0xff]  }
 0x944   : > { %3295 = vmatprep.subr.bf16.mxu0 %v3572_v13 }
 0x946   : > { %1811 = vmatpush1.bf16.msra.mxu1 %v3688_v4  ;;  %v4042_v4 = vld [vmem:[%s4305_s9 + $0x18] sm:$0xff]  }
 0x947   : > { %1812 = vmatprep.subr.bf16.mxu1 %v3696_v5  ;;  %3296 = vmatpush3.bf16.msra.mxu0 %v4028_v2  ;;  %v4049_v5 = vld [vmem:[%s4304_s8] ss:$0 sm:$0xff] }
 0x948   : > { %3297 = vmatprep.subr.bf16.mxu0 %v3572_v13 }
 0x94a   : > { %1813 = vmatpush1.bf16.msra.mxu1 %v3710_v6 }
 0x94b   : > { %1814 = vmatprep.subr.bf16.mxu1 %v3715_v7  ;;  %3298 = vmatpush3.bf16.msra.mxu0 %v4035_v3 }
 0x94c   : > { %3299 = vmatprep.subr.bf16.mxu0 %v3572_v13 }
 0x94e   : > { %1815 = vmatpush1.bf16.msra.mxu1 %v3721_v8 }
 0x94f   : > { %3311 = vmatprep.subr.bf16.mxu1 %v3572_v13  ;;  %3300 = vmatpush3.bf16.msra.mxu0 %v4042_v4 }
 0x950   : > { %3305 = vmatprep.subr.bf16.mxu0 %v3572_v13 }
 0x951   : > { %3056 = vmatmul.mubr.msk.bf16.vlgmr.msra.gmra.mrb[44].mxu1 %vm538_vm0, %v1804_v59 }
 0x952   : > { %3313 = vmatprep.mubr.msk.bf16.mxu1 %vm3573_vm1, %v3572_v13 }
 0xa14   : > { %v1684_v6 = vpop.f32.mrb[40].mxu1 }
 0xa15   : > { %v1685_v7 = vadd.f32 %v4049_v5, %v1684_v6  ;;  %v3291_v8 = vpop.f32.mrb[41].mxu1 }
 0xa16   : > { %v1687_v60 = vpop.f32.mrb[42].mxu1 }
 0xa17   : > { %v1691_v61 = vmul.f32 0.044715, %v1685_v7  ;;  %v3292_v62 = vpop.f32.mrb[43].mxu1 }
 0xa19   : > { %v1692_v63 = vmul.f32 %v1691_v61, %v1685_v7 }
 0xa1b   : > { %v1693_v10 = vmul.f32 %v1692_v63, %v1685_v7 }
 0xa1d   : > { %v1694_v11 = vadd.f32 %v1693_v10, %v1685_v7 }
 0xa1f   : > { %v1695_v12 = vmul.f32 0.7978846, %v1694_v11 }
 0xa21   : > { %3521 = vtanh.f32 %v1695_v12 }
 0xa24   : > { %v1842_v15 = vpop.f32.mrb[44].mxu1 }
 0xa25   : > { %v1843_v18 = vadd.f32 %v1842_v15, %v3741_v16  ;;  %v1844_v19 = vpop.f32.mrb[45].mxu1  ;;  %v1690_v16 = vmul.f32 0.5, %v1685_v7 }
 0xa26   : > { %v1845_v17 = vadd.f32 %v1844_v19, %v3746_v24  ;;  %v1846_v20 = vpop.f32.mrb[46].mxu1 }
 0xa27   : > { %v1849_v21 = vmul.f32 0.35355338, %v1843_v18  ;;  %v1851_v22 = vpack.c.bf16 %v1843_v18, %v1843_v18  ;;  %v1847_v23 = vpop.f32.mrb[47].mxu1 }
 0xa28   : > { %v4054_v25 = vpack.c.bf16 %v1845_v17, %v1845_v17 }
 0xa29   : > { %1963 = vrot.lane.b32.xlu1 %v1851_v22, %s3574_s18  ;;  %1854 = vrot.lane.b32.xlu0 %v1851_v22, %s4324_s19  ;;  %v1850_v28 = vpack.c.bf16 %v1849_v21, %v1849_v21 }
 0xa2a   : > { %v1918_v26 = vsel %vm654_vm3, %v4054_v25, 0 }
 0xa2b   : > { %v3522_v27 = vpop.eup %3521  ;;  %3312 = vmatpush3.bf16.msra.mxu1 %v1918_v26 }
 0xa2c   : > { %v1697_v14 = vadd.f32 1.0, %v3522_v27  ;;  %3323 = vmatprep.subr.bf16.mxu1 %v3572_v13 }
 0xa2d   : > { %2074 = vrot.lane.b32.xlu0 %v1851_v22, %s3580_s27  ;;  %1961 = vrot.lane.b32.xlu1 %v1850_v28, %s3579_s26 }
 0xa2e   : > { %v1698_v24 = vmul.f32 %v1697_v14, %v1690_v16 }
 0xa30   : > { %v1699_v30 = vpack.c.bf16 %v1698_v24, %v1698_v24 }
 0xa31   : > { %2184 = vrot.lane.b32.xlu0 %v1851_v22, %s3582_s30  ;;  %2072 = vrot.lane.b32.xlu1 %v1850_v28, %s3581_s28 }
 0xa32   : > { %3302 = vmatmul.mubr.msk.bf16.vlgmr.msra.gmra.mrb[32].mxu0 %vm538_vm0, %v1699_v30 }
 0xa33   : > { %3307 = vmatprep.mubr.msk.bf16.mxu0 %vm3573_vm1, %v3572_v13 }
 0xa35   : > { %2294 = vrot.lane.b32.xlu0 %v1851_v22, %s3583_s14  ;;  %2182 = vrot.lane.b32.xlu1 %v1850_v28, %s3576_s20 }
 0xa39   : > { %2404 = vrot.lane.b32.xlu0 %v1851_v22, %s3585_s16  ;;  %2292 = vrot.lane.b32.xlu1 %v1850_v28, %s4325_s22 }
 0xa3d   : > { %2514 = vrot.lane.b32.xlu0 %v1851_v22, %s4326_s21  ;;  %2402 = vrot.lane.b32.xlu1 %v1850_v28, %s4327_s23 }
 0xa41   : > { %2624 = vrot.lane.b32.xlu0 %v1851_v22, %s4328_s15  ;;  %2512 = vrot.lane.b32.xlu1 %v1850_v28, %s4329_s17 }
 0xa45   : > { %2622 = vrot.lane.b32.xlu1 %v1850_v28, %s4330_s24 }
 0xa9b   : > { %v1855_v32 = vpop.permute.xlu0 %1854  ;;  %v1964_v34 = vpop.permute.xlu1 %1963 }
 0xa9c   : > { %v1860_v33 = vsel %vm590_vm2, %v1855_v32, 0  ;;  %v1969_v35 = vsel %vm590_vm2, %v1964_v34, 0 }
 0xa9d   : > { %3306 = vmatpush3.bf16.xpose.msra.mxu0 %v1860_v33 }
 0xa9e   : > { %3317 = vmatprep.subr.bf16.mxu0 %v3572_v13 }
 0xa9f   : > { %v2075_v36 = vpop.permute.xlu0 %2074  ;;  %v1962_v37 = vpop.permute.xlu1 %1961 }
 0xaa0   : > { %v2080_v38 = vsel %vm590_vm2, %v2075_v36, 0 }
 0xaa3   : > { %v2185_v39 = vpop.permute.xlu0 %2184  ;;  %v2073_v41 = vpop.permute.xlu1 %2072 }
 0xaa4   : > { %3308 = vmatmul.mubr.msk.bf16.vlgmr.msra.gmra.mrb[36].mxu0 %vm590_vm2, %v1850_v28  ;;  %v2190_v40 = vsel %vm590_vm2, %v2185_v39, 0 }
 0xaa5   : > { %3318 = vmatpush3.bf16.xpose.msra.mxu0 %v1969_v35  ;;  %3319 = vmatprep.mubr.msk.bf16.mxu0 %vm3573_vm1, %v3572_v13 }
 0xaa6   : > { %3329 = vmatprep.subr.bf16.mxu0 %v3572_v13 }
 0xaa7   : > { %v2295_v42 = vpop.permute.xlu0 %2294  ;;  %v2183_v46 = vpop.permute.xlu1 %2182 }
 0xaa8   : > { %v2300_v47 = vsel %vm590_vm2, %v2295_v42, 0 }
 0xaab   : > { %v2405_v48 = vpop.permute.xlu0 %2404  ;;  %v2293_v49 = vpop.permute.xlu1 %2292 }
 0xaac   : > { %3320 = vmatmul.mubr.msk.bf16.vlgmr.msra.gmra.mrb[40].mxu0 %vm590_vm2, %v1962_v37  ;;  %v2410_v29 = vsel %vm590_vm2, %v2405_v48, 0 }
 0xaad   : > { %3330 = vmatpush3.bf16.xpose.msra.mxu0 %v2080_v38  ;;  %3331 = vmatprep.mubr.msk.bf16.mxu0 %vm3573_vm1, %v3572_v13 }
 0xaae   : > { %3341 = vmatprep.subr.bf16.mxu0 %v3572_v13 }
 0xaaf   : > { %v2515_v55 = vpop.permute.xlu0 %2514  ;;  %v2403_v57 = vpop.permute.xlu1 %2402 }
 0xab0   : > { %v2520_v59 = vsel %vm590_vm2, %v2515_v55, 0 }
 0xab3   : > { %v2625_v6 = vpop.permute.xlu0 %2624  ;;  %v2513_v7 = vpop.permute.xlu1 %2512 }
 0xab4   : > { %3332 = vmatmul.mubr.msk.bf16.vlgmr.msra.gmra.mrb[44].mxu0 %vm590_vm2, %v2073_v41  ;;  %v2630_v8 = vsel %vm590_vm2, %v2625_v6, 0 }
 0xab5   : > { %3342 = vmatpush3.bf16.xpose.msra.mxu0 %v2190_v40  ;;  %3343 = vmatprep.mubr.msk.bf16.mxu0 %vm3573_vm1, %v3572_v13 }
 0xab6   : > { %3353 = vmatprep.subr.bf16.mxu0 %v3572_v13 }
 0xab7   : > { %v2623_v60 = vpop.permute.xlu1 %2622 }
 0xabc   : > { %3344 = vmatmul.mubr.msk.bf16.vlgmr.msra.gmra.mrb[48].mxu0 %vm590_vm2, %v2183_v46 }
 0xabd   : > { %3354 = vmatpush3.bf16.xpose.msra.mxu0 %v2300_v47  ;;  %3355 = vmatprep.mubr.msk.bf16.mxu0 %vm3573_vm1, %v3572_v13 }
 0xabe   : > { %3365 = vmatprep.subr.bf16.mxu0 %v3572_v13 }
 0xac4   : > { %3356 = vmatmul.mubr.msk.bf16.vlgmr.msra.gmra.mrb[52].mxu0 %vm590_vm2, %v2293_v49 }
 0xac5   : > { %3366 = vmatpush3.bf16.xpose.msra.mxu0 %v2410_v29  ;;  %3367 = vmatprep.mubr.msk.bf16.mxu0 %vm3573_vm1, %v3572_v13 }
 0xac6   : > { %3377 = vmatprep.subr.bf16.mxu0 %v3572_v13 }
 0xacc   : > { %3368 = vmatmul.mubr.msk.bf16.vlgmr.msra.gmra.mrb[56].mxu0 %vm590_vm2, %v2403_v57 }
 0xacd   : > { %3378 = vmatpush3.bf16.xpose.msra.mxu0 %v2520_v59  ;;  %3379 = vmatprep.mubr.msk.bf16.mxu0 %vm3573_vm1, %v3572_v13 }
 0xace   : > { %3389 = vmatprep.subr.bf16.mxu0 %v3572_v13 }
 0xad4   : > { %3380 = vmatmul.mubr.msk.bf16.vlgmr.msra.gmra.mrb[60].mxu0 %vm590_vm2, %v2513_v7 }
 0xad5   : > { %3390 = vmatpush3.bf16.xpose.msra.mxu0 %v2630_v8  ;;  %3391 = vmatprep.mubr.msk.bf16.mxu0 %vm3573_vm1, %v3572_v13 }
 0xad6   : > { %3401 = vmatprep.subr.bf16.mxu0 %v3572_v13 }
 0xadc   : > { %3392 = vmatmul.mubr.msk.bf16.vlgmr.msra.gmra.mrb[64].mxu0 %vm590_vm2, %v2623_v60 }
 0xadd   : > { %3402 = vmatpush3.bf16.msra.mxu0 %v3908_v50  ;;  %3409 = vmatprep.mubr.msk.bf16.mxu0 %vm3573_vm1, %v3572_v13 }
 0xade   : > { %3403 = vmatprep.subr.bf16.mxu0 %v3572_v13 }
 0xae1   : > { %3404 = vmatpush3.bf16.msra.mxu0 %v3915_v51 }
 0xae2   : > { %3405 = vmatprep.subr.bf16.mxu0 %v3572_v13 }
 0xae5   : > { %3406 = vmatpush3.bf16.msra.mxu0 %v3921_v52 }
 0xae6   : > { %3407 = vmatprep.subr.bf16.mxu0 %v3572_v13 }
 0xae9   : > { %3408 = vmatpush3.bf16.msra.mxu0 %v3930_v56 }
 0xaea   : > { %3425 = vmatprep.subr.bf16.mxu0 %v3572_v13 }
 0xb05   : > { %v4125_v61 = vpop.f32.mrb[32].mxu0 }
 0xb06   : > { %v3303_v50 = vpop.f32.mrb[33].mxu0 }
 0xb07   : > { %v1770_v62 = vpop.f32.mrb[34].mxu0 }
 0xb08   : > { %v3304_v63 = vpop.f32.mrb[35].mxu0 }
 0xb77   : > { %v1896_v10 = vpop.f32.mrb[36].mxu0 }
 0xb78   : > { %v3309_v11 = vpop.f32.mrb[37].mxu0  ;;  %v1902_v12 = vsel %vm637_vm4, %v1896_v10, -inf }
 0xb79   : > { %1903 = vmax.xlane.f32.xlu0 %v1902_v12  ;;  %v1899_v51 = vpop.f32.mrb[38].mxu0 }
 0xb7a   : > { %v3310_v15 = vpop.f32.mrb[39].mxu0 }
 0xb7f   : > { %v2005_v18 = vpop.f32.mrb[40].mxu0 }
 0xb80   : > { %v3321_v52 = vpop.f32.mrb[41].mxu0  ;;  %v2011_v19 = vsel %vm637_vm4, %v2005_v18, -inf }
 0xb81   : > { %2012 = vmax.xlane.f32.xlu1 %v2011_v19  ;;  %v2008_v56 = vpop.f32.mrb[42].mxu0 }
 0xb82   : > { %v3322_v17 = vpop.f32.mrb[43].mxu0 }
 0xb87   : > { %v2116_v20 = vpop.f32.mrb[44].mxu0 }
 0xb88   : > { %v3333_v21 = vpop.f32.mrb[45].mxu0  ;;  %v2122_v22 = vsel %vm637_vm4, %v2116_v20, -inf }
 0xb89   : > { %2123 = vmax.xlane.f32.xlu0 %v2122_v22  ;;  %v2119_v23 = vpop.f32.mrb[46].mxu0 }
 0xb8a   : > { %v3334_v26 = vpop.f32.mrb[47].mxu0 }
 0xb8f   : > { %v2226_v27 = vpop.f32.mrb[48].mxu0 }
 0xb90   : > { %v3345_v28 = vpop.f32.mrb[49].mxu0  ;;  %v2232_v16 = vsel %vm637_vm4, %v2226_v27, -inf }
 0xb91   : > { %2233 = vmax.xlane.f32.xlu0 %v2232_v16  ;;  %v2229_v14 = vpop.f32.mrb[50].mxu0 }
 0xb92   : > { %v3346_v24 = vpop.f32.mrb[51].mxu0 }
 0xb97   : > { %v2336_v30 = vpop.f32.mrb[52].mxu0 }
 0xb98   : > { %v3357_v32 = vpop.f32.mrb[53].mxu0  ;;  %v2342_v33 = vsel %vm637_vm4, %v2336_v30, -inf }
 0xb99   : > { %2343 = vmax.xlane.f32.xlu1 %v2342_v33  ;;  %v2339_v34 = vpop.f32.mrb[54].mxu0 }
 0xb9a   : > { %v3358_v35 = vpop.f32.mrb[55].mxu0 }
 0xb9f   : > { %v2446_v36 = vpop.f32.mrb[56].mxu0 }
 0xba0   : > { %v3369_v37 = vpop.f32.mrb[57].mxu0  ;;  %v2452_v38 = vsel %vm637_vm4, %v2446_v36, -inf }
 0xba1   : > { %2453 = vmax.xlane.f32.xlu0 %v2452_v38  ;;  %v2449_v39 = vpop.f32.mrb[58].mxu0 }
 0xba2   : > { %v3370_v41 = vpop.f32.mrb[59].mxu0 }
 0xba7   : > { %v2556_v40 = vpop.f32.mrb[60].mxu0 }
 0xba8   : > { %v3381_v42 = vpop.f32.mrb[61].mxu0  ;;  %v2562_v46 = vsel %vm637_vm4, %v2556_v40, -inf }
 0xba9   : > { %2563 = vmax.xlane.f32.xlu1 %v2562_v46  ;;  %v2559_v47 = vpop.f32.mrb[62].mxu0 }
 0xbaa   : > { %v3382_v48 = vpop.f32.mrb[63].mxu0 }
 0xbaf   : > { %v2666_v49 = vpop.f32.mrb[64].mxu0 }
 0xbb0   : > { %v3393_v29 = vpop.f32.mrb[65].mxu0  ;;  %v2672_v55 = vsel %vm637_vm4, %v2666_v49, -inf }
 0xbb1   : > { %2673 = vmax.xlane.f32.xlu0 %v2672_v55  ;;  %v2669_v57 = vpop.f32.mrb[66].mxu0 }
 0xbb2   : > { %v3394_v59 = vpop.f32.mrb[67].mxu0 }
 0xbba   : > { %2134 = vrot.lane.b32.xlu1 %v4054_v25, %s3581_s28 }
 0xbc7   : > { %2024 = vrot.lane.b32.xlu0 %v4054_v25, %s3579_s26 }
 0xc06   : > { %v1904_v6 = vpop.xlane.xlu0 %1903 }
 0xc07   : > { %v1905_v7 = vsub.f32 %v1896_v10, %v1904_v6 }
 0xc09   : > { %v1906_v8 = vmul.f32 1.442695, %v1905_v7 }
 0xc0b   : > { %3523 = vpow2.f32 %v1906_v8 }
 0xc0e   : > { %v2013_v60 = vpop.xlane.xlu1 %2012 }
 0xc0f   : > { %v2014_v50 = vsub.f32 %v2005_v18, %v2013_v60 }
 0xc11   : > { %v2015_v62 = vmul.f32 1.442695, %v2014_v50 }
 0xc13   : > { %3525 = vpow2.f32 %v2015_v62 }
 0xc15   : > { %v3524_v63 = vpop.eup %3523 }
 0xc16   : > { %v2124_v11 = vpop.xlane.xlu0 %2123  ;;  %v1908_v12 = vsel %vm637_vm4, %v3524_v63, 0.0 }
 0xc17   : > { %v2125_v51 = vsub.f32 %v2116_v20, %v2124_v11  ;;  %1909 = vadd.xlane.f32.xlu1 %v1908_v12 }
 0xc19   : > { %v2126_v15 = vmul.f32 1.442695, %v2125_v51 }
 0xc1b   : > { %3527 = vpow2.f32 %v2126_v15 }
 0xc1d   : > { %v4140_v52 = vpop.eup %3525 }
 0xc1e   : > { %v2234_v19 = vpop.xlane.xlu0 %2233  ;;  %v2017_v10 = vsel %vm637_vm4, %v4140_v52, 0.0 }
 0xc1f   : > { %v2235_v56 = vsub.f32 %v2226_v27, %v2234_v19  ;;  %2018 = vadd.xlane.f32.xlu0 %v2017_v10 }
 0xc21   : > { %v2236_v17 = vmul.f32 1.442695, %v2235_v56 }
 0xc23   : > { %3529 = vpow2.f32 %v2236_v17 }
 0xc25   : > { %v4144_v18 = vpop.eup %3527 }
 0xc26   : > { %v2128_v21 = vsel %vm637_vm4, %v4144_v18, 0.0  ;;  %v2344_v23 = vpop.xlane.xlu1 %2343 }
 0xc27   : > { %2129 = vadd.xlane.f32.xlu1 %v2128_v21  ;;  %v2345_v26 = vsub.f32 %v2336_v30, %v2344_v23 }
 0xc29   : > { %v2346_v28 = vmul.f32 1.442695, %v2345_v26 }
 0xc2b   : > { %3531 = vpow2.f32 %v2346_v28 }
 0xc2d   : > { %v4148_v20 = vpop.eup %3529 }
 0xc2e   : > { %v2238_v22 = vsel %vm637_vm4, %v4148_v20, 0.0  ;;  %v2454_v27 = vpop.xlane.xlu0 %2453 }
 0xc2f   : > { %2239 = vadd.xlane.f32.xlu0 %v2238_v22  ;;  %v2455_v16 = vsub.f32 %v2446_v36, %v2454_v27 }
 0xc31   : > { %v2456_v33 = vmul.f32 1.442695, %v2455_v16 }
 0xc33   : > { %3533 = vpow2.f32 %v2456_v33 }
 0xc35   : > { %v4156_v38 = vpop.eup %3531 }
 0xc36   : > { %v2564_v14 = vpop.xlane.xlu1 %2563  ;;  %v2348_v39 = vsel %vm637_vm4, %v4156_v38, 0.0 }
 0xc37   : > { %v2565_v32 = vsub.f32 %v2556_v40, %v2564_v14 }
 0xc38   : > { %2244 = vrot.lane.b32.xlu1 %v4054_v25, %s3576_s20 }
 0xc39   : > { %v2566_v35 = vmul.f32 1.442695, %v2565_v32 }
 0xc3a   : > { %v2135_v47 = vpop.permute.xlu1 %2134 }
 0xc3b   : > { %3535 = vpow2.f32 %v2566_v35  ;;  %v2140_v50 = vsel %vm654_vm3, %v2135_v47, 0 }
 0xc3d   : > { %v4160_v30 = vpop.eup %3533 }
 0xc3e   : > { %v2674_v24 = vpop.xlane.xlu0 %2673  ;;  %v2458_v41 = vsel %vm637_vm4, %v4160_v30, 0.0 }
 0xc3f   : > { %v2675_v34 = vsub.f32 %v2666_v49, %v2674_v24 }
 0xc41   : > { %v2676_v37 = vmul.f32 1.442695, %v2675_v34 }
 0xc42   : > { %v2025_v49 = vpop.permute.xlu0 %2024 }
 0xc43   : > { %3537 = vpow2.f32 %v2676_v37  ;;  %v2030_v6 = vsel %vm654_vm3, %v2025_v49, 0 }
 0xc45   : > { %2354 = vrot.lane.b32.xlu0 %v4054_v25, %s4325_s22  ;;  %v4162_v36 = vpop.eup %3535 }
 0xc46   : > { %v2568_v42 = vsel %vm637_vm4, %v4162_v36, 0.0 }
 0xc4d   : > { %v4166_v40 = vpop.eup %3537 }
 0xc4e   : > { %v2678_v46 = vsel %vm637_vm4, %v4166_v40, 0.0 }
 0xc5c   : > { %2349 = vadd.xlane.f32.xlu1 %v2348_v39 }
 0xc60   : > { %2459 = vadd.xlane.f32.xlu1 %v2458_v41 }
 0xc64   : > { %2569 = vadd.xlane.f32.xlu0 %v2568_v42  ;;  %2679 = vadd.xlane.f32.xlu1 %v2678_v46 }
 0xc75   : > { %2464 = vrot.lane.b32.xlu1 %v4054_v25, %s4327_s23 }
 0xc7a   : > { %2574 = vrot.lane.b32.xlu0 %v4054_v25, %s4329_s17 }
 0xc7e   : > { %2684 = vrot.lane.b32.xlu0 %v4054_v25, %s4330_s24 }
 0xca4   : > { %v1910_v48 = vpop.xlane.xlu1 %1909 }
 0xca5   : > { %3539 = vrcp.f32 %v1910_v48 }
 0xcac   : > { %v2019_v29 = vpop.xlane.xlu0 %2018 }
 0xcad   : > { %3541 = vrcp.f32 %v2019_v29 }
 0xcaf   : > { %v3540_v55 = vpop.eup %3539 }
 0xcb0   : > { %v1912_v57 = vmul.f32 %v3540_v55, %v3524_v63 }
 0xcb2   : > { %v1913_v59 = vpack.c.bf16 %v1912_v57, %v1912_v57 }
 0xcb4   : > { %3314 = vmatmul.mubr.msk.bf16.vlgmr.msra.gmra.mrb[48].mxu1 %vm650_vm5, %v1913_v59  ;;  %v2130_v7 = vpop.xlane.xlu1 %2129 }
 0xcb5   : > { %3543 = vrcp.f32 %v2130_v7  ;;  %3324 = vmatpush3.bf16.msra.mxu1 %v2030_v6  ;;  %3325 = vmatprep.mubr.msk.bf16.mxu1 %vm3573_vm1, %v3572_v13 }
 0xcb6   : > { %3335 = vmatprep.subr.bf16.mxu1 %v3572_v13 }
 0xcb7   : > { %v3542_v25 = vpop.eup %3541 }
 0xcb8   : > { %v2021_v8 = vmul.f32 %v3542_v25, %v4140_v52  ;;  %v2245_v12 = vpop.permute.xlu1 %2244 }
 0xcb9   : > { %v2250_v15 = vsel %vm654_vm3, %v2245_v12, 0 }
 0xcba   : > { %v2022_v60 = vpack.c.bf16 %v2021_v8, %v2021_v8 }
 0xcbc   : > { %3326 = vmatmul.mubr.msk.bf16.vlgmr.msra.gmra.mrb[52].mxu1 %vm650_vm5, %v2022_v60  ;;  %v2240_v62 = vpop.xlane.xlu0 %2239 }
 0xcbd   : > { %3336 = vmatpush3.bf16.msra.mxu1 %v2140_v50  ;;  %3545 = vrcp.f32 %v2240_v62  ;;  %3337 = vmatprep.mubr.msk.bf16.mxu1 %vm3573_vm1, %v3572_v13 }
 0xcbe   : > { %3347 = vmatprep.subr.bf16.mxu1 %v3572_v13 }
 0xcbf   : > { %v3544_v63 = vpop.eup %3543 }
 0xcc0   : > { %v2132_v11 = vmul.f32 %v3544_v63, %v4144_v18  ;;  %v2355_v10 = vpop.permute.xlu0 %2354 }
 0xcc1   : > { %v2360_v17 = vsel %vm654_vm3, %v2355_v10, 0 }
 0xcc2   : > { %v2133_v51 = vpack.c.bf16 %v2132_v11, %v2132_v11 }
 0xcc4   : > { %3338 = vmatmul.mubr.msk.bf16.vlgmr.msra.gmra.mrb[56].mxu1 %vm650_vm5, %v2133_v51 }
 0xcc5   : > { %3348 = vmatpush3.bf16.msra.mxu1 %v2250_v15  ;;  %3349 = vmatprep.mubr.msk.bf16.mxu1 %vm3573_vm1, %v3572_v13 }
 0xcc6   : > { %3359 = vmatprep.subr.bf16.mxu1 %v3572_v13 }
 0xcc7   : > { %v3546_v52 = vpop.eup %3545 }
 0xcc8   : > { %v2242_v19 = vmul.f32 %v3546_v52, %v4148_v20 }
 0xcca   : > { %v2243_v56 = vpack.c.bf16 %v2242_v19, %v2242_v19 }
 0xccc   : > { %3350 = vmatmul.mubr.msk.bf16.vlgmr.msra.gmra.mrb[60].mxu1 %vm650_vm5, %v2243_v56 }
 0xccd   : > { %3360 = vmatpush3.bf16.msra.mxu1 %v2360_v17  ;;  %3361 = vmatprep.mubr.msk.bf16.mxu1 %vm3573_vm1, %v3572_v13 }
 0xcce   : > { %3371 = vmatprep.subr.bf16.mxu1 %v3572_v13 }
 0xce9   : > { %v2350_v18 = vpop.xlane.xlu1 %2349 }
 0xcea   : > { %3547 = vrcp.f32 %v2350_v18 }
 0xced   : > { %v2460_v21 = vpop.xlane.xlu1 %2459 }
 0xcee   : > { %3549 = vrcp.f32 %v2460_v21 }
 0xcf1   : > { %v2680_v22 = vpop.xlane.xlu1 %2679  ;;  %v2570_v23 = vpop.xlane.xlu0 %2569 }
 0xcf2   : > { %3551 = vrcp.f32 %v2570_v23 }
 0xcf3   : > { %3553 = vrcp.f32 %v2680_v22 }
 0xcf4   : > { %v3548_v26 = vpop.eup %3547 }
 0xcf5   : > { %v2352_v20 = vmul.f32 %v3548_v26, %v4156_v38  ;;  %v2465_v27 = vpop.permute.xlu1 %2464  ;;  %v2575_v32 = vpop.permute.xlu0 %2574 }
 0xcf6   : > { %v2470_v14 = vsel %vm654_vm3, %v2465_v27, 0  ;;  %v2580_v35 = vsel %vm654_vm3, %v2575_v32, 0 }
 0xcf7   : > { %v2353_v28 = vpack.c.bf16 %v2352_v20, %v2352_v20 }
 0xcf8   : > { %v3550_v16 = vpop.eup %3549 }
 0xcf9   : > { %3362 = vmatmul.mubr.msk.bf16.vlgmr.msra.gmra.mrb[64].mxu1 %vm650_vm5, %v2353_v28  ;;  %v2462_v24 = vmul.f32 %v3550_v16, %v4160_v30  ;;  %v2685_v38 = vpop.permute.xlu0 %2684 }
 0xcfa   : > { %3372 = vmatpush3.bf16.msra.mxu1 %v2470_v14  ;;  %3373 = vmatprep.mubr.msk.bf16.mxu1 %vm3573_vm1, %v3572_v13  ;;  %v2690_v41 = vsel %vm654_vm3, %v2685_v38, 0 }
 0xcfb   : > { %3383 = vmatprep.subr.bf16.mxu1 %v3572_v13  ;;  %v2463_v33 = vpack.c.bf16 %v2462_v24, %v2462_v24 }
 0xcfc   : > { %v3552_v34 = vpop.eup %3551 }
 0xcfd   : > { %v2572_v37 = vmul.f32 %v3552_v34, %v4162_v36  ;;  %v3554_v30 = vpop.eup %3553 }
 0xcfe   : > { %v2682_v42 = vmul.f32 %v3554_v30, %v4166_v40 }
 0xcff   : > { %v2573_v39 = vpack.c.bf16 %v2572_v37, %v2572_v37 }
 0xd00   : > { %v2683_v46 = vpack.c.bf16 %v2682_v42, %v2682_v42 }
 0xd01   : > { %3374 = vmatmul.mubr.msk.bf16.vlgmr.msra.gmra.mrb[68].mxu1 %vm650_vm5, %v2463_v33 }
 0xd02   : > { %3384 = vmatpush3.bf16.msra.mxu1 %v2580_v35  ;;  %3385 = vmatprep.mubr.msk.bf16.mxu1 %vm3573_vm1, %v3572_v13 }
 0xd03   : > { %3395 = vmatprep.subr.bf16.mxu1 %v3572_v13 }
 0xd09   : > { %3386 = vmatmul.mubr.msk.bf16.vlgmr.msra.gmra.mrb[72].mxu1 %vm650_vm5, %v2573_v39  ;;  %v4257_v39 = vld [vmem:[%s4306_s10] ss:$0 sm:$0xff] }
 0xd0a   : > { %3396 = vmatpush3.bf16.msra.mxu1 %v2690_v41  ;;  %3397 = vmatprep.mubr.msk.bf16.mxu1 %vm3573_vm1, %v3572_v13  ;;  %v1768_v30 = vadd.f32 %v4257_v39, %v4125_v61 }
 0xd0b   : > { %3413 = vmatprep.subr.bf16.mxu1 %v3572_v13 }
 0xd11   : > { %3398 = vmatmul.mubr.msk.bf16.vlgmr.msra.gmra.mrb[76].mxu1 %vm650_vm5, %v2683_v46 }
 0xd12   : > { %3414 = vmatpush3.bf16.msra.mxu1 %v3959_v9  ;;  %3421 = vmatprep.mubr.msk.bf16.mxu1 %vm3573_vm1, %v3572_v13 }
 0xd13   : > { %3415 = vmatprep.subr.bf16.mxu1 %v3572_v13 }
 0xd16   : > { %3416 = vmatpush3.bf16.msra.mxu1 %v3966_v43 }
 0xd17   : > { %3417 = vmatprep.subr.bf16.mxu1 %v3572_v13 }
 0xd1a   : > { %3418 = vmatpush3.bf16.msra.mxu1 %v3973_v44 }
 0xd1b   : > { %3419 = vmatprep.subr.bf16.mxu1 %v3572_v13 }
 0xd1e   : > { %3420 = vmatpush3.bf16.msra.mxu1 %v3980_v45 }
 0xd87   : > { %v1954_v36 = vpop.f32.mrb[48].mxu1 }
 0xd88   : > { %v3315_v40 = vpop.f32.mrb[49].mxu1 }
 0xd89   : > { %v1957_v47 = vpop.f32.mrb[50].mxu1 }
 0xd8a   : > { %v3316_v48 = vpop.f32.mrb[51].mxu1 }
 0xd8f   : > { %v2066_v9 = vpop.f32.mrb[52].mxu1 }
 0xd90   : > { %2733 = vrot.lane.b32.xlu1 %v2066_v9, %s4328_s15  ;;  %v3327_v49 = vpop.f32.mrb[53].mxu1 }
 0xd91   : > { %v2069_v29 = vpop.f32.mrb[54].mxu1 }
 0xd92   : > { %v3328_v55 = vpop.f32.mrb[55].mxu1 }
 0xd97   : > { %v2176_v57 = vpop.f32.mrb[56].mxu1 }
 0xd98   : > { %2737 = vrot.lane.b32.xlu0 %v2176_v57, %s4326_s21  ;;  %v3339_v43 = vpop.f32.mrb[57].mxu1 }
 0xd99   : > { %v2179_v59 = vpop.f32.mrb[58].mxu1 }
 0xd9a   : > { %v3340_v44 = vpop.f32.mrb[59].mxu1 }
 0xd9f   : > { %v2286_v6 = vpop.f32.mrb[60].mxu1 }
 0xda0   : > { %2741 = vrot.lane.b32.xlu1 %v2286_v6, %s3585_s16  ;;  %v3351_v45 = vpop.f32.mrb[61].mxu1 }
 0xda1   : > { %v2289_v7 = vpop.f32.mrb[62].mxu1 }
 0xda2   : > { %v3352_v25 = vpop.f32.mrb[63].mxu1 }
 0xdcc   : > { %v2396_v8 = vpop.f32.mrb[64].mxu1 }
 0xdcd   : > { %2745 = vrot.lane.b32.xlu0 %v2396_v8, %s3583_s14  ;;  %v3363_v60 = vpop.f32.mrb[65].mxu1  ;;  %s4331_s14 = sshll.u32 %s4333_s29, 2 }
 0xdce   : > { %v2399_v50 = vpop.f32.mrb[66].mxu1  ;;  %v3053_v60 = vld [vmem:[%s4307_s11] ss:$0 sm:$0xff]  ;;  %s4281_s22 = scalar_lea.vmem %s4309_s13, %s4331_s14 }
 0xdcf   : > { %v3364_v62 = vpop.f32.mrb[67].mxu1 }
 0xdd4   : > { %v2506_v63 = vpop.f32.mrb[68].mxu1 }
 0xdd5   : > { %2749 = vrot.lane.b32.xlu1 %v2506_v63, %s3582_s30  ;;  %v3375_v11 = vpop.f32.mrb[69].mxu1  ;;  %v3054_v63 = vld [vmem:[%s4308_s12] ss:$0 sm:$0xff] }
 0xdd6   : > { %v2509_v12 = vpop.f32.mrb[70].mxu1 }
 0xdd7   : > { %v3376_v51 = vpop.f32.mrb[71].mxu1 }
 0xddc   : > { %v2616_v15 = vpop.f32.mrb[72].mxu1 }
 0xddd   : > { %2753 = vrot.lane.b32.xlu0 %v2616_v15, %s3580_s27  ;;  %v3387_v52 = vpop.f32.mrb[73].mxu1 }
 0xdde   : > { %v2619_v19 = vpop.f32.mrb[74].mxu1 }
 0xddf   : > { %v3388_v10 = vpop.f32.mrb[75].mxu1 }
 0xde4   : > { %v2726_v56 = vpop.f32.mrb[76].mxu1 }
 0xde5   : > { %2757 = vrot.lane.b32.xlu1 %v2726_v56, %s3574_s18  ;;  %v3399_v17 = vpop.f32.mrb[77].mxu1 }
 0xde6   : > { %v2729_v18 = vpop.f32.mrb[78].mxu1 }
 0xde7   : > { %v3400_v21 = vpop.f32.mrb[79].mxu1 }
 0xe02   : > { %v2734_v22 = vpop.permute.xlu1 %2733 }
 0xe03   : > { %v2760_v27 = vsel %vm590_vm2, %v1954_v36, %v2734_v22 }
 0xe0a   : > { %v2738_v23 = vpop.permute.xlu0 %2737 }
 0xe0b   : > { %v2761_v28 = vsel %vm1499_vm6, %v2760_v27, %v2738_v23 }
 0xe12   : > { %v2742_v26 = vpop.permute.xlu1 %2741 }
 0xe13   : > { %v2762_v14 = vsel %vm1501_vm7, %v2761_v28, %v2742_v26 }
 0xe3f   : > { %v2746_v20 = vpop.permute.xlu0 %2745 }
 0xe40   : > { %v2763_v32 = vsel %vm1503_vm8, %v2762_v14, %v2746_v20 }
 0xe47   : > { %v2750_v16 = vpop.permute.xlu1 %2749 }
 0xe48   : > { %v2764_v33 = vsel %vm1505_vm9, %v2763_v32, %v2750_v16 }
 0xe4f   : > { %v2754_v24 = vpop.permute.xlu0 %2753 }
 0xe50   : > { %v2765_v34 = vsel %vm1507_vm10, %v2764_v33, %v2754_v24 }
 0xe57   : > { %v2758_v35 = vpop.permute.xlu1 %2757 }
 0xe58   : > { %v2766_v37 = vsel %vm1509_vm11, %v2765_v34, %v2758_v35 }
 0xe59   : > { %v2767_v38 = vpack.c.bf16 %v2766_v37, %v2766_v37 }
 0xe5b   : > { %3410 = vmatmul.mubr.msk.bf16.vlgmr.msra.gmra.mrb[68].mxu0 %vm538_vm0, %v2767_v38 }
 0xe5c   : > { %3426 = vmatpush3.bf16.msra.mxu0 %v4021_v1  ;;  %3433 = vmatprep.mubr.msk.bf16.mxu0 %vm3573_vm1, %v3572_v13 }
 0xe5d   : > { %3427 = vmatprep.subr.bf16.mxu0 %v3572_v13 }
 0xe60   : > { %3428 = vmatpush3.bf16.msra.mxu0 %v4028_v2 }
 0xe61   : > { %3429 = vmatprep.subr.bf16.mxu0 %v3572_v13 }
 0xe64   : > { %3430 = vmatpush3.bf16.msra.mxu0 %v4035_v3 }
 0xe65   : > { %3431 = vmatprep.subr.bf16.mxu0 %v3572_v13 }
 0xe68   : > { %3432 = vmatpush3.bf16.msra.mxu0 %v4042_v4  ;;  %v1773_v4 = vadd.f32 %v1768_v30, %v3996_v0 }
 0xe6a   : > { %v1774_v36 = vsel %vm1587_vm12, %v1773_v4, 0.0 }
 0xf2e   : > { %v2805_v1 = vpop.f32.mrb[68].mxu0 }
 0xf2f   : > { %v2811_v41 = vadd.f32 %v4007_v58, %v2805_v1  ;;  %v3411_v2 = vpop.f32.mrb[69].mxu0 }
 0xf30   : > { %v2808_v42 = vpop.f32.mrb[70].mxu0 }
 0xf31   : > { %v3412_v46 = vpop.f32.mrb[71].mxu0  ;;  %v2812_v3 = vadd.f32 %v3950_v31, %v2811_v41 }
 0xf33   : > { %v2813_v13 = vsel %vm1587_vm12, %v2812_v3, 0.0 }
 0xf34   : > { %2814 = vadd.xlane.f32.xlu0 %v2813_v13 }
 0xf38   : > { %1775 = vadd.xlane.f32.xlu0 %v1774_v36 }
 0xfc1   : > { %v2815_v40 = vpop.xlane.xlu0 %2814 }
 0xfc2   : > { %v2816_v47 = vmul.f32 0.015625, %v2815_v40 }
 0xfc4   : > { %v2817_v48 = vsub.f32 %v2812_v3, %v2816_v47 }
 0xfc5   : > { %v1776_v9 = vpop.xlane.xlu0 %1775 }
 0xfc6   : > { %v1777_v61 = vmul.f32 0.015625, %v1776_v9  ;;  %v2818_v49 = vmul.f32 %v2817_v48, %v2817_v48 }
 0xfc8   : > { %v1778_v58 = vsub.f32 %v1773_v4, %v1777_v61  ;;  %v2819_v29 = vsel %vm1587_vm12, %v2818_v49, 0.0 }
 0xfc9   : > { %2820 = vadd.xlane.f32.xlu1 %v2819_v29 }
 0xfca   : > { %v1779_v55 = vmul.f32 %v1778_v58, %v1778_v58 }
 0xfcc   : > { %v1780_v31 = vsel %vm1587_vm12, %v1779_v55, 0.0 }
 0xfcd   : > { %1781 = vadd.xlane.f32.xlu1 %v1780_v31 }
0x1056   : > { %v2821_v57 = vpop.xlane.xlu1 %2820 }
0x1057   : > { %v2822_v0 = vmul.f32 0.015625, %v2821_v57 }
0x1059   : > { %v2823_v43 = vadd.f32 1e-05, %v2822_v0 }
0x105a   : > { %v1782_v59 = vpop.xlane.xlu1 %1781 }
0x105b   : > { %3555 = vrsqrt.f32 %v2823_v43  ;;  %v1783_v44 = vmul.f32 0.015625, %v1782_v59 }
0x105d   : > { %v1784_v6 = vadd.f32 1e-05, %v1783_v44 }
0x105f   : > { %3557 = vrsqrt.f32 %v1784_v6 }
0x1065   : > { %v3556_v45 = vpop.eup %3555 }
0x1066   : > { %v2825_v7 = vmul.f32 %v3556_v45, %v2817_v48 }
0x1068   : > { %v2826_v25 = vmul.f32 %v3987_v53, %v2825_v7 }
0x1069   : > { %v3558_v8 = vpop.eup %3557 }
0x106a   : > { %v1786_v50 = vmul.f32 %v3558_v8, %v1778_v58  ;;  %v2827_v62 = vadd.f32 %v3992_v54, %v2826_v25 }
0x106c   : > { %v1793_v11 = vmul.f32 %v3053_v60, %v1786_v50  ;;  %v2828_v12 = vpack.c.bf16 %v2827_v62, %v2827_v62 }
0x106e   : > { %v1800_v53 = vadd.f32 %v3054_v63, %v1793_v11  ;;  %3422 = vmatmul.mubr.msk.bf16.vlgmr.msra.gmra.mrb[80].mxu1 %vm538_vm0, %v2828_v12 }
0x1070   : > { %1801 = vst.msk [vmem:[%s4281_s22] sm:$0xf] %vm1587_vm12, %v1800_v53 }
0x1141   : > { %v2866_v51 = vpop.f32.mrb[80].mxu1 }
0x1142   : > { %v2867_v54 = vadd.f32 %v4049_v5, %v2866_v51  ;;  %v3423_v15 = vpop.f32.mrb[81].mxu1 }
0x1143   : > { %v2869_v52 = vpop.f32.mrb[82].mxu1 }
0x1144   : > { %v2873_v19 = vmul.f32 0.044715, %v2867_v54  ;;  %v3424_v10 = vpop.f32.mrb[83].mxu1  ;;  %v2872_v23 = vmul.f32 0.5, %v2867_v54 }
0x1146   : > { %v2874_v56 = vmul.f32 %v2873_v19, %v2867_v54 }
0x1148   : > { %v2875_v17 = vmul.f32 %v2874_v56, %v2867_v54 }
0x114a   : > { %v2876_v18 = vadd.f32 %v2875_v17, %v2867_v54 }
0x114c   : > { %v2877_v21 = vmul.f32 0.7978846, %v2876_v18 }
0x114e   : > { %3559 = vtanh.f32 %v2877_v21 }
0x1158   : > { %v3560_v22 = vpop.eup %3559 }
0x1159   : > { %v2879_v26 = vadd.f32 1.0, %v3560_v22 }
0x115b   : > { %v2880_v20 = vmul.f32 %v2879_v26, %v2872_v23 }
0x115d   : > { %v2881_v27 = vpack.c.bf16 %v2880_v20, %v2880_v20 }
0x115f   : > { %3434 = vmatmul.mubr.msk.bf16.vlgmr.msra.gmra.mrb[72].mxu0 %vm538_vm0, %v2881_v27 }
0x1232   : > { %v2919_v28 = vpop.f32.mrb[72].mxu0 }
0x1233   : > { %v2920_v16 = vadd.f32 %v4257_v39, %v2919_v28  ;;  %v3435_v5 = vpop.f32.mrb[73].mxu0 }
0x1234   : > { %v2922_v14 = vpop.f32.mrb[74].mxu0 }
0x1235   : > { %v3436_v24 = vpop.f32.mrb[75].mxu0  ;;  %v2925_v32 = vadd.f32 %v2920_v16, %v2827_v62 }
0x1237   : > { %v2926_v33 = vsel %vm1587_vm12, %v2925_v32, 0.0 }
0x1238   : > { %2927 = vadd.xlane.f32.xlu0 %v2926_v33 }
0x12c5   : > { %v2928_v34 = vpop.xlane.xlu0 %2927 }
0x12c6   : > { %v2929_v35 = vmul.f32 0.015625, %v2928_v34 }
0x12c8   : > { %v2930_v37 = vsub.f32 %v2925_v32, %v2929_v35 }
0x12ca   : > { %v2931_v38 = vmul.f32 %v2930_v37, %v2930_v37 }
0x12cc   : > { %v2932_v1 = vsel %vm1587_vm12, %v2931_v38, 0.0 }
0x12cd   : > { %2933 = vadd.xlane.f32.xlu0 %v2932_v1 }
0x135a   : > { %v2934_v30 = vpop.xlane.xlu0 %2933 }
0x135b   : > { %v2935_v41 = vmul.f32 0.015625, %v2934_v30 }
0x135d   : > { %v2936_v2 = vadd.f32 1e-05, %v2935_v41 }
0x135f   : > { %3561 = vrsqrt.f32 %v2936_v2 }
0x1369   : > { %v3562_v39 = vpop.eup %3561 }
0x136a   : > { %v2938_v42 = vmul.f32 %v3562_v39, %v2930_v37 }
0x136c   : > { %v2939_v46 = vmul.f32 %v3053_v60, %v2938_v42 }
0x136e   : > { %v2940_v3 = vadd.f32 %v3054_v63, %v2939_v46 }
0x1370   : > { %3076 = vst.msk [vmem:[%s4281_s22 + $0x4] sm:$0xf] %vm1587_vm12, %v2940_v3 }
0x1371 PF: > { %s23_s25 = sadd.s32 1, %s3569_s25  }
0x1372   : > { %p20_p4 = scmp.ge.s32.totalorder %s23_s25, 13  }
0x1374   :  { %22 = sbr.rel (!%p20_p4) target bundleno = 1 (0x1), region = 104 }

// kernel: diff_csdi_forward.9
= control target key start
LH: loop header
LB: loop body
LE: loop exit
PB: predicated region body
PF: predicated region fallthrough
CT: control target
= control target key end

     0   :  { %s7560_s25 = smov 0   ;;  %s9317_s0 = inlined_call_operand.vmem [shape: f32[8,11,64], index: 0, kind: input, shape index: {}]   ;;  %s9318_s1 = inlined_call_operand.vmem [shape: bf16[64,192], index: 1, kind: input, shape index: {}]   ;;  %s9319_s2 = inlined_call_operand.vmem [shape: f32[1,192], index: 2, kind: input, shape index: {}]   ;;  %s9320_s3 = inlined_call_operand.vmem [shape: bf16[64,64], index: 3, kind: input, shape index: {}]   ;;  %s9321_s4 = inlined_call_operand.vmem [shape: f32[1,64], index: 4, kind: input, shape index: {}]   ;;  %s9322_s5 = inlined_call_operand.vmem [shape: f32[1,64], index: 5, kind: input, shape index: {}]   ;;  %s9323_s6 = inlined_call_operand.vmem [shape: f32[1,64], index: 6, kind: input, shape index: {}]   ;;  %s9324_s7 = inlined_call_operand.vmem [shape: bf16[64,64], index: 7, kind: input, shape index: {}]   ;;  %s9325_s8 = inlined_call_operand.vmem [shape: f32[1,64], index: 8, kind: input, shape index: {}]   ;;  %s9326_s9 = inlined_call_operand.vmem [shape: bf16[64,64], index: 9, kind: input, shape index: {}]   ;;  %s9327_s10 = inlined_call_operand.vmem [shape: f32[1,64], index: 10, kind: input, shape index: {}]   ;;  %s9328_s11 = inlined_call_operand.vmem [shape: f32[1,64], index: 11, kind: input, shape index: {}]   ;;  %s9329_s12 = inlined_call_operand.vmem [shape: f32[1,64], index: 12, kind: input, shape index: {}]   ;;  %s9330_s13 = inlined_call_operand.vmem [shape: f32[8,11,64], index: 13, kind: output, shape index: {}]  }
   0x1   :  { %9365 = sst [smem:[#allocation4_spill]] %s9317_s0 }
   0x2   :  { %9366 = sst [smem:[#allocation5_spill]] %s9319_s2 }
   0x3   :  { %9367 = sst [smem:[#allocation6_spill]] %s9320_s3 }
   0x4   :  { %9368 = sst [smem:[#allocation7_spill]] %s9327_s10 }
   0x5   :  { %9369 = sst [smem:[#allocation8_spill]] %s9328_s11 }
   0x6   :  { %9370 = sst [smem:[#allocation9_spill]] %s9329_s12 }
   0x7   :  { %9371 = sst [smem:[#allocation10_spill]] %s9330_s13 }
   0x8 LB: > { %9372 = sst [smem:[#allocation2_spill]] %s7469_s25  ;;  %s6047_s26 = sadd.s32 4294967295, %s7469_s25   ;;  %s7469_s25 = sphi %s7560_s25, %s23_s25  }
   0x9   : > { %p6051_p0 = scmp.ge.s32.totalorder %s7469_s25, 1  ;;  %p389_p1 = scmp.lt.s32.totalorder %s7469_s25, 3 }
   0xb   : > { %p390_p2 = pnand %p6051_p0, %p389_p1 }
   0xd   : > { %393 = sbr.rel (%p390_p2) target bundleno = 8865 (0x22a1), region = 72 }
  0x14   : > { %v7064_v0 = vld [vmem:[%s9318_s1 + $0x4] ss:$8 sps:$4 sm:$0xff]   ;;  %s6052_s29 = sshll.u32 %s6047_s26, 2  ;;  %v7066_v1 = vld [vmem:[%s9318_s1] ss:$8 sps:$4 sm:$0xff]   ;;  %v7471_v2 = vmov 0   ;;  %v494_v12 = vlaneseq }
  0x15   : > { %580 = vmatprep.mubr.bf16.mxu0 %v7471_v2  ;;  %p436_p3 = scmp.lt.s32.totalorder %s6052_s29, 7  ;;  %548 = vmatprep.subr.bf16.mxu0 %v7064_v0  ;;  %v7067_v3 = vld [vmem:[%s9318_s1 + $0x14] ss:$8 sps:$4 sm:$0xff]   ;;  %v7069_v4 = vld [vmem:[%s9318_s1 + $0x10] ss:$8 sps:$4 sm:$0xff]   ;;  %s9374_s0 = sld [smem:[#allocation4_spill]] }
  0x16   : > { %549 = vmatpush1.bf16.msra.mxu0 %v7066_v1  ;;  %v7070_v5 = vld [vmem:[%s9318_s1 + $0x24] ss:$8 sps:$4 sm:$0xff]   ;;  %v7072_v6 = vld [vmem:[%s9318_s1 + $0x20] ss:$8 sps:$4 sm:$0xff]   ;;  %v7073_v7 = vld [vmem:[%s9318_s1 + $0x34] ss:$8 sps:$4 sm:$0xff]  }
  0x17   : > { %s9401_s29 = smov (!%p436_p3, %s6052_s29), 7  ;;  %550 = vmatprep.subr.bf16.mxu0 %v7067_v3  ;;  %v7075_v8 = vld [vmem:[%s9318_s1 + $0x30] ss:$8 sps:$4 sm:$0xff]   ;;  %vm544_vm0 = vcmask 523264   ;;  %v495_v13 = vshrl.u32 %v494_v12, 7  ;;  %s9375_s2 = sld [smem:[#allocation5_spill]] }
  0x18   : > { %9373 = sst [smem:[#allocation3_spill]] %s9401_s29  ;;  %s9331_s21 = sshll.u32 %s9401_s29, 4  ;;  %v7472_v16 = vmov 0.0   ;;  %vm7473_vm1 = vmmov 0   ;;  %vm599_vm2 = vcmask 64512   ;;  %vm675_vm3 = vcmask 1044480  }
  0x19   : > { %v496_v14 = vsub.s32 0, %v495_v13  ;;  %6369 = vmatprep.subr.bf16.mxu1 %v7472_v16  ;;  %v500_v17 = vsub.s32 1, %v495_v13  ;;  %6371 = vmatprep.mubr.msk.bf16.mxu1 %vm7473_vm1, %v7472_v16  ;;  %s9332_s18 = smov 64   ;;  %vm676_vm4 = vcmask 1045504   ;;  %v7475_v35 = vmov 65535   ;;  %s9350_s19 = smov 56  }
  0x1a   : > { %551 = vmatpush1.bf16.msra.mxu0 %v7069_v4  ;;  %v677_v36 = vsel %vm675_vm3, 4294967295, %v7475_v35  ;;  %vm647_vm5 = vcmask 89088   ;;  %vm651_vm6 = vcmask 83968   ;;  %s9354_s20 = smov 112   ;;  %s9340_s22 = smov 88   ;;  %vm1644_vm7 = vcmask 130048  }
  0x1b   : > { %s7592_s24 = scalar_lea.vmem %s9374_s0, %s9331_s21  ;;  %552 = vmatprep.subr.bf16.mxu0 %v7070_v5  ;;  %v7631_v37 = vsel %vm676_vm4, %v677_v36, 0  ;;  %s9336_s23 = smov 80   ;;  %vm1647_vm8 = vcmask 195584   ;;  %vm1650_vm9 = vcmask 261120   ;;  %vm1653_vm10 = vcmask 326656  }
  0x1c   : > { %v490_v9 = vld [vmem:[%s7592_s24] sm:$0xff]  ;;  %v491_v10 = vld [vmem:[%s7592_s24 + $0x8] sm:$0x7]  ;;  %s9334_s26 = smov 72   ;;  %s9358_s27 = smov 120   ;;  %vm1656_vm11 = vcmask 392192  }
  0x1d   : > { %v492_v11 = vpack.c.bf16 %v491_v10, %v490_v9  ;;  %v458_v15 = vld [vmem:[%s9375_s2] sm:$0x3]  ;;  %s9360_s28 = smov 48   ;;  %s9356_s30 = smov 40   ;;  %vm1659_vm12 = vcmask 457728   ;;  %vm1744_vm13 = vcmask 518144  }
  0x1e   : > { %553 = vmatpush1.bf16.msra.mxu0 %v7072_v6  ;;  %v7615_v18 = vrot.slane %v458_v15, %v496_v14  ;;  %v7617_v20 = vrot.slane %v458_v15, %v500_v17  ;;  %s9348_s14 = smov 104   ;;  %s9352_s15 = smov 32  }
  0x1f   : > { %554 = vmatprep.subr.bf16.mxu0 %v7073_v7  ;;  %s9344_s16 = smov 96   ;;  %s9346_s17 = smov 24  }
  0x20   : > { %s9342_s21 = smov 16   ;;  %s9376_s3 = sld [smem:[#allocation6_spill]] }
  0x21   : > { %s9389_s0 = smov 40   ;;  %s9390_s2 = smov 112  }
  0x22   : > { %555 = vmatpush1.bf16.msra.mxu0 %v7075_v8  ;;  %s9392_s11 = sld [smem:[#allocation6_spill]] }
  0x23   : > { %6393 = vmatprep.subr.bf16.mxu0 %v7472_v16 }
  0x25   : > { %6066 = vmatmul.mubr.msk.bf16.vlgmr.msra.gmra.mrb[0].mxu0 %vm544_vm0, %v492_v11 }
  0x26   : > { %6395 = vmatprep.mubr.msk.bf16.mxu0 %vm7473_vm1, %v7472_v16 }
  0xf8   : > { %v582_v19 = vpop.f32.mrb[0].mxu0 }
  0xf9   : > { %v583_v21 = vadd.f32 %v582_v19, %v7615_v18  ;;  %v584_v22 = vpop.f32.mrb[1].mxu0 }
  0xfa   : > { %v586_v23 = vpop.f32.mrb[2].mxu0  ;;  %v585_v26 = vadd.f32 %v584_v22, %v7617_v20 }
  0xfb   : > { %v587_v24 = vadd.f32 %v586_v23, %v7615_v18  ;;  %v588_v25 = vpop.f32.mrb[3].mxu0  ;;  %v591_v28 = vmul.f32 0.35355338, %v583_v21 }
  0xfc   : > { %v589_v27 = vadd.f32 %v588_v25, %v7617_v20 }
  0xfd   : > { %v592_v29 = vmul.f32 0.35355338, %v587_v24  ;;  %v7623_v30 = vpack.c.bf16 %v587_v24, %v583_v21 }
  0xfe   : > { %v7625_v31 = vpack.c.bf16 %v589_v27, %v585_v26 }
  0xff   : > { %v593_v32 = vpack.c.bf16 %v592_v29, %v591_v28  ;;  %597 = vrot.lane.b32.xlu0 %v7623_v30, %s9332_s18  ;;  %s9338_s18 = smov 8  }
 0x100   : > { %v680_v38 = vand.u32 %v7631_v37, %v7625_v31 }
 0x171   : > { %v598_v33 = vpop.permute.xlu0 %597 }
 0x172   : > { %v604_v34 = vsel %vm599_vm2, %v598_v33, 0 }
 0x173   : > { %6370 = vmatpush3.bf16.xpose.msra.mxu1 %v604_v34 }
 0x174   : > { %6375 = vmatprep.subr.bf16.mxu1 %v7472_v16 }
 0x17a   : > { %6372 = vmatmul.mubr.msk.bf16.vlgmr.msra.gmra.mrb[0].mxu1 %vm599_vm2, %v593_v32 }
 0x17b   : > { %6376 = vmatpush3.bf16.msra.mxu1 %v680_v38  ;;  %6377 = vmatprep.mubr.msk.bf16.mxu1 %vm7473_vm1, %v7472_v16 }
 0x17c   : > { %6381 = vmatprep.subr.bf16.mxu1 %v7472_v16 }
 0x24d   : > { %v640_v39 = vpop.f32.mrb[0].mxu1 }
 0x24e   : > { %v6373_v40 = vpop.f32.mrb[1].mxu1  ;;  %v648_v41 = vsel %vm647_vm5, %v640_v39, -inf }
 0x24f   : > { %649 = vmax.xlane.f32.xlu0 %v648_v41  ;;  %v643_v42 = vpop.f32.mrb[2].mxu1 }
 0x250   : > { %v6374_v43 = vpop.f32.mrb[3].mxu1  ;;  %v652_v44 = vsel %vm651_vm6, %v643_v42, -inf }
 0x251   : > { %653 = vmax.xlane.f32.xlu1 %v652_v44 }
 0x262   : > { %726 = vrot.lane.b32.xlu1 %v7623_v30, %s9350_s19 }
 0x265   : > { %848 = vrot.lane.b32.xlu0 %v593_v32, %s9354_s20 }
 0x269   : > { %1217 = vrot.lane.b32.xlu0 %v593_v32, %s9340_s22 }
 0x26d   : > { %1340 = vrot.lane.b32.xlu0 %v593_v32, %s9336_s23 }
 0x271   : > { %1463 = vrot.lane.b32.xlu0 %v593_v32, %s9334_s26 }
 0x2dc   : > { %v650_v45 = vpop.xlane.xlu0 %649 }
 0x2dd   : > { %v655_v46 = vsub.f32 %v640_v39, %v650_v45 }
 0x2de   : > { %v654_v47 = vpop.xlane.xlu1 %653 }
 0x2df   : > { %v657_v48 = vmul.f32 1.442695, %v655_v46  ;;  %v656_v49 = vsub.f32 %v643_v42, %v654_v47 }
 0x2e0   : > { %v849_v4 = vpop.permute.xlu0 %848 }
 0x2e1   : > { %7088 = vpow2.f32 %v657_v48  ;;  %v659_v50 = vmul.f32 1.442695, %v656_v49 }
 0x2e2   : > { %v727_v55 = vpop.permute.xlu1 %726 }
 0x2e3   : > { %7090 = vpow2.f32 %v659_v50  ;;  %v732_v5 = vsel %vm599_vm2, %v727_v55, 0 }
 0x2e4   : > { %v1218_v14 = vpop.permute.xlu0 %1217 }
 0x2e8   : > { %v1341_v19 = vpop.permute.xlu0 %1340 }
 0x2eb   : > { %v7089_v51 = vpop.eup %7088 }
 0x2ec   : > { %v661_v52 = vsel %vm647_vm5, %v7089_v51, 0.0  ;;  %v1464_v22 = vpop.permute.xlu0 %1463 }
 0x2ed   : > { %v7091_v53 = vpop.eup %7090  ;;  %662 = vadd.xlane.f32.xlu1 %v661_v52 }
 0x2ee   : > { %v664_v54 = vsel %vm651_vm6, %v7091_v53, 0.0 }
 0x2f1   : > { %665 = vadd.xlane.f32.xlu1 %v664_v54 }
 0x302   : > { %724 = vrot.lane.b32.xlu1 %v593_v32, %s9358_s27 }
 0x306   : > { %850 = vrot.lane.b32.xlu1 %v7623_v30, %s9360_s28 }
 0x30a   : > { %973 = vrot.lane.b32.xlu1 %v7623_v30, %s9356_s30 }
 0x30e   : > { %971 = vrot.lane.b32.xlu1 %v593_v32, %s9348_s14 }
 0x312   : > { %1096 = vrot.lane.b32.xlu1 %v7623_v30, %s9352_s15 }
 0x316   : > { %1094 = vrot.lane.b32.xlu1 %v593_v32, %s9344_s16 }
 0x31a   : > { %1219 = vrot.lane.b32.xlu1 %v7623_v30, %s9346_s17 }
 0x31e   : > { %1342 = vrot.lane.b32.xlu1 %v7623_v30, %s9342_s21 }
 0x322   : > { %1465 = vrot.lane.b32.xlu1 %v7623_v30, %s9338_s18 }
 0x37a   : > { %v663_v56 = vpop.xlane.xlu1 %662 }
 0x37b   : > { %7092 = vrcp.f32 %v663_v56 }
 0x37e   : > { %v666_v57 = vpop.xlane.xlu1 %665 }
 0x37f   : > { %7094 = vrcp.f32 %v666_v57 }
 0x382   : > { %v725_v58 = vpop.permute.xlu1 %724 }
 0x385   : > { %v7093_v60 = vpop.eup %7092 }
 0x386   : > { %v851_v59 = vpop.permute.xlu1 %850  ;;  %v669_v63 = vmul.f32 %v7093_v60, %v7089_v51 }
 0x387   : > { %v856_v61 = vsel %vm599_vm2, %v851_v59, 0 }
 0x388   : > { %6394 = vmatpush3.bf16.xpose.msra.mxu0 %v856_v61 }
 0x389   : > { %v7095_v62 = vpop.eup %7094  ;;  %6405 = vmatprep.subr.bf16.mxu0 %v7472_v16 }
 0x38a   : > { %v670_v0 = vmul.f32 %v7095_v62, %v7091_v53  ;;  %v974_v1 = vpop.permute.xlu1 %973 }
 0x38b   : > { %v979_v7 = vsel %vm599_vm2, %v974_v1, 0 }
 0x38c   : > { %v671_v3 = vpack.c.bf16 %v670_v0, %v669_v63 }
 0x38e   : > { %6378 = vmatmul.mubr.msk.bf16.vlgmr.msra.gmra.mrb[4].mxu1 %vm647_vm5, %v671_v3  ;;  %v972_v6 = vpop.permute.xlu1 %971 }
 0x38f   : > { %6382 = vmatpush3.bf16.xpose.msra.mxu1 %v732_v5  ;;  %6396 = vmatmul.mubr.msk.bf16.vlgmr.msra.gmra.mrb[4].mxu0 %vm599_vm2, %v849_v4 }
 0x390   : > { %6406 = vmatpush3.bf16.xpose.msra.mxu0 %v979_v7  ;;  %6383 = vmatprep.mubr.msk.bf16.mxu1 %vm7473_vm1, %v7472_v16 }
 0x391   : > { %6407 = vmatprep.mubr.msk.bf16.mxu0 %vm7473_vm1, %v7472_v16  ;;  %6417 = vmatprep.subr.bf16.mxu0 %v7472_v16 }
 0x392   : > { %v1097_v8 = vpop.permute.xlu1 %1096  ;;  %6387 = vmatprep.subr.bf16.mxu1 %v7472_v16 }
 0x393   : > { %v1102_v10 = vsel %vm599_vm2, %v1097_v8, 0 }
 0x396   : > { %6384 = vmatmul.mubr.msk.bf16.vlgmr.msra.gmra.mrb[8].mxu1 %vm599_vm2, %v725_v58  ;;  %v1095_v9 = vpop.permute.xlu1 %1094 }
 0x397   : > { %6408 = vmatmul.mubr.msk.bf16.vlgmr.msra.gmra.mrb[8].mxu0 %vm599_vm2, %v972_v6  ;;  %6389 = vmatprep.mubr.msk.bf16.mxu1 %vm7473_vm1, %v7472_v16 }
 0x398   : > { %6418 = vmatpush3.bf16.xpose.msra.mxu0 %v1102_v10  ;;  %6419 = vmatprep.mubr.msk.bf16.mxu0 %vm7473_vm1, %v7472_v16 }
 0x399   : > { %6429 = vmatprep.subr.bf16.mxu0 %v7472_v16 }
 0x39a   : > { %v1220_v11 = vpop.permute.xlu1 %1219 }
 0x39b   : > { %v1225_v12 = vsel %vm599_vm2, %v1220_v11, 0 }
 0x39e   : > { %v1343_v13 = vpop.permute.xlu1 %1342 }
 0x39f   : > { %6420 = vmatmul.mubr.msk.bf16.vlgmr.msra.gmra.mrb[12].mxu0 %vm599_vm2, %v1095_v9  ;;  %v1348_v15 = vsel %vm599_vm2, %v1343_v13, 0 }
 0x3a0   : > { %6430 = vmatpush3.bf16.xpose.msra.mxu0 %v1225_v12  ;;  %6431 = vmatprep.mubr.msk.bf16.mxu0 %vm7473_vm1, %v7472_v16 }
 0x3a1   : > { %6441 = vmatprep.subr.bf16.mxu0 %v7472_v16 }
 0x3a2   : > { %v1466_v17 = vpop.permute.xlu1 %1465 }
 0x3a3   : > { %v1471_v21 = vsel %vm599_vm2, %v1466_v17, 0 }
 0x3a7   : > { %6432 = vmatmul.mubr.msk.bf16.vlgmr.msra.gmra.mrb[16].mxu0 %vm599_vm2, %v1218_v14 }
 0x3a8   : > { %6442 = vmatpush3.bf16.xpose.msra.mxu0 %v1348_v15  ;;  %6443 = vmatprep.mubr.msk.bf16.mxu0 %vm7473_vm1, %v7472_v16 }
 0x3a9   : > { %6453 = vmatprep.subr.bf16.mxu0 %v7472_v16 }
 0x3af   : > { %6444 = vmatmul.mubr.msk.bf16.vlgmr.msra.gmra.mrb[20].mxu0 %vm599_vm2, %v1341_v19 }
 0x3b0   : > { %6454 = vmatpush3.bf16.xpose.msra.mxu0 %v1471_v21  ;;  %6455 = vmatprep.mubr.msk.bf16.mxu0 %vm7473_vm1, %v7472_v16 }
 0x3b1   : > { %6465 = vmatprep.subr.bf16.mxu0 %v7472_v16 }
 0x3b7   : > { %6456 = vmatmul.mubr.msk.bf16.vlgmr.msra.gmra.mrb[24].mxu0 %vm599_vm2, %v1464_v22 }
 0x3b8   : > { %6473 = vmatprep.mubr.msk.bf16.mxu0 %vm7473_vm1, %v7472_v16 }
 0x461   : > { %v7702_v23 = vpop.f32.mrb[4].mxu1 }
 0x462   : > { %v6379_v24 = vpop.f32.mrb[5].mxu1  ;;  %v892_v25 = vpop.f32.mrb[4].mxu0 }
 0x463   : > { %v7704_v26 = vpop.f32.mrb[6].mxu1  ;;  %v6397_v27 = vpop.f32.mrb[5].mxu0  ;;  %v899_v28 = vsel %vm647_vm5, %v892_v25, -inf }
 0x464   : > { %900 = vmax.xlane.f32.xlu0 %v899_v28  ;;  %v6380_v29 = vpop.f32.mrb[7].mxu1  ;;  %v895_v30 = vpop.f32.mrb[6].mxu0 }
 0x465   : > { %v6398_v32 = vpop.f32.mrb[7].mxu0  ;;  %v902_v33 = vsel %vm651_vm6, %v895_v30, -inf }
 0x466   : > { %903 = vmax.xlane.f32.xlu1 %v902_v33 }
 0x469   : > { %v7708_v34 = vpop.f32.mrb[8].mxu1 }
 0x46a   : > { %v6385_v35 = vpop.f32.mrb[9].mxu1  ;;  %v1015_v36 = vpop.f32.mrb[8].mxu0 }
 0x46b   : > { %v7710_v38 = vpop.f32.mrb[10].mxu1  ;;  %v6409_v39 = vpop.f32.mrb[9].mxu0  ;;  %v1022_v40 = vsel %vm647_vm5, %v1015_v36, -inf }
 0x46c   : > { %1023 = vmax.xlane.f32.xlu0 %v1022_v40  ;;  %v6386_v41 = vpop.f32.mrb[11].mxu1  ;;  %v1018_v42 = vpop.f32.mrb[10].mxu0  ;;  %v778_v33 = vsel %vm651_vm6, %v7710_v38, -inf }
 0x46d   : > { %v6410_v43 = vpop.f32.mrb[11].mxu0  ;;  %v1025_v44 = vsel %vm651_vm6, %v1018_v42, -inf }
 0x46e   : > { %1026 = vmax.xlane.f32.xlu1 %v1025_v44 }
 0x472   : > { %v1138_v45 = vpop.f32.mrb[12].mxu0 }
 0x473   : > { %v6421_v46 = vpop.f32.mrb[13].mxu0  ;;  %v1145_v47 = vsel %vm647_vm5, %v1138_v45, -inf }
 0x474   : > { %1146 = vmax.xlane.f32.xlu0 %v1145_v47  ;;  %v1141_v48 = vpop.f32.mrb[14].mxu0 }
 0x475   : > { %v6422_v49 = vpop.f32.mrb[15].mxu0  ;;  %v1148_v50 = vsel %vm651_vm6, %v1141_v48, -inf }
 0x476   : > { %1149 = vmax.xlane.f32.xlu1 %v1148_v50 }
 0x47a   : > { %v7716_v51 = vpop.f32.mrb[16].mxu0 }
 0x47b   : > { %v6433_v52 = vpop.f32.mrb[17].mxu0  ;;  %v1268_v53 = vsel %vm647_vm5, %v7716_v51, -inf }
 0x47c   : > { %1269 = vmax.xlane.f32.xlu0 %v1268_v53  ;;  %v7720_v54 = vpop.f32.mrb[18].mxu0 }
 0x47d   : > { %v6434_v55 = vpop.f32.mrb[19].mxu0  ;;  %v1271_v56 = vsel %vm651_vm6, %v7720_v54, -inf }
 0x47e   : > { %1272 = vmax.xlane.f32.xlu1 %v1271_v56 }
 0x482   : > { %v7724_v57 = vpop.f32.mrb[20].mxu0 }
 0x483   : > { %v6445_v58 = vpop.f32.mrb[21].mxu0  ;;  %v1391_v59 = vsel %vm647_vm5, %v7724_v57, -inf }
 0x484   : > { %1392 = vmax.xlane.f32.xlu0 %v1391_v59  ;;  %v7728_v60 = vpop.f32.mrb[22].mxu0 }
 0x485   : > { %v6446_v61 = vpop.f32.mrb[23].mxu0  ;;  %v1394_v62 = vsel %vm651_vm6, %v7728_v60, -inf }
 0x486   : > { %1395 = vmax.xlane.f32.xlu1 %v1394_v62 }
 0x48a   : > { %v7732_v63 = vpop.f32.mrb[24].mxu0 }
 0x48b   : > { %v6457_v0 = vpop.f32.mrb[25].mxu0  ;;  %v1514_v1 = vsel %vm647_vm5, %v7732_v63, -inf }
 0x48c   : > { %1515 = vmax.xlane.f32.xlu0 %v1514_v1  ;;  %v7736_v3 = vpop.f32.mrb[26].mxu0 }
 0x48d   : > { %v6458_v4 = vpop.f32.mrb[27].mxu0  ;;  %v1517_v5 = vsel %vm651_vm6, %v7736_v3, -inf }
 0x48e   : > { %1518 = vmax.xlane.f32.xlu1 %v1517_v5 }
 0x4f1   : > { %v901_v6 = vpop.xlane.xlu0 %900 }
 0x4f2   : > { %v905_v7 = vsub.f32 %v892_v25, %v901_v6 }
 0x4f3   : > { %v904_v8 = vpop.xlane.xlu1 %903 }
 0x4f4   : > { %v907_v9 = vmul.f32 1.442695, %v905_v7  ;;  %v906_v10 = vsub.f32 %v895_v30, %v904_v8 }
 0x4f6   : > { %7096 = vpow2.f32 %v907_v9  ;;  %v909_v11 = vmul.f32 1.442695, %v906_v10 }
 0x4f8   : > { %7098 = vpow2.f32 %v909_v11 }
 0x4f9   : > { %v1024_v12 = vpop.xlane.xlu0 %1023 }
 0x4fa   : > { %v1028_v13 = vsub.f32 %v1015_v36, %v1024_v12  ;;  %v775_v36 = vsel %vm647_vm5, %v7708_v34, -inf }
 0x4fb   : > { %v1027_v14 = vpop.xlane.xlu1 %1026 }
 0x4fc   : > { %v1030_v15 = vmul.f32 1.442695, %v1028_v13  ;;  %v1029_v17 = vsub.f32 %v1018_v42, %v1027_v14 }
 0x4fe   : > { %7100 = vpow2.f32 %v1030_v15  ;;  %v1032_v19 = vmul.f32 1.442695, %v1029_v17 }
 0x500   : > { %v7740_v21 = vpop.eup %7096  ;;  %7102 = vpow2.f32 %v1032_v19 }
 0x501   : > { %v1147_v22 = vpop.xlane.xlu0 %1146  ;;  %v911_v24 = vsel %vm647_vm5, %v7740_v21, 0.0 }
 0x502   : > { %v7744_v25 = vpop.eup %7098  ;;  %v1151_v27 = vsub.f32 %v1138_v45, %v1147_v22  ;;  %912 = vadd.xlane.f32.xlu0 %v911_v24 }
 0x503   : > { %v1150_v28 = vpop.xlane.xlu1 %1149  ;;  %v914_v29 = vsel %vm651_vm6, %v7744_v25, 0.0 }
 0x504   : > { %v1153_v30 = vmul.f32 1.442695, %v1151_v27  ;;  %v1152_v32 = vsub.f32 %v1141_v48, %v1150_v28  ;;  %915 = vadd.xlane.f32.xlu1 %v914_v29 }
 0x506   : > { %7104 = vpow2.f32 %v1153_v30  ;;  %v1155_v35 = vmul.f32 1.442695, %v1152_v32  ;;  %779 = vmax.xlane.f32.xlu0 %v778_v33 }
 0x508   : > { %v7752_v39 = vpop.eup %7100  ;;  %7106 = vpow2.f32 %v1155_v35  ;;  %776 = vmax.xlane.f32.xlu1 %v775_v36 }
 0x509   : > { %v1034_v40 = vsel %vm647_vm5, %v7752_v39, 0.0  ;;  %v1270_v47 = vpop.xlane.xlu0 %1269 }
 0x50a   : > { %v7756_v41 = vpop.eup %7102  ;;  %1035 = vadd.xlane.f32.xlu0 %v1034_v40  ;;  %v1274_v48 = vsub.f32 %v7716_v51, %v1270_v47 }
 0x50b   : > { %v1037_v42 = vsel %vm651_vm6, %v7756_v41, 0.0  ;;  %v1273_v50 = vpop.xlane.xlu1 %1272 }
 0x50c   : > { %1038 = vadd.xlane.f32.xlu1 %v1037_v42  ;;  %v1276_v49 = vmul.f32 1.442695, %v1274_v48  ;;  %v1275_v52 = vsub.f32 %v7720_v54, %v1273_v50 }
 0x50e   : > { %7108 = vpow2.f32 %v1276_v49  ;;  %v1278_v55 = vmul.f32 1.442695, %v1275_v52 }
 0x510   : > { %v7760_v43 = vpop.eup %7104  ;;  %7110 = vpow2.f32 %v1278_v55 }
 0x511   : > { %v1157_v44 = vsel %vm647_vm5, %v7760_v43, 0.0  ;;  %v1393_v53 = vpop.xlane.xlu0 %1392 }
 0x512   : > { %v7764_v45 = vpop.eup %7106  ;;  %1158 = vadd.xlane.f32.xlu1 %v1157_v44  ;;  %v1397_v56 = vsub.f32 %v7724_v57, %v1393_v53 }
 0x513   : > { %v1160_v46 = vsel %vm651_vm6, %v7764_v45, 0.0  ;;  %v1396_v58 = vpop.xlane.xlu1 %1395 }
 0x514   : > { %v1399_v61 = vmul.f32 1.442695, %v1397_v56  ;;  %v1398_v62 = vsub.f32 %v7728_v60, %v1396_v58 }
 0x516   : > { %1161 = vadd.xlane.f32.xlu1 %v1160_v46  ;;  %7112 = vpow2.f32 %v1399_v61  ;;  %v1401_v51 = vmul.f32 1.442695, %v1398_v62 }
 0x518   : > { %v7775_v59 = vpop.eup %7108  ;;  %7114 = vpow2.f32 %v1401_v51 }
 0x519   : > { %v1280_v0 = vsel %vm647_vm5, %v7775_v59, 0.0  ;;  %v1516_v6 = vpop.xlane.xlu0 %1515 }
 0x51a   : > { %v7780_v1 = vpop.eup %7110  ;;  %v1520_v29 = vsub.f32 %v7732_v63, %v1516_v6 }
 0x51b   : > { %v1283_v54 = vsel %vm651_vm6, %v7780_v1, 0.0  ;;  %v1519_v7 = vpop.xlane.xlu1 %1518 }
 0x51c   : > { %v1522_v32 = vmul.f32 1.442695, %v1520_v29 }
 0x520   : > { %799 = vrot.lane.b32.xlu0 %v7625_v31, %s9358_s27  ;;  %v7784_v57 = vpop.eup %7112 }
 0x521   : > { %v1403_v4 = vsel %vm647_vm5, %v7784_v57, 0.0 }
 0x522   : > { %v7788_v5 = vpop.eup %7114 }
 0x523   : > { %v1406_v60 = vsel %vm651_vm6, %v7788_v5, 0.0 }
 0x527   : > { %922 = vrot.lane.b32.xlu1 %v7625_v31, %s9354_s20 }
 0x53f   : > { %1281 = vadd.xlane.f32.xlu0 %v1280_v0 }
 0x54b   : > { %1284 = vadd.xlane.f32.xlu1 %v1283_v54 }
 0x54f   : > { %1404 = vadd.xlane.f32.xlu1 %v1403_v4 }
 0x553   : > { %1407 = vadd.xlane.f32.xlu1 %v1406_v60 }
 0x58f   : > { %v913_v8 = vpop.xlane.xlu0 %912 }
 0x591   : > { %v916_v9 = vpop.xlane.xlu1 %915 }
 0x593   : > { %v780_v10 = vpop.xlane.xlu0 %779 }
 0x594   : > { %v782_v11 = vsub.f32 %v7710_v38, %v780_v10 }
 0x595   : > { %v777_v12 = vpop.xlane.xlu1 %776 }
 0x596   : > { %v785_v13 = vmul.f32 1.442695, %v782_v11  ;;  %v781_v14 = vsub.f32 %v7708_v34, %v777_v12  ;;  %v1521_v34 = vsub.f32 %v7736_v3, %v1519_v7 }
 0x597   : > { %v1036_v15 = vpop.xlane.xlu0 %1035 }
 0x598   : > { %7116 = vpow2.f32 %v785_v13  ;;  %v783_v17 = vmul.f32 1.442695, %v781_v14  ;;  %v1524_v30 = vmul.f32 1.442695, %v1521_v34 }
 0x599   : > { %v1039_v63 = vpop.xlane.xlu1 %1038 }
 0x59a   : > { %7118 = vpow2.f32 %v783_v17 }
 0x59b   : > { %v800_v19 = vpop.permute.xlu0 %799  ;;  %7120 = vpow2.f32 %v1524_v30 }
 0x59c   : > { %v805_v22 = vand.u32 %v800_v19, %v7631_v37  ;;  %7122 = vpow2.f32 %v1522_v32 }
 0x59e   : > { %6388 = vmatpush3.bf16.msra.mxu1 %v805_v22 }
 0x59f   : > { %6399 = vmatprep.subr.bf16.mxu1 %v7472_v16  ;;  %v1159_v3 = vpop.xlane.xlu1 %1158 }
 0x5a2   : > { %v7117_v24 = vpop.eup %7116 }
 0x5a3   : > { %v790_v27 = vsel %vm651_vm6, %v7117_v24, 0.0  ;;  %v1162_v42 = vpop.xlane.xlu1 %1161 }
 0x5a4   : > { %v7119_v28 = vpop.eup %7118  ;;  %791 = vadd.xlane.f32.xlu1 %v790_v27 }
 0x5a5   : > { %v787_v38 = vsel %vm647_vm5, %v7119_v28, 0.0  ;;  %v7804_v33 = vpop.eup %7120 }
 0x5a6   : > { %788 = vadd.xlane.f32.xlu0 %v787_v38  ;;  %v7806_v35 = vpop.eup %7122  ;;  %v1529_v36 = vsel %vm651_vm6, %v7804_v33, 0.0 }
 0x5a7   : > { %v1526_v40 = vsel %vm647_vm5, %v7806_v35, 0.0  ;;  %v923_v44 = vpop.permute.xlu1 %922 }
 0x5a8   : > { %v928_v62 = vand.u32 %v923_v44, %v7631_v37 }
 0x5b5   : > { %1168 = vrot.lane.b32.xlu1 %v7625_v31, %s9344_s16  ;;  %s9379_s16 = smov 24  }
 0x5bc   : > { %1045 = vrot.lane.b32.xlu0 %v7625_v31, %s9348_s14  ;;  %s9383_s14 = smov 8  }
 0x5cc   : > { %v1282_v49 = vpop.xlane.xlu0 %1281 }
 0x5d8   : > { %v1285_v46 = vpop.xlane.xlu1 %1284 }
 0x5d9   : > { %1530 = vadd.xlane.f32.xlu1 %v1529_v36 }
 0x5db   : > { %1527 = vadd.xlane.f32.xlu0 %v1526_v40 }
 0x5dc   : > { %v1405_v47 = vpop.xlane.xlu1 %1404 }
 0x5e0   : > { %v1408_v48 = vpop.xlane.xlu1 %1407 }
 0x5ea   : > { %1414 = vrot.lane.b32.xlu1 %v7625_v31, %s9336_s23  ;;  %s9381_s23 = smov 16  }
 0x5f1   : > { %1291 = vrot.lane.b32.xlu0 %v7625_v31, %s9340_s22  ;;  %s9377_s22 = smov 64  }
 0x5f5   : > { %1537 = vrot.lane.b32.xlu0 %v7625_v31, %s9334_s26  ;;  %s9380_s26 = smov 96  }
 0x631   : > { %v792_v50 = vpop.xlane.xlu1 %791 }
 0x632   : > { %7124 = vrcp.f32 %v792_v50 }
 0x633   : > { %v789_v52 = vpop.xlane.xlu0 %788 }
 0x634   : > { %7126 = vrcp.f32 %v789_v52 }
 0x635   : > { %7128 = vrcp.f32 %v916_v9  ;;  %v1169_v9 = vpop.permute.xlu1 %1168 }
 0x636   : > { %7130 = vrcp.f32 %v913_v8  ;;  %v1174_v12 = vand.u32 %v1169_v9, %v7631_v37 }
 0x637   : > { %7132 = vrcp.f32 %v1039_v63  ;;  %v1046_v4 = vpop.permute.xlu0 %1045 }
 0x638   : > { %7134 = vrcp.f32 %v1036_v15  ;;  %v1051_v7 = vand.u32 %v1046_v4, %v7631_v37 }
 0x639   : > { %7136 = vrcp.f32 %v1162_v42 }
 0x63a   : > { %7138 = vrcp.f32 %v1159_v3 }
 0x63b   : > { %7140 = vrcp.f32 %v1285_v46 }
 0x63c   : > { %v7125_v53 = vpop.eup %7124  ;;  %7142 = vrcp.f32 %v1282_v49 }
 0x63d   : > { %v796_v56 = vmul.f32 %v7125_v53, %v7117_v24  ;;  %7144 = vrcp.f32 %v1408_v48 }
 0x63e   : > { %v7127_v55 = vpop.eup %7126  ;;  %7146 = vrcp.f32 %v1405_v47 }
 0x63f   : > { %v795_v58 = vmul.f32 %v7127_v55, %v7119_v28  ;;  %v7129_v61 = vpop.eup %7128 }
 0x640   : > { %v7131_v0 = vpop.eup %7130  ;;  %v920_v51 = vmul.f32 %v7129_v61, %v7744_v25 }
 0x641   : > { %v797_v31 = vpack.c.bf16 %v796_v56, %v795_v58  ;;  %v919_v54 = vmul.f32 %v7131_v0, %v7740_v21  ;;  %v7133_v6 = vpop.eup %7132 }
 0x642   : > { %v7135_v8 = vpop.eup %7134  ;;  %v1043_v25 = vmul.f32 %v7133_v6, %v7756_v41 }
 0x643   : > { %6390 = vmatmul.mubr.msk.bf16.vlgmr.msra.gmra.mrb[12].mxu1 %vm647_vm5, %v797_v31  ;;  %v921_v60 = vpack.c.bf16 %v920_v51, %v919_v54  ;;  %v1042_v21 = vmul.f32 %v7135_v8, %v7752_v39  ;;  %v7137_v11 = vpop.eup %7136  ;;  %v7877_v8 = vld [vmem:[%s9376_s3 + $0x8] sm:$0xff]  }
 0x644   : > { %6400 = vmatpush3.bf16.msra.mxu1 %v928_v62  ;;  %6401 = vmatprep.mubr.msk.bf16.mxu1 %vm7473_vm1, %v7472_v16  ;;  %v7139_v13 = vpop.eup %7138  ;;  %v1166_v14 = vmul.f32 %v7137_v11, %v7764_v45 }
 0x645   : > { %6411 = vmatprep.subr.bf16.mxu1 %v7472_v16  ;;  %v1044_v10 = vpack.c.bf16 %v1043_v25, %v1042_v21  ;;  %v1165_v41 = vmul.f32 %v7139_v13, %v7760_v43  ;;  %v7141_v19 = vpop.eup %7140  ;;  %v7892_v13 = vld [vmem:[%s9376_s3 + $0x18] sm:$0xff]  }
 0x646   : > { %v7143_v22 = vpop.eup %7142  ;;  %v1289_v45 = vmul.f32 %v7141_v19, %v7780_v1 }
 0x647   : > { %v1167_v15 = vpack.c.bf16 %v1166_v14, %v1165_v41  ;;  %v1288_v43 = vmul.f32 %v7143_v22, %v7775_v59  ;;  %v7145_v34 = vpop.eup %7144 }
 0x648   : > { %v7147_v30 = vpop.eup %7146  ;;  %v1412_v1 = vmul.f32 %v7145_v34, %v7788_v5 }
 0x649   : > { %v1290_v38 = vpack.c.bf16 %v1289_v45, %v1288_v43  ;;  %v1411_v59 = vmul.f32 %v7147_v30, %v7784_v57 }
 0x64b   : > { %6402 = vmatmul.mubr.msk.bf16.vlgmr.msra.gmra.mrb[16].mxu1 %vm647_vm5, %v921_v60  ;;  %v1413_v36 = vpack.c.bf16 %v1412_v1, %v1411_v59  ;;  %v7870_v60 = vld [vmem:[%s9376_s3] sm:$0xff]  }
 0x64c   : > { %6412 = vmatpush3.bf16.msra.mxu1 %v1051_v7  ;;  %6413 = vmatprep.mubr.msk.bf16.mxu1 %vm7473_vm1, %v7472_v16 }
 0x64d   : > { %6423 = vmatprep.subr.bf16.mxu1 %v7472_v16  ;;  %6466 = vmatpush3.bf16.msra.mxu0 %v7870_v60 }
 0x64e   : > { %6467 = vmatprep.subr.bf16.mxu0 %v7472_v16 }
 0x651   : > { %6468 = vmatpush3.bf16.msra.mxu0 %v7877_v8 }
 0x652   : > { %6469 = vmatprep.subr.bf16.mxu0 %v7472_v16 }
 0x653   : > { %6414 = vmatmul.mubr.msk.bf16.vlgmr.msra.gmra.mrb[20].mxu1 %vm647_vm5, %v1044_v10  ;;  %v7883_v10 = vld [vmem:[%s9376_s3 + $0x10] sm:$0xff]  }
 0x654   : > { %6424 = vmatpush3.bf16.msra.mxu1 %v1174_v12  ;;  %6425 = vmatprep.mubr.msk.bf16.mxu1 %vm7473_vm1, %v7472_v16 }
 0x655   : > { %6435 = vmatprep.subr.bf16.mxu1 %v7472_v16  ;;  %6470 = vmatpush3.bf16.msra.mxu0 %v7883_v10 }
 0x656   : > { %6471 = vmatprep.subr.bf16.mxu0 %v7472_v16 }
 0x659   : > { %6472 = vmatpush3.bf16.msra.mxu0 %v7892_v13 }
 0x65a   : > { %6489 = vmatprep.subr.bf16.mxu0 %v7472_v16 }
 0x65b   : > { %6426 = vmatmul.mubr.msk.bf16.vlgmr.msra.gmra.mrb[24].mxu1 %vm647_vm5, %v1167_v15 }
 0x65c   : > { %6437 = vmatprep.mubr.msk.bf16.mxu1 %vm7473_vm1, %v7472_v16 }
 0x666   : > { %v1531_v39 = vpop.xlane.xlu1 %1530 }
 0x668   : > { %v1528_v17 = vpop.xlane.xlu0 %1527 }
 0x669   : > { %7148 = vrcp.f32 %v1528_v17 }
 0x66a   : > { %v1415_v28 = vpop.permute.xlu1 %1414  ;;  %7150 = vrcp.f32 %v1531_v39 }
 0x66b   : > { %v1420_v29 = vand.u32 %v1415_v28, %v7631_v37 }
 0x66c   : > { %v1292_v24 = vpop.permute.xlu0 %1291 }
 0x66d   : > { %v1297_v27 = vand.u32 %v1292_v24, %v7631_v37 }
 0x66f   : > { %6436 = vmatpush3.bf16.msra.mxu1 %v1297_v27 }
 0x670   : > { %6447 = vmatprep.subr.bf16.mxu1 %v7472_v16  ;;  %v1538_v32 = vpop.permute.xlu0 %1537 }
 0x671   : > { %v1543_v63 = vand.u32 %v1538_v32, %v7631_v37 }
 0x672   : > { %6438 = vmatmul.mubr.msk.bf16.vlgmr.msra.gmra.mrb[28].mxu1 %vm647_vm5, %v1290_v38 }
 0x673   : > { %6448 = vmatpush3.bf16.msra.mxu1 %v1420_v29  ;;  %6449 = vmatprep.mubr.msk.bf16.mxu1 %vm7473_vm1, %v7472_v16  ;;  %v7149_v40 = vpop.eup %7148 }
 0x674   : > { %6459 = vmatprep.subr.bf16.mxu1 %v7472_v16  ;;  %v7151_v3 = vpop.eup %7150  ;;  %v1534_v42 = vmul.f32 %v7149_v40, %v7806_v35 }
 0x675   : > { %v1535_v5 = vmul.f32 %v7151_v3, %v7804_v33 }
 0x677   : > { %v1536_v44 = vpack.c.bf16 %v1535_v5, %v1534_v42 }
 0x67a   : > { %6450 = vmatmul.mubr.msk.bf16.vlgmr.msra.gmra.mrb[32].mxu1 %vm647_vm5, %v1413_v36 }
 0x67b   : > { %6460 = vmatpush3.bf16.msra.mxu1 %v1543_v63  ;;  %6461 = vmatprep.mubr.msk.bf16.mxu1 %vm7473_vm1, %v7472_v16 }
 0x67c   : > { %6477 = vmatprep.subr.bf16.mxu1 %v7472_v16 }
 0x682   : > { %6462 = vmatmul.mubr.msk.bf16.vlgmr.msra.gmra.mrb[36].mxu1 %vm647_vm5, %v1536_v44 }
 0x683   : > { %6485 = vmatprep.mubr.msk.bf16.mxu1 %vm7473_vm1, %v7472_v16 }
 0x716   : > { %v841_v57 = vpop.f32.mrb[12].mxu1 }
 0x717   : > { %v6391_v46 = vpop.f32.mrb[13].mxu1 }
 0x718   : > { %v844_v47 = vpop.f32.mrb[14].mxu1 }
 0x719   : > { %v6924_v48 = vpack.i.bf16 %v844_v47, %v841_v57  ;;  %v6392_v49 = vpop.f32.mrb[15].mxu1 }
 0x71b   : > { %6925 = vrot.lane.b32.xlu0 %v6924_v48, %s9338_s18  ;;  %s9382_s18 = smov 88  }
 0x71e   : > { %v964_v50 = vpop.f32.mrb[16].mxu1 }
 0x71f   : > { %v6403_v52 = vpop.f32.mrb[17].mxu1 }
 0x720   : > { %v967_v35 = vpop.f32.mrb[18].mxu1 }
 0x721   : > { %v6929_v53 = vpack.i.bf16 %v967_v35, %v964_v50  ;;  %v6404_v55 = vpop.f32.mrb[19].mxu1 }
 0x723   : > { %6930 = vrot.lane.b32.xlu0 %v6929_v53, %s9342_s21  ;;  %s9378_s21 = smov 104  }
 0x726   : > { %v1087_v33 = vpop.f32.mrb[20].mxu1 }
 0x727   : > { %v6415_v56 = vpop.f32.mrb[21].mxu1 }
 0x728   : > { %v1090_v58 = vpop.f32.mrb[22].mxu1 }
 0x729   : > { %v6934_v31 = vpack.i.bf16 %v1090_v58, %v1087_v33  ;;  %v6416_v61 = vpop.f32.mrb[23].mxu1 }
 0x72b   : > { %6935 = vrot.lane.b32.xlu0 %v6934_v31, %s9346_s17  ;;  %s9384_s17 = smov 80  }
 0x72e   : > { %v1210_v62 = vpop.f32.mrb[24].mxu1 }
 0x72f   : > { %v6427_v0 = vpop.f32.mrb[25].mxu1 }
 0x730   : > { %v1213_v51 = vpop.f32.mrb[26].mxu1 }
 0x731   : > { %v6939_v54 = vpack.i.bf16 %v1213_v51, %v1210_v62  ;;  %v6428_v4 = vpop.f32.mrb[27].mxu1  ;;  %v6088_v51 = vld [vmem:[%s9321_s4] ss:$0 sm:$0xff] }
 0x733   : > { %6940 = vrot.lane.b32.xlu1 %v6939_v54, %s9352_s15  ;;  %v7392_v54 = vld [vmem:[%s7592_s24] sm:$0xff] }
 0x745   : > { %v1333_v6 = vpop.f32.mrb[28].mxu1 }
 0x746   : > { %v6439_v7 = vpop.f32.mrb[29].mxu1 }
 0x747   : > { %v1336_v25 = vpop.f32.mrb[30].mxu1 }
 0x748   : > { %v6944_v21 = vpack.i.bf16 %v1336_v25, %v1333_v6  ;;  %v6440_v9 = vpop.f32.mrb[31].mxu1  ;;  %v7393_v25 = vld [vmem:[%s7592_s24 + $0x8] sm:$0x7] }
 0x74a   : > { %6945 = vrot.lane.b32.xlu0 %v6944_v21, %s9356_s30 }
 0x74d   : > { %v1456_v11 = vpop.f32.mrb[32].mxu1 }
 0x74e   : > { %v6451_v12 = vpop.f32.mrb[33].mxu1 }
 0x74f   : > { %v1459_v14 = vpop.f32.mrb[34].mxu1 }
 0x750   : > { %v6949_v41 = vpack.i.bf16 %v1459_v14, %v1456_v11  ;;  %v6452_v15 = vpop.f32.mrb[35].mxu1 }
 0x752   : > { %6950 = vrot.lane.b32.xlu1 %v6949_v41, %s9360_s28 }
 0x755   : > { %v1579_v39 = vpop.f32.mrb[36].mxu1 }
 0x756   : > { %v6463_v17 = vpop.f32.mrb[37].mxu1 }
 0x757   : > { %v1582_v19 = vpop.f32.mrb[38].mxu1 }
 0x758   : > { %v6954_v22 = vpack.i.bf16 %v1582_v19, %v1579_v39  ;;  %v6464_v45 = vpop.f32.mrb[39].mxu1 }
 0x75a   : > { %6955 = vrot.lane.b32.xlu0 %v6954_v22, %s9350_s19 }
 0x78d   : > { %v6926_v24 = vpop.permute.xlu0 %6925 }
 0x78e   : > { %v6928_v38 = vunpack.i.h.bf16 %v6926_v24  ;;  %v6927_v34 = vunpack.i.l.bf16 %v6926_v24 }
 0x790   : > { %v1643_v3 = vsel %vm599_vm2, %v7704_v26, %v6928_v38  ;;  %v1642_v42 = vsel %vm599_vm2, %v7702_v23, %v6927_v34  ;;  %v7929_v38 = vld [vmem:[%s9324_s7] sm:$0xff]   ;;  %v7936_v34 = vld [vmem:[%s9324_s7 + $0x8] sm:$0xff]  }
 0x791   : > { %6478 = vmatpush3.bf16.msra.mxu1 %v7929_v38 }
 0x792   : > { %6479 = vmatprep.subr.bf16.mxu1 %v7472_v16 }
 0x795   : > { %v6931_v27 = vpop.permute.xlu0 %6930  ;;  %6480 = vmatpush3.bf16.msra.mxu1 %v7936_v34 }
 0x796   : > { %v6933_v29 = vunpack.i.h.bf16 %v6931_v27  ;;  %v6932_v30 = vunpack.i.l.bf16 %v6931_v27  ;;  %6481 = vmatprep.subr.bf16.mxu1 %v7472_v16 }
 0x798   : > { %v1646_v57 = vsel %vm1644_vm7, %v1643_v3, %v6933_v29  ;;  %v1645_v46 = vsel %vm1644_vm7, %v1642_v42, %v6932_v30  ;;  %v7943_v29 = vld [vmem:[%s9324_s7 + $0x10] sm:$0xff]   ;;  %v7950_v30 = vld [vmem:[%s9324_s7 + $0x18] sm:$0xff]  }
 0x799   : > { %6482 = vmatpush3.bf16.msra.mxu1 %v7943_v29 }
 0x79a   : > { %6483 = vmatprep.subr.bf16.mxu1 %v7472_v16 }
 0x79d   : > { %v6936_v43 = vpop.permute.xlu0 %6935  ;;  %6484 = vmatpush3.bf16.msra.mxu1 %v7950_v30 }
 0x79e   : > { %v6938_v59 = vunpack.i.h.bf16 %v6936_v43  ;;  %v6937_v32 = vunpack.i.l.bf16 %v6936_v43 }
 0x7a0   : > { %v1649_v49 = vsel %vm1647_vm8, %v1646_v57, %v6938_v59  ;;  %v1648_v50 = vsel %vm1647_vm8, %v1645_v46, %v6937_v32 }
 0x7a5   : > { %v6941_v28 = vpop.permute.xlu1 %6940 }
 0x7a6   : > { %v6943_v40 = vunpack.i.h.bf16 %v6941_v28  ;;  %v6942_v63 = vunpack.i.l.bf16 %v6941_v28 }
 0x7a8   : > { %v1652_v52 = vsel %vm1650_vm9, %v1649_v49, %v6943_v40  ;;  %v1651_v26 = vsel %vm1650_vm9, %v1648_v50, %v6942_v63 }
 0x7bc   : > { %v6946_v1 = vpop.permute.xlu0 %6945 }
 0x7bd   : > { %v6948_v5 = vunpack.i.h.bf16 %v6946_v1  ;;  %v6947_v44 = vunpack.i.l.bf16 %v6946_v1  ;;  %v7956_v1 = vld [vmem:[%s9318_s1 + $0x4] ss:$8 sps:$4 sm:$0xff]  }
 0x7be   : > { %2006 = vmatprep.subr.bf16.mxu1 %v7956_v1 }
 0x7bf   : > { %v1655_v35 = vsel %vm1653_vm10, %v1652_v52, %v6948_v5  ;;  %v1654_v53 = vsel %vm1653_vm10, %v1651_v26, %v6947_v44  ;;  %v6089_v5 = vld [vmem:[%s9322_s5] ss:$0 sm:$0xff] }
 0x7c4   : > { %v6951_v36 = vpop.permute.xlu1 %6950 }
 0x7c5   : > { %v6953_v47 = vunpack.i.h.bf16 %v6951_v36  ;;  %v6952_v48 = vunpack.i.l.bf16 %v6951_v36 }
 0x7c7   : > { %v1658_v56 = vsel %vm1656_vm11, %v1655_v35, %v6953_v47  ;;  %v1657_v58 = vsel %vm1656_vm11, %v1654_v53, %v6952_v48  ;;  %v6090_v48 = vld [vmem:[%s9323_s6] ss:$0 sm:$0xff]  ;;  %v7396_v35 = vld [vmem:[%s9318_s1 + $0x14] ss:$8 sps:$4 sm:$0xff]   ;;  %v7397_v53 = vld [vmem:[%s9318_s1 + $0x10] ss:$8 sps:$4 sm:$0xff]  }
 0x7cc   : > { %v6956_v23 = vpop.permute.xlu0 %6955 }
 0x7cd   : > { %v6958_v55 = vunpack.i.h.bf16 %v6956_v23  ;;  %v6957_v33 = vunpack.i.l.bf16 %v6956_v23  ;;  %v7395_v23 = vld [vmem:[%s9318_s1] ss:$8 sps:$4 sm:$0xff]  }
 0x7cf   : > { %v1661_v31 = vsel %vm1659_vm12, %v1658_v56, %v6958_v55  ;;  %v1660_v61 = vsel %vm1659_vm12, %v1657_v58, %v6957_v33  ;;  %v7398_v55 = vld [vmem:[%s9318_s1 + $0x24] ss:$8 sps:$4 sm:$0xff]   ;;  %v7399_v33 = vld [vmem:[%s9318_s1 + $0x20] ss:$8 sps:$4 sm:$0xff]   ;;  %v6105_v56 = vld [vmem:[%s7592_s24 + $0x10] sm:$0xff] }
 0x7d0   : > { %v1662_v62 = vpack.c.bf16 %v1661_v31, %v1660_v61  ;;  %v6106_v58 = vld [vmem:[%s7592_s24 + $0x18] sm:$0x7]  ;;  %v7400_v31 = vld [vmem:[%s9318_s1 + $0x34] ss:$8 sps:$4 sm:$0xff]  }
 0x7d1   : > { %v2002_v61 = vpack.c.bf16 %v6106_v58, %v6105_v56 }
 0x7d2   : > { %6474 = vmatmul.mubr.msk.bf16.vlgmr.msra.gmra.mrb[28].mxu0 %vm544_vm0, %v1662_v62  ;;  %v7401_v62 = vld [vmem:[%s9318_s1 + $0x30] ss:$8 sps:$4 sm:$0xff]  }
 0x7d3   : > { %6497 = vmatprep.mubr.msk.bf16.mxu0 %vm7473_vm1, %v7472_v16 }
 0x8a5   : > { %v1724_v0 = vpop.f32.mrb[28].mxu0 }
 0x8a6   : > { %v1731_v4 = vadd.f32 %v7392_v54, %v1724_v0  ;;  %v6475_v6 = vpop.f32.mrb[29].mxu0  ;;  %v7084_v0 = vld [vmem:[%s9326_s9] sm:$0xff]   ;;  %v7086_v54 = vld [vmem:[%s9326_s9 + $0x10] sm:$0xff]  }
 0x8a7   : > { %v1727_v7 = vpop.f32.mrb[30].mxu0  ;;  %6490 = vmatpush3.bf16.msra.mxu0 %v7084_v0  ;;  %v6091_v6 = vld [vmem:[%s9325_s8] ss:$0 sm:$0xff] }
 0x8a8   : > { %v1732_v21 = vadd.f32 %v7393_v25, %v1727_v7  ;;  %v6476_v9 = vpop.f32.mrb[31].mxu0  ;;  %v1739_v11 = vadd.f32 %v6088_v51, %v1731_v4  ;;  %6491 = vmatprep.subr.bf16.mxu0 %v7472_v16  ;;  %v7087_v4 = vld [vmem:[%s9326_s9 + $0x18] sm:$0xff]  }
 0x8aa   : > { %v1741_v12 = vsel %vm544_vm0, %v1739_v11, 0.0  ;;  %v1740_v14 = vadd.f32 %v6088_v51, %v1732_v21  ;;  %v7085_v51 = vld [vmem:[%s9326_s9 + $0x8] sm:$0xff]  }
 0x8ab   : > { %1742 = vadd.xlane.f32.xlu1 %v1741_v12  ;;  %6492 = vmatpush3.bf16.msra.mxu0 %v7085_v51 }
 0x8ac   : > { %v1745_v41 = vsel %vm1744_vm13, %v1740_v14, 0.0  ;;  %6493 = vmatprep.subr.bf16.mxu0 %v7472_v16 }
 0x8ad   : > { %1746 = vadd.xlane.f32.xlu0 %v1745_v41 }
 0x8af   : > { %6494 = vmatpush3.bf16.msra.mxu0 %v7086_v54 }
 0x8b0   : > { %6495 = vmatprep.subr.bf16.mxu0 %v7472_v16 }
 0x8b3   : > { %6496 = vmatpush3.bf16.msra.mxu0 %v7087_v4 }
 0x8b4   : > { %6501 = vmatprep.subr.bf16.mxu0 %v7472_v16 }
 0x938   : > { %v1743_v15 = vpop.xlane.xlu1 %1742 }
 0x939   : > { %v1749_v39 = vmul.f32 0.015625, %v1743_v15 }
 0x93a   : > { %v1747_v17 = vpop.xlane.xlu0 %1746 }
 0x93b   : > { %v1751_v19 = vsub.f32 %v1739_v11, %v1749_v39  ;;  %v1750_v22 = vmul.f32 0.015625, %v1747_v17 }
 0x93d   : > { %v1752_v45 = vsub.f32 %v1740_v14, %v1750_v22  ;;  %v1753_v24 = vmul.f32 %v1751_v19, %v1751_v19 }
 0x93f   : > { %v1755_v27 = vsel %vm544_vm0, %v1753_v24, 0.0  ;;  %v1754_v43 = vmul.f32 %v1752_v45, %v1752_v45 }
 0x940   : > { %1756 = vadd.xlane.f32.xlu0 %v1755_v27 }
 0x941   : > { %v1758_v28 = vsel %vm1744_vm13, %v1754_v43, 0.0 }
 0x942   : > { %1759 = vadd.xlane.f32.xlu1 %v1758_v28 }
 0x9cd   : > { %v1757_v59 = vpop.xlane.xlu0 %1756 }
 0x9ce   : > { %v1761_v32 = vmul.f32 0.015625, %v1757_v59 }
 0x9cf   : > { %v1760_v36 = vpop.xlane.xlu1 %1759 }
 0x9d0   : > { %v1763_v40 = vadd.f32 1e-05, %v1761_v32  ;;  %v1762_v63 = vmul.f32 0.015625, %v1760_v36 }
 0x9d2   : > { %7152 = vrsqrt.f32 %v1763_v40  ;;  %v1764_v3 = vadd.f32 1e-05, %v1762_v63 }
 0x9d4   : > { %7154 = vrsqrt.f32 %v1764_v3 }
 0x9dc   : > { %v7153_v42 = vpop.eup %7152 }
 0x9dd   : > { %v1767_v44 = vmul.f32 %v7153_v42, %v1751_v19 }
 0x9de   : > { %v7155_v57 = vpop.eup %7154 }
 0x9df   : > { %v1775_v46 = vmul.f32 %v6089_v5, %v1767_v44  ;;  %v1768_v47 = vmul.f32 %v7155_v57, %v1752_v45 }
 0x9e1   : > { %v1776_v49 = vmul.f32 %v6089_v5, %v1768_v47  ;;  %v7965_v50 = vadd.f32 %v6090_v48, %v1775_v46 }
 0x9e3   : > { %v7967_v52 = vadd.f32 %v6090_v48, %v1776_v49 }
 0x9e5   : > { %v1785_v26 = vpack.c.bf16 %v7967_v52, %v7965_v50 }
 0x9e7   : > { %6486 = vmatmul.mubr.msk.bf16.vlgmr.msra.gmra.mrb[40].mxu1 %vm544_vm0, %v1785_v26 }
 0x9e8   : > { %2007 = vmatpush1.bf16.msra.mxu1 %v7395_v23  ;;  %2038 = vmatprep.mubr.bf16.mxu1 %v7471_v2 }
 0x9e9   : > { %2008 = vmatprep.subr.bf16.mxu1 %v7396_v35 }
 0x9ec   : > { %2009 = vmatpush1.bf16.msra.mxu1 %v7397_v53 }
 0x9ed   : > { %2010 = vmatprep.subr.bf16.mxu1 %v7398_v55 }
 0x9f0   : > { %2011 = vmatpush1.bf16.msra.mxu1 %v7399_v33 }
 0x9f1   : > { %2012 = vmatprep.subr.bf16.mxu1 %v7400_v31 }
 0x9f4   : > { %2013 = vmatpush1.bf16.msra.mxu1 %v7401_v62 }
 0x9f5   : > { %6507 = vmatprep.subr.bf16.mxu1 %v7472_v16 }
 0x9f7   : > { %6107 = vmatmul.mubr.msk.bf16.vlgmr.msra.gmra.mrb[44].mxu1 %vm544_vm0, %v2002_v61 }
 0x9f8   : > { %6509 = vmatprep.mubr.msk.bf16.mxu1 %vm7473_vm1, %v7472_v16 }
 0xaba   : > { %v1853_v7 = vpop.f32.mrb[40].mxu1 }
 0xabb   : > { %v1854_v25 = vadd.f32 %v6091_v6, %v1853_v7  ;;  %v6487_v21 = vpop.f32.mrb[41].mxu1 }
 0xabc   : > { %v1856_v9 = vpop.f32.mrb[42].mxu1 }
 0xabd   : > { %v1862_v11 = vmul.f32 0.044715, %v1854_v25  ;;  %v1857_v12 = vadd.f32 %v6091_v6, %v1856_v9  ;;  %v6488_v14 = vpop.f32.mrb[43].mxu1  ;;  %v1860_v23 = vmul.f32 0.5, %v1854_v25 }
 0xabf   : > { %v1864_v41 = vmul.f32 %v1862_v11, %v1854_v25  ;;  %v1863_v15 = vmul.f32 0.044715, %v1857_v12  ;;  %v1861_v35 = vmul.f32 0.5, %v1857_v12 }
 0xac1   : > { %v1866_v39 = vmul.f32 %v1864_v41, %v1854_v25  ;;  %v1865_v17 = vmul.f32 %v1863_v15, %v1857_v12 }
 0xac3   : > { %v1868_v19 = vadd.f32 %v1866_v39, %v1854_v25  ;;  %v1867_v22 = vmul.f32 %v1865_v17, %v1857_v12 }
 0xac5   : > { %v1870_v45 = vmul.f32 0.7978846, %v1868_v19  ;;  %v1869_v24 = vadd.f32 %v1867_v22, %v1857_v12 }
 0xac7   : > { %7156 = vtanh.f32 %v1870_v45  ;;  %v1871_v27 = vmul.f32 0.7978846, %v1869_v24 }
 0xac9   : > { %7158 = vtanh.f32 %v1871_v27 }
 0xaca   : > { %v2040_v43 = vpop.f32.mrb[44].mxu1 }
 0xacb   : > { %v2041_v28 = vadd.f32 %v2040_v43, %v7615_v18  ;;  %v2042_v59 = vpop.f32.mrb[45].mxu1 }
 0xacc   : > { %v2044_v32 = vpop.f32.mrb[46].mxu1  ;;  %v2043_v63 = vadd.f32 %v2042_v59, %v7617_v20 }
 0xacd   : > { %v2045_v36 = vadd.f32 %v2044_v32, %v7615_v18  ;;  %v2046_v40 = vpop.f32.mrb[47].mxu1  ;;  %v2049_v42 = vmul.f32 0.35355338, %v2041_v28 }
 0xace   : > { %v2047_v3 = vadd.f32 %v2046_v40, %v7617_v20 }
 0xacf   : > { %v2050_v5 = vmul.f32 0.35355338, %v2045_v36  ;;  %v2052_v44 = vpack.c.bf16 %v2045_v36, %v2041_v28 }
 0xad0   : > { %v8023_v57 = vpack.c.bf16 %v2047_v3, %v2043_v63 }
 0xad1   : > { %v7157_v46 = vpop.eup %7156  ;;  %v2051_v47 = vpack.c.bf16 %v2050_v5, %v2049_v42  ;;  %2177 = vrot.lane.b32.xlu1 %v2052_v44, %s9350_s19  ;;  %2055 = vrot.lane.b32.xlu0 %v2052_v44, %s9377_s22  ;;  %s9385_s19 = smov 72  }
 0xad2   : > { %v2131_v48 = vand.u32 %v8023_v57, %v7631_v37  ;;  %v1874_v49 = vadd.f32 1.0, %v7157_v46 }
 0xad3   : > { %v7159_v26 = vpop.eup %7158 }
 0xad4   : > { %6508 = vmatpush3.bf16.msra.mxu1 %v2131_v48  ;;  %v1875_v53 = vadd.f32 1.0, %v7159_v26  ;;  %v1876_v55 = vmul.f32 %v1874_v49, %v1860_v23 }
 0xad5   : > { %2301 = vrot.lane.b32.xlu0 %v2052_v44, %s9360_s28  ;;  %2175 = vrot.lane.b32.xlu1 %v2051_v47, %s9358_s27 }
 0xad6   : > { %v1877_v33 = vmul.f32 %v1875_v53, %v1861_v35  ;;  %6519 = vmatprep.subr.bf16.mxu1 %v7472_v16 }
 0xad8   : > { %v1878_v56 = vpack.c.bf16 %v1877_v33, %v1876_v55 }
 0xad9   : > { %2424 = vrot.lane.b32.xlu0 %v2052_v44, %s9356_s30  ;;  %2299 = vrot.lane.b32.xlu1 %v2051_v47, %s9354_s20 }
 0xada   : > { %6498 = vmatmul.mubr.msk.bf16.vlgmr.msra.gmra.mrb[32].mxu0 %vm544_vm0, %v1878_v56 }
 0xadb   : > { %6503 = vmatprep.mubr.msk.bf16.mxu0 %vm7473_vm1, %v7472_v16 }
 0xadd   : > { %2547 = vrot.lane.b32.xlu0 %v2052_v44, %s9352_s15  ;;  %2422 = vrot.lane.b32.xlu1 %v2051_v47, %s9378_s21 }
 0xae1   : > { %2670 = vrot.lane.b32.xlu0 %v2052_v44, %s9379_s16  ;;  %2545 = vrot.lane.b32.xlu1 %v2051_v47, %s9380_s26 }
 0xae5   : > { %2793 = vrot.lane.b32.xlu0 %v2052_v44, %s9381_s23  ;;  %2668 = vrot.lane.b32.xlu1 %v2051_v47, %s9382_s18 }
 0xae9   : > { %2916 = vrot.lane.b32.xlu0 %v2052_v44, %s9383_s14  ;;  %2791 = vrot.lane.b32.xlu1 %v2051_v47, %s9384_s17 }
 0xaed   : > { %2914 = vrot.lane.b32.xlu1 %v2051_v47, %s9385_s19 }
 0xaf1   : > { %2250 = vrot.lane.b32.xlu1 %v8023_v57, %s9358_s27  ;;  %s9387_s27 = smov 48  }
 0xb43   : > { %v2056_v58 = vpop.permute.xlu0 %2055  ;;  %v2178_v61 = vpop.permute.xlu1 %2177 }
 0xb44   : > { %v2061_v31 = vsel %vm599_vm2, %v2056_v58, 0  ;;  %v2183_v62 = vsel %vm599_vm2, %v2178_v61, 0 }
 0xb45   : > { %6502 = vmatpush3.bf16.xpose.msra.mxu0 %v2061_v31 }
 0xb46   : > { %6513 = vmatprep.subr.bf16.mxu0 %v7472_v16 }
 0xb47   : > { %v2302_v0 = vpop.permute.xlu0 %2301  ;;  %v2176_v51 = vpop.permute.xlu1 %2175 }
 0xb48   : > { %v2307_v54 = vsel %vm599_vm2, %v2302_v0, 0 }
 0xb4b   : > { %v2425_v4 = vpop.permute.xlu0 %2424  ;;  %v2300_v6 = vpop.permute.xlu1 %2299 }
 0xb4c   : > { %6504 = vmatmul.mubr.msk.bf16.vlgmr.msra.gmra.mrb[36].mxu0 %vm599_vm2, %v2051_v47  ;;  %v2430_v7 = vsel %vm599_vm2, %v2425_v4, 0 }
 0xb4d   : > { %6514 = vmatpush3.bf16.xpose.msra.mxu0 %v2183_v62  ;;  %6515 = vmatprep.mubr.msk.bf16.mxu0 %vm7473_vm1, %v7472_v16 }
 0xb4e   : > { %6525 = vmatprep.subr.bf16.mxu0 %v7472_v16 }
 0xb4f   : > { %v2548_v25 = vpop.permute.xlu0 %2547  ;;  %v2423_v21 = vpop.permute.xlu1 %2422 }
 0xb50   : > { %v2553_v9 = vsel %vm599_vm2, %v2548_v25, 0 }
 0xb53   : > { %v2671_v11 = vpop.permute.xlu0 %2670  ;;  %v2546_v12 = vpop.permute.xlu1 %2545 }
 0xb54   : > { %6516 = vmatmul.mubr.msk.bf16.vlgmr.msra.gmra.mrb[40].mxu0 %vm599_vm2, %v2176_v51  ;;  %v2676_v14 = vsel %vm599_vm2, %v2671_v11, 0 }
 0xb55   : > { %6526 = vmatpush3.bf16.xpose.msra.mxu0 %v2307_v54  ;;  %6527 = vmatprep.mubr.msk.bf16.mxu0 %vm7473_vm1, %v7472_v16 }
 0xb56   : > { %6537 = vmatprep.subr.bf16.mxu0 %v7472_v16 }
 0xb57   : > { %v2794_v41 = vpop.permute.xlu0 %2793  ;;  %v2669_v15 = vpop.permute.xlu1 %2668 }
 0xb58   : > { %v2799_v39 = vsel %vm599_vm2, %v2794_v41, 0 }
 0xb5b   : > { %v2917_v17 = vpop.permute.xlu0 %2916  ;;  %v2792_v19 = vpop.permute.xlu1 %2791 }
 0xb5c   : > { %6528 = vmatmul.mubr.msk.bf16.vlgmr.msra.gmra.mrb[44].mxu0 %vm599_vm2, %v2300_v6  ;;  %v2922_v22 = vsel %vm599_vm2, %v2917_v17, 0 }
 0xb5d   : > { %6538 = vmatpush3.bf16.xpose.msra.mxu0 %v2430_v7  ;;  %6539 = vmatprep.mubr.msk.bf16.mxu0 %vm7473_vm1, %v7472_v16 }
 0xb5e   : > { %6549 = vmatprep.subr.bf16.mxu0 %v7472_v16 }
 0xb5f   : > { %v2915_v45 = vpop.permute.xlu1 %2914 }
 0xb64   : > { %6540 = vmatmul.mubr.msk.bf16.vlgmr.msra.gmra.mrb[48].mxu0 %vm599_vm2, %v2423_v21 }
 0xb65   : > { %6550 = vmatpush3.bf16.xpose.msra.mxu0 %v2553_v9  ;;  %6551 = vmatprep.mubr.msk.bf16.mxu0 %vm7473_vm1, %v7472_v16 }
 0xb66   : > { %6561 = vmatprep.subr.bf16.mxu0 %v7472_v16 }
 0xb6c   : > { %6552 = vmatmul.mubr.msk.bf16.vlgmr.msra.gmra.mrb[52].mxu0 %vm599_vm2, %v2546_v12 }
 0xb6d   : > { %6562 = vmatpush3.bf16.xpose.msra.mxu0 %v2676_v14  ;;  %6563 = vmatprep.mubr.msk.bf16.mxu0 %vm7473_vm1, %v7472_v16 }
 0xb6e   : > { %6573 = vmatprep.subr.bf16.mxu0 %v7472_v16 }
 0xb74   : > { %6564 = vmatmul.mubr.msk.bf16.vlgmr.msra.gmra.mrb[56].mxu0 %vm599_vm2, %v2669_v15 }
 0xb75   : > { %6574 = vmatpush3.bf16.xpose.msra.mxu0 %v2799_v39  ;;  %6575 = vmatprep.mubr.msk.bf16.mxu0 %vm7473_vm1, %v7472_v16 }
 0xb76   : > { %6585 = vmatprep.subr.bf16.mxu0 %v7472_v16 }
 0xb7c   : > { %6576 = vmatmul.mubr.msk.bf16.vlgmr.msra.gmra.mrb[60].mxu0 %vm599_vm2, %v2792_v19 }
 0xb7d   : > { %6586 = vmatpush3.bf16.xpose.msra.mxu0 %v2922_v22  ;;  %6587 = vmatprep.mubr.msk.bf16.mxu0 %vm7473_vm1, %v7472_v16 }
 0xb7e   : > { %6597 = vmatprep.subr.bf16.mxu0 %v7472_v16 }
 0xb84   : > { %6588 = vmatmul.mubr.msk.bf16.vlgmr.msra.gmra.mrb[64].mxu0 %vm599_vm2, %v2915_v45 }
 0xb85   : > { %6598 = vmatpush3.bf16.msra.mxu0 %v7870_v60  ;;  %6605 = vmatprep.mubr.msk.bf16.mxu0 %vm7473_vm1, %v7472_v16 }
 0xb86   : > { %6599 = vmatprep.subr.bf16.mxu0 %v7472_v16 }
 0xb89   : > { %6600 = vmatpush3.bf16.msra.mxu0 %v7877_v8 }
 0xb8a   : > { %6601 = vmatprep.subr.bf16.mxu0 %v7472_v16 }
 0xb8d   : > { %6602 = vmatpush3.bf16.msra.mxu0 %v7883_v10 }
 0xb8e   : > { %6603 = vmatprep.subr.bf16.mxu0 %v7472_v16 }
 0xb91   : > { %6604 = vmatpush3.bf16.msra.mxu0 %v7892_v13 }
 0xb92   : > { %6621 = vmatprep.subr.bf16.mxu0 %v7472_v16 }
 0xbad   : > { %v8096_v24 = vpop.f32.mrb[32].mxu0 }
 0xbae   : > { %v6499_v60 = vpop.f32.mrb[33].mxu0 }
 0xbaf   : > { %v8098_v27 = vpop.f32.mrb[34].mxu0 }
 0xbb0   : > { %v6500_v43 = vpop.f32.mrb[35].mxu0 }
 0xbb1   : > { %v8168_v43 = vpop.permute.xlu1 %2250 }
 0xc1f   : > { %v8100_v28 = vpop.f32.mrb[36].mxu0 }
 0xc20   : > { %v6505_v59 = vpop.f32.mrb[37].mxu0  ;;  %v2104_v8 = vsel %vm647_vm5, %v8100_v28, -inf }
 0xc21   : > { %2105 = vmax.xlane.f32.xlu0 %v2104_v8  ;;  %v8104_v10 = vpop.f32.mrb[38].mxu0 }
 0xc22   : > { %v6506_v32 = vpop.f32.mrb[39].mxu0  ;;  %v2107_v13 = vsel %vm651_vm6, %v8104_v10, -inf }
 0xc23   : > { %2108 = vmax.xlane.f32.xlu1 %v2107_v13 }
 0xc27   : > { %v8108_v36 = vpop.f32.mrb[40].mxu0 }
 0xc28   : > { %v6517_v40 = vpop.f32.mrb[41].mxu0  ;;  %v2226_v63 = vsel %vm647_vm5, %v8108_v36, -inf }
 0xc29   : > { %2227 = vmax.xlane.f32.xlu0 %v2226_v63  ;;  %v8112_v3 = vpop.f32.mrb[42].mxu0 }
 0xc2a   : > { %v6518_v42 = vpop.f32.mrb[43].mxu0  ;;  %v2229_v5 = vsel %vm651_vm6, %v8112_v3, -inf }
 0xc2d   : > { %2230 = vmax.xlane.f32.xlu0 %v2229_v5 }
 0xc2f   : > { %v8116_v44 = vpop.f32.mrb[44].mxu0 }
 0xc30   : > { %v6529_v46 = vpop.f32.mrb[45].mxu0  ;;  %v2350_v47 = vsel %vm647_vm5, %v8116_v44, -inf }
 0xc31   : > { %2351 = vmax.xlane.f32.xlu1 %v2350_v47  ;;  %v8120_v48 = vpop.f32.mrb[46].mxu0 }
 0xc32   : > { %v6530_v49 = vpop.f32.mrb[47].mxu0  ;;  %v2353_v26 = vsel %vm651_vm6, %v8120_v48, -inf }
 0xc33   : > { %2354 = vmax.xlane.f32.xlu0 %v2353_v26 }
 0xc37   : > { %v8124_v23 = vpop.f32.mrb[48].mxu0 }
 0xc38   : > { %v6541_v35 = vpop.f32.mrb[49].mxu0  ;;  %v2473_v53 = vsel %vm647_vm5, %v8124_v23, -inf }
 0xc39   : > { %2474 = vmax.xlane.f32.xlu1 %v2473_v53  ;;  %v8128_v55 = vpop.f32.mrb[50].mxu0 }
 0xc3a   : > { %v6542_v33 = vpop.f32.mrb[51].mxu0  ;;  %v2476_v56 = vsel %vm651_vm6, %v8128_v55, -inf }
 0xc3b   : > { %2477 = vmax.xlane.f32.xlu0 %v2476_v56 }
 0xc3f   : > { %v8132_v58 = vpop.f32.mrb[52].mxu0 }
 0xc40   : > { %v6553_v31 = vpop.f32.mrb[53].mxu0  ;;  %v2596_v61 = vsel %vm647_vm5, %v8132_v58, -inf }
 0xc41   : > { %2597 = vmax.xlane.f32.xlu1 %v2596_v61  ;;  %v8136_v62 = vpop.f32.mrb[54].mxu0 }
 0xc42   : > { %v6554_v0 = vpop.f32.mrb[55].mxu0  ;;  %v2599_v51 = vsel %vm651_vm6, %v8136_v62, -inf }
 0xc43   : > { %2600 = vmax.xlane.f32.xlu0 %v2599_v51 }
 0xc47   : > { %v8140_v54 = vpop.f32.mrb[56].mxu0 }
 0xc48   : > { %v6565_v4 = vpop.f32.mrb[57].mxu0  ;;  %v2719_v6 = vsel %vm647_vm5, %v8140_v54, -inf }
 0xc49   : > { %2720 = vmax.xlane.f32.xlu1 %v2719_v6  ;;  %v8144_v7 = vpop.f32.mrb[58].mxu0 }
 0xc4a   : > { %v6566_v25 = vpop.f32.mrb[59].mxu0  ;;  %v2722_v21 = vsel %vm651_vm6, %v8144_v7, -inf }
 0xc4b   : > { %2723 = vmax.xlane.f32.xlu0 %v2722_v21 }
 0xc4f   : > { %v8148_v9 = vpop.f32.mrb[60].mxu0 }
 0xc50   : > { %v6577_v11 = vpop.f32.mrb[61].mxu0  ;;  %v2842_v12 = vsel %vm647_vm5, %v8148_v9, -inf }
 0xc51   : > { %2843 = vmax.xlane.f32.xlu1 %v2842_v12  ;;  %v8152_v14 = vpop.f32.mrb[62].mxu0 }
 0xc52   : > { %v6578_v41 = vpop.f32.mrb[63].mxu0  ;;  %v2845_v15 = vsel %vm651_vm6, %v8152_v14, -inf }
 0xc53   : > { %2846 = vmax.xlane.f32.xlu0 %v2845_v15 }
 0xc57   : > { %v8156_v39 = vpop.f32.mrb[64].mxu0 }
 0xc58   : > { %v6589_v17 = vpop.f32.mrb[65].mxu0  ;;  %v2965_v19 = vsel %vm647_vm5, %v8156_v39, -inf }
 0xc59   : > { %2966 = vmax.xlane.f32.xlu1 %v2965_v19  ;;  %v8160_v22 = vpop.f32.mrb[66].mxu0 }
 0xc5a   : > { %v6590_v45 = vpop.f32.mrb[67].mxu0  ;;  %v2968_v60 = vsel %vm651_vm6, %v8160_v22, -inf }
 0xc5b   : > { %2969 = vmax.xlane.f32.xlu0 %v2968_v60 }
 0xc6a   : > { %2496 = vrot.lane.b32.xlu1 %v8023_v57, %s9378_s21 }
 0xc71   : > { %2373 = vrot.lane.b32.xlu0 %v8023_v57, %s9354_s20  ;;  %s9391_s20 = smov 32  }
 0xcae   : > { %v2106_v59 = vpop.xlane.xlu0 %2105 }
 0xcaf   : > { %v2110_v8 = vsub.f32 %v8100_v28, %v2106_v59 }
 0xcb0   : > { %v2109_v32 = vpop.xlane.xlu1 %2108 }
 0xcb1   : > { %v2112_v13 = vmul.f32 1.442695, %v2110_v8  ;;  %v2111_v40 = vsub.f32 %v8104_v10, %v2109_v32 }
 0xcb3   : > { %7160 = vpow2.f32 %v2112_v13  ;;  %v2114_v63 = vmul.f32 1.442695, %v2111_v40 }
 0xcb5   : > { %7162 = vpow2.f32 %v2114_v63 }
 0xcb6   : > { %v2228_v42 = vpop.xlane.xlu0 %2227 }
 0xcb7   : > { %v2232_v5 = vsub.f32 %v8108_v36, %v2228_v42 }
 0xcb9   : > { %v2234_v46 = vmul.f32 1.442695, %v2232_v5 }
 0xcba   : > { %v2231_v47 = vpop.xlane.xlu0 %2230 }
 0xcbb   : > { %7164 = vpow2.f32 %v2234_v46  ;;  %v2233_v49 = vsub.f32 %v8112_v3, %v2231_v47 }
 0xcbd   : > { %v8174_v26 = vpop.eup %7160  ;;  %v2236_v35 = vmul.f32 1.442695, %v2233_v49 }
 0xcbe   : > { %v2352_v53 = vpop.xlane.xlu1 %2351  ;;  %v2116_v28 = vsel %vm647_vm5, %v8174_v26, 0.0 }
 0xcbf   : > { %v8178_v33 = vpop.eup %7162  ;;  %7166 = vpow2.f32 %v2236_v35  ;;  %v2356_v10 = vsub.f32 %v8116_v44, %v2352_v53  ;;  %2117 = vadd.xlane.f32.xlu1 %v2116_v28 }
 0xcc0   : > { %v2355_v56 = vpop.xlane.xlu0 %2354  ;;  %v2119_v36 = vsel %vm651_vm6, %v8178_v33, 0.0 }
 0xcc1   : > { %v2358_v31 = vmul.f32 1.442695, %v2356_v10  ;;  %v2357_v3 = vsub.f32 %v8120_v48, %v2355_v56  ;;  %2120 = vadd.xlane.f32.xlu0 %v2119_v36 }
 0xcc3   : > { %7168 = vpow2.f32 %v2358_v31  ;;  %v2360_v61 = vmul.f32 1.442695, %v2357_v3 }
 0xcc5   : > { %v8184_v0 = vpop.eup %7164  ;;  %7170 = vpow2.f32 %v2360_v61 }
 0xcc6   : > { %v2475_v51 = vpop.xlane.xlu1 %2474  ;;  %v2238_v4 = vsel %vm647_vm5, %v8184_v0, 0.0 }
 0xcc7   : > { %v2479_v44 = vsub.f32 %v8124_v23, %v2475_v51  ;;  %2239 = vadd.xlane.f32.xlu1 %v2238_v4 }
 0xcc8   : > { %v2478_v6 = vpop.xlane.xlu0 %2477 }
 0xcc9   : > { %v8189_v25 = vpop.eup %7166  ;;  %v2481_v21 = vmul.f32 1.442695, %v2479_v44  ;;  %v2480_v11 = vsub.f32 %v8128_v55, %v2478_v6 }
 0xcca   : > { %v2241_v48 = vsel %vm651_vm6, %v8189_v25, 0.0 }
 0xccb   : > { %7172 = vpow2.f32 %v2481_v21  ;;  %v2483_v12 = vmul.f32 1.442695, %v2480_v11  ;;  %2242 = vadd.xlane.f32.xlu0 %v2241_v48 }
 0xccd   : > { %v8194_v41 = vpop.eup %7168  ;;  %7174 = vpow2.f32 %v2483_v12 }
 0xcce   : > { %v2598_v15 = vpop.xlane.xlu1 %2597  ;;  %v2362_v23 = vsel %vm647_vm5, %v8194_v41, 0.0 }
 0xccf   : > { %v8198_v17 = vpop.eup %7170  ;;  %v2602_v19 = vsub.f32 %v8132_v58, %v2598_v15  ;;  %2363 = vadd.xlane.f32.xlu1 %v2362_v23 }
 0xcd0   : > { %v2601_v45 = vpop.xlane.xlu0 %2600  ;;  %v2365_v55 = vsel %vm651_vm6, %v8198_v17, 0.0 }
 0xcd1   : > { %v2604_v60 = vmul.f32 1.442695, %v2602_v19  ;;  %v2603_v59 = vsub.f32 %v8136_v62, %v2601_v45  ;;  %2366 = vadd.xlane.f32.xlu0 %v2365_v55 }
 0xcd3   : > { %7176 = vpow2.f32 %v2604_v60  ;;  %v2606_v8 = vmul.f32 1.442695, %v2603_v59 }
 0xcd5   : > { %v8204_v32 = vpop.eup %7172  ;;  %7178 = vpow2.f32 %v2606_v8 }
 0xcd6   : > { %v2721_v13 = vpop.xlane.xlu1 %2720  ;;  %v2485_v40 = vsel %vm647_vm5, %v8204_v32, 0.0 }
 0xcd7   : > { %v8208_v63 = vpop.eup %7174  ;;  %v2725_v58 = vsub.f32 %v8140_v54, %v2721_v13  ;;  %2486 = vadd.xlane.f32.xlu1 %v2485_v40 }
 0xcd8   : > { %v2724_v42 = vpop.xlane.xlu0 %2723  ;;  %v2488_v5 = vsel %vm651_vm6, %v8208_v63, 0.0 }
 0xcd9   : > { %v2727_v62 = vmul.f32 1.442695, %v2725_v58  ;;  %v2726_v46 = vsub.f32 %v8144_v7, %v2724_v42  ;;  %2489 = vadd.xlane.f32.xlu0 %v2488_v5 }
 0xcdb   : > { %7180 = vpow2.f32 %v2727_v62  ;;  %v2729_v47 = vmul.f32 1.442695, %v2726_v46 }
 0xcdd   : > { %v8214_v49 = vpop.eup %7176  ;;  %7182 = vpow2.f32 %v2729_v47  ;;  %v2256_v47 = vand.u32 %v8168_v43, %v7631_v37 }
 0xcde   : > { %v2844_v35 = vpop.xlane.xlu1 %2843  ;;  %v2608_v53 = vsel %vm647_vm5, %v8214_v49, 0.0 }
 0xcdf   : > { %v8218_v28 = vpop.eup %7178  ;;  %v2848_v54 = vsub.f32 %v8148_v9, %v2844_v35  ;;  %2609 = vadd.xlane.f32.xlu0 %v2608_v53 }
 0xce0   : > { %v2847_v10 = vpop.xlane.xlu0 %2846  ;;  %v2611_v7 = vsel %vm651_vm6, %v8218_v28, 0.0 }
 0xce1   : > { %v2850_v56 = vmul.f32 1.442695, %v2848_v54  ;;  %v2849_v36 = vsub.f32 %v8152_v14, %v2847_v10 }
 0xce3   : > { %7184 = vpow2.f32 %v2850_v56  ;;  %v2852_v31 = vmul.f32 1.442695, %v2849_v36  ;;  %2612 = vadd.xlane.f32.xlu0 %v2611_v7 }
 0xce5   : > { %v8224_v3 = vpop.eup %7180  ;;  %7186 = vpow2.f32 %v2852_v31 }
 0xce6   : > { %v2967_v61 = vpop.xlane.xlu1 %2966  ;;  %v2731_v51 = vsel %vm647_vm5, %v8224_v3, 0.0 }
 0xce7   : > { %v8228_v4 = vpop.eup %7182  ;;  %v2971_v9 = vsub.f32 %v8156_v39, %v2967_v61  ;;  %2732 = vadd.xlane.f32.xlu1 %v2731_v51 }
 0xce8   : > { %v2734_v14 = vsel %vm651_vm6, %v8228_v4, 0.0  ;;  %v2970_v15 = vpop.xlane.xlu0 %2969 }
 0xce9   : > { %v2973_v44 = vmul.f32 1.442695, %v2971_v9  ;;  %2735 = vadd.xlane.f32.xlu0 %v2734_v14  ;;  %v2972_v23 = vsub.f32 %v8160_v22, %v2970_v15 }
 0xcea   : > { %v2497_v60 = vpop.permute.xlu1 %2496 }
 0xceb   : > { %7188 = vpow2.f32 %v2973_v44  ;;  %v2975_v19 = vmul.f32 1.442695, %v2972_v23  ;;  %v2502_v9 = vand.u32 %v2497_v60, %v7631_v37 }
 0xcec   : > { %v2374_v59 = vpop.permute.xlu0 %2373 }
 0xced   : > { %v8233_v6 = vpop.eup %7184  ;;  %7190 = vpow2.f32 %v2975_v19  ;;  %v2379_v36 = vand.u32 %v2374_v59, %v7631_v37 }
 0xcee   : > { %v2854_v21 = vsel %vm647_vm5, %v8233_v6, 0.0 }
 0xcef   : > { %v8237_v11 = vpop.eup %7186  ;;  %2855 = vadd.xlane.f32.xlu0 %v2854_v21 }
 0xcf0   : > { %v2857_v48 = vsel %vm651_vm6, %v8237_v11, 0.0 }
 0xcf3   : > { %2858 = vadd.xlane.f32.xlu0 %v2857_v48 }
 0xcf5   : > { %v8241_v39 = vpop.eup %7188 }
 0xcf6   : > { %v2977_v12 = vsel %vm647_vm5, %v8241_v39, 0.0 }
 0xcf7   : > { %2978 = vadd.xlane.f32.xlu0 %v2977_v12  ;;  %v8254_v45 = vpop.eup %7190 }
 0xcf8   : > { %2619 = vrot.lane.b32.xlu1 %v8023_v57, %s9380_s26  ;;  %v2980_v55 = vsel %vm651_vm6, %v8254_v45, 0.0 }
 0xd0d   : > { %2742 = vrot.lane.b32.xlu0 %v8023_v57, %s9382_s18 }
 0xd11   : > { %2865 = vrot.lane.b32.xlu0 %v8023_v57, %s9384_s17 }
 0xd15   : > { %2988 = vrot.lane.b32.xlu0 %v8023_v57, %s9385_s19 }
 0xd1c   : > { %2981 = vadd.xlane.f32.xlu1 %v2980_v55 }
 0xd4c   : > { %v2118_v22 = vpop.xlane.xlu1 %2117 }
 0xd4d   : > { %7192 = vrcp.f32 %v2118_v22 }
 0xd4e   : > { %v2121_v8 = vpop.xlane.xlu0 %2120 }
 0xd4f   : > { %7194 = vrcp.f32 %v2121_v8 }
 0xd54   : > { %v2240_v13 = vpop.xlane.xlu1 %2239 }
 0xd55   : > { %7196 = vrcp.f32 %v2240_v13 }
 0xd57   : > { %v7193_v40 = vpop.eup %7192 }
 0xd58   : > { %v2243_v58 = vpop.xlane.xlu0 %2242  ;;  %v2124_v57 = vmul.f32 %v7193_v40, %v8174_v26 }
 0xd59   : > { %v7195_v42 = vpop.eup %7194  ;;  %7198 = vrcp.f32 %v2243_v58 }
 0xd5a   : > { %v2125_v5 = vmul.f32 %v7195_v42, %v8178_v33 }
 0xd5c   : > { %v2364_v62 = vpop.xlane.xlu1 %2363  ;;  %v2126_v46 = vpack.c.bf16 %v2125_v5, %v2124_v57 }
 0xd5d   : > { %7200 = vrcp.f32 %v2364_v62 }
 0xd5e   : > { %6510 = vmatmul.mubr.msk.bf16.vlgmr.msra.gmra.mrb[48].mxu1 %vm647_vm5, %v2126_v46  ;;  %v2367_v35 = vpop.xlane.xlu0 %2366 }
 0xd5f   : > { %6520 = vmatpush3.bf16.msra.mxu1 %v2256_v47  ;;  %7202 = vrcp.f32 %v2367_v35  ;;  %6521 = vmatprep.mubr.msk.bf16.mxu1 %vm7473_vm1, %v7472_v16  ;;  %v7197_v53 = vpop.eup %7196 }
 0xd60   : > { %6531 = vmatprep.subr.bf16.mxu1 %v7472_v16  ;;  %v2246_v33 = vmul.f32 %v7197_v53, %v8184_v0 }
 0xd63   : > { %v7199_v26 = vpop.eup %7198 }
 0xd64   : > { %v2247_v54 = vmul.f32 %v7199_v26, %v8189_v25  ;;  %v2487_v10 = vpop.xlane.xlu1 %2486 }
 0xd65   : > { %7204 = vrcp.f32 %v2487_v10 }
 0xd66   : > { %v2490_v43 = vpop.xlane.xlu0 %2489  ;;  %v2248_v56 = vpack.c.bf16 %v2247_v54, %v2246_v33 }
 0xd67   : > { %7206 = vrcp.f32 %v2490_v43  ;;  %v7201_v7 = vpop.eup %7200 }
 0xd68   : > { %6522 = vmatmul.mubr.msk.bf16.vlgmr.msra.gmra.mrb[52].mxu1 %vm647_vm5, %v2248_v56  ;;  %v2370_v0 = vmul.f32 %v7201_v7, %v8194_v41 }
 0xd69   : > { %v7203_v31 = vpop.eup %7202  ;;  %6532 = vmatpush3.bf16.msra.mxu1 %v2379_v36  ;;  %6533 = vmatprep.mubr.msk.bf16.mxu1 %vm7473_vm1, %v7472_v16 }
 0xd6a   : > { %v2371_v61 = vmul.f32 %v7203_v31, %v8198_v17  ;;  %6543 = vmatprep.subr.bf16.mxu1 %v7472_v16 }
 0xd6c   : > { %v2610_v25 = vpop.xlane.xlu0 %2609  ;;  %v2372_v51 = vpack.c.bf16 %v2371_v61, %v2370_v0 }
 0xd6d   : > { %7208 = vrcp.f32 %v2610_v25 }
 0xd6f   : > { %v7205_v14 = vpop.eup %7204 }
 0xd70   : > { %6534 = vmatmul.mubr.msk.bf16.vlgmr.msra.gmra.mrb[56].mxu1 %vm647_vm5, %v2372_v51  ;;  %v2613_v44 = vpop.xlane.xlu0 %2612  ;;  %v2493_v41 = vmul.f32 %v7205_v14, %v8204_v32 }
 0xd71   : > { %v7207_v21 = vpop.eup %7206  ;;  %6544 = vmatpush3.bf16.msra.mxu1 %v2502_v9  ;;  %7210 = vrcp.f32 %v2613_v44  ;;  %6545 = vmatprep.mubr.msk.bf16.mxu1 %vm7473_vm1, %v7472_v16 }
 0xd72   : > { %v2494_v17 = vmul.f32 %v7207_v21, %v8208_v63  ;;  %6555 = vmatprep.subr.bf16.mxu1 %v7472_v16 }
 0xd74   : > { %v2733_v48 = vpop.xlane.xlu1 %2732  ;;  %v2495_v12 = vpack.c.bf16 %v2494_v17, %v2493_v41 }
 0xd76   : > { %v2736_v15 = vpop.xlane.xlu0 %2735 }
 0xd77   : > { %v7209_v19 = vpop.eup %7208  ;;  %7212 = vrcp.f32 %v2736_v15 }
 0xd78   : > { %v2620_v23 = vpop.permute.xlu1 %2619  ;;  %6546 = vmatmul.mubr.msk.bf16.vlgmr.msra.gmra.mrb[60].mxu1 %vm647_vm5, %v2495_v12  ;;  %v2616_v63 = vmul.f32 %v7209_v19, %v8214_v49  ;;  %7214 = vrcp.f32 %v2733_v48 }
 0xd79   : > { %v2625_v55 = vand.u32 %v2620_v23, %v7631_v37  ;;  %6557 = vmatprep.mubr.msk.bf16.mxu1 %vm7473_vm1, %v7472_v16 }
 0xd7b   : > { %v7211_v60 = vpop.eup %7210  ;;  %6556 = vmatpush3.bf16.msra.mxu1 %v2625_v55 }
 0xd7c   : > { %v2617_v59 = vmul.f32 %v7211_v60, %v8218_v28  ;;  %v2856_v32 = vpop.xlane.xlu0 %2855  ;;  %6567 = vmatprep.subr.bf16.mxu1 %v7472_v16 }
 0xd7e   : > { %v2618_v22 = vpack.c.bf16 %v2617_v59, %v2616_v63 }
 0xd80   : > { %6558 = vmatmul.mubr.msk.bf16.vlgmr.msra.gmra.mrb[64].mxu1 %vm647_vm5, %v2618_v22  ;;  %v2859_v8 = vpop.xlane.xlu0 %2858 }
 0xd81   : > { %6569 = vmatprep.mubr.msk.bf16.mxu1 %vm7473_vm1, %v7472_v16  ;;  %7216 = vrcp.f32 %v2859_v8  ;;  %v7213_v40 = vpop.eup %7212 }
 0xd82   : > { %7218 = vrcp.f32 %v2856_v32  ;;  %v7215_v58 = vpop.eup %7214  ;;  %v2740_v49 = vmul.f32 %v7213_v40, %v8228_v4 }
 0xd83   : > { %v2739_v57 = vmul.f32 %v7215_v58, %v8224_v3 }
 0xd84   : > { %v2979_v13 = vpop.xlane.xlu0 %2978 }
 0xd85   : > { %v2741_v62 = vpack.c.bf16 %v2740_v49, %v2739_v57  ;;  %7220 = vrcp.f32 %v2979_v13 }
 0xd88   : > { %v2743_v42 = vpop.permute.xlu0 %2742 }
 0xd89   : > { %v2748_v28 = vand.u32 %v2743_v42, %v7631_v37 }
 0xd8b   : > { %6568 = vmatpush3.bf16.msra.mxu1 %v2748_v28  ;;  %v7217_v46 = vpop.eup %7216 }
 0xd8c   : > { %v2866_v5 = vpop.permute.xlu0 %2865  ;;  %6579 = vmatprep.subr.bf16.mxu1 %v7472_v16  ;;  %v7219_v35 = vpop.eup %7218  ;;  %v2863_v4 = vmul.f32 %v7217_v46, %v8237_v11 }
 0xd8d   : > { %v2871_v47 = vand.u32 %v2866_v5, %v7631_v37  ;;  %v2862_v3 = vmul.f32 %v7219_v35, %v8233_v6 }
 0xd8e   : > { %6570 = vmatmul.mubr.msk.bf16.vlgmr.msra.gmra.mrb[68].mxu1 %vm647_vm5, %v2741_v62 }
 0xd8f   : > { %6580 = vmatpush3.bf16.msra.mxu1 %v2871_v47  ;;  %6581 = vmatprep.mubr.msk.bf16.mxu1 %vm7473_vm1, %v7472_v16  ;;  %v2864_v26 = vpack.c.bf16 %v2863_v4, %v2862_v3  ;;  %v7221_v11 = vpop.eup %7220 }
 0xd90   : > { %6591 = vmatprep.subr.bf16.mxu1 %v7472_v16  ;;  %v2989_v53 = vpop.permute.xlu0 %2988  ;;  %v2985_v43 = vmul.f32 %v7221_v11, %v8241_v39 }
 0xd91   : > { %v2994_v33 = vand.u32 %v2989_v53, %v7631_v37 }
 0xd96   : > { %6582 = vmatmul.mubr.msk.bf16.vlgmr.msra.gmra.mrb[72].mxu1 %vm647_vm5, %v2864_v26 }
 0xd97   : > { %6592 = vmatpush3.bf16.msra.mxu1 %v2994_v33  ;;  %6593 = vmatprep.mubr.msk.bf16.mxu1 %vm7473_vm1, %v7472_v16 }
 0xd98   : > { %6609 = vmatprep.subr.bf16.mxu1 %v7472_v16 }
 0xda9   : > { %v2982_v54 = vpop.xlane.xlu1 %2981 }
 0xdaa   : > { %7222 = vrcp.f32 %v2982_v54 }
 0xdb4   : > { %v7223_v10 = vpop.eup %7222 }
 0xdb5   : > { %v2986_v6 = vmul.f32 %v7223_v10, %v8254_v45 }
 0xdb7   : > { %v2987_v56 = vpack.c.bf16 %v2986_v6, %v2985_v43 }
 0xdb9   : > { %6594 = vmatmul.mubr.msk.bf16.vlgmr.msra.gmra.mrb[76].mxu1 %vm647_vm5, %v2987_v56 }
 0xdba   : > { %6610 = vmatpush3.bf16.msra.mxu1 %v7929_v38  ;;  %6617 = vmatprep.mubr.msk.bf16.mxu1 %vm7473_vm1, %v7472_v16 }
 0xdbb   : > { %6611 = vmatprep.subr.bf16.mxu1 %v7472_v16 }
 0xdbe   : > { %6612 = vmatpush3.bf16.msra.mxu1 %v7936_v34 }
 0xdbf   : > { %6613 = vmatprep.subr.bf16.mxu1 %v7472_v16 }
 0xdc2   : > { %6614 = vmatpush3.bf16.msra.mxu1 %v7943_v29 }
 0xdc3   : > { %6615 = vmatprep.subr.bf16.mxu1 %v7472_v16 }
 0xdc6   : > { %6616 = vmatpush3.bf16.msra.mxu1 %v7950_v30 }
 0xdc7   : > { %3336 = vmatprep.subr.bf16.mxu1 %v7956_v1 }
 0xe31   : > { %v2167_v39 = vpop.f32.mrb[48].mxu1 }
 0xe32   : > { %v6511_v45 = vpop.f32.mrb[49].mxu1 }
 0xe33   : > { %v2170_v38 = vpop.f32.mrb[50].mxu1 }
 0xe34   : > { %v6512_v36 = vpop.f32.mrb[51].mxu1 }
 0xe3b   : > { %v2292_v7 = vpop.f32.mrb[52].mxu1 }
 0xe3c   : > { %v6523_v31 = vpop.f32.mrb[53].mxu1 }
 0xe3d   : > { %v2295_v61 = vpop.f32.mrb[54].mxu1 }
 0xe3e   : > { %v6959_v0 = vpack.i.bf16 %v2295_v61, %v2292_v7  ;;  %v6524_v25 = vpop.f32.mrb[55].mxu1 }
 0xe40   : > { %6960 = vrot.lane.b32.xlu0 %v6959_v0, %s9383_s14 }
 0xe43   : > { %v2415_v34 = vpop.f32.mrb[56].mxu1 }
 0xe44   : > { %v6535_v51 = vpop.f32.mrb[57].mxu1 }
 0xe45   : > { %v2418_v29 = vpop.f32.mrb[58].mxu1 }
 0xe46   : > { %v6964_v9 = vpack.i.bf16 %v2418_v29, %v2415_v34  ;;  %v6536_v14 = vpop.f32.mrb[59].mxu1 }
 0xe48   : > { %6965 = vrot.lane.b32.xlu0 %v6964_v9, %s9381_s23 }
 0xe4b   : > { %v2538_v30 = vpop.f32.mrb[60].mxu1 }
 0xe4c   : > { %v6547_v1 = vpop.f32.mrb[61].mxu1 }
 0xe4d   : > { %v2541_v44 = vpop.f32.mrb[62].mxu1 }
 0xe4e   : > { %v6969_v21 = vpack.i.bf16 %v2541_v44, %v2538_v30  ;;  %v6548_v17 = vpop.f32.mrb[63].mxu1 }
 0xe50   : > { %6970 = vrot.lane.b32.xlu1 %v6969_v21, %s9379_s16 }
 0xe53   : > { %v2661_v41 = vpop.f32.mrb[64].mxu1 }
 0xe54   : > { %v6559_v48 = vpop.f32.mrb[65].mxu1 }
 0xe55   : > { %v2664_v12 = vpop.f32.mrb[66].mxu1  ;;  %v7402_v48 = vld [vmem:[%s9326_s9] sm:$0xff]  }
 0xe56   : > { %v6974_v15 = vpack.i.bf16 %v2664_v12, %v2661_v41  ;;  %v6560_v23 = vpop.f32.mrb[67].mxu1  ;;  %v7403_v12 = vld [vmem:[%s9326_s9 + $0x8] sm:$0xff]  }
 0xe57   : > { %v7405_v23 = vld [vmem:[%s9326_s9 + $0x18] sm:$0xff]  }
 0xe58   : > { %6975 = vrot.lane.b32.xlu0 %v6974_v15, %s9352_s15  ;;  %s9386_s15 = smov 56   ;;  %v7404_v15 = vld [vmem:[%s9326_s9 + $0x10] sm:$0xff]  }
 0xe61   : > { %v2784_v19 = vpop.f32.mrb[68].mxu1 }
 0xe62   : > { %v6571_v55 = vpop.f32.mrb[69].mxu1 }
 0xe63   : > { %v2787_v60 = vpop.f32.mrb[70].mxu1  ;;  %v7406_v55 = vld [vmem:[%s7592_s24 + $0x10] sm:$0xff] }
 0xe64   : > { %v6979_v63 = vpack.i.bf16 %v2787_v60, %v2784_v19  ;;  %v6572_v59 = vpop.f32.mrb[71].mxu1 }
 0xe66   : > { %6980 = vrot.lane.b32.xlu0 %v6979_v63, %s9356_s30  ;;  %s9394_s30 = sld [smem:[#allocation3_spill]] }
 0xe69   : > { %v2907_v32 = vpop.f32.mrb[72].mxu1 }
 0xe6a   : > { %v6583_v22 = vpop.f32.mrb[73].mxu1 }
 0xe6b   : > { %v2910_v8 = vpop.f32.mrb[74].mxu1 }
 0xe6c   : > { %v6984_v13 = vpack.i.bf16 %v2910_v8, %v2907_v32  ;;  %v6584_v40 = vpop.f32.mrb[75].mxu1  ;;  %v7407_v32 = vld [vmem:[%s9321_s4] ss:$0 sm:$0xff]  ;;  %v7408_v8 = vld [vmem:[%s7592_s24 + $0x18] sm:$0x7] }
 0xe6e   : > { %6985 = vrot.lane.b32.xlu0 %v6984_v13, %s9360_s28  ;;  %s9388_s28 = smov 120  }
 0xe8c   : > { %v3030_v58 = vpop.f32.mrb[76].mxu1 }
 0xe8d   : > { %v6595_v49 = vpop.f32.mrb[77].mxu1 }
 0xe8e   : > { %v3033_v42 = vpop.f32.mrb[78].mxu1 }
 0xe8f   : > { %v6989_v28 = vpack.i.bf16 %v3033_v42, %v3030_v58  ;;  %v6596_v57 = vpop.f32.mrb[79].mxu1 }
 0xe91   : > { %6990 = vrot.lane.b32.xlu0 %v6989_v28, %s9386_s15 }
 0xeb2   : > { %v6961_v5 = vpop.permute.xlu0 %6960 }
 0xeb3   : > { %v6963_v4 = vunpack.i.h.bf16 %v6961_v5  ;;  %v6962_v3 = vunpack.i.l.bf16 %v6961_v5 }
 0xeb5   : > { %v3094_v6 = vsel %vm599_vm2, %v2170_v38, %v6963_v4  ;;  %v3093_v56 = vsel %vm599_vm2, %v2167_v39, %v6962_v3 }
 0xeba   : > { %v6966_v62 = vpop.permute.xlu0 %6965 }
 0xebb   : > { %v6968_v53 = vunpack.i.h.bf16 %v6966_v62  ;;  %v6967_v26 = vunpack.i.l.bf16 %v6966_v62 }
 0xebd   : > { %v3095_v7 = vsel %vm1644_vm7, %v3093_v56, %v6967_v26  ;;  %v3096_v31 = vsel %vm1644_vm7, %v3094_v6, %v6968_v53 }
 0xec2   : > { %v6971_v35 = vpop.permute.xlu1 %6970 }
 0xec3   : > { %v6973_v33 = vunpack.i.h.bf16 %v6971_v35  ;;  %v6972_v54 = vunpack.i.l.bf16 %v6971_v35 }
 0xec5   : > { %v3097_v25 = vsel %vm1647_vm8, %v3095_v7, %v6972_v54  ;;  %v3098_v34 = vsel %vm1647_vm8, %v3096_v31, %v6973_v33 }
 0xeca   : > { %v6976_v46 = vpop.permute.xlu0 %6975 }
 0xecb   : > { %v6978_v10 = vunpack.i.h.bf16 %v6976_v46  ;;  %v6977_v43 = vunpack.i.l.bf16 %v6976_v46 }
 0xecd   : > { %v3099_v51 = vsel %vm1650_vm9, %v3097_v25, %v6977_v43  ;;  %v3100_v29 = vsel %vm1650_vm9, %v3098_v34, %v6978_v10 }
 0xed8   : > { %v6981_v47 = vpop.permute.xlu0 %6980 }
 0xed9   : > { %v6983_v45 = vunpack.i.h.bf16 %v6981_v47  ;;  %v6982_v36 = vunpack.i.l.bf16 %v6981_v47 }
 0xedb   : > { %v3101_v38 = vsel %vm1653_vm10, %v3099_v51, %v6982_v36  ;;  %v3102_v39 = vsel %vm1653_vm10, %v3100_v29, %v6983_v45  ;;  %v7409_v36 = vld [vmem:[%s9322_s5] ss:$0 sm:$0xff] }
 0xedc   : > { %v7411_v29 = vld [vmem:[%s9318_s1] ss:$8 sps:$4 sm:$0xff]  }
 0xee0   : > { %v6986_v11 = vpop.permute.xlu0 %6985 }
 0xee1   : > { %v6988_v61 = vunpack.i.h.bf16 %v6986_v11  ;;  %v6987_v0 = vunpack.i.l.bf16 %v6986_v11 }
 0xee3   : > { %v3103_v1 = vsel %vm1656_vm11, %v3101_v38, %v6987_v0  ;;  %v3104_v44 = vsel %vm1656_vm11, %v3102_v39, %v6988_v61  ;;  %v7410_v0 = vld [vmem:[%s9323_s6] ss:$0 sm:$0xff]  ;;  %v7413_v38 = vld [vmem:[%s9318_s1 + $0x10] ss:$8 sps:$4 sm:$0xff]   ;;  %v7414_v39 = vld [vmem:[%s9318_s1 + $0x24] ss:$8 sps:$4 sm:$0xff]  }
 0xf03   : > { %v6991_v9 = vpop.permute.xlu0 %6990 }
 0xf04   : > { %v6993_v14 = vunpack.i.h.bf16 %v6991_v9  ;;  %v6992_v30 = vunpack.i.l.bf16 %v6991_v9  ;;  %v7412_v9 = vld [vmem:[%s9318_s1 + $0x14] ss:$8 sps:$4 sm:$0xff]  }
 0xf06   : > { %v3105_v21 = vsel %vm1659_vm12, %v3103_v1, %v6992_v30  ;;  %v3106_v17 = vsel %vm1659_vm12, %v3104_v44, %v6993_v14  ;;  %v7415_v14 = vld [vmem:[%s9318_s1 + $0x20] ss:$8 sps:$4 sm:$0xff]   ;;  %v7416_v44 = vld [vmem:[%s9318_s1 + $0x34] ss:$8 sps:$4 sm:$0xff]  }
 0xf07   : > { %v3107_v41 = vpack.c.bf16 %v3106_v17, %v3105_v21  ;;  %v6129_v30 = vld [vmem:[%s7592_s24 + $0x20] sm:$0xff]  ;;  %v6130_v1 = vld [vmem:[%s7592_s24 + $0x28] sm:$0x7]  ;;  %v7417_v17 = vld [vmem:[%s9318_s1 + $0x30] ss:$8 sps:$4 sm:$0xff]  }
 0xf08   : > { %v3332_v21 = vpack.c.bf16 %v6130_v1, %v6129_v30 }
 0xf09   : > { %6606 = vmatmul.mubr.msk.bf16.vlgmr.msra.gmra.mrb[68].mxu0 %vm544_vm0, %v3107_v41 }
 0xf0a   : > { %6622 = vmatpush3.bf16.msra.mxu0 %v7402_v48  ;;  %6629 = vmatprep.mubr.msk.bf16.mxu0 %vm7473_vm1, %v7472_v16  ;;  %v7418_v48 = vld [vmem:[%s9325_s8] ss:$0 sm:$0xff] }
 0xf0b   : > { %6623 = vmatprep.subr.bf16.mxu0 %v7472_v16 }
 0xf0e   : > { %6624 = vmatpush3.bf16.msra.mxu0 %v7403_v12 }
 0xf0f   : > { %6625 = vmatprep.subr.bf16.mxu0 %v7472_v16 }
 0xf12   : > { %6626 = vmatpush3.bf16.msra.mxu0 %v7404_v15 }
 0xf13   : > { %6627 = vmatprep.subr.bf16.mxu0 %v7472_v16 }
 0xf16   : > { %6628 = vmatpush3.bf16.msra.mxu0 %v7405_v23 }
 0xf17   : > { %6633 = vmatprep.subr.bf16.mxu0 %v7472_v16 }
 0xfdc   : > { %v3145_v19 = vpop.f32.mrb[68].mxu0 }
 0xfdd   : > { %v3152_v60 = vadd.f32 %v7406_v55, %v3145_v19  ;;  %v6607_v63 = vpop.f32.mrb[69].mxu0 }
 0xfde   : > { %v3148_v59 = vpop.f32.mrb[70].mxu0 }
 0xfdf   : > { %v3154_v22 = vadd.f32 %v7407_v32, %v3152_v60  ;;  %v3153_v13 = vadd.f32 %v7408_v8, %v3148_v59  ;;  %v6608_v40 = vpop.f32.mrb[71].mxu0 }
 0xfe1   : > { %v3155_v58 = vadd.f32 %v7407_v32, %v3153_v13  ;;  %v3156_v49 = vsel %vm544_vm0, %v3154_v22, 0.0 }
 0xfe2   : > { %3157 = vadd.xlane.f32.xlu1 %v3156_v49 }
 0xfe3   : > { %v3159_v42 = vsel %vm1744_vm13, %v3155_v58, 0.0 }
 0xfe4   : > { %3160 = vadd.xlane.f32.xlu0 %v3159_v42 }
0x106f   : > { %v3158_v28 = vpop.xlane.xlu1 %3157 }
0x1070   : > { %v3162_v57 = vmul.f32 0.015625, %v3158_v28 }
0x1071   : > { %v3161_v5 = vpop.xlane.xlu0 %3160 }
0x1072   : > { %v3164_v62 = vsub.f32 %v3154_v22, %v3162_v57  ;;  %v3163_v46 = vmul.f32 0.015625, %v3161_v5 }
0x1074   : > { %v3165_v47 = vsub.f32 %v3155_v58, %v3163_v46  ;;  %v3166_v35 = vmul.f32 %v3164_v62, %v3164_v62 }
0x1076   : > { %v3168_v4 = vsel %vm544_vm0, %v3166_v35, 0.0  ;;  %v3167_v3 = vmul.f32 %v3165_v47, %v3165_v47 }
0x1077   : > { %3169 = vadd.xlane.f32.xlu0 %v3168_v4 }
0x1078   : > { %v3171_v53 = vsel %vm1744_vm13, %v3167_v3, 0.0 }
0x1079   : > { %3172 = vadd.xlane.f32.xlu1 %v3171_v53 }
0x1104   : > { %v3170_v26 = vpop.xlane.xlu0 %3169 }
0x1105   : > { %v3174_v33 = vmul.f32 0.015625, %v3170_v26 }
0x1106   : > { %v3173_v54 = vpop.xlane.xlu1 %3172 }
0x1107   : > { %v3176_v11 = vadd.f32 1e-05, %v3174_v33  ;;  %v3175_v10 = vmul.f32 0.015625, %v3173_v54 }
0x1109   : > { %7224 = vrsqrt.f32 %v3176_v11  ;;  %v3177_v43 = vadd.f32 1e-05, %v3175_v10 }
0x110b   : > { %7226 = vrsqrt.f32 %v3177_v43 }
0x1113   : > { %v7225_v6 = vpop.eup %7224 }
0x1114   : > { %v3180_v56 = vmul.f32 %v7225_v6, %v3164_v62 }
0x1115   : > { %v7227_v45 = vpop.eup %7226 }
0x1116   : > { %v3182_v7 = vmul.f32 %v7409_v36, %v3180_v56  ;;  %v3181_v31 = vmul.f32 %v7227_v45, %v3165_v47 }
0x1118   : > { %v3183_v61 = vmul.f32 %v7409_v36, %v3181_v31  ;;  %v8376_v25 = vadd.f32 %v7410_v0, %v3182_v7 }
0x111a   : > { %v8378_v34 = vadd.f32 %v7410_v0, %v3183_v61 }
0x111c   : > { %v3186_v51 = vpack.c.bf16 %v8378_v34, %v8376_v25 }
0x111e   : > { %6618 = vmatmul.mubr.msk.bf16.vlgmr.msra.gmra.mrb[80].mxu1 %vm544_vm0, %v3186_v51 }
0x111f   : > { %3337 = vmatpush1.bf16.msra.mxu1 %v7411_v29  ;;  %3368 = vmatprep.mubr.bf16.mxu1 %v7471_v2 }
0x1120   : > { %3338 = vmatprep.subr.bf16.mxu1 %v7412_v9 }
0x1123   : > { %3339 = vmatpush1.bf16.msra.mxu1 %v7413_v38 }
0x1124   : > { %3340 = vmatprep.subr.bf16.mxu1 %v7414_v39 }
0x1127   : > { %3341 = vmatpush1.bf16.msra.mxu1 %v7415_v14 }
0x1128   : > { %3342 = vmatprep.subr.bf16.mxu1 %v7416_v44 }
0x112b   : > { %3343 = vmatpush1.bf16.msra.mxu1 %v7417_v17 }
0x112c   : > { %6639 = vmatprep.subr.bf16.mxu1 %v7472_v16 }
0x112e   : > { %6131 = vmatmul.mubr.msk.bf16.vlgmr.msra.gmra.mrb[84].mxu1 %vm544_vm0, %v3332_v21 }
0x112f   : > { %6641 = vmatprep.mubr.msk.bf16.mxu1 %vm7473_vm1, %v7472_v16 }
0x11f1   : > { %v3224_v41 = vpop.f32.mrb[80].mxu1 }
0x11f2   : > { %v3225_v12 = vadd.f32 %v7418_v48, %v3224_v41  ;;  %v6619_v15 = vpop.f32.mrb[81].mxu1 }
0x11f3   : > { %v3227_v23 = vpop.f32.mrb[82].mxu1 }
0x11f4   : > { %v3233_v19 = vmul.f32 0.044715, %v3225_v12  ;;  %v3228_v55 = vadd.f32 %v7418_v48, %v3227_v23  ;;  %v6620_v60 = vpop.f32.mrb[83].mxu1  ;;  %v3231_v6 = vmul.f32 0.5, %v3225_v12 }
0x11f6   : > { %v3235_v63 = vmul.f32 %v3233_v19, %v3225_v12  ;;  %v3234_v59 = vmul.f32 0.044715, %v3228_v55  ;;  %v3232_v56 = vmul.f32 0.5, %v3228_v55 }
0x11f8   : > { %v3237_v32 = vmul.f32 %v3235_v63, %v3225_v12  ;;  %v3236_v22 = vmul.f32 %v3234_v59, %v3228_v55 }
0x11fa   : > { %v3239_v8 = vadd.f32 %v3237_v32, %v3225_v12  ;;  %v3238_v13 = vmul.f32 %v3236_v22, %v3228_v55  ;;  %v7419_v32 = vld [vmem:[%s9376_s3] sm:$0xff]   ;;  %v7420_v22 = vld [vmem:[%s9376_s3 + $0x8] sm:$0xff]  }
0x11fc   : > { %v3241_v40 = vmul.f32 0.7978846, %v3239_v8  ;;  %v3240_v58 = vadd.f32 %v3238_v13, %v3228_v55  ;;  %v7421_v8 = vld [vmem:[%s9376_s3 + $0x10] sm:$0xff]   ;;  %v7422_v13 = vld [vmem:[%s9376_s3 + $0x18] sm:$0xff]   ;;  %s9393_s3 = sld [smem:[#allocation7_spill]] }
0x11fe   : > { %7228 = vtanh.f32 %v3241_v40  ;;  %v3242_v49 = vmul.f32 0.7978846, %v3240_v58 }
0x1200   : > { %7230 = vtanh.f32 %v3242_v49 }
0x1201   : > { %v3370_v42 = vpop.f32.mrb[84].mxu1 }
0x1202   : > { %v3371_v28 = vadd.f32 %v3370_v42, %v7615_v18  ;;  %v3372_v57 = vpop.f32.mrb[85].mxu1 }
0x1203   : > { %v3374_v5 = vpop.f32.mrb[86].mxu1  ;;  %v3373_v47 = vadd.f32 %v3372_v57, %v7617_v20 }
0x1204   : > { %v3375_v62 = vadd.f32 %v3374_v5, %v7615_v18  ;;  %v3376_v46 = vpop.f32.mrb[87].mxu1  ;;  %v3379_v4 = vmul.f32 0.35355338, %v3371_v28 }
0x1205   : > { %v3377_v35 = vadd.f32 %v3376_v46, %v7617_v20 }
0x1206   : > { %v3380_v3 = vmul.f32 0.35355338, %v3375_v62  ;;  %v3382_v53 = vpack.c.bf16 %v3375_v62, %v3371_v28 }
0x1207   : > { %v8418_v26 = vpack.c.bf16 %v3377_v35, %v3373_v47 }
0x1208   : > { %v7229_v33 = vpop.eup %7228  ;;  %v3381_v54 = vpack.c.bf16 %v3380_v3, %v3379_v4  ;;  %3507 = vrot.lane.b32.xlu1 %v3382_v53, %s9386_s15  ;;  %3385 = vrot.lane.b32.xlu0 %v3382_v53, %s9377_s22 }
0x1209   : > { %v3461_v11 = vand.u32 %v8418_v26, %v7631_v37  ;;  %v3245_v10 = vadd.f32 1.0, %v7229_v33 }
0x120a   : > { %v7231_v43 = vpop.eup %7230 }
0x120b   : > { %6640 = vmatpush3.bf16.msra.mxu1 %v3461_v11  ;;  %v3246_v45 = vadd.f32 1.0, %v7231_v43  ;;  %v3247_v36 = vmul.f32 %v3245_v10, %v3231_v6 }
0x120c   : > { %3631 = vrot.lane.b32.xlu0 %v3382_v53, %s9387_s27  ;;  %3505 = vrot.lane.b32.xlu1 %v3381_v54, %s9388_s28 }
0x120d   : > { %v3248_v7 = vmul.f32 %v3246_v45, %v3232_v56  ;;  %6651 = vmatprep.subr.bf16.mxu1 %v7472_v16 }
0x120f   : > { %v3249_v31 = vpack.c.bf16 %v3248_v7, %v3247_v36 }
0x1210   : > { %3754 = vrot.lane.b32.xlu0 %v3382_v53, %s9389_s0  ;;  %3629 = vrot.lane.b32.xlu1 %v3381_v54, %s9390_s2 }
0x1211   : > { %6630 = vmatmul.mubr.msk.bf16.vlgmr.msra.gmra.mrb[72].mxu0 %vm544_vm0, %v3249_v31 }
0x1212   : > { %6635 = vmatprep.mubr.msk.bf16.mxu0 %vm7473_vm1, %v7472_v16 }
0x1214   : > { %3877 = vrot.lane.b32.xlu0 %v3382_v53, %s9391_s20  ;;  %3752 = vrot.lane.b32.xlu1 %v3381_v54, %s9378_s21 }
0x1218   : > { %4000 = vrot.lane.b32.xlu0 %v3382_v53, %s9379_s16  ;;  %3875 = vrot.lane.b32.xlu1 %v3381_v54, %s9380_s26 }
0x121c   : > { %4123 = vrot.lane.b32.xlu0 %v3382_v53, %s9381_s23  ;;  %3998 = vrot.lane.b32.xlu1 %v3381_v54, %s9382_s18 }
0x1220   : > { %4246 = vrot.lane.b32.xlu0 %v3382_v53, %s9383_s14  ;;  %4121 = vrot.lane.b32.xlu1 %v3381_v54, %s9384_s17 }
0x1224   : > { %4244 = vrot.lane.b32.xlu1 %v3381_v54, %s9385_s19 }
0x1228   : > { %3580 = vrot.lane.b32.xlu1 %v8418_v26, %s9388_s28 }
0x127a   : > { %v3386_v61 = vpop.permute.xlu0 %3385  ;;  %v3508_v51 = vpop.permute.xlu1 %3507 }
0x127b   : > { %v3391_v0 = vsel %vm599_vm2, %v3386_v61, 0  ;;  %v3513_v29 = vsel %vm599_vm2, %v3508_v51, 0 }
0x127c   : > { %6634 = vmatpush3.bf16.xpose.msra.mxu0 %v3391_v0 }
0x127d   : > { %6645 = vmatprep.subr.bf16.mxu0 %v7472_v16 }
0x127e   : > { %v3632_v9 = vpop.permute.xlu0 %3631  ;;  %v3506_v38 = vpop.permute.xlu1 %3505 }
0x127f   : > { %v3637_v39 = vsel %vm599_vm2, %v3632_v9, 0 }
0x1282   : > { %v3755_v14 = vpop.permute.xlu0 %3754  ;;  %v3630_v30 = vpop.permute.xlu1 %3629 }
0x1283   : > { %6636 = vmatmul.mubr.msk.bf16.vlgmr.msra.gmra.mrb[76].mxu0 %vm599_vm2, %v3381_v54  ;;  %v3760_v1 = vsel %vm599_vm2, %v3755_v14, 0 }
0x1284   : > { %6646 = vmatpush3.bf16.xpose.msra.mxu0 %v3513_v29  ;;  %6647 = vmatprep.mubr.msk.bf16.mxu0 %vm7473_vm1, %v7472_v16 }
0x1285   : > { %6657 = vmatprep.subr.bf16.mxu0 %v7472_v16 }
0x1286   : > { %v3878_v44 = vpop.permute.xlu0 %3877  ;;  %v3753_v21 = vpop.permute.xlu1 %3752 }
0x1287   : > { %v3883_v17 = vsel %vm599_vm2, %v3878_v44, 0 }
0x128a   : > { %v4001_v41 = vpop.permute.xlu0 %4000  ;;  %v3876_v48 = vpop.permute.xlu1 %3875 }
0x128b   : > { %6648 = vmatmul.mubr.msk.bf16.vlgmr.msra.gmra.mrb[80].mxu0 %vm599_vm2, %v3506_v38  ;;  %v4006_v12 = vsel %vm599_vm2, %v4001_v41, 0 }
0x128c   : > { %6658 = vmatpush3.bf16.xpose.msra.mxu0 %v3637_v39  ;;  %6659 = vmatprep.mubr.msk.bf16.mxu0 %vm7473_vm1, %v7472_v16 }
0x128d   : > { %6669 = vmatprep.subr.bf16.mxu0 %v7472_v16 }
0x128e   : > { %v4124_v15 = vpop.permute.xlu0 %4123  ;;  %v3999_v23 = vpop.permute.xlu1 %3998 }
0x128f   : > { %v4129_v19 = vsel %vm599_vm2, %v4124_v15, 0 }
0x1292   : > { %v4247_v55 = vpop.permute.xlu0 %4246  ;;  %v4122_v60 = vpop.permute.xlu1 %4121 }
0x1293   : > { %6660 = vmatmul.mubr.msk.bf16.vlgmr.msra.gmra.mrb[84].mxu0 %vm599_vm2, %v3630_v30  ;;  %v4252_v63 = vsel %vm599_vm2, %v4247_v55, 0 }
0x1294   : > { %6670 = vmatpush3.bf16.xpose.msra.mxu0 %v3760_v1  ;;  %6671 = vmatprep.mubr.msk.bf16.mxu0 %vm7473_vm1, %v7472_v16 }
0x1295   : > { %6681 = vmatprep.subr.bf16.mxu0 %v7472_v16 }
0x1296   : > { %v4245_v59 = vpop.permute.xlu1 %4244 }
0x129b   : > { %6672 = vmatmul.mubr.msk.bf16.vlgmr.msra.gmra.mrb[88].mxu0 %vm599_vm2, %v3753_v21 }
0x129c   : > { %6682 = vmatpush3.bf16.xpose.msra.mxu0 %v3883_v17  ;;  %6683 = vmatprep.mubr.msk.bf16.mxu0 %vm7473_vm1, %v7472_v16 }
0x129d   : > { %6693 = vmatprep.subr.bf16.mxu0 %v7472_v16 }
0x12a3   : > { %6684 = vmatmul.mubr.msk.bf16.vlgmr.msra.gmra.mrb[92].mxu0 %vm599_vm2, %v3876_v48 }
0x12a4   : > { %6694 = vmatpush3.bf16.xpose.msra.mxu0 %v4006_v12  ;;  %6695 = vmatprep.mubr.msk.bf16.mxu0 %vm7473_vm1, %v7472_v16 }
0x12a5   : > { %6705 = vmatprep.subr.bf16.mxu0 %v7472_v16 }
0x12ab   : > { %6696 = vmatmul.mubr.msk.bf16.vlgmr.msra.gmra.mrb[96].mxu0 %vm599_vm2, %v3999_v23 }
0x12ac   : > { %6706 = vmatpush3.bf16.xpose.msra.mxu0 %v4129_v19  ;;  %6707 = vmatprep.mubr.msk.bf16.mxu0 %vm7473_vm1, %v7472_v16 }
0x12ad   : > { %6717 = vmatprep.subr.bf16.mxu0 %v7472_v16 }
0x12b3   : > { %6708 = vmatmul.mubr.msk.bf16.vlgmr.msra.gmra.mrb[100].mxu0 %vm599_vm2, %v4122_v60 }
0x12b4   : > { %6718 = vmatpush3.bf16.xpose.msra.mxu0 %v4252_v63  ;;  %6719 = vmatprep.mubr.msk.bf16.mxu0 %vm7473_vm1, %v7472_v16 }
0x12b5   : > { %6729 = vmatprep.subr.bf16.mxu0 %v7472_v16 }
0x12bb   : > { %6720 = vmatmul.mubr.msk.bf16.vlgmr.msra.gmra.mrb[104].mxu0 %vm599_vm2, %v4245_v59 }
0x12bc   : > { %6730 = vmatpush3.bf16.msra.mxu0 %v7419_v32  ;;  %6737 = vmatprep.mubr.msk.bf16.mxu0 %vm7473_vm1, %v7472_v16 }
0x12bd   : > { %6731 = vmatprep.subr.bf16.mxu0 %v7472_v16 }
0x12c0   : > { %6732 = vmatpush3.bf16.msra.mxu0 %v7420_v22 }
0x12c1   : > { %6733 = vmatprep.subr.bf16.mxu0 %v7472_v16 }
0x12c4   : > { %6734 = vmatpush3.bf16.msra.mxu0 %v7421_v8 }
0x12c5   : > { %6735 = vmatprep.subr.bf16.mxu0 %v7472_v16 }
0x12c8   : > { %6736 = vmatpush3.bf16.msra.mxu0 %v7422_v13 }
0x12c9   : > { %6753 = vmatprep.subr.bf16.mxu0 %v7472_v16 }
0x12e4   : > { %v8499_v40 = vpop.f32.mrb[72].mxu0 }
0x12e5   : > { %v6631_v58 = vpop.f32.mrb[73].mxu0 }
0x12e6   : > { %v8501_v49 = vpop.f32.mrb[74].mxu0  ;;  %v8571_v58 = vpop.permute.xlu1 %3580 }
0x12e7   : > { %v6632_v42 = vpop.f32.mrb[75].mxu0 }
0x1356   : > { %v8503_v28 = vpop.f32.mrb[76].mxu0 }
0x1357   : > { %v6637_v57 = vpop.f32.mrb[77].mxu0  ;;  %v3434_v5 = vsel %vm647_vm5, %v8503_v28, -inf }
0x1358   : > { %3435 = vmax.xlane.f32.xlu0 %v3434_v5  ;;  %v8507_v62 = vpop.f32.mrb[78].mxu0 }
0x1359   : > { %v6638_v46 = vpop.f32.mrb[79].mxu0  ;;  %v3437_v47 = vsel %vm651_vm6, %v8507_v62, -inf }
0x135a   : > { %3438 = vmax.xlane.f32.xlu1 %v3437_v47 }
0x135e   : > { %v8511_v35 = vpop.f32.mrb[80].mxu0 }
0x135f   : > { %v6649_v4 = vpop.f32.mrb[81].mxu0  ;;  %v3556_v3 = vsel %vm647_vm5, %v8511_v35, -inf }
0x1360   : > { %3557 = vmax.xlane.f32.xlu0 %v3556_v3  ;;  %v8515_v53 = vpop.f32.mrb[82].mxu0 }
0x1361   : > { %v6650_v33 = vpop.f32.mrb[83].mxu0  ;;  %v3559_v54 = vsel %vm651_vm6, %v8515_v53, -inf }
0x1364   : > { %3560 = vmax.xlane.f32.xlu0 %v3559_v54 }
0x1366   : > { %v8519_v11 = vpop.f32.mrb[84].mxu0 }
0x1367   : > { %v6661_v10 = vpop.f32.mrb[85].mxu0  ;;  %v3680_v43 = vsel %vm647_vm5, %v8519_v11, -inf }
0x1368   : > { %3681 = vmax.xlane.f32.xlu1 %v3680_v43  ;;  %v8523_v6 = vpop.f32.mrb[86].mxu0 }
0x1369   : > { %v6662_v56 = vpop.f32.mrb[87].mxu0  ;;  %v3683_v45 = vsel %vm651_vm6, %v8523_v6, -inf }
0x136a   : > { %3684 = vmax.xlane.f32.xlu0 %v3683_v45 }
0x136e   : > { %v8527_v36 = vpop.f32.mrb[88].mxu0 }
0x136f   : > { %v6673_v7 = vpop.f32.mrb[89].mxu0  ;;  %v3803_v31 = vsel %vm647_vm5, %v8527_v36, -inf }
0x1370   : > { %3804 = vmax.xlane.f32.xlu1 %v3803_v31  ;;  %v8531_v61 = vpop.f32.mrb[90].mxu0 }
0x1371   : > { %v6674_v0 = vpop.f32.mrb[91].mxu0  ;;  %v3806_v51 = vsel %vm651_vm6, %v8531_v61, -inf }
0x1372   : > { %3807 = vmax.xlane.f32.xlu0 %v3806_v51 }
0x1376   : > { %v8535_v29 = vpop.f32.mrb[92].mxu0 }
0x1377   : > { %v6685_v9 = vpop.f32.mrb[93].mxu0  ;;  %v3926_v38 = vsel %vm647_vm5, %v8535_v29, -inf }
0x1378   : > { %3927 = vmax.xlane.f32.xlu1 %v3926_v38  ;;  %v8539_v39 = vpop.f32.mrb[94].mxu0 }
0x1379   : > { %v6686_v14 = vpop.f32.mrb[95].mxu0  ;;  %v3929_v30 = vsel %vm651_vm6, %v8539_v39, -inf }
0x137a   : > { %3930 = vmax.xlane.f32.xlu0 %v3929_v30 }
0x137e   : > { %v8543_v1 = vpop.f32.mrb[96].mxu0 }
0x137f   : > { %v6697_v44 = vpop.f32.mrb[97].mxu0  ;;  %v4049_v21 = vsel %vm647_vm5, %v8543_v1, -inf }
0x1380   : > { %4050 = vmax.xlane.f32.xlu1 %v4049_v21  ;;  %v8547_v17 = vpop.f32.mrb[98].mxu0 }
0x1381   : > { %v6698_v41 = vpop.f32.mrb[99].mxu0  ;;  %v4052_v48 = vsel %vm651_vm6, %v8547_v17, -inf }
0x1382   : > { %4053 = vmax.xlane.f32.xlu0 %v4052_v48 }
0x1386   : > { %v8551_v12 = vpop.f32.mrb[100].mxu0 }
0x1387   : > { %v6709_v15 = vpop.f32.mrb[101].mxu0  ;;  %v4172_v23 = vsel %vm647_vm5, %v8551_v12, -inf }
0x1388   : > { %4173 = vmax.xlane.f32.xlu1 %v4172_v23  ;;  %v8555_v19 = vpop.f32.mrb[102].mxu0 }
0x1389   : > { %v6710_v55 = vpop.f32.mrb[103].mxu0  ;;  %v4175_v60 = vsel %vm651_vm6, %v8555_v19, -inf }
0x138a   : > { %4176 = vmax.xlane.f32.xlu0 %v4175_v60 }
0x138e   : > { %v8559_v63 = vpop.f32.mrb[104].mxu0 }
0x138f   : > { %v6721_v59 = vpop.f32.mrb[105].mxu0  ;;  %v4295_v32 = vsel %vm647_vm5, %v8559_v63, -inf }
0x1390   : > { %4296 = vmax.xlane.f32.xlu1 %v4295_v32  ;;  %v8563_v22 = vpop.f32.mrb[106].mxu0 }
0x1391   : > { %v6722_v8 = vpop.f32.mrb[107].mxu0  ;;  %v4298_v13 = vsel %vm651_vm6, %v8563_v22, -inf }
0x1392   : > { %4299 = vmax.xlane.f32.xlu0 %v4298_v13 }
0x13a1   : > { %3826 = vrot.lane.b32.xlu1 %v8418_v26, %s9378_s21 }
0x13a8   : > { %3703 = vrot.lane.b32.xlu0 %v8418_v26, %s9390_s2 }
0x13e5   : > { %v3436_v42 = vpop.xlane.xlu0 %3435 }
0x13e6   : > { %v3440_v57 = vsub.f32 %v8503_v28, %v3436_v42 }
0x13e7   : > { %v3439_v5 = vpop.xlane.xlu1 %3438 }
0x13e8   : > { %v3442_v46 = vmul.f32 1.442695, %v3440_v57  ;;  %v3441_v47 = vsub.f32 %v8507_v62, %v3439_v5 }
0x13ea   : > { %7232 = vpow2.f32 %v3442_v46  ;;  %v3444_v4 = vmul.f32 1.442695, %v3441_v47 }
0x13ec   : > { %7234 = vpow2.f32 %v3444_v4 }
0x13ed   : > { %v3558_v3 = vpop.xlane.xlu0 %3557 }
0x13ee   : > { %v3562_v33 = vsub.f32 %v8511_v35, %v3558_v3 }
0x13f0   : > { %v3564_v54 = vmul.f32 1.442695, %v3562_v33 }
0x13f1   : > { %v3561_v10 = vpop.xlane.xlu0 %3560 }
0x13f2   : > { %7236 = vpow2.f32 %v3564_v54  ;;  %v3563_v43 = vsub.f32 %v8515_v53, %v3561_v10 }
0x13f4   : > { %v8577_v56 = vpop.eup %7232  ;;  %v3566_v45 = vmul.f32 1.442695, %v3563_v43 }
0x13f5   : > { %v3682_v7 = vpop.xlane.xlu1 %3681  ;;  %v3446_v28 = vsel %vm647_vm5, %v8577_v56, 0.0 }
0x13f6   : > { %v8581_v31 = vpop.eup %7234  ;;  %7238 = vpow2.f32 %v3566_v45  ;;  %v3686_v62 = vsub.f32 %v8519_v11, %v3682_v7  ;;  %3447 = vadd.xlane.f32.xlu1 %v3446_v28 }
0x13f7   : > { %v3685_v0 = vpop.xlane.xlu0 %3684  ;;  %v3449_v35 = vsel %vm651_vm6, %v8581_v31, 0.0 }
0x13f8   : > { %v3688_v51 = vmul.f32 1.442695, %v3686_v62  ;;  %v3687_v53 = vsub.f32 %v8523_v6, %v3685_v0  ;;  %3450 = vadd.xlane.f32.xlu0 %v3449_v35 }
0x13fa   : > { %7240 = vpow2.f32 %v3688_v51  ;;  %v3690_v9 = vmul.f32 1.442695, %v3687_v53 }
0x13fc   : > { %v8587_v38 = vpop.eup %7236  ;;  %7242 = vpow2.f32 %v3690_v9 }
0x13fd   : > { %v3805_v14 = vpop.xlane.xlu1 %3804  ;;  %v3568_v30 = vsel %vm647_vm5, %v8587_v38, 0.0 }
0x13fe   : > { %v3809_v11 = vsub.f32 %v8527_v36, %v3805_v14  ;;  %3569 = vadd.xlane.f32.xlu1 %v3568_v30 }
0x13ff   : > { %v3808_v44 = vpop.xlane.xlu0 %3807 }
0x1400   : > { %v8592_v21 = vpop.eup %7238  ;;  %v3811_v41 = vmul.f32 1.442695, %v3809_v11  ;;  %v3810_v48 = vsub.f32 %v8531_v61, %v3808_v44 }
0x1401   : > { %v3571_v6 = vsel %vm651_vm6, %v8592_v21, 0.0 }
0x1402   : > { %7244 = vpow2.f32 %v3811_v41  ;;  %v3813_v15 = vmul.f32 1.442695, %v3810_v48  ;;  %3572 = vadd.xlane.f32.xlu0 %v3571_v6 }
0x1404   : > { %v8597_v23 = vpop.eup %7240  ;;  %7246 = vpow2.f32 %v3813_v15 }
0x1405   : > { %v3928_v55 = vpop.xlane.xlu1 %3927  ;;  %v3692_v36 = vsel %vm647_vm5, %v8597_v23, 0.0 }
0x1406   : > { %v8601_v60 = vpop.eup %7242  ;;  %v3932_v59 = vsub.f32 %v8535_v29, %v3928_v55  ;;  %3693 = vadd.xlane.f32.xlu1 %v3692_v36 }
0x1407   : > { %v3931_v32 = vpop.xlane.xlu0 %3930  ;;  %v3695_v61 = vsel %vm651_vm6, %v8601_v60, 0.0 }
0x1408   : > { %v3934_v8 = vmul.f32 1.442695, %v3932_v59  ;;  %v3933_v13 = vsub.f32 %v8539_v39, %v3931_v32  ;;  %3696 = vadd.xlane.f32.xlu0 %v3695_v61 }
0x140a   : > { %7248 = vpow2.f32 %v3934_v8  ;;  %v3936_v42 = vmul.f32 1.442695, %v3933_v13 }
0x140c   : > { %v8607_v57 = vpop.eup %7244  ;;  %7250 = vpow2.f32 %v3936_v42 }
0x140d   : > { %v4051_v5 = vpop.xlane.xlu1 %4050  ;;  %v3815_v46 = vsel %vm647_vm5, %v8607_v57, 0.0 }
0x140e   : > { %v8611_v47 = vpop.eup %7246  ;;  %v4055_v29 = vsub.f32 %v8543_v1, %v4051_v5  ;;  %3816 = vadd.xlane.f32.xlu1 %v3815_v46 }
0x140f   : > { %v4054_v4 = vpop.xlane.xlu0 %4053  ;;  %v3818_v3 = vsel %vm651_vm6, %v8611_v47, 0.0 }
0x1410   : > { %v4057_v39 = vmul.f32 1.442695, %v4055_v29  ;;  %v4056_v33 = vsub.f32 %v8547_v17, %v4054_v4  ;;  %3819 = vadd.xlane.f32.xlu0 %v3818_v3 }
0x1412   : > { %7252 = vpow2.f32 %v4057_v39  ;;  %v4059_v54 = vmul.f32 1.442695, %v4056_v33  ;;  %v3586_v33 = vand.u32 %v8571_v58, %v7631_v37 }
0x1414   : > { %v8617_v10 = vpop.eup %7248  ;;  %7254 = vpow2.f32 %v4059_v54 }
0x1415   : > { %v4174_v43 = vpop.xlane.xlu1 %4173  ;;  %v3938_v45 = vsel %vm647_vm5, %v8617_v10, 0.0 }
0x1416   : > { %v8621_v7 = vpop.eup %7250  ;;  %v4178_v1 = vsub.f32 %v8551_v12, %v4174_v43  ;;  %3939 = vadd.xlane.f32.xlu0 %v3938_v45 }
0x1417   : > { %v4177_v28 = vpop.xlane.xlu0 %4176  ;;  %v3941_v17 = vsel %vm651_vm6, %v8621_v7, 0.0 }
0x1418   : > { %v4180_v62 = vmul.f32 1.442695, %v4178_v1  ;;  %v4179_v0 = vsub.f32 %v8555_v19, %v4177_v28 }
0x141a   : > { %7256 = vpow2.f32 %v4180_v62  ;;  %v4182_v35 = vmul.f32 1.442695, %v4179_v0  ;;  %3942 = vadd.xlane.f32.xlu0 %v3941_v17 }
0x141c   : > { %v8627_v51 = vpop.eup %7252  ;;  %7258 = vpow2.f32 %v4182_v35 }
0x141d   : > { %v4297_v53 = vpop.xlane.xlu1 %4296  ;;  %v4061_v9 = vsel %vm647_vm5, %v8627_v51, 0.0 }
0x141e   : > { %v8631_v14 = vpop.eup %7254  ;;  %v4301_v12 = vsub.f32 %v8559_v63, %v4297_v53  ;;  %4062 = vadd.xlane.f32.xlu1 %v4061_v9 }
0x141f   : > { %v4064_v19 = vsel %vm651_vm6, %v8631_v14, 0.0  ;;  %v4300_v15 = vpop.xlane.xlu0 %4299 }
0x1420   : > { %v4303_v30 = vmul.f32 1.442695, %v4301_v12  ;;  %4065 = vadd.xlane.f32.xlu0 %v4064_v19  ;;  %v4302_v55 = vsub.f32 %v8563_v22, %v4300_v15 }
0x1421   : > { %v3827_v61 = vpop.permute.xlu1 %3826 }
0x1422   : > { %7260 = vpow2.f32 %v4303_v30  ;;  %v4305_v36 = vmul.f32 1.442695, %v4302_v55  ;;  %v3832_v9 = vand.u32 %v3827_v61, %v7631_v37 }
0x1423   : > { %v3704_v8 = vpop.permute.xlu0 %3703 }
0x1424   : > { %v8636_v11 = vpop.eup %7256  ;;  %7262 = vpow2.f32 %v4305_v36  ;;  %v3709_v62 = vand.u32 %v3704_v8, %v7631_v37 }
0x1425   : > { %v4184_v44 = vsel %vm647_vm5, %v8636_v11, 0.0 }
0x1426   : > { %v8640_v41 = vpop.eup %7258  ;;  %4185 = vadd.xlane.f32.xlu0 %v4184_v44 }
0x1427   : > { %v4187_v48 = vsel %vm651_vm6, %v8640_v41, 0.0 }
0x142a   : > { %4188 = vadd.xlane.f32.xlu0 %v4187_v48 }
0x142c   : > { %v8644_v63 = vpop.eup %7260 }
0x142d   : > { %v4307_v6 = vsel %vm647_vm5, %v8644_v63, 0.0 }
0x142e   : > { %4308 = vadd.xlane.f32.xlu0 %v4307_v6  ;;  %v8657_v59 = vpop.eup %7262 }
0x142f   : > { %3949 = vrot.lane.b32.xlu1 %v8418_v26, %s9380_s26  ;;  %v4310_v32 = vsel %vm651_vm6, %v8657_v59, 0.0 }
0x1444   : > { %4072 = vrot.lane.b32.xlu0 %v8418_v26, %s9382_s18 }
0x1448   : > { %4195 = vrot.lane.b32.xlu0 %v8418_v26, %s9384_s17 }
0x144c   : > { %4318 = vrot.lane.b32.xlu0 %v8418_v26, %s9385_s19 }
0x1453   : > { %4311 = vadd.xlane.f32.xlu1 %v4310_v32 }
0x1483   : > { %v3448_v22 = vpop.xlane.xlu1 %3447 }
0x1484   : > { %7264 = vrcp.f32 %v3448_v22 }
0x1485   : > { %v3451_v13 = vpop.xlane.xlu0 %3450 }
0x1486   : > { %7266 = vrcp.f32 %v3451_v13 }
0x148b   : > { %v3570_v42 = vpop.xlane.xlu1 %3569 }
0x148c   : > { %7268 = vrcp.f32 %v3570_v42 }
0x148e   : > { %v7265_v5 = vpop.eup %7264 }
0x148f   : > { %v3573_v46 = vpop.xlane.xlu0 %3572  ;;  %v3454_v26 = vmul.f32 %v7265_v5, %v8577_v56 }
0x1490   : > { %v7267_v29 = vpop.eup %7266  ;;  %7270 = vrcp.f32 %v3573_v46 }
0x1491   : > { %v3455_v4 = vmul.f32 %v7267_v29, %v8581_v31 }
0x1493   : > { %v3694_v3 = vpop.xlane.xlu1 %3693  ;;  %v3456_v39 = vpack.c.bf16 %v3455_v4, %v3454_v26 }
0x1494   : > { %7272 = vrcp.f32 %v3694_v3 }
0x1495   : > { %6642 = vmatmul.mubr.msk.bf16.vlgmr.msra.gmra.mrb[88].mxu1 %vm647_vm5, %v3456_v39  ;;  %v3697_v54 = vpop.xlane.xlu0 %3696 }
0x1496   : > { %6652 = vmatpush3.bf16.msra.mxu1 %v3586_v33  ;;  %7274 = vrcp.f32 %v3697_v54  ;;  %6653 = vmatprep.mubr.msk.bf16.mxu1 %vm7473_vm1, %v7472_v16  ;;  %v7269_v43 = vpop.eup %7268 }
0x1497   : > { %6663 = vmatprep.subr.bf16.mxu1 %v7472_v16  ;;  %v3576_v31 = vmul.f32 %v7269_v43, %v8587_v38 }
0x149a   : > { %v7271_v56 = vpop.eup %7270 }
0x149b   : > { %v3577_v45 = vmul.f32 %v7271_v56, %v8592_v21  ;;  %v3817_v1 = vpop.xlane.xlu1 %3816 }
0x149c   : > { %7276 = vrcp.f32 %v3817_v1 }
0x149d   : > { %v3820_v58 = vpop.xlane.xlu0 %3819  ;;  %v3578_v28 = vpack.c.bf16 %v3577_v45, %v3576_v31 }
0x149e   : > { %7278 = vrcp.f32 %v3820_v58  ;;  %v7273_v0 = vpop.eup %7272 }
0x149f   : > { %6654 = vmatmul.mubr.msk.bf16.vlgmr.msra.gmra.mrb[92].mxu1 %vm647_vm5, %v3578_v28  ;;  %v3700_v38 = vmul.f32 %v7273_v0, %v8597_v23  ;;  %v7423_v28 = vld [vmem:[%s9324_s7] sm:$0xff]  }
0x14a0   : > { %v7275_v17 = vpop.eup %7274  ;;  %6664 = vmatpush3.bf16.msra.mxu1 %v3709_v62  ;;  %6665 = vmatprep.mubr.msk.bf16.mxu1 %vm7473_vm1, %v7472_v16  ;;  %v7424_v62 = vld [vmem:[%s9324_s7 + $0x8] sm:$0xff]  }
0x14a1   : > { %v3701_v35 = vmul.f32 %v7275_v17, %v8601_v60  ;;  %6675 = vmatprep.subr.bf16.mxu1 %v7472_v16  ;;  %v7427_v0 = vld [vmem:[%s9318_s1 + $0x4] ss:$8 sps:$4 sm:$0xff]  }
0x14a3   : > { %v3940_v21 = vpop.xlane.xlu0 %3939  ;;  %v3702_v53 = vpack.c.bf16 %v3701_v35, %v3700_v38 }
0x14a4   : > { %7280 = vrcp.f32 %v3940_v21 }
0x14a6   : > { %v7277_v12 = vpop.eup %7276 }
0x14a7   : > { %6666 = vmatmul.mubr.msk.bf16.vlgmr.msra.gmra.mrb[96].mxu1 %vm647_vm5, %v3702_v53  ;;  %v3943_v19 = vpop.xlane.xlu0 %3942  ;;  %v3823_v23 = vmul.f32 %v7277_v12, %v8607_v57 }
0x14a8   : > { %v7279_v30 = vpop.eup %7278  ;;  %6676 = vmatpush3.bf16.msra.mxu1 %v3832_v9  ;;  %7282 = vrcp.f32 %v3943_v19  ;;  %6677 = vmatprep.mubr.msk.bf16.mxu1 %vm7473_vm1, %v7472_v16 }
0x14a9   : > { %v3824_v60 = vmul.f32 %v7279_v30, %v8611_v47  ;;  %6687 = vmatprep.subr.bf16.mxu1 %v7472_v16 }
0x14ab   : > { %v4063_v44 = vpop.xlane.xlu1 %4062  ;;  %v3825_v48 = vpack.c.bf16 %v3824_v60, %v3823_v23 }
0x14ad   : > { %v4066_v6 = vpop.xlane.xlu0 %4065 }
0x14ae   : > { %v7281_v55 = vpop.eup %7280  ;;  %7284 = vrcp.f32 %v4066_v6 }
0x14af   : > { %v3950_v15 = vpop.permute.xlu1 %3949  ;;  %6678 = vmatmul.mubr.msk.bf16.vlgmr.msra.gmra.mrb[100].mxu1 %vm647_vm5, %v3825_v48  ;;  %v3946_v47 = vmul.f32 %v7281_v55, %v8617_v10  ;;  %7286 = vrcp.f32 %v4063_v44 }
0x14b0   : > { %v3955_v36 = vand.u32 %v3950_v15, %v7631_v37  ;;  %6689 = vmatprep.mubr.msk.bf16.mxu1 %vm7473_vm1, %v7472_v16 }
0x14b2   : > { %v7283_v32 = vpop.eup %7282  ;;  %6688 = vmatpush3.bf16.msra.mxu1 %v3955_v36 }
0x14b3   : > { %v3947_v61 = vmul.f32 %v7283_v32, %v8621_v7  ;;  %v4186_v57 = vpop.xlane.xlu0 %4185  ;;  %6699 = vmatprep.subr.bf16.mxu1 %v7472_v16 }
0x14b5   : > { %v3948_v8 = vpack.c.bf16 %v3947_v61, %v3946_v47 }
0x14b7   : > { %6690 = vmatmul.mubr.msk.bf16.vlgmr.msra.gmra.mrb[104].mxu1 %vm647_vm5, %v3948_v8  ;;  %v4189_v22 = vpop.xlane.xlu0 %4188 }
0x14b8   : > { %6701 = vmatprep.mubr.msk.bf16.mxu1 %vm7473_vm1, %v7472_v16  ;;  %7288 = vrcp.f32 %v4189_v22  ;;  %v7285_v42 = vpop.eup %7284 }
0x14b9   : > { %7290 = vrcp.f32 %v4186_v57  ;;  %v7287_v5 = vpop.eup %7286  ;;  %v4070_v10 = vmul.f32 %v7285_v42, %v8631_v14 }
0x14ba   : > { %v4069_v29 = vmul.f32 %v7287_v5, %v8627_v51 }
0x14bb   : > { %v4309_v13 = vpop.xlane.xlu0 %4308 }
0x14bc   : > { %v4071_v4 = vpack.c.bf16 %v4070_v10, %v4069_v29  ;;  %7292 = vrcp.f32 %v4309_v13 }
0x14bf   : > { %v4073_v46 = vpop.permute.xlu0 %4072 }
0x14c0   : > { %v4078_v7 = vand.u32 %v4073_v46, %v7631_v37 }
0x14c2   : > { %6700 = vmatpush3.bf16.msra.mxu1 %v4078_v7  ;;  %v7289_v3 = vpop.eup %7288 }
0x14c3   : > { %v4196_v26 = vpop.permute.xlu0 %4195  ;;  %6711 = vmatprep.subr.bf16.mxu1 %v7472_v16  ;;  %v7291_v33 = vpop.eup %7290  ;;  %v4193_v14 = vmul.f32 %v7289_v3, %v8640_v41 }
0x14c4   : > { %v4201_v39 = vand.u32 %v4196_v26, %v7631_v37  ;;  %v4192_v51 = vmul.f32 %v7291_v33, %v8636_v11 }
0x14c5   : > { %6702 = vmatmul.mubr.msk.bf16.vlgmr.msra.gmra.mrb[108].mxu1 %vm647_vm5, %v4071_v4 }
0x14c6   : > { %6712 = vmatpush3.bf16.msra.mxu1 %v4201_v39  ;;  %6713 = vmatprep.mubr.msk.bf16.mxu1 %vm7473_vm1, %v7472_v16  ;;  %v4194_v43 = vpack.c.bf16 %v4193_v14, %v4192_v51  ;;  %v7293_v41 = vpop.eup %7292 }
0x14c7   : > { %6723 = vmatprep.subr.bf16.mxu1 %v7472_v16  ;;  %v4319_v54 = vpop.permute.xlu0 %4318  ;;  %v4315_v1 = vmul.f32 %v7293_v41, %v8644_v63  ;;  %v7425_v63 = vld [vmem:[%s9324_s7 + $0x10] sm:$0xff]  }
0x14c8   : > { %v4324_v56 = vand.u32 %v4319_v54, %v7631_v37 }
0x14cd   : > { %6714 = vmatmul.mubr.msk.bf16.vlgmr.msra.gmra.mrb[112].mxu1 %vm647_vm5, %v4194_v43 }
0x14ce   : > { %6724 = vmatpush3.bf16.msra.mxu1 %v4324_v56  ;;  %6725 = vmatprep.mubr.msk.bf16.mxu1 %vm7473_vm1, %v7472_v16 }
0x14cf   : > { %6741 = vmatprep.subr.bf16.mxu1 %v7472_v16 }
0x14e0   : > { %v4312_v31 = vpop.xlane.xlu1 %4311 }
0x14e1   : > { %7294 = vrcp.f32 %v4312_v31 }
0x14eb   : > { %v7295_v45 = vpop.eup %7294 }
0x14ec   : > { %v4316_v11 = vmul.f32 %v7295_v45, %v8657_v59  ;;  %v7426_v59 = vld [vmem:[%s9324_s7 + $0x18] sm:$0xff]  }
0x14ee   : > { %v4317_v58 = vpack.c.bf16 %v4316_v11, %v4315_v1 }
0x14f0   : > { %6726 = vmatmul.mubr.msk.bf16.vlgmr.msra.gmra.mrb[116].mxu1 %vm647_vm5, %v4317_v58 }
0x14f1   : > { %6742 = vmatpush3.bf16.msra.mxu1 %v7423_v28  ;;  %6749 = vmatprep.mubr.msk.bf16.mxu1 %vm7473_vm1, %v7472_v16 }
0x14f2   : > { %6743 = vmatprep.subr.bf16.mxu1 %v7472_v16 }
0x14f5   : > { %6744 = vmatpush3.bf16.msra.mxu1 %v7424_v62 }
0x14f6   : > { %6745 = vmatprep.subr.bf16.mxu1 %v7472_v16 }
0x14f9   : > { %6746 = vmatpush3.bf16.msra.mxu1 %v7425_v63 }
0x14fa   : > { %6747 = vmatprep.subr.bf16.mxu1 %v7472_v16 }
0x14fd   : > { %6748 = vmatpush3.bf16.msra.mxu1 %v7426_v59 }
0x14fe   : > { %4666 = vmatprep.subr.bf16.mxu1 %v7427_v0 }
0x1568   : > { %v3497_v17 = vpop.f32.mrb[88].mxu1 }
0x1569   : > { %v6643_v35 = vpop.f32.mrb[89].mxu1 }
0x156a   : > { %v3500_v38 = vpop.f32.mrb[90].mxu1 }
0x156b   : > { %v6644_v21 = vpop.f32.mrb[91].mxu1 }
0x1572   : > { %v3622_v53 = vpop.f32.mrb[92].mxu1 }
0x1573   : > { %v6655_v9 = vpop.f32.mrb[93].mxu1 }
0x1574   : > { %v3625_v12 = vpop.f32.mrb[94].mxu1 }
0x1575   : > { %v6994_v19 = vpack.i.bf16 %v3625_v12, %v3622_v53  ;;  %v6656_v30 = vpop.f32.mrb[95].mxu1 }
0x1577   : > { %6995 = vrot.lane.b32.xlu0 %v6994_v19, %s9383_s14 }
0x157a   : > { %v3745_v60 = vpop.f32.mrb[96].mxu1 }
0x157b   : > { %v6667_v23 = vpop.f32.mrb[97].mxu1 }
0x157c   : > { %v3748_v44 = vpop.f32.mrb[98].mxu1 }
0x157d   : > { %v6999_v48 = vpack.i.bf16 %v3748_v44, %v3745_v60  ;;  %v6668_v6 = vpop.f32.mrb[99].mxu1 }
0x157f   : > { %7000 = vrot.lane.b32.xlu0 %v6999_v48, %s9381_s23 }
0x1582   : > { %v3868_v15 = vpop.f32.mrb[100].mxu1 }
0x1583   : > { %v6679_v55 = vpop.f32.mrb[101].mxu1 }
0x1584   : > { %v3871_v36 = vpop.f32.mrb[102].mxu1 }
0x1585   : > { %v7004_v32 = vpack.i.bf16 %v3871_v36, %v3868_v15  ;;  %v6680_v47 = vpop.f32.mrb[103].mxu1 }
0x1587   : > { %7005 = vrot.lane.b32.xlu1 %v7004_v32, %s9379_s16 }
0x158a   : > { %v3991_v61 = vpop.f32.mrb[104].mxu1 }
0x158b   : > { %v6691_v57 = vpop.f32.mrb[105].mxu1 }
0x158c   : > { %v3994_v8 = vpop.f32.mrb[106].mxu1 }
0x158d   : > { %v7009_v22 = vpack.i.bf16 %v3994_v8, %v3991_v61  ;;  %v6692_v13 = vpop.f32.mrb[107].mxu1 }
0x158f   : > { %7010 = vrot.lane.b32.xlu0 %v7009_v22, %s9391_s20 }
0x1598   : > { %v4114_v42 = vpop.f32.mrb[108].mxu1 }
0x1599   : > { %v6703_v5 = vpop.f32.mrb[109].mxu1 }
0x159a   : > { %v4117_v10 = vpop.f32.mrb[110].mxu1  ;;  %v7429_v5 = vld [vmem:[%s9326_s9 + $0x8] sm:$0xff]  }
0x159b   : > { %v7014_v46 = vpack.i.bf16 %v4117_v10, %v4114_v42  ;;  %v6704_v7 = vpop.f32.mrb[111].mxu1  ;;  %v7428_v42 = vld [vmem:[%s9326_s9] sm:$0xff]   ;;  %v7430_v10 = vld [vmem:[%s9326_s9 + $0x10] sm:$0xff]  }
0x159d   : > { %7015 = vrot.lane.b32.xlu0 %v7014_v46, %s9389_s0  ;;  %v7431_v46 = vld [vmem:[%s9326_s9 + $0x18] sm:$0xff]  }
0x15a0   : > { %v4237_v29 = vpop.f32.mrb[112].mxu1 }
0x15a1   : > { %v6715_v26 = vpop.f32.mrb[113].mxu1 }
0x15a2   : > { %v4240_v4 = vpop.f32.mrb[114].mxu1 }
0x15a3   : > { %v7019_v3 = vpack.i.bf16 %v4240_v4, %v4237_v29  ;;  %v6716_v39 = vpop.f32.mrb[115].mxu1  ;;  %v7432_v29 = vld [vmem:[%s7592_s24 + $0x20] sm:$0xff] }
0x15a4   : > { %v7433_v39 = vld [vmem:[%s9321_s4] ss:$0 sm:$0xff] }
0x15a5   : > { %7020 = vrot.lane.b32.xlu0 %v7019_v3, %s9387_s27 }
0x15c3   : > { %v4360_v33 = vpop.f32.mrb[116].mxu1 }
0x15c4   : > { %v6727_v14 = vpop.f32.mrb[117].mxu1 }
0x15c5   : > { %v4363_v51 = vpop.f32.mrb[118].mxu1  ;;  %v7434_v14 = vld [vmem:[%s7592_s24 + $0x28] sm:$0x7] }
0x15c6   : > { %v7024_v54 = vpack.i.bf16 %v4363_v51, %v4360_v33  ;;  %v6728_v43 = vpop.f32.mrb[119].mxu1 }
0x15c8   : > { %7025 = vrot.lane.b32.xlu0 %v7024_v54, %s9386_s15 }
0x15e9   : > { %v6996_v56 = vpop.permute.xlu0 %6995 }
0x15ea   : > { %v6998_v11 = vunpack.i.h.bf16 %v6996_v56  ;;  %v6997_v58 = vunpack.i.l.bf16 %v6996_v56 }
0x15ec   : > { %v4424_v53 = vsel %vm599_vm2, %v3500_v38, %v6998_v11  ;;  %v4423_v9 = vsel %vm599_vm2, %v3497_v17, %v6997_v58 }
0x15f1   : > { %v7001_v31 = vpop.permute.xlu0 %7000 }
0x15f2   : > { %v7003_v28 = vunpack.i.h.bf16 %v7001_v31  ;;  %v7002_v62 = vunpack.i.l.bf16 %v7001_v31 }
0x15f4   : > { %v4425_v30 = vsel %vm1644_vm7, %v4423_v9, %v7002_v62  ;;  %v4426_v60 = vsel %vm1644_vm7, %v4424_v53, %v7003_v28 }
0x15f9   : > { %v7006_v1 = vpop.permute.xlu1 %7005 }
0x15fa   : > { %v7008_v63 = vunpack.i.h.bf16 %v7006_v1  ;;  %v7007_v59 = vunpack.i.l.bf16 %v7006_v1 }
0x15fc   : > { %v4427_v48 = vsel %vm1647_vm8, %v4425_v30, %v7007_v59  ;;  %v4428_v6 = vsel %vm1647_vm8, %v4426_v60, %v7008_v63 }
0x1601   : > { %v7011_v41 = vpop.permute.xlu0 %7010 }
0x1602   : > { %v7013_v35 = vunpack.i.h.bf16 %v7011_v41  ;;  %v7012_v21 = vunpack.i.l.bf16 %v7011_v41 }
0x1604   : > { %v4429_v15 = vsel %vm1650_vm9, %v4427_v48, %v7012_v21  ;;  %v4430_v55 = vsel %vm1650_vm9, %v4428_v6, %v7013_v35 }
0x160f   : > { %v7016_v45 = vpop.permute.xlu0 %7015 }
0x1610   : > { %v7018_v12 = vunpack.i.h.bf16 %v7016_v45  ;;  %v7017_v19 = vunpack.i.l.bf16 %v7016_v45 }
0x1612   : > { %v4431_v38 = vsel %vm1653_vm10, %v4429_v15, %v7017_v19  ;;  %v4432_v17 = vsel %vm1653_vm10, %v4430_v55, %v7018_v12  ;;  %v7436_v55 = vld [vmem:[%s9323_s6] ss:$0 sm:$0xff] }
0x1617   : > { %v7021_v0 = vpop.permute.xlu0 %7020 }
0x1618   : > { %v7023_v23 = vunpack.i.h.bf16 %v7021_v0  ;;  %v7022_v44 = vunpack.i.l.bf16 %v7021_v0 }
0x161a   : > { %v4433_v61 = vsel %vm1656_vm11, %v4431_v38, %v7022_v44  ;;  %v4434_v57 = vsel %vm1656_vm11, %v4432_v17, %v7023_v23  ;;  %v7435_v44 = vld [vmem:[%s9322_s5] ss:$0 sm:$0xff] }
0x163a   : > { %v7026_v36 = vpop.permute.xlu0 %7025 }
0x163b   : > { %v7028_v32 = vunpack.i.h.bf16 %v7026_v36  ;;  %v7027_v47 = vunpack.i.l.bf16 %v7026_v36 }
0x163d   : > { %v4435_v8 = vsel %vm1659_vm12, %v4433_v61, %v7027_v47  ;;  %v4436_v22 = vsel %vm1659_vm12, %v4434_v57, %v7028_v32  ;;  %v7437_v32 = vld [vmem:[%s9318_s1] ss:$8 sps:$4 sm:$0xff]   ;;  %v7438_v47 = vld [vmem:[%s9318_s1 + $0x14] ss:$8 sps:$4 sm:$0xff]   ;;  %v7439_v61 = vld [vmem:[%s9318_s1 + $0x10] ss:$8 sps:$4 sm:$0xff]  }
0x163e   : > { %v4437_v13 = vpack.c.bf16 %v4436_v22, %v4435_v8  ;;  %v7440_v57 = vld [vmem:[%s9318_s1 + $0x24] ss:$8 sps:$4 sm:$0xff]   ;;  %v7441_v8 = vld [vmem:[%s9318_s1 + $0x20] ss:$8 sps:$4 sm:$0xff]   ;;  %v6154_v22 = vld [vmem:[%s7592_s24 + $0x38] sm:$0x7] }
0x1640   : > { %6738 = vmatmul.mubr.msk.bf16.vlgmr.msra.gmra.mrb[108].mxu0 %vm544_vm0, %v4437_v13  ;;  %v7442_v13 = vld [vmem:[%s9318_s1 + $0x34] ss:$8 sps:$4 sm:$0xff]  }
0x1641   : > { %6754 = vmatpush3.bf16.msra.mxu0 %v7428_v42  ;;  %6761 = vmatprep.mubr.msk.bf16.mxu0 %vm7473_vm1, %v7472_v16 }
0x1642   : > { %6755 = vmatprep.subr.bf16.mxu0 %v7472_v16 }
0x1645   : > { %6756 = vmatpush3.bf16.msra.mxu0 %v7429_v5  ;;  %v7443_v5 = vld [vmem:[%s9318_s1 + $0x30] ss:$8 sps:$4 sm:$0xff]  }
0x1646   : > { %6757 = vmatprep.subr.bf16.mxu0 %v7472_v16 }
0x1649   : > { %6758 = vmatpush3.bf16.msra.mxu0 %v7430_v10 }
0x164a   : > { %6759 = vmatprep.subr.bf16.mxu0 %v7472_v16 }
0x164d   : > { %6760 = vmatpush3.bf16.msra.mxu0 %v7431_v46  ;;  %v7444_v46 = vld [vmem:[%s9325_s8] ss:$0 sm:$0xff] }
0x164e   : > { %6765 = vmatprep.subr.bf16.mxu0 %v7472_v16 }
0x1713   : > { %v4475_v7 = vpop.f32.mrb[108].mxu0 }
0x1714   : > { %v4482_v26 = vadd.f32 %v7432_v29, %v4475_v7  ;;  %v6739_v4 = vpop.f32.mrb[109].mxu0 }
0x1715   : > { %v4478_v3 = vpop.f32.mrb[110].mxu0 }
0x1716   : > { %v4484_v33 = vadd.f32 %v7433_v39, %v4482_v26  ;;  %v4483_v51 = vadd.f32 %v7434_v14, %v4478_v3  ;;  %v6740_v54 = vpop.f32.mrb[111].mxu0 }
0x1718   : > { %v4485_v43 = vadd.f32 %v7433_v39, %v4483_v51  ;;  %v4486_v56 = vsel %vm544_vm0, %v4484_v33, 0.0 }
0x1719   : > { %4487 = vadd.xlane.f32.xlu1 %v4486_v56 }
0x171a   : > { %v4489_v31 = vsel %vm1744_vm13, %v4485_v43, 0.0 }
0x171b   : > { %4490 = vadd.xlane.f32.xlu0 %v4489_v31 }
0x17a6   : > { %v4488_v41 = vpop.xlane.xlu1 %4487 }
0x17a7   : > { %v4492_v45 = vmul.f32 0.015625, %v4488_v41 }
0x17a8   : > { %v4491_v1 = vpop.xlane.xlu0 %4490 }
0x17a9   : > { %v4494_v11 = vsub.f32 %v4484_v33, %v4492_v45  ;;  %v4493_v58 = vmul.f32 0.015625, %v4491_v1 }
0x17ab   : > { %v4495_v28 = vsub.f32 %v4485_v43, %v4493_v58  ;;  %v4496_v62 = vmul.f32 %v4494_v11, %v4494_v11 }
0x17ad   : > { %v4498_v63 = vsel %vm544_vm0, %v4496_v62, 0.0  ;;  %v4497_v59 = vmul.f32 %v4495_v28, %v4495_v28 }
0x17ae   : > { %4499 = vadd.xlane.f32.xlu0 %v4498_v63 }
0x17af   : > { %v4501_v0 = vsel %vm1744_vm13, %v4497_v59, 0.0 }
0x17b0   : > { %4502 = vadd.xlane.f32.xlu1 %v4501_v0 }
0x183b   : > { %v4500_v35 = vpop.xlane.xlu0 %4499 }
0x183c   : > { %v4504_v21 = vmul.f32 0.015625, %v4500_v35 }
0x183d   : > { %v4503_v53 = vpop.xlane.xlu1 %4502 }
0x183e   : > { %v4506_v9 = vadd.f32 1e-05, %v4504_v21  ;;  %v4505_v12 = vmul.f32 0.015625, %v4503_v53 }
0x1840   : > { %7296 = vrsqrt.f32 %v4506_v9  ;;  %v4507_v19 = vadd.f32 1e-05, %v4505_v12 }
0x1842   : > { %7298 = vrsqrt.f32 %v4507_v19 }
0x184a   : > { %v7297_v30 = vpop.eup %7296 }
0x184b   : > { %v4510_v60 = vmul.f32 %v7297_v30, %v4494_v11 }
0x184c   : > { %v7299_v23 = vpop.eup %7298 }
0x184d   : > { %v4512_v48 = vmul.f32 %v7435_v44, %v4510_v60  ;;  %v4511_v6 = vmul.f32 %v7299_v23, %v4495_v28 }
0x184f   : > { %v4513_v15 = vmul.f32 %v7435_v44, %v4511_v6  ;;  %v8789_v36 = vadd.f32 %v7436_v55, %v4512_v48 }
0x1851   : > { %v8791_v38 = vadd.f32 %v7436_v55, %v4513_v15 }
0x1853   : > { %v4516_v17 = vpack.c.bf16 %v8791_v38, %v8789_v36 }
0x1855   : > { %6750 = vmatmul.mubr.msk.bf16.vlgmr.msra.gmra.mrb[120].mxu1 %vm544_vm0, %v4516_v17 }
0x1856   : > { %4667 = vmatpush1.bf16.msra.mxu1 %v7437_v32  ;;  %4698 = vmatprep.mubr.bf16.mxu1 %v7471_v2  ;;  %v6153_v2 = vld [vmem:[%s7592_s24 + $0x30] sm:$0xff] }
0x1857   : > { %4668 = vmatprep.subr.bf16.mxu1 %v7438_v47  ;;  %v4662_v42 = vpack.c.bf16 %v6154_v22, %v6153_v2 }
0x185a   : > { %4669 = vmatpush1.bf16.msra.mxu1 %v7439_v61 }
0x185b   : > { %4670 = vmatprep.subr.bf16.mxu1 %v7440_v57 }
0x185e   : > { %4671 = vmatpush1.bf16.msra.mxu1 %v7441_v8 }
0x185f   : > { %4672 = vmatprep.subr.bf16.mxu1 %v7442_v13 }
0x1862   : > { %4673 = vmatpush1.bf16.msra.mxu1 %v7443_v5 }
0x1863   : > { %6771 = vmatprep.subr.bf16.mxu1 %v7472_v16 }
0x1865   : > { %6155 = vmatmul.mubr.msk.bf16.vlgmr.msra.gmra.mrb[124].mxu1 %vm544_vm0, %v4662_v42 }
0x1866   : > { %6773 = vmatprep.mubr.msk.bf16.mxu1 %vm7473_vm1, %v7472_v16 }
0x1928   : > { %v4554_v10 = vpop.f32.mrb[120].mxu1 }
0x1929   : > { %v4555_v7 = vadd.f32 %v7444_v46, %v4554_v10  ;;  %v6751_v29 = vpop.f32.mrb[121].mxu1 }
0x192a   : > { %v4557_v26 = vpop.f32.mrb[122].mxu1 }
0x192b   : > { %v4563_v4 = vmul.f32 0.044715, %v4555_v7  ;;  %v4558_v3 = vadd.f32 %v7444_v46, %v4557_v26  ;;  %v6752_v39 = vpop.f32.mrb[123].mxu1  ;;  %v4561_v23 = vmul.f32 0.5, %v4555_v7 }
0x192d   : > { %v4565_v33 = vmul.f32 %v4563_v4, %v4555_v7  ;;  %v4564_v14 = vmul.f32 0.044715, %v4558_v3  ;;  %v4562_v44 = vmul.f32 0.5, %v4558_v3 }
0x192f   : > { %v4567_v51 = vmul.f32 %v4565_v33, %v4555_v7  ;;  %v4566_v54 = vmul.f32 %v4564_v14, %v4558_v3 }
0x1931   : > { %v4569_v43 = vadd.f32 %v4567_v51, %v4555_v7  ;;  %v4568_v56 = vmul.f32 %v4566_v54, %v4558_v3  ;;  %v7445_v54 = vld [vmem:[%s9392_s11] sm:$0xff]  }
0x1933   : > { %v4571_v31 = vmul.f32 0.7978846, %v4569_v43  ;;  %v4570_v41 = vadd.f32 %v4568_v56, %v4558_v3  ;;  %v7446_v43 = vld [vmem:[%s9392_s11 + $0x8] sm:$0xff]   ;;  %v7447_v56 = vld [vmem:[%s9392_s11 + $0x10] sm:$0xff]  }
0x1935   : > { %7300 = vtanh.f32 %v4571_v31  ;;  %v4572_v45 = vmul.f32 0.7978846, %v4570_v41  ;;  %v7448_v31 = vld [vmem:[%s9392_s11 + $0x18] sm:$0xff]  }
0x1937   : > { %7302 = vtanh.f32 %v4572_v45 }
0x1938   : > { %v4700_v1 = vpop.f32.mrb[124].mxu1 }
0x1939   : > { %v4701_v11 = vadd.f32 %v4700_v1, %v7615_v18  ;;  %v4702_v58 = vpop.f32.mrb[125].mxu1 }
0x193a   : > { %v4704_v28 = vpop.f32.mrb[126].mxu1  ;;  %v4703_v59 = vadd.f32 %v4702_v58, %v7617_v20 }
0x193b   : > { %v4705_v62 = vadd.f32 %v4704_v28, %v7615_v18  ;;  %v4706_v63 = vpop.f32.mrb[127].mxu1  ;;  %v4709_v35 = vmul.f32 0.35355338, %v4701_v11 }
0x193c   : > { %v4707_v0 = vadd.f32 %v4706_v63, %v7617_v20 }
0x193d   : > { %v4710_v21 = vmul.f32 0.35355338, %v4705_v62  ;;  %v4712_v53 = vpack.c.bf16 %v4705_v62, %v4701_v11 }
0x193e   : > { %v8831_v9 = vpack.c.bf16 %v4707_v0, %v4703_v59 }
0x193f   : > { %v7301_v12 = vpop.eup %7300  ;;  %v4711_v19 = vpack.c.bf16 %v4710_v21, %v4709_v35  ;;  %4837 = vrot.lane.b32.xlu1 %v4712_v53, %s9386_s15  ;;  %4715 = vrot.lane.b32.xlu0 %v4712_v53, %s9377_s22 }
0x1940   : > { %v4791_v30 = vand.u32 %v8831_v9, %v7631_v37  ;;  %v4575_v18 = vadd.f32 1.0, %v7301_v12 }
0x1941   : > { %v7303_v60 = vpop.eup %7302 }
0x1942   : > { %6772 = vmatpush3.bf16.msra.mxu1 %v4791_v30  ;;  %v4576_v20 = vadd.f32 1.0, %v7303_v60  ;;  %v4577_v48 = vmul.f32 %v4575_v18, %v4561_v23 }
0x1943   : > { %4961 = vrot.lane.b32.xlu0 %v4712_v53, %s9387_s27  ;;  %4835 = vrot.lane.b32.xlu1 %v4711_v19, %s9388_s28 }
0x1944   : > { %v4578_v6 = vmul.f32 %v4576_v20, %v4562_v44  ;;  %6783 = vmatprep.subr.bf16.mxu1 %v7472_v16 }
0x1946   : > { %v4579_v15 = vpack.c.bf16 %v4578_v6, %v4577_v48 }
0x1947   : > { %5084 = vrot.lane.b32.xlu0 %v4712_v53, %s9389_s0  ;;  %4959 = vrot.lane.b32.xlu1 %v4711_v19, %s9390_s2 }
0x1948   : > { %6762 = vmatmul.mubr.msk.bf16.vlgmr.msra.gmra.mrb[112].mxu0 %vm544_vm0, %v4579_v15 }
0x1949   : > { %6767 = vmatprep.mubr.msk.bf16.mxu0 %vm7473_vm1, %v7472_v16 }
0x194b   : > { %5207 = vrot.lane.b32.xlu0 %v4712_v53, %s9391_s20  ;;  %5082 = vrot.lane.b32.xlu1 %v4711_v19, %s9378_s21 }
0x194f   : > { %5330 = vrot.lane.b32.xlu0 %v4712_v53, %s9379_s16  ;;  %5205 = vrot.lane.b32.xlu1 %v4711_v19, %s9380_s26 }
0x1953   : > { %5453 = vrot.lane.b32.xlu0 %v4712_v53, %s9381_s23  ;;  %5328 = vrot.lane.b32.xlu1 %v4711_v19, %s9382_s18 }
0x1957   : > { %5576 = vrot.lane.b32.xlu0 %v4712_v53, %s9383_s14  ;;  %5451 = vrot.lane.b32.xlu1 %v4711_v19, %s9384_s17 }
0x195b   : > { %5574 = vrot.lane.b32.xlu1 %v4711_v19, %s9385_s19 }
0x195f   : > { %4910 = vrot.lane.b32.xlu1 %v8831_v9, %s9388_s28 }
0x19b1   : > { %v4716_v55 = vpop.permute.xlu0 %4715  ;;  %v4838_v32 = vpop.permute.xlu1 %4837 }
0x19b2   : > { %v4721_v17 = vsel %vm599_vm2, %v4716_v55, 0  ;;  %v4843_v47 = vsel %vm599_vm2, %v4838_v32, 0 }
0x19b3   : > { %6766 = vmatpush3.bf16.xpose.msra.mxu0 %v4721_v17 }
0x19b4   : > { %6777 = vmatprep.subr.bf16.mxu0 %v7472_v16 }
0x19b5   : > { %v4962_v61 = vpop.permute.xlu0 %4961  ;;  %v4836_v57 = vpop.permute.xlu1 %4835 }
0x19b6   : > { %v4967_v8 = vsel %vm599_vm2, %v4962_v61, 0 }
0x19b9   : > { %v5085_v2 = vpop.permute.xlu0 %5084  ;;  %v4960_v22 = vpop.permute.xlu1 %4959 }
0x19ba   : > { %6768 = vmatmul.mubr.msk.bf16.vlgmr.msra.gmra.mrb[116].mxu0 %vm599_vm2, %v4711_v19  ;;  %v5090_v13 = vsel %vm599_vm2, %v5085_v2, 0 }
0x19bb   : > { %6778 = vmatpush3.bf16.xpose.msra.mxu0 %v4843_v47  ;;  %6779 = vmatprep.mubr.msk.bf16.mxu0 %vm7473_vm1, %v7472_v16 }
0x19bc   : > { %6789 = vmatprep.subr.bf16.mxu0 %v7472_v16 }
0x19bd   : > { %v5208_v42 = vpop.permute.xlu0 %5207  ;;  %v5083_v5 = vpop.permute.xlu1 %5082 }
0x19be   : > { %v5213_v10 = vsel %vm599_vm2, %v5208_v42, 0 }
0x19c1   : > { %v5331_v46 = vpop.permute.xlu0 %5330  ;;  %v5206_v7 = vpop.permute.xlu1 %5205 }
0x19c2   : > { %6780 = vmatmul.mubr.msk.bf16.vlgmr.msra.gmra.mrb[120].mxu0 %vm599_vm2, %v4836_v57  ;;  %v5336_v29 = vsel %vm599_vm2, %v5331_v46, 0 }
0x19c3   : > { %6790 = vmatpush3.bf16.xpose.msra.mxu0 %v4967_v8  ;;  %6791 = vmatprep.mubr.msk.bf16.mxu0 %vm7473_vm1, %v7472_v16 }
0x19c4   : > { %6801 = vmatprep.subr.bf16.mxu0 %v7472_v16 }
0x19c5   : > { %v5454_v26 = vpop.permute.xlu0 %5453  ;;  %v5329_v4 = vpop.permute.xlu1 %5328 }
0x19c6   : > { %v5459_v3 = vsel %vm599_vm2, %v5454_v26, 0 }
0x19c9   : > { %v5577_v39 = vpop.permute.xlu0 %5576  ;;  %v5452_v33 = vpop.permute.xlu1 %5451 }
0x19ca   : > { %6792 = vmatmul.mubr.msk.bf16.vlgmr.msra.gmra.mrb[124].mxu0 %vm599_vm2, %v4960_v22  ;;  %v5582_v14 = vsel %vm599_vm2, %v5577_v39, 0 }
0x19cb   : > { %6802 = vmatpush3.bf16.xpose.msra.mxu0 %v5090_v13  ;;  %6803 = vmatprep.mubr.msk.bf16.mxu0 %vm7473_vm1, %v7472_v16 }
0x19cc   : > { %6813 = vmatprep.subr.bf16.mxu0 %v7472_v16 }
0x19cd   : > { %v5575_v51 = vpop.permute.xlu1 %5574 }
0x19d2   : > { %6804 = vmatmul.mubr.msk.bf16.vlgmr.msra.gmra.mrb[128].mxu0 %vm599_vm2, %v5083_v5 }
0x19d3   : > { %6814 = vmatpush3.bf16.xpose.msra.mxu0 %v5213_v10  ;;  %6815 = vmatprep.mubr.msk.bf16.mxu0 %vm7473_vm1, %v7472_v16 }
0x19d4   : > { %6825 = vmatprep.subr.bf16.mxu0 %v7472_v16 }
0x19da   : > { %6816 = vmatmul.mubr.msk.bf16.vlgmr.msra.gmra.mrb[132].mxu0 %vm599_vm2, %v5206_v7 }
0x19db   : > { %6826 = vmatpush3.bf16.xpose.msra.mxu0 %v5336_v29  ;;  %6827 = vmatprep.mubr.msk.bf16.mxu0 %vm7473_vm1, %v7472_v16 }
0x19dc   : > { %6837 = vmatprep.subr.bf16.mxu0 %v7472_v16 }
0x19e2   : > { %6828 = vmatmul.mubr.msk.bf16.vlgmr.msra.gmra.mrb[136].mxu0 %vm599_vm2, %v5329_v4 }
0x19e3   : > { %6838 = vmatpush3.bf16.xpose.msra.mxu0 %v5459_v3  ;;  %6839 = vmatprep.mubr.msk.bf16.mxu0 %vm7473_vm1, %v7472_v16 }
0x19e4   : > { %6849 = vmatprep.subr.bf16.mxu0 %v7472_v16 }
0x19ea   : > { %6840 = vmatmul.mubr.msk.bf16.vlgmr.msra.gmra.mrb[140].mxu0 %vm599_vm2, %v5452_v33 }
0x19eb   : > { %6850 = vmatpush3.bf16.xpose.msra.mxu0 %v5582_v14  ;;  %6851 = vmatprep.mubr.msk.bf16.mxu0 %vm7473_vm1, %v7472_v16 }
0x19ec   : > { %6861 = vmatprep.subr.bf16.mxu0 %v7472_v16 }
0x19f2   : > { %6852 = vmatmul.mubr.msk.bf16.vlgmr.msra.gmra.mrb[144].mxu0 %vm599_vm2, %v5575_v51 }
0x19f3   : > { %6862 = vmatpush3.bf16.msra.mxu0 %v7445_v54  ;;  %6869 = vmatprep.mubr.msk.bf16.mxu0 %vm7473_vm1, %v7472_v16 }
0x19f4   : > { %6863 = vmatprep.subr.bf16.mxu0 %v7472_v16 }
0x19f7   : > { %6864 = vmatpush3.bf16.msra.mxu0 %v7446_v43 }
0x19f8   : > { %6865 = vmatprep.subr.bf16.mxu0 %v7472_v16 }
0x19fb   : > { %6866 = vmatpush3.bf16.msra.mxu0 %v7447_v56 }
0x19fc   : > { %6867 = vmatprep.subr.bf16.mxu0 %v7472_v16 }
0x19ff   : > { %6868 = vmatpush3.bf16.msra.mxu0 %v7448_v31 }
0x1a00   : > { %6885 = vmatprep.subr.bf16.mxu0 %v7472_v16 }
0x1a1b   : > { %v8912_v41 = vpop.f32.mrb[112].mxu0 }
0x1a1c   : > { %v6763_v45 = vpop.f32.mrb[113].mxu0 }
0x1a1d   : > { %v8914_v1 = vpop.f32.mrb[114].mxu0 }
0x1a1e   : > { %v6764_v11 = vpop.f32.mrb[115].mxu0 }
0x1a1f   : > { %v8984_v11 = vpop.permute.xlu1 %4910 }
0x1a8d   : > { %v8916_v58 = vpop.f32.mrb[116].mxu0 }
0x1a8e   : > { %v6769_v28 = vpop.f32.mrb[117].mxu0  ;;  %v4764_v62 = vsel %vm647_vm5, %v8916_v58, -inf }
0x1a8f   : > { %4765 = vmax.xlane.f32.xlu0 %v4764_v62  ;;  %v8920_v63 = vpop.f32.mrb[118].mxu0 }
0x1a90   : > { %v6770_v59 = vpop.f32.mrb[119].mxu0  ;;  %v4767_v0 = vsel %vm651_vm6, %v8920_v63, -inf }
0x1a91   : > { %4768 = vmax.xlane.f32.xlu1 %v4767_v0 }
0x1a95   : > { %v8924_v35 = vpop.f32.mrb[120].mxu0 }
0x1a96   : > { %v6781_v21 = vpop.f32.mrb[121].mxu0  ;;  %v4886_v53 = vsel %vm647_vm5, %v8924_v35, -inf }
0x1a97   : > { %4887 = vmax.xlane.f32.xlu0 %v4886_v53  ;;  %v8928_v12 = vpop.f32.mrb[122].mxu0 }
0x1a98   : > { %v6782_v19 = vpop.f32.mrb[123].mxu0  ;;  %v4889_v30 = vsel %vm651_vm6, %v8928_v12, -inf }
0x1a9b   : > { %4890 = vmax.xlane.f32.xlu0 %v4889_v30 }
0x1a9d   : > { %v8932_v18 = vpop.f32.mrb[124].mxu0 }
0x1a9e   : > { %v6793_v60 = vpop.f32.mrb[125].mxu0  ;;  %v5010_v23 = vsel %vm647_vm5, %v8932_v18, -inf }
0x1a9f   : > { %5011 = vmax.xlane.f32.xlu1 %v5010_v23  ;;  %v8936_v44 = vpop.f32.mrb[126].mxu0 }
0x1aa0   : > { %v6794_v20 = vpop.f32.mrb[127].mxu0  ;;  %v5013_v48 = vsel %vm651_vm6, %v8936_v44, -inf }
0x1aa1   : > { %5014 = vmax.xlane.f32.xlu0 %v5013_v48 }
0x1aa5   : > { %v8940_v6 = vpop.f32.mrb[128].mxu0 }
0x1aa6   : > { %v6805_v15 = vpop.f32.mrb[129].mxu0  ;;  %v5133_v55 = vsel %vm647_vm5, %v8940_v6, -inf }
0x1aa7   : > { %5134 = vmax.xlane.f32.xlu1 %v5133_v55  ;;  %v8944_v17 = vpop.f32.mrb[130].mxu0 }
0x1aa8   : > { %v6806_v32 = vpop.f32.mrb[131].mxu0  ;;  %v5136_v54 = vsel %vm651_vm6, %v8944_v17, -inf }
0x1aad   : > { %v8946_v47 = vpop.f32.mrb[132].mxu0 }
0x1aae   : > { %v6817_v61 = vpop.f32.mrb[133].mxu0  ;;  %v5256_v57 = vsel %vm647_vm5, %v8946_v47, -inf }
0x1aaf   : > { %5257 = vmax.xlane.f32.xlu1 %v5256_v57  ;;  %v8950_v8 = vpop.f32.mrb[134].mxu0 }
0x1ab0   : > { %v6818_v2 = vpop.f32.mrb[135].mxu0  ;;  %v5259_v43 = vsel %vm651_vm6, %v8950_v8, -inf }
0x1ab5   : > { %v8952_v22 = vpop.f32.mrb[136].mxu0 }
0x1ab6   : > { %v6829_v13 = vpop.f32.mrb[137].mxu0  ;;  %v5379_v42 = vsel %vm647_vm5, %v8952_v22, -inf }
0x1ab7   : > { %5033 = vrot.lane.b32.xlu0 %v8831_v9, %s9390_s2  ;;  %5380 = vmax.xlane.f32.xlu1 %v5379_v42  ;;  %v8958_v5 = vpop.f32.mrb[138].mxu0  ;;  %s9396_s2 = sld [smem:[#allocation9_spill]] }
0x1ab8   : > { %v6830_v10 = vpop.f32.mrb[139].mxu0  ;;  %v5382_v56 = vsel %vm651_vm6, %v8958_v5, -inf }
0x1abd   : > { %v8960_v46 = vpop.f32.mrb[140].mxu0 }
0x1abe   : > { %v6841_v7 = vpop.f32.mrb[141].mxu0  ;;  %v5502_v29 = vsel %vm647_vm5, %v8960_v46, -inf }
0x1abf   : > { %5503 = vmax.xlane.f32.xlu1 %v5502_v29  ;;  %v8964_v26 = vpop.f32.mrb[142].mxu0 }
0x1ac0   : > { %v6842_v4 = vpop.f32.mrb[143].mxu0  ;;  %v5505_v31 = vsel %vm651_vm6, %v8964_v26, -inf }
0x1ac5   : > { %v8966_v3 = vpop.f32.mrb[144].mxu0 }
0x1ac6   : > { %v6853_v39 = vpop.f32.mrb[145].mxu0  ;;  %v5625_v33 = vsel %vm647_vm5, %v8966_v3, -inf }
0x1ac7   : > { %5626 = vmax.xlane.f32.xlu1 %v5625_v33  ;;  %v8970_v14 = vpop.f32.mrb[146].mxu0 }
0x1ac8   : > { %v6854_v51 = vpop.f32.mrb[147].mxu0  ;;  %v5628_v45 = vsel %vm651_vm6, %v8970_v14, -inf }
0x1ad6   : > { %5137 = vmax.xlane.f32.xlu0 %v5136_v54 }
0x1ad8   : > { %5156 = vrot.lane.b32.xlu1 %v8831_v9, %s9378_s21 }
0x1ada   : > { %5260 = vmax.xlane.f32.xlu0 %v5259_v43 }
0x1ade   : > { %5383 = vmax.xlane.f32.xlu0 %v5382_v56 }
0x1ae2   : > { %5506 = vmax.xlane.f32.xlu0 %v5505_v31 }
0x1ae6   : > { %5629 = vmax.xlane.f32.xlu0 %v5628_v45 }
0x1b1c   : > { %v4766_v28 = vpop.xlane.xlu0 %4765 }
0x1b1d   : > { %v4770_v62 = vsub.f32 %v8916_v58, %v4766_v28 }
0x1b1e   : > { %v4769_v59 = vpop.xlane.xlu1 %4768 }
0x1b1f   : > { %v4772_v0 = vmul.f32 1.442695, %v4770_v62  ;;  %v4771_v21 = vsub.f32 %v8920_v63, %v4769_v59 }
0x1b21   : > { %7304 = vpow2.f32 %v4772_v0  ;;  %v4774_v53 = vmul.f32 1.442695, %v4771_v21 }
0x1b23   : > { %7306 = vpow2.f32 %v4774_v53 }
0x1b24   : > { %v4888_v19 = vpop.xlane.xlu0 %4887 }
0x1b25   : > { %v4892_v30 = vsub.f32 %v8924_v35, %v4888_v19 }
0x1b27   : > { %v4894_v60 = vmul.f32 1.442695, %v4892_v30 }
0x1b28   : > { %v4891_v23 = vpop.xlane.xlu0 %4890 }
0x1b29   : > { %7308 = vpow2.f32 %v4894_v60  ;;  %v4893_v20 = vsub.f32 %v8928_v12, %v4891_v23 }
0x1b2b   : > { %v8990_v48 = vpop.eup %7304  ;;  %v4896_v15 = vmul.f32 1.442695, %v4893_v20 }
0x1b2c   : > { %v5012_v55 = vpop.xlane.xlu1 %5011  ;;  %v4776_v58 = vsel %vm647_vm5, %v8990_v48, 0.0 }
0x1b2d   : > { %v8994_v32 = vpop.eup %7306  ;;  %7310 = vpow2.f32 %v4896_v15  ;;  %v5016_v63 = vsub.f32 %v8932_v18, %v5012_v55  ;;  %4777 = vadd.xlane.f32.xlu1 %v4776_v58 }
0x1b2e   : > { %v4779_v35 = vsel %vm651_vm6, %v8994_v32, 0.0  ;;  %v5015_v39 = vpop.xlane.xlu0 %5014 }
0x1b2f   : > { %v5018_v61 = vmul.f32 1.442695, %v5016_v63  ;;  %4780 = vadd.xlane.f32.xlu0 %v4779_v35  ;;  %v5017_v33 = vsub.f32 %v8936_v44, %v5015_v39 }
0x1b31   : > { %7312 = vpow2.f32 %v5018_v61  ;;  %v5020_v54 = vmul.f32 1.442695, %v5017_v33 }
0x1b32   : > { %v9021_v56 = vpop.permute.xlu0 %5033 }
0x1b33   : > { %v8999_v12 = vpop.eup %7308 }
0x1b34   : > { %v5135_v57 = vpop.xlane.xlu1 %5134  ;;  %v4898_v2 = vsel %vm647_vm5, %v8999_v12, 0.0 }
0x1b35   : > { %v5139_v13 = vsub.f32 %v8940_v6, %v5135_v57  ;;  %4899 = vadd.xlane.f32.xlu1 %v4898_v2 }
0x1b37   : > { %v9004_v42 = vpop.eup %7310  ;;  %v5141_v10 = vmul.f32 1.442695, %v5139_v13 }
0x1b38   : > { %v4901_v18 = vsel %vm651_vm6, %v9004_v42, 0.0 }
0x1b39   : > { %7314 = vpow2.f32 %v5141_v10  ;;  %4902 = vadd.xlane.f32.xlu0 %v4901_v18 }
0x1b3a   : > { %7316 = vpow2.f32 %v5020_v54 }
0x1b3b   : > { %v9008_v7 = vpop.eup %7312 }
0x1b3c   : > { %v5022_v29 = vsel %vm647_vm5, %v9008_v7, 0.0  ;;  %v5258_v51 = vpop.xlane.xlu1 %5257 }
0x1b3d   : > { %5023 = vadd.xlane.f32.xlu1 %v5022_v29  ;;  %v5262_v45 = vsub.f32 %v8946_v47, %v5258_v51 }
0x1b3f   : > { %v5264_v21 = vmul.f32 1.442695, %v5262_v45 }
0x1b43   : > { %v9012_v4 = vpop.eup %7314 }
0x1b44   : > { %v5145_v6 = vsel %vm647_vm5, %v9012_v4, 0.0  ;;  %v5381_v43 = vpop.xlane.xlu1 %5380  ;;  %v9028_v23 = vpop.eup %7316 }
0x1b45   : > { %5146 = vadd.xlane.f32.xlu1 %v5145_v6  ;;  %v5385_v62 = vsub.f32 %v8952_v22, %v5381_v43 }
0x1b47   : > { %v5387_v30 = vmul.f32 1.442695, %v5385_v62 }
0x1b4c   : > { %v5504_v31 = vpop.xlane.xlu1 %5503 }
0x1b4d   : > { %v5508_v55 = vsub.f32 %v8960_v46, %v5504_v31 }
0x1b4f   : > { %5279 = vrot.lane.b32.xlu0 %v8831_v9, %s9380_s26  ;;  %v5510_v63 = vmul.f32 1.442695, %v5508_v55  ;;  %s9395_s26 = sld [smem:[#allocation8_spill]] }
0x1b54   : > { %v5627_v0 = vpop.xlane.xlu1 %5626 }
0x1b55   : > { %v5631_v44 = vsub.f32 %v8966_v3, %v5627_v0 }
0x1b56   : > { %5402 = vrot.lane.b32.xlu1 %v8831_v9, %s9382_s18 }
0x1b57   : > { %v5633_v15 = vmul.f32 1.442695, %v5631_v44 }
0x1b63   : > { %v5138_v28 = vpop.xlane.xlu0 %5137 }
0x1b64   : > { %v5140_v59 = vsub.f32 %v8944_v17, %v5138_v28  ;;  %v5025_v17 = vsel %vm651_vm6, %v9028_v23, 0.0 }
0x1b66   : > { %v5143_v53 = vmul.f32 1.442695, %v5140_v59  ;;  %v5157_v59 = vpop.permute.xlu1 %5156 }
0x1b67   : > { %v5261_v19 = vpop.xlane.xlu0 %5260 }
0x1b68   : > { %7318 = vpow2.f32 %v5143_v53  ;;  %v5263_v60 = vsub.f32 %v8950_v8, %v5261_v19 }
0x1b69   : > { %7320 = vpow2.f32 %v5264_v21 }
0x1b6a   : > { %v5266_v20 = vmul.f32 1.442695, %v5263_v60  ;;  %7322 = vpow2.f32 %v5387_v30 }
0x1b6b   : > { %v5384_v47 = vpop.xlane.xlu0 %5383 }
0x1b6c   : > { %v5386_v22 = vsub.f32 %v8958_v5, %v5384_v47  ;;  %7324 = vpow2.f32 %v5266_v20 }
0x1b6d   : > { %7326 = vpow2.f32 %v5633_v15  ;;  %v4916_v15 = vand.u32 %v8984_v11, %v7631_v37 }
0x1b6e   : > { %v5389_v58 = vmul.f32 1.442695, %v5386_v22  ;;  %5026 = vadd.xlane.f32.xlu0 %v5025_v17 }
0x1b6f   : > { %v5507_v3 = vpop.xlane.xlu0 %5506 }
0x1b70   : > { %7328 = vpow2.f32 %v5389_v58  ;;  %v5509_v35 = vsub.f32 %v8964_v26, %v5507_v3 }
0x1b71   : > { %7330 = vpow2.f32 %v5510_v63 }
0x1b72   : > { %v9034_v8 = vpop.eup %7318  ;;  %v5512_v46 = vmul.f32 1.442695, %v5509_v35 }
0x1b73   : > { %v5630_v61 = vpop.xlane.xlu0 %5629  ;;  %v5148_v5 = vsel %vm651_vm6, %v9034_v8, 0.0  ;;  %v9039_v57 = vpop.eup %7320 }
0x1b74   : > { %5149 = vadd.xlane.f32.xlu0 %v5148_v5  ;;  %v9041_v2 = vpop.eup %7322  ;;  %v5632_v13 = vsub.f32 %v8970_v14, %v5630_v61  ;;  %v5268_v10 = vsel %vm647_vm5, %v9039_v57, 0.0  ;;  %7332 = vpow2.f32 %v5512_v46 }
0x1b75   : > { %v5391_v26 = vsel %vm647_vm5, %v9041_v2, 0.0 }
0x1b76   : > { %v9046_v18 = vpop.eup %7324  ;;  %v5635_v6 = vmul.f32 1.442695, %v5632_v13 }
0x1b77   : > { %v9050_v29 = vpop.eup %7326  ;;  %v5271_v39 = vsel %vm651_vm6, %v9046_v18, 0.0 }
0x1b78   : > { %5269 = vadd.xlane.f32.xlu0 %v5268_v10  ;;  %v5637_v14 = vsel %vm647_vm5, %v9050_v29, 0.0  ;;  %7334 = vpow2.f32 %v5635_v6  ;;  %v5162_v10 = vand.u32 %v5157_v59, %v7631_v37 }
0x1b7a   : > { %5392 = vadd.xlane.f32.xlu1 %v5391_v26  ;;  %v9054_v33 = vpop.eup %7328 }
0x1b7b   : > { %v5394_v51 = vsel %vm651_vm6, %v9054_v33, 0.0  ;;  %v9060_v54 = vpop.eup %7330 }
0x1b7c   : > { %5272 = vadd.xlane.f32.xlu0 %v5271_v39  ;;  %v5514_v43 = vsel %vm647_vm5, %v9060_v54, 0.0 }
0x1b7e   : > { %5638 = vadd.xlane.f32.xlu1 %v5637_v14  ;;  %v9064_v31 = vpop.eup %7332 }
0x1b7f   : > { %v5517_v45 = vsel %vm651_vm6, %v9064_v31, 0.0 }
0x1b80   : > { %5395 = vadd.xlane.f32.xlu0 %v5394_v51 }
0x1b82   : > { %v9068_v28 = vpop.eup %7334 }
0x1b83   : > { %v5640_v62 = vsel %vm651_vm6, %v9068_v28, 0.0 }
0x1b84   : > { %5515 = vadd.xlane.f32.xlu0 %v5514_v43 }
0x1b88   : > { %5518 = vadd.xlane.f32.xlu0 %v5517_v45 }
0x1b8c   : > { %5641 = vadd.xlane.f32.xlu0 %v5640_v62 }
0x1b8f   : > { %5648 = vrot.lane.b32.xlu1 %v8831_v9, %s9385_s19 }
0x1ba2   : > { %5525 = vrot.lane.b32.xlu0 %v8831_v9, %s9384_s17 }
0x1bba   : > { %v4778_v0 = vpop.xlane.xlu1 %4777 }
0x1bbb   : > { %7336 = vrcp.f32 %v4778_v0 }
0x1bbc   : > { %v4781_v21 = vpop.xlane.xlu0 %4780 }
0x1bbd   : > { %7338 = vrcp.f32 %v4781_v21 }
0x1bc2   : > { %v4900_v53 = vpop.xlane.xlu1 %4899 }
0x1bc3   : > { %7340 = vrcp.f32 %v4900_v53 }
0x1bc5   : > { %v7337_v19 = vpop.eup %7336 }
0x1bc6   : > { %v4903_v30 = vpop.xlane.xlu0 %4902  ;;  %v4784_v60 = vmul.f32 %v7337_v19, %v8990_v48 }
0x1bc7   : > { %v7339_v44 = vpop.eup %7338  ;;  %7342 = vrcp.f32 %v4903_v30 }
0x1bc8   : > { %v4785_v20 = vmul.f32 %v7339_v44, %v8994_v32  ;;  %v5039_v32 = vand.u32 %v9021_v56, %v7631_v37 }
0x1bca   : > { %v4786_v47 = vpack.c.bf16 %v4785_v20, %v4784_v60  ;;  %v5024_v11 = vpop.xlane.xlu1 %5023  ;;  %v5280_v58 = vpop.permute.xlu0 %5279 }
0x1bcb   : > { %7344 = vrcp.f32 %v5024_v11  ;;  %v5285_v62 = vand.u32 %v5280_v58, %v7631_v37 }
0x1bcc   : > { %6774 = vmatmul.mubr.msk.bf16.vlgmr.msra.gmra.mrb[128].mxu1 %vm647_vm5, %v4786_v47 }
0x1bcd   : > { %6784 = vmatpush3.bf16.msra.mxu1 %v4916_v15  ;;  %6785 = vmatprep.mubr.msk.bf16.mxu1 %vm7473_vm1, %v7472_v16  ;;  %v7341_v9 = vpop.eup %7340 }
0x1bce   : > { %6795 = vmatprep.subr.bf16.mxu1 %v7472_v16  ;;  %v4906_v17 = vmul.f32 %v7341_v9, %v8999_v12 }
0x1bd1   : > { %v7343_v22 = vpop.eup %7342 }
0x1bd2   : > { %v4907_v48 = vmul.f32 %v7343_v22, %v9004_v42  ;;  %v5147_v12 = vpop.xlane.xlu1 %5146 }
0x1bd4   : > { %v4908_v55 = vpack.c.bf16 %v4907_v48, %v4906_v17 }
0x1bd5   : > { %v7345_v63 = vpop.eup %7344 }
0x1bd6   : > { %6786 = vmatmul.mubr.msk.bf16.vlgmr.msra.gmra.mrb[132].mxu1 %vm647_vm5, %v4908_v55  ;;  %v5030_v61 = vmul.f32 %v7345_v63, %v9008_v7  ;;  %v5403_v6 = vpop.permute.xlu1 %5402 }
0x1bd7   : > { %6796 = vmatpush3.bf16.msra.mxu1 %v5039_v32  ;;  %6797 = vmatprep.mubr.msk.bf16.mxu1 %vm7473_vm1, %v7472_v16  ;;  %v5408_v44 = vand.u32 %v5403_v6, %v7631_v37 }
0x1bd8   : > { %6807 = vmatprep.subr.bf16.mxu1 %v7472_v16 }
0x1bfb   : > { %v5027_v3 = vpop.xlane.xlu0 %5026 }
0x1bfc   : > { %7346 = vrcp.f32 %v5027_v3 }
0x1bfd   : > { %7348 = vrcp.f32 %v5147_v12 }
0x1c01   : > { %v5150_v42 = vpop.xlane.xlu0 %5149 }
0x1c02   : > { %7350 = vrcp.f32 %v5150_v42 }
0x1c05   : > { %v5270_v35 = vpop.xlane.xlu0 %5269 }
0x1c06   : > { %v7347_v56 = vpop.eup %7346  ;;  %7352 = vrcp.f32 %v5270_v35 }
0x1c07   : > { %v5031_v5 = vmul.f32 %v7347_v56, %v9028_v23  ;;  %v7349_v26 = vpop.eup %7348  ;;  %v5393_v51 = vpop.xlane.xlu1 %5392 }
0x1c08   : > { %v5153_v23 = vmul.f32 %v7349_v26, %v9012_v4 }
0x1c09   : > { %v5273_v46 = vpop.xlane.xlu0 %5272  ;;  %v5032_v13 = vpack.c.bf16 %v5031_v5, %v5030_v61 }
0x1c0a   : > { %7354 = vrcp.f32 %v5273_v46 }
0x1c0b   : > { %6798 = vmatmul.mubr.msk.bf16.vlgmr.msra.gmra.mrb[136].mxu1 %vm647_vm5, %v5032_v13  ;;  %v5639_v20 = vpop.xlane.xlu1 %5638 }
0x1c0c   : > { %v7351_v39 = vpop.eup %7350  ;;  %6808 = vmatpush3.bf16.msra.mxu1 %v5162_v10  ;;  %6809 = vmatprep.mubr.msk.bf16.mxu1 %vm7473_vm1, %v7472_v16 }
0x1c0d   : > { %v5154_v14 = vmul.f32 %v7351_v39, %v9034_v8  ;;  %v5396_v7 = vpop.xlane.xlu0 %5395  ;;  %6819 = vmatprep.subr.bf16.mxu1 %v7472_v16 }
0x1c0e   : > { %7356 = vrcp.f32 %v5396_v7 }
0x1c0f   : > { %v5155_v45 = vpack.c.bf16 %v5154_v14, %v5153_v23  ;;  %7358 = vrcp.f32 %v5393_v51 }
0x1c10   : > { %v7353_v59 = vpop.eup %7352 }
0x1c11   : > { %v5516_v43 = vpop.xlane.xlu0 %5515  ;;  %v5276_v4 = vmul.f32 %v7353_v59, %v9039_v57 }
0x1c13   : > { %6810 = vmatmul.mubr.msk.bf16.vlgmr.msra.gmra.mrb[140].mxu1 %vm647_vm5, %v5155_v45 }
0x1c14   : > { %v7355_v0 = vpop.eup %7354  ;;  %6820 = vmatpush3.bf16.msra.mxu1 %v5285_v62  ;;  %6821 = vmatprep.mubr.msk.bf16.mxu1 %vm7473_vm1, %v7472_v16 }
0x1c15   : > { %v5277_v8 = vmul.f32 %v7355_v0, %v9046_v18  ;;  %v5519_v21 = vpop.xlane.xlu0 %5518  ;;  %6831 = vmatprep.subr.bf16.mxu1 %v7472_v16 }
0x1c16   : > { %7360 = vrcp.f32 %v5519_v21 }
0x1c17   : > { %v5278_v19 = vpack.c.bf16 %v5277_v8, %v5276_v4  ;;  %7362 = vrcp.f32 %v5516_v43 }
0x1c18   : > { %v7357_v30 = vpop.eup %7356 }
0x1c19   : > { %v5642_v53 = vpop.xlane.xlu0 %5641  ;;  %v7359_v60 = vpop.eup %7358  ;;  %v5400_v18 = vmul.f32 %v7357_v30, %v9054_v33 }
0x1c1a   : > { %v5399_v57 = vmul.f32 %v7359_v60, %v9041_v2  ;;  %7364 = vrcp.f32 %v5642_v53  ;;  %v5649_v2 = vpop.permute.xlu1 %5648 }
0x1c1b   : > { %6822 = vmatmul.mubr.msk.bf16.vlgmr.msra.gmra.mrb[144].mxu1 %vm647_vm5, %v5278_v19  ;;  %7366 = vrcp.f32 %v5639_v20  ;;  %v5654_v11 = vand.u32 %v5649_v2, %v7631_v37 }
0x1c1c   : > { %6832 = vmatpush3.bf16.msra.mxu1 %v5408_v44  ;;  %6833 = vmatprep.mubr.msk.bf16.mxu1 %vm7473_vm1, %v7472_v16  ;;  %v5401_v15 = vpack.c.bf16 %v5400_v18, %v5399_v57 }
0x1c1d   : > { %6843 = vmatprep.subr.bf16.mxu1 %v7472_v16  ;;  %v5526_v47 = vpop.permute.xlu0 %5525 }
0x1c1e   : > { %v5531_v22 = vand.u32 %v5526_v47, %v7631_v37  ;;  %v7449_v37 = vld [vmem:[%s9324_s7] sm:$0xff]  }
0x1c20   : > { %v7361_v9 = vpop.eup %7360 }
0x1c21   : > { %v7363_v17 = vpop.eup %7362  ;;  %v5523_v33 = vmul.f32 %v7361_v9, %v9064_v31 }
0x1c22   : > { %v5522_v48 = vmul.f32 %v7363_v17, %v9060_v54  ;;  %v7450_v54 = vld [vmem:[%s9324_s7 + $0x8] sm:$0xff]  }
0x1c23   : > { %6834 = vmatmul.mubr.msk.bf16.vlgmr.msra.gmra.mrb[148].mxu1 %vm647_vm5, %v5401_v15 }
0x1c24   : > { %6844 = vmatpush3.bf16.msra.mxu1 %v5531_v22  ;;  %6845 = vmatprep.mubr.msk.bf16.mxu1 %vm7473_vm1, %v7472_v16  ;;  %v5524_v55 = vpack.c.bf16 %v5523_v33, %v5522_v48  ;;  %v7365_v32 = vpop.eup %7364 }
0x1c25   : > { %6855 = vmatprep.subr.bf16.mxu1 %v7472_v16  ;;  %v7367_v58 = vpop.eup %7366  ;;  %v5646_v3 = vmul.f32 %v7365_v32, %v9068_v28  ;;  %v7452_v28 = vld [vmem:[%s9324_s7 + $0x18] sm:$0xff]  }
0x1c26   : > { %v5645_v31 = vmul.f32 %v7367_v58, %v9050_v29  ;;  %v7451_v29 = vld [vmem:[%s9324_s7 + $0x10] sm:$0xff]  }
0x1c28   : > { %v5647_v12 = vpack.c.bf16 %v5646_v3, %v5645_v31 }
0x1c2b   : > { %6846 = vmatmul.mubr.msk.bf16.vlgmr.msra.gmra.mrb[152].mxu1 %vm647_vm5, %v5524_v55 }
0x1c2c   : > { %6856 = vmatpush3.bf16.msra.mxu1 %v5654_v11  ;;  %6857 = vmatprep.mubr.msk.bf16.mxu1 %vm7473_vm1, %v7472_v16 }
0x1c2d   : > { %6873 = vmatprep.subr.bf16.mxu1 %v7472_v16 }
0x1c33   : > { %6858 = vmatmul.mubr.msk.bf16.vlgmr.msra.gmra.mrb[156].mxu1 %vm647_vm5, %v5647_v12 }
0x1c34   : > { %6874 = vmatpush3.bf16.msra.mxu1 %v7449_v37  ;;  %6881 = vmatprep.mubr.msk.bf16.mxu1 %vm7473_vm1, %v7472_v16 }
0x1c35   : > { %6875 = vmatprep.subr.bf16.mxu1 %v7472_v16 }
0x1c38   : > { %6876 = vmatpush3.bf16.msra.mxu1 %v7450_v54 }
0x1c39   : > { %6877 = vmatprep.subr.bf16.mxu1 %v7472_v16 }
0x1c3c   : > { %6878 = vmatpush3.bf16.msra.mxu1 %v7451_v29 }
0x1c3d   : > { %6879 = vmatprep.subr.bf16.mxu1 %v7472_v16 }
0x1c40   : > { %6880 = vmatpush3.bf16.msra.mxu1 %v7452_v28 }
0x1c9f   : > { %v4827_v42 = vpop.f32.mrb[128].mxu1 }
0x1ca0   : > { %v6775_v63 = vpop.f32.mrb[129].mxu1 }
0x1ca1   : > { %v4830_v35 = vpop.f32.mrb[130].mxu1 }
0x1ca2   : > { %v6776_v56 = vpop.f32.mrb[131].mxu1 }
0x1ca9   : > { %v4952_v61 = vpop.f32.mrb[132].mxu1 }
0x1caa   : > { %v6787_v5 = vpop.f32.mrb[133].mxu1 }
0x1cab   : > { %v4955_v46 = vpop.f32.mrb[134].mxu1 }
0x1cac   : > { %v7029_v13 = vpack.i.bf16 %v4955_v46, %v4952_v61  ;;  %v6788_v10 = vpop.f32.mrb[135].mxu1 }
0x1cae   : > { %7030 = vrot.lane.b32.xlu1 %v7029_v13, %s9383_s14  ;;  %s9398_s14 = sld [smem:[#allocation10_spill]] }
0x1cde   : > { %v5075_v26 = vpop.f32.mrb[136].mxu1 }
0x1cdf   : > { %v6799_v6 = vpop.f32.mrb[137].mxu1 }
0x1ce0   : > { %v5078_v39 = vpop.f32.mrb[138].mxu1 }
0x1ce1   : > { %v7034_v14 = vpack.i.bf16 %v5078_v39, %v5075_v26  ;;  %v6800_v7 = vpop.f32.mrb[139].mxu1 }
0x1ce3   : > { %7035 = vrot.lane.b32.xlu1 %v7034_v14, %s9381_s23 }
0x1ce6   : > { %v5198_v23 = vpop.f32.mrb[140].mxu1 }
0x1ce7   : > { %v6811_v51 = vpop.f32.mrb[141].mxu1 }
0x1ce8   : > { %v5201_v43 = vpop.f32.mrb[142].mxu1 }
0x1ce9   : > { %v7039_v45 = vpack.i.bf16 %v5201_v43, %v5198_v23  ;;  %v6812_v62 = vpop.f32.mrb[143].mxu1 }
0x1ceb   : > { %7040 = vrot.lane.b32.xlu1 %v7039_v45, %s9379_s16 }
0x1cee   : > { %v5321_v59 = vpop.f32.mrb[144].mxu1 }
0x1cef   : > { %v6823_v0 = vpop.f32.mrb[145].mxu1 }
0x1cf0   : > { %v5324_v8 = vpop.f32.mrb[146].mxu1 }
0x1cf1   : > { %v7044_v21 = vpack.i.bf16 %v5324_v8, %v5321_v59  ;;  %v6824_v4 = vpop.f32.mrb[147].mxu1 }
0x1cf3   : > { %7045 = vrot.lane.b32.xlu1 %v7044_v21, %s9391_s20 }
0x1cf6   : > { %v5444_v53 = vpop.f32.mrb[148].mxu1 }
0x1cf7   : > { %v6835_v19 = vpop.f32.mrb[149].mxu1 }
0x1cf8   : > { %v5447_v30 = vpop.f32.mrb[150].mxu1  ;;  %v7454_v19 = vld [vmem:[%s9326_s9 + $0x8] sm:$0xff]  }
0x1cf9   : > { %v7049_v44 = vpack.i.bf16 %v5447_v30, %v5444_v53  ;;  %v6836_v60 = vpop.f32.mrb[151].mxu1  ;;  %v7453_v53 = vld [vmem:[%s9326_s9] sm:$0xff]   ;;  %v7455_v30 = vld [vmem:[%s9326_s9 + $0x10] sm:$0xff]  }
0x1cfa   : > { %v9189_v60 = vld [vmem:[%s9393_s3] ss:$0 sm:$0xff] }
0x1cfb   : > { %7050 = vrot.lane.b32.xlu1 %v7049_v44, %s9389_s0  ;;  %v7456_v44 = vld [vmem:[%s9326_s9 + $0x18] sm:$0xff]  }
0x1cfe   : > { %v5567_v18 = vpop.f32.mrb[152].mxu1 }
0x1cff   : > { %v6847_v57 = vpop.f32.mrb[153].mxu1 }
0x1d00   : > { %v5570_v20 = vpop.f32.mrb[154].mxu1  ;;  %v7457_v57 = vld [vmem:[%s7592_s24 + $0x30] sm:$0xff] }
0x1d01   : > { %v7054_v47 = vpack.i.bf16 %v5570_v20, %v5567_v18  ;;  %v6848_v15 = vpop.f32.mrb[155].mxu1 }
0x1d03   : > { %7055 = vrot.lane.b32.xlu0 %v7054_v47, %s9387_s27 }
0x1d06   : > { %v5690_v9 = vpop.f32.mrb[156].mxu1 }
0x1d07   : > { %v6859_v22 = vpop.f32.mrb[157].mxu1 }
0x1d08   : > { %v5693_v17 = vpop.f32.mrb[158].mxu1 }
0x1d09   : > { %v7059_v33 = vpack.i.bf16 %v5693_v17, %v5690_v9  ;;  %v6860_v2 = vpop.f32.mrb[159].mxu1  ;;  %v1947_v9 = vadd.f32 %v9189_v60, %v8096_v24  ;;  %v7459_v17 = vld [vmem:[%s7592_s24 + $0x38] sm:$0x7] }
0x1d0b   : > { %7060 = vrot.lane.b32.xlu1 %v7059_v33, %s9386_s15  ;;  %s9397_s15 = sshll.u32 %s9394_s30, 4 }
0x1d0c   : > { %s9249_s27 = scalar_lea.vmem %s9398_s14, %s9397_s15 }
0x1d20   : > { %v7031_v48 = vpop.permute.xlu1 %7030 }
0x1d21   : > { %v7033_v58 = vunpack.i.h.bf16 %v7031_v48  ;;  %v7032_v3 = vunpack.i.l.bf16 %v7031_v48 }
0x1d23   : > { %v5754_v61 = vsel %vm599_vm2, %v4830_v35, %v7033_v58  ;;  %v5753_v5 = vsel %vm599_vm2, %v4827_v42, %v7032_v3 }
0x1d55   : > { %v7036_v55 = vpop.permute.xlu1 %7035 }
0x1d56   : > { %v7038_v31 = vunpack.i.h.bf16 %v7036_v55  ;;  %v7037_v12 = vunpack.i.l.bf16 %v7036_v55 }
0x1d58   : > { %v5756_v10 = vsel %vm1644_vm7, %v5754_v61, %v7038_v31  ;;  %v5755_v26 = vsel %vm1644_vm7, %v5753_v5, %v7037_v12  ;;  %v3288_v5 = vadd.f32 %v9189_v60, %v8499_v40 }
0x1d5d   : > { %v7041_v32 = vpop.permute.xlu1 %7040 }
0x1d5e   : > { %v7043_v54 = vunpack.i.h.bf16 %v7041_v32  ;;  %v7042_v29 = vunpack.i.l.bf16 %v7041_v32  ;;  %v1953_v32 = vadd.f32 %v1947_v9, %v7965_v50 }
0x1d60   : > { %v5758_v14 = vsel %vm1647_vm8, %v5756_v10, %v7043_v54  ;;  %v5757_v7 = vsel %vm1647_vm8, %v5755_v26, %v7042_v29  ;;  %v1955_v58 = vsel %vm544_vm0, %v1953_v32, 0.0 }
0x1d65   : > { %v7046_v11 = vpop.permute.xlu1 %7045 }
0x1d66   : > { %v7048_v63 = vunpack.i.h.bf16 %v7046_v11  ;;  %v7047_v56 = vunpack.i.l.bf16 %v7046_v11 }
0x1d68   : > { %v5760_v23 = vsel %vm1650_vm9, %v5758_v14, %v7048_v63  ;;  %v5759_v51 = vsel %vm1650_vm9, %v5757_v7, %v7047_v56  ;;  %v1950_v63 = vadd.f32 %v9189_v60, %v8098_v27 }
0x1d6d   : > { %v7051_v37 = vpop.permute.xlu1 %7050 }
0x1d6e   : > { %v7053_v46 = vunpack.i.h.bf16 %v7051_v37  ;;  %v7052_v13 = vunpack.i.l.bf16 %v7051_v37 }
0x1d70   : > { %v5762_v35 = vsel %vm1653_vm10, %v5760_v23, %v7053_v46  ;;  %v5761_v42 = vsel %vm1653_vm10, %v5759_v51, %v7052_v13  ;;  %v1954_v13 = vadd.f32 %v1950_v63, %v7967_v52 }
0x1d72   : > { %v1958_v27 = vsel %vm1744_vm13, %v1954_v13, 0.0 }
0x1d75   : > { %v7056_v28 = vpop.permute.xlu0 %7055 }
0x1d76   : > { %v7058_v6 = vunpack.i.h.bf16 %v7056_v28  ;;  %v7057_v39 = vunpack.i.l.bf16 %v7056_v28 }
0x1d78   : > { %v5764_v59 = vsel %vm1656_vm11, %v5762_v35, %v7058_v6  ;;  %v5763_v0 = vsel %vm1656_vm11, %v5761_v42, %v7057_v39  ;;  %v3294_v6 = vadd.f32 %v3288_v5, %v8376_v25 }
0x1d7a   : > { %v3296_v14 = vsel %vm544_vm0, %v3294_v6, 0.0 }
0x1d7d   : > { %v7061_v43 = vpop.permute.xlu1 %7060 }
0x1d7e   : > { %v7063_v45 = vunpack.i.h.bf16 %v7061_v43  ;;  %v7062_v62 = vunpack.i.l.bf16 %v7061_v43 }
0x1d80   : > { %v5766_v8 = vsel %vm1659_vm12, %v5764_v59, %v7063_v45  ;;  %v5765_v21 = vsel %vm1659_vm12, %v5763_v0, %v7062_v62  ;;  %v3291_v0 = vadd.f32 %v9189_v60, %v8501_v49 }
0x1d81   : > { %v5767_v4 = vpack.c.bf16 %v5766_v8, %v5765_v21 }
0x1d83   : > { %6870 = vmatmul.mubr.msk.bf16.vlgmr.msra.gmra.mrb[148].mxu0 %vm544_vm0, %v5767_v4  ;;  %v4618_v4 = vadd.f32 %v9189_v60, %v8912_v41  ;;  %v7460_v41 = vld [vmem:[%s9322_s5] ss:$0 sm:$0xff] }
0x1d84   : > { %6886 = vmatpush3.bf16.msra.mxu0 %v7453_v53  ;;  %6893 = vmatprep.mubr.msk.bf16.mxu0 %vm7473_vm1, %v7472_v16 }
0x1d85   : > { %6887 = vmatprep.subr.bf16.mxu0 %v7472_v16 }
0x1d88   : > { %6888 = vmatpush3.bf16.msra.mxu0 %v7454_v19 }
0x1d89   : > { %6889 = vmatprep.subr.bf16.mxu0 %v7472_v16 }
0x1d8c   : > { %6890 = vmatpush3.bf16.msra.mxu0 %v7455_v30 }
0x1d8d   : > { %6891 = vmatprep.subr.bf16.mxu0 %v7472_v16  ;;  %v7458_v16 = vld [vmem:[%s9321_s4] ss:$0 sm:$0xff] }
0x1d90   : > { %6892 = vmatpush3.bf16.msra.mxu0 %v7456_v44  ;;  %v3295_v44 = vadd.f32 %v3291_v0, %v8378_v34 }
0x1d92   : > { %v3299_v9 = vsel %vm1744_vm13, %v3295_v44, 0.0 }
0x1e56   : > { %v5805_v18 = vpop.f32.mrb[148].mxu0 }
0x1e57   : > { %v5812_v20 = vadd.f32 %v7457_v57, %v5805_v18  ;;  %v6871_v47 = vpop.f32.mrb[149].mxu0 }
0x1e58   : > { %v5808_v15 = vpop.f32.mrb[150].mxu0  ;;  %v4624_v47 = vadd.f32 %v4618_v4, %v8789_v36 }
0x1e59   : > { %v5814_v22 = vadd.f32 %v7458_v16, %v5812_v20  ;;  %v5813_v33 = vadd.f32 %v7459_v17, %v5808_v15  ;;  %v6872_v2 = vpop.f32.mrb[151].mxu0  ;;  %v9228_v17 = vld [vmem:[%s9395_s26] ss:$0 sm:$0xff] }
0x1e5a   : > { %v4626_v36 = vsel %vm544_vm0, %v4624_v47, 0.0 }
0x1e5b   : > { %v5815_v48 = vadd.f32 %v7458_v16, %v5813_v33  ;;  %v5816_v55 = vsel %vm544_vm0, %v5814_v22, 0.0 }
0x1e5c   : > { %5817 = vadd.xlane.f32.xlu0 %v5816_v55 }
0x1e5d   : > { %v5819_v11 = vsel %vm1744_vm13, %v5815_v48, 0.0 }
0x1e5e   : > { %5820 = vadd.xlane.f32.xlu1 %v5819_v11 }
0x1e62   : > { %1956 = vadd.xlane.f32.xlu1 %v1955_v58 }
0x1ee9   : > { %v5818_v24 = vpop.xlane.xlu0 %5817 }
0x1eea   : > { %v5822_v3 = vmul.f32 0.015625, %v5818_v24 }
0x1eeb   : > { %v5821_v31 = vpop.xlane.xlu1 %5820 }
0x1eec   : > { %v5824_v12 = vsub.f32 %v5814_v22, %v5822_v3  ;;  %v5823_v37 = vmul.f32 0.015625, %v5821_v31 }
0x1eee   : > { %v5825_v54 = vsub.f32 %v5815_v48, %v5823_v37  ;;  %v5826_v29 = vmul.f32 %v5824_v12, %v5824_v12  ;;  %v9234_v48 = vld [vmem:[%s9396_s2] ss:$0 sm:$0xff] }
0x1eef   : > { %v1957_v28 = vpop.xlane.xlu1 %1956 }
0x1ef0   : > { %v1961_v56 = vmul.f32 0.015625, %v1957_v28  ;;  %v5828_v50 = vsel %vm544_vm0, %v5826_v29, 0.0  ;;  %v5827_v61 = vmul.f32 %v5825_v54, %v5825_v54 }
0x1ef1   : > { %5829 = vadd.xlane.f32.xlu0 %v5828_v50 }
0x1ef2   : > { %v1963_v46 = vsub.f32 %v1953_v32, %v1961_v56  ;;  %v5831_v10 = vsel %vm1744_vm13, %v5827_v61, 0.0  ;;  %v7461_v32 = vld [vmem:[%s9323_s6] ss:$0 sm:$0xff]  ;;  %v4621_v61 = vadd.f32 %v9189_v60, %v8914_v1 }
0x1ef4   : > { %v1965_v26 = vmul.f32 %v1963_v46, %v1963_v46 }
0x1ef5   : > { %5832 = vadd.xlane.f32.xlu0 %v5831_v10 }
0x1ef6   : > { %v1967_v39 = vsel %vm544_vm0, %v1965_v26, 0.0  ;;  %v4625_v26 = vadd.f32 %v4621_v61, %v8791_v38 }
0x1ef7   : > { %1968 = vadd.xlane.f32.xlu1 %v1967_v39 }
0x1ef9   : > { %1959 = vadd.xlane.f32.xlu0 %v1958_v27 }
0x1efb   : > { %3297 = vadd.xlane.f32.xlu1 %v3296_v14  ;;  %v4629_v14 = vsel %vm1744_vm13, %v4625_v26, 0.0 }
0x1f7e   : > { %v5830_v7 = vpop.xlane.xlu0 %5829 }
0x1f7f   : > { %v5834_v40 = vmul.f32 0.015625, %v5830_v7 }
0x1f81   : > { %v5836_v23 = vadd.f32 1e-05, %v5834_v40 }
0x1f82   : > { %v5833_v51 = vpop.xlane.xlu0 %5832 }
0x1f83   : > { %7368 = vrsqrt.f32 %v5836_v23  ;;  %v5835_v52 = vmul.f32 0.015625, %v5833_v51 }
0x1f84   : > { %v1969_v43 = vpop.xlane.xlu1 %1968 }
0x1f85   : > { %v5837_v35 = vadd.f32 1e-05, %v5835_v52  ;;  %v1973_v42 = vmul.f32 0.015625, %v1969_v43 }
0x1f86   : > { %v1960_v45 = vpop.xlane.xlu0 %1959 }
0x1f87   : > { %7370 = vrsqrt.f32 %v5837_v35  ;;  %v1975_v25 = vadd.f32 1e-05, %v1973_v42  ;;  %v1962_v62 = vmul.f32 0.015625, %v1960_v45  ;;  %v7462_v42 = vld [vmem:[%s9325_s8] ss:$0 sm:$0xff] }
0x1f88   : > { %v3298_v59 = vpop.xlane.xlu1 %3297 }
0x1f89   : > { %7372 = vrsqrt.f32 %v1975_v25  ;;  %v1964_v8 = vsub.f32 %v1954_v13, %v1962_v62  ;;  %v3302_v21 = vmul.f32 0.015625, %v3298_v59 }
0x1f8b   : > { %v3304_v53 = vsub.f32 %v3294_v6, %v3302_v21  ;;  %v1966_v19 = vmul.f32 %v1964_v8, %v1964_v8 }
0x1f8d   : > { %v7369_v30 = vpop.eup %7368  ;;  %v1970_v18 = vsel %vm1744_vm13, %v1966_v19, 0.0  ;;  %v3306_v57 = vmul.f32 %v3304_v53, %v3304_v53 }
0x1f8e   : > { %v5840_v20 = vmul.f32 %v7369_v30, %v5824_v12  ;;  %1971 = vadd.xlane.f32.xlu0 %v1970_v18 }
0x1f8f   : > { %v3308_v49 = vsel %vm544_vm0, %v3306_v57, 0.0 }
0x1f90   : > { %3309 = vadd.xlane.f32.xlu1 %v3308_v49  ;;  %v5842_v16 = vmul.f32 %v7460_v41, %v5840_v20 }
0x1f91   : > { %v7371_v15 = vpop.eup %7370 }
0x1f92   : > { %v5841_v34 = vmul.f32 %v7371_v15, %v5825_v54  ;;  %3300 = vadd.xlane.f32.xlu0 %v3299_v9  ;;  %v9240_v11 = vadd.f32 %v7461_v32, %v5842_v16 }
0x1f93   : > { %v7373_v22 = vpop.eup %7372 }
0x1f94   : > { %v5843_v33 = vmul.f32 %v7460_v41, %v5841_v34  ;;  %v1979_v2 = vmul.f32 %v7373_v22, %v1963_v46  ;;  %4627 = vadd.xlane.f32.xlu1 %v4626_v36 }
0x1f96   : > { %v1987_v55 = vmul.f32 %v9228_v17, %v1979_v2  ;;  %v9242_v58 = vadd.f32 %v7461_v32, %v5843_v33 }
0x1f98   : > { %v1995_v24 = vadd.f32 %v9234_v48, %v1987_v55  ;;  %v5846_v3 = vpack.c.bf16 %v9242_v58, %v9240_v11 }
0x1f9a   : > { %1997 = vst.msk [vmem:[%s9249_s27] sm:$0xff] %vm544_vm0, %v1995_v24  ;;  %6882 = vmatmul.mubr.msk.bf16.vlgmr.msra.gmra.mrb[160].mxu1 %vm544_vm0, %v5846_v3 }
0x201b   : > { %v1972_v31 = vpop.xlane.xlu0 %1971 }
0x201c   : > { %v1974_v12 = vmul.f32 0.015625, %v1972_v31 }
0x201d   : > { %v3310_v37 = vpop.xlane.xlu1 %3309 }
0x201e   : > { %v1976_v54 = vadd.f32 1e-05, %v1974_v12  ;;  %v3314_v29 = vmul.f32 0.015625, %v3310_v37 }
0x201f   : > { %v3301_v28 = vpop.xlane.xlu0 %3300 }
0x2020   : > { %7374 = vrsqrt.f32 %v1976_v54  ;;  %v3316_v63 = vadd.f32 1e-05, %v3314_v29  ;;  %v3303_v56 = vmul.f32 0.015625, %v3301_v28 }
0x2021   : > { %v4628_v50 = vpop.xlane.xlu1 %4627 }
0x2022   : > { %7376 = vrsqrt.f32 %v3316_v63  ;;  %v9259_v5 = vsub.f32 %v3295_v44, %v3303_v56  ;;  %v4632_v46 = vmul.f32 0.015625, %v4628_v50 }
0x2024   : > { %v9261_v13 = vsub.f32 %v4624_v47, %v4632_v46  ;;  %v3307_v10 = vmul.f32 %v9259_v5, %v9259_v5 }
0x2026   : > { %v3311_v6 = vsel %vm1744_vm13, %v3307_v10, 0.0  ;;  %v4636_v39 = vmul.f32 %v9261_v13, %v9261_v13 }
0x2027   : > { %3312 = vadd.xlane.f32.xlu0 %v3311_v6 }
0x2028   : > { %v4638_v1 = vsel %vm544_vm0, %v4636_v39, 0.0 }
0x2029   : > { %4639 = vadd.xlane.f32.xlu1 %v4638_v1 }
0x202a   : > { %v7375_v27 = vpop.eup %7374 }
0x202b   : > { %v1980_v7 = vmul.f32 %v7375_v27, %v1964_v8  ;;  %4630 = vadd.xlane.f32.xlu0 %v4629_v14 }
0x202c   : > { %v7377_v40 = vpop.eup %7376 }
0x202d   : > { %v1988_v23 = vmul.f32 %v9228_v17, %v1980_v7  ;;  %v3320_v51 = vmul.f32 %v7377_v40, %v3304_v53 }
0x202f   : > { %v1996_v38 = vadd.f32 %v9234_v48, %v1988_v23  ;;  %v3322_v52 = vmul.f32 %v9228_v17, %v3320_v51 }
0x2031   : > { %1998 = vst.msk [vmem:[%s9249_s27 + $0x8] sm:$0x7] %vm1744_vm13, %v1996_v38  ;;  %v3324_v43 = vadd.f32 %v9234_v48, %v3322_v52 }
0x2033   : > { %6127 = vst.msk [vmem:[%s9249_s27 + $0x10] sm:$0xff] %vm544_vm0, %v3324_v43 }
0x206d   : > { %v5884_v35 = vpop.f32.mrb[160].mxu1 }
0x206e   : > { %v5885_v45 = vadd.f32 %v7462_v42, %v5884_v35  ;;  %v6883_v25 = vpop.f32.mrb[161].mxu1 }
0x206f   : > { %v5887_v62 = vpop.f32.mrb[162].mxu1 }
0x2070   : > { %v5893_v59 = vmul.f32 0.044715, %v5885_v45  ;;  %v5888_v0 = vadd.f32 %v7462_v42, %v5887_v62  ;;  %v6884_v8 = vpop.f32.mrb[163].mxu1  ;;  %v5891_v9 = vmul.f32 0.5, %v5885_v45 }
0x2072   : > { %v5895_v21 = vmul.f32 %v5893_v59, %v5885_v45  ;;  %v5894_v4 = vmul.f32 0.044715, %v5888_v0  ;;  %v5892_v41 = vmul.f32 0.5, %v5888_v0 }
0x2074   : > { %v5897_v53 = vmul.f32 %v5895_v21, %v5885_v45  ;;  %v5896_v19 = vmul.f32 %v5894_v4, %v5888_v0 }
0x2076   : > { %v5899_v30 = vadd.f32 %v5897_v53, %v5885_v45  ;;  %v5898_v44 = vmul.f32 %v5896_v19, %v5888_v0 }
0x2078   : > { %v5901_v18 = vmul.f32 0.7978846, %v5899_v30  ;;  %v5900_v57 = vadd.f32 %v5898_v44, %v5888_v0 }
0x207a   : > { %7378 = vtanh.f32 %v5901_v18  ;;  %v5902_v20 = vmul.f32 0.7978846, %v5900_v57 }
0x207c   : > { %7380 = vtanh.f32 %v5902_v20 }
0x2084   : > { %v7379_v47 = vpop.eup %7378 }
0x2085   : > { %v5905_v49 = vadd.f32 1.0, %v7379_v47 }
0x2086   : > { %v7381_v15 = vpop.eup %7380 }
0x2087   : > { %v5906_v16 = vadd.f32 1.0, %v7381_v15  ;;  %v5907_v34 = vmul.f32 %v5905_v49, %v5891_v9 }
0x2089   : > { %v5908_v22 = vmul.f32 %v5906_v16, %v5892_v41 }
0x208b   : > { %v5909_v36 = vpack.c.bf16 %v5908_v22, %v5907_v34 }
0x208d   : > { %6894 = vmatmul.mubr.msk.bf16.vlgmr.msra.gmra.mrb[152].mxu0 %vm544_vm0, %v5909_v36 }
0x20b4   : > { %v3313_v33 = vpop.xlane.xlu0 %3312 }
0x20b5   : > { %v3315_v2 = vmul.f32 0.015625, %v3313_v33 }
0x20b6   : > { %v4640_v55 = vpop.xlane.xlu1 %4639 }
0x20b7   : > { %v3317_v32 = vadd.f32 1e-05, %v3315_v2  ;;  %v4644_v24 = vmul.f32 0.015625, %v4640_v55 }
0x20b8   : > { %v4631_v3 = vpop.xlane.xlu0 %4630 }
0x20b9   : > { %7382 = vrsqrt.f32 %v3317_v32  ;;  %v4646_v31 = vadd.f32 1e-05, %v4644_v24  ;;  %v4633_v12 = vmul.f32 0.015625, %v4631_v3 }
0x20bb   : > { %7384 = vrsqrt.f32 %v4646_v31  ;;  %v4635_v37 = vsub.f32 %v4625_v26, %v4633_v12 }
0x20bd   : > { %v4637_v54 = vmul.f32 %v4635_v37, %v4635_v37 }
0x20bf   : > { %v4641_v29 = vsel %vm1744_vm13, %v4637_v54, 0.0 }
0x20c0   : > { %4642 = vadd.xlane.f32.xlu0 %v4641_v29 }
0x20c3   : > { %v7383_v28 = vpop.eup %7382 }
0x20c4   : > { %v3321_v63 = vmul.f32 %v7383_v28, %v9259_v5 }
0x20c5   : > { %v7385_v56 = vpop.eup %7384 }
0x20c6   : > { %v3323_v50 = vmul.f32 %v9228_v17, %v3321_v63  ;;  %v4650_v61 = vmul.f32 %v7385_v56, %v9261_v13 }
0x20c8   : > { %v3325_v46 = vadd.f32 %v9234_v48, %v3323_v50  ;;  %v4652_v10 = vmul.f32 %v9228_v17, %v4650_v61 }
0x20ca   : > { %6128 = vst.msk [vmem:[%s9249_s27 + $0x18] sm:$0x7] %vm1744_vm13, %v3325_v46  ;;  %v4654_v26 = vadd.f32 %v9234_v48, %v4652_v10 }
0x20cc   : > { %6151 = vst.msk [vmem:[%s9249_s27 + $0x20] sm:$0xff] %vm544_vm0, %v4654_v26 }
0x214d   : > { %v4643_v6 = vpop.xlane.xlu0 %4642 }
0x214e   : > { %v4645_v39 = vmul.f32 0.015625, %v4643_v6 }
0x2150   : > { %v4647_v1 = vadd.f32 1e-05, %v4645_v39 }
0x2152   : > { %7386 = vrsqrt.f32 %v4647_v1 }
0x215c   : > { %v7387_v5 = vpop.eup %7386 }
0x215d   : > { %v4651_v27 = vmul.f32 %v7387_v5, %v4635_v37 }
0x215f   : > { %v4653_v14 = vmul.f32 %v9228_v17, %v4651_v27 }
0x2160   : > { %v5947_v13 = vpop.f32.mrb[152].mxu0 }
0x2161   : > { %v4655_v7 = vadd.f32 %v9234_v48, %v4653_v14  ;;  %v5948_v40 = vadd.f32 %v9189_v60, %v5947_v13  ;;  %v6895_v23 = vpop.f32.mrb[153].mxu0 }
0x2162   : > { %v5950_v51 = vpop.f32.mrb[154].mxu0 }
0x2163   : > { %6152 = vst.msk [vmem:[%s9249_s27 + $0x28] sm:$0x7] %vm1744_vm13, %v4655_v7  ;;  %v5954_v38 = vadd.f32 %v5948_v40, %v9240_v11  ;;  %v5951_v52 = vadd.f32 %v9189_v60, %v5950_v51  ;;  %v6896_v43 = vpop.f32.mrb[155].mxu0 }
0x2165   : > { %v5955_v35 = vadd.f32 %v5951_v52, %v9242_v58  ;;  %v5956_v42 = vsel %vm544_vm0, %v5954_v38, 0.0 }
0x2166   : > { %5957 = vadd.xlane.f32.xlu1 %v5956_v42 }
0x2167   : > { %v5959_v45 = vsel %vm1744_vm13, %v5955_v35, 0.0 }
0x2168   : > { %5960 = vadd.xlane.f32.xlu0 %v5959_v45 }
0x21f3   : > { %v5958_v25 = vpop.xlane.xlu1 %5957 }
0x21f4   : > { %v5962_v62 = vmul.f32 0.015625, %v5958_v25 }
0x21f5   : > { %v5961_v59 = vpop.xlane.xlu0 %5960 }
0x21f6   : > { %v5964_v0 = vsub.f32 %v5954_v38, %v5962_v62  ;;  %v5963_v8 = vmul.f32 0.015625, %v5961_v59 }
0x21f8   : > { %v5965_v21 = vsub.f32 %v5955_v35, %v5963_v8  ;;  %v5966_v4 = vmul.f32 %v5964_v0, %v5964_v0 }
0x21fa   : > { %v5968_v11 = vsel %vm544_vm0, %v5966_v4, 0.0  ;;  %v5967_v53 = vmul.f32 %v5965_v21, %v5965_v21 }
0x21fb   : > { %5969 = vadd.xlane.f32.xlu1 %v5968_v11 }
0x21fc   : > { %v5971_v60 = vsel %vm1744_vm13, %v5967_v53, 0.0 }
0x21fd   : > { %5972 = vadd.xlane.f32.xlu0 %v5971_v60 }
0x2288   : > { %v5970_v58 = vpop.xlane.xlu1 %5969 }
0x2289   : > { %v5974_v19 = vmul.f32 0.015625, %v5970_v58 }
0x228a   : > { %v5973_v30 = vpop.xlane.xlu0 %5972 }
0x228b   : > { %v5976_v44 = vadd.f32 1e-05, %v5974_v19  ;;  %v5975_v18 = vmul.f32 0.015625, %v5973_v30 }
0x228d   : > { %7388 = vrsqrt.f32 %v5976_v44  ;;  %v5977_v57 = vadd.f32 1e-05, %v5975_v18 }
0x228f   : > { %7390 = vrsqrt.f32 %v5977_v57 }
0x2297   : > { %v7389_v20 = vpop.eup %7388 }
0x2298   : > { %v5980_v47 = vmul.f32 %v7389_v20, %v5964_v0 }
0x2299   : > { %v7391_v49 = vpop.eup %7390 }
0x229a   : > { %v5982_v15 = vmul.f32 %v9228_v17, %v5980_v47  ;;  %v5981_v9 = vmul.f32 %v7391_v49, %v5965_v21 }
0x229c   : > { %v5984_v41 = vadd.f32 %v9234_v48, %v5982_v15  ;;  %v5983_v16 = vmul.f32 %v9228_v17, %v5981_v9 }
0x229e   : > { %6175 = vst.msk [vmem:[%s9249_s27 + $0x30] sm:$0xff] %vm544_vm0, %v5984_v41  ;;  %v5985_v34 = vadd.f32 %v9234_v48, %v5983_v16 }
0x22a0   : > { %6176 = vst.msk [vmem:[%s9249_s27 + $0x38] sm:$0x7] %vm1744_vm13, %v5985_v34 }
0x22a1 PF: > { %s9399_s28 = sld [smem:[#allocation2_spill]] }
0x22a7   : > { %s23_s25 = sadd.s32 1, %s9399_s28  }
0x22a8   : > { %p20_p4 = scmp.ge.s32.totalorder %s23_s25, 4  }
0x22aa   :  { %22 = sbr.rel (!%p20_p4) target bundleno = 8 (0x8), region = 108 }

</bundles_post_ra>
